<compile_context>
chip_gen: v7x
topology: tpu7x:2x2x1
jax: 0.10.0
libtpu: 0.0.40
codegen_flags: <defaults>
</compile_context>

<pallas_src>
import functools
import math

import jax
import jax.numpy as jnp
from jax.experimental import pallas as pl
from jax.experimental.pallas import tpu as pltpu

LN_EPS = 1e-5          # torch.nn.LayerNorm default
K_IN = 5000            # raw instance feature width (nn.Linear(5000, 256))
D_MODEL = 256
D_FF = 2048            # TransformerEncoderLayer default dim_feedforward
D_HID = 64
N_CLASSES = 3
NUM_LAYERS = 2
_MIB = 1024 * 1024

_KERNEL_WEIGHTS = (
    "fc1_w", "fc1_b",
    "wvo", "bvo", "g1", "be1",
    "w1", "b1", "w2", "b2", "g2", "be2",
    "fc2_w", "fc2_b",
    "wab", "bab", "wc_row", "bc",
)


def _round_up(x, m):
    return (x + m - 1) // m * m


@functools.lru_cache(maxsize=1)
def _vmem_capacity_bytes():
    cap = 64 * _MIB                    # conservative fallback (v7x per-core)
    try:
        info = pltpu.get_tpu_info()
        cap = int(getattr(info, "vmem_capacity_bytes", cap)) or cap
    except Exception:
        pass
    return cap


def _compiler_params(dimension_semantics, vmem_limit_bytes):
    cls = (getattr(pltpu, "CompilerParams", None)
           or getattr(pltpu, "TPUCompilerParams", None))
    if cls is None:
        return None
    return cls(dimension_semantics=dimension_semantics,
               vmem_limit_bytes=vmem_limit_bytes)


def _layernorm(x, gain, offset, eps=LN_EPS):
    mu = jnp.mean(x, axis=-1, keepdims=True)
    var = jnp.mean(jnp.square(x - mu), axis=-1, keepdims=True)
    return (x - mu) * jax.lax.rsqrt(var + eps) * gain + offset


# ------------------------------ Pallas kernel --------------------------------

def _scmil_tile_kernel(
        x_ref,
        fc1_w_ref, fc1_b_ref,
        wvo_ref, bvo_ref, g1_ref, be1_ref,
        w1_ref, b1_ref, w2_ref, b2_ref, g2_ref, be2_ref,
        fc2_w_ref, fc2_b_ref,
        wab_ref, bab_ref, wc_ref, bc_ref,
        out_ref,
        *, num_layers, d_hid, eps):
    bf16, f32 = jnp.bfloat16, jnp.float32

    # fc1 + ReLU.  The x tile is cast to bf16 in-kernel (no host pre-pass);
    # the contraction dim stays at its native 5000.
    h = jnp.dot(x_ref[...].astype(bf16), fc1_w_ref[...],
                preferred_element_type=f32) + fc1_b_ref[...]
    h = jnp.maximum(h, 0.0)

    # num_layers x post-norm TransformerEncoderLayer with seq_len == 1:
    # softmax over a single key == 1, so self-attn == out_proj(V(h)); the two
    # attention matmuls are algebraically fused into one (256, 256) weight.
    for l in range(num_layers):
        sa = jnp.dot(h.astype(bf16), wvo_ref[l],
                     preferred_element_type=f32) + bvo_ref[l]
        z = _layernorm(h + sa, g1_ref[l], be1_ref[l], eps)
        ff = jnp.dot(z.astype(bf16), w1_ref[l],
                     preferred_element_type=f32) + b1_ref[l]
        ff = jnp.maximum(ff, 0.0)
        ff = jnp.dot(ff.astype(bf16), w2_ref[l],
                     preferred_element_type=f32) + b2_ref[l]
        h = _layernorm(z + ff, g2_ref[l], be2_ref[l], eps)

    # fc2 + ReLU -> per-instance 64-d features g.
    g = jnp.dot(h.astype(bf16), fc2_w_ref[...],
                preferred_element_type=f32) + fc2_b_ref[...]
    g = jnp.maximum(g, 0.0)

    # Gated attention: Wa|Wb fused into a single (64, 128) matmul; the final
    # 1-wide projection is an elementwise mul + lane reduction (no MXU).
    ab = jnp.dot(g.astype(bf16), wab_ref[...],
                 preferred_element_type=f32) + bab_ref[...]
    a = jnp.tanh(ab[:, :d_hid])
    b = jax.nn.sigmoid(ab[:, d_hid:])
    logit = (jnp.sum((a * b) * wc_ref[...], axis=-1, keepdims=True)
             + bc_ref[...])

    # Lane-dense packed output: [ g (64 cols) | logit broadcast (64 cols) ].
    out_ref[...] = jnp.concatenate(
        [g, jnp.broadcast_to(logit, (g.shape[0], d_hid))], axis=-1)


def _const_spec(a):
    zeros = (0,) * a.ndim
    return pl.BlockSpec(a.shape, lambda i, _z=zeros: _z)


# -------------------------------- forward ------------------------------------

@functools.partial(jax.jit, static_argnames=("tile_n",))
def scmil_forward(x, params, *, tile_n=None):
    """SCMIL forward.  Returns (M, logits) with shapes (1, 64), (1, 3)."""
    n, k = x.shape
    assert n >= 1, "empty bag"
    num_layers = params["wvo"].shape[0]
    d_hid = params["fc2_w"].shape[1]

    cap = _vmem_capacity_bytes()
    if tile_n is None:
        big = 512 if cap >= 100 * _MIB else 384   # 512 on v5e/v6e, 384 on v7x
        tile_n = big if n >= big else max(8, _round_up(n, 8))
    num_tiles = pl.cdiv(n, tile_n)
    vmem_limit = int(max(min(cap - 12 * _MIB, 96 * _MIB), 52 * _MIB))

    weights = [params[name] for name in _KERNEL_WEIGHTS]
    kernel = functools.partial(_scmil_tile_kernel, num_layers=num_layers,
                               d_hid=d_hid, eps=LN_EPS)

    grid_spec = pltpu.PrefetchScalarGridSpec(
        num_scalar_prefetch=0,
        grid=(num_tiles,),
        in_specs=[pl.BlockSpec((tile_n, k), lambda i: (i, 0))]
                 + [_const_spec(w) for w in weights],
        out_specs=pl.BlockSpec((tile_n, 2 * d_hid), lambda i: (i, 0)),
    )

    packed = pl.pallas_call(
        kernel,
        out_shape=jax.ShapeDtypeStruct((n, 2 * d_hid), jnp.float32),
        grid_spec=grid_spec,
        compiler_params=_compiler_params(
            dimension_semantics=("parallel",),   # no cross-tile state
            vmem_limit_bytes=vmem_limit),
    )(x, *weights)

    # Tiny epilogue in plain XLA: instance softmax, pooled embedding M, and
    # the (1, 64) x (64, 3) classifier.  <2% of the kernel's HBM traffic.
    g = packed[:, :d_hid]
    logit = packed[:, d_hid]
    w = jax.nn.softmax(logit)
    M = w[None, :] @ g
    logits = M @ params["cls_w"] + params["cls_b"]
    return M, logits


# ----------------------------- parameter creation ----------------------------

def make_params(key, *, k_in=K_IN, d_model=D_MODEL, d_ff=D_FF, d_hid=D_HID,
                n_cls=N_CLASSES, num_layers=NUM_LAYERS):
    # Matmul weights are xavier-normal (as in the torch module).  Biases and
    # LayerNorm params get small random values (the torch init zeroes them)
    # purely so the kernel's bias/gain code paths are actually exercised.
    keys = iter(jax.random.split(key, 128))
    bf16, f32 = jnp.bfloat16, jnp.float32

    def xavier(fi, fo):
        std = math.sqrt(2.0 / (fi + fo))
        return std * jax.random.normal(next(keys), (fi, fo), f32)

    def vec(fo, mean=0.0, scale=0.1):
        return mean + scale * jax.random.normal(next(keys), (1, fo), f32)

    wvo, bvo, g1, be1, w1, b1, w2, b2, g2, be2 = ([] for _ in range(10))
    for _ in range(num_layers):
        wv, bv = xavier(d_model, d_model), vec(d_model)
        wo, bo = xavier(d_model, d_model), vec(d_model)
        # seq_len == 1  =>  self-attention == out_proj(V(x)); fuse exactly:
        #   (h Wv + bv) Wo + bo == h (Wv Wo) + (bv Wo + bo)
        wvo.append(wv @ wo)
        bvo.append(bv @ wo + bo)
        g1.append(vec(d_model, mean=1.0)); be1.append(vec(d_model))
        w1.append(xavier(d_model, d_ff));  b1.append(vec(d_ff))
        w2.append(xavier(d_ff, d_model));  b2.append(vec(d_model))
        g2.append(vec(d_model, mean=1.0)); be2.append(vec(d_model))

    wa, ba = xavier(d_hid, d_hid), vec(d_hid)
    wb, bb = xavier(d_hid, d_hid), vec(d_hid)

    return {
        "fc1_w": xavier(k_in, d_model).astype(bf16),
        "fc1_b": vec(d_model),
        "wvo": jnp.stack(wvo).astype(bf16),
        "bvo": jnp.stack(bvo),
        "g1": jnp.stack(g1), "be1": jnp.stack(be1),
        "w1": jnp.stack(w1).astype(bf16), "b1": jnp.stack(b1),
        "w2": jnp.stack(w2).astype(bf16), "b2": jnp.stack(b2),
        "g2": jnp.stack(g2), "be2": jnp.stack(be2),
        "fc2_w": xavier(d_model, d_hid).astype(bf16),
        "fc2_b": vec(d_hid),
        "wab": jnp.concatenate([wa, wb], axis=1).astype(bf16),   # (64, 128)
        "bab": jnp.concatenate([ba, bb], axis=1),                # (1, 128)
        "wc_row": xavier(d_hid, 1).T,                            # (1, 64)
        "bc": vec(1),
        "cls_w": xavier(d_hid, n_cls),
        "cls_b": vec(n_cls),
    }


# ---------------------------- pure-JAX reference -----------------------------
# Same operand precision as the kernel (bf16 matmul operands, f32 accumulate,
# f32 LayerNorm/softmax) so the comparison is apples-to-apples.

def reference(x, p):
    f32 = jnp.float32

    def dot(a, b):
        return jnp.dot(a.astype(jnp.bfloat16), b, preferred_element_type=f32)

    d_hid = p["fc2_w"].shape[1]
    h = jnp.maximum(dot(x, p["fc1_w"]) + p["fc1_b"], 0.0)
    for l in range(p["wvo"].shape[0]):
        sa = dot(h, p["wvo"][l]) + p["bvo"][l]
        z = _layernorm(h + sa, p["g1"][l], p["be1"][l])
        ff = jnp.maximum(dot(z, p["w1"][l]) + p["b1"][l], 0.0)
        ff = dot(ff, p["w2"][l]) + p["b2"][l]
        h = _layernorm(z + ff, p["g2"][l], p["be2"][l])
    g = jnp.maximum(dot(h, p["fc2_w"]) + p["fc2_b"], 0.0)
    ab = dot(g, p["wab"]) + p["bab"]
    a = jnp.tanh(ab[:, :d_hid])
    b = jax.nn.sigmoid(ab[:, d_hid:])
    logit = jnp.sum((a * b) * p["wc_row"], axis=-1) + p["bc"][0, 0]
    w = jax.nn.softmax(logit)
    M = w[None, :] @ g
    logits = M @ p["cls_w"] + p["cls_b"]
    return M, logits


# ----------------------------------- main ------------------------------------

def _check(got, want, name, tol=5e-3):
    err = float(jnp.max(jnp.abs(got - want)))
    assert jnp.allclose(got, want, rtol=tol, atol=tol), (name, err)


if __name__ == "__main__":
    key = jax.random.PRNGKey(0)
    kx, kp = jax.random.split(key)
    params = make_params(kp)

    # Case 1: small bag, single tile (auto tile size).
    x1 = jax.random.normal(kx, (8, K_IN), jnp.float32)
    M1, logits1 = scmil_forward(x1, params)
    jax.block_until_ready((M1, logits1))
    assert M1.shape == (1, D_HID) and logits1.shape == (1, N_CLASSES)
    M1_ref, logits1_ref = reference(x1, params)
    _check(M1, M1_ref, "M (single tile)")
    _check(logits1, logits1_ref, "logits (single tile)")

    # Case 2: multi-tile grid with a partial last tile (40 rows, 16-row tiles)
    # to exercise tiling, the parallel grid axis, and partial-block writes.
    x2 = jax.random.normal(jax.random.fold_in(kx, 1), (40, K_IN), jnp.float32)
    M2, logits2 = scmil_forward(x2, params, tile_n=16)
    jax.block_until_ready((M2, logits2))
    M2_ref, logits2_ref = reference(x2, params)
    _check(M2, M2_ref, "M (multi tile)")
    _check(logits2, logits2_ref, "logits (multi tile)")

    print("KERNEL_OK")
</pallas_src>

<mosaic_0001>
module attributes {stable_mosaic.version = 11 : i64} {
  func.func @_scmil_tile_kernel(%arg0: i32, %arg1: memref<8x5000xf32, #tpu.memory_space<vmem>>, %arg2: memref<5000x256xbf16, #tpu.memory_space<vmem>>, %arg3: memref<1x256xf32, #tpu.memory_space<vmem>>, %arg4: memref<2x256x256xbf16, #tpu.memory_space<vmem>>, %arg5: memref<2x1x256xf32, #tpu.memory_space<vmem>>, %arg6: memref<2x1x256xf32, #tpu.memory_space<vmem>>, %arg7: memref<2x1x256xf32, #tpu.memory_space<vmem>>, %arg8: memref<2x256x2048xbf16, #tpu.memory_space<vmem>>, %arg9: memref<2x1x2048xf32, #tpu.memory_space<vmem>>, %arg10: memref<2x2048x256xbf16, #tpu.memory_space<vmem>>, %arg11: memref<2x1x256xf32, #tpu.memory_space<vmem>>, %arg12: memref<2x1x256xf32, #tpu.memory_space<vmem>>, %arg13: memref<2x1x256xf32, #tpu.memory_space<vmem>>, %arg14: memref<256x64xbf16, #tpu.memory_space<vmem>>, %arg15: memref<1x64xf32, #tpu.memory_space<vmem>>, %arg16: memref<64x128xbf16, #tpu.memory_space<vmem>>, %arg17: memref<1x128xf32, #tpu.memory_space<vmem>>, %arg18: memref<1x64xf32, #tpu.memory_space<vmem>>, %arg19: memref<1x1xf32, #tpu.memory_space<vmem>>, %arg20: memref<8x128xf32, #tpu.memory_space<vmem>>) attributes {dimension_semantics = [#tpu.dimension_semantics<parallel>], iteration_bounds = array<i64: 1>, scalar_prefetch = 0 : i64, scratch_operands = 0 : i64, tpu.core_type = #tpu.core_type<tc>, window_params = [{transform_indices = @transform_0, window_bounds = array<i64: 8, 5000>}, {pipeline_mode = #tpu.pipeline_mode<synchronous>, transform_indices = @transform_1, window_bounds = array<i64: 5000, 256>}, {pipeline_mode = #tpu.pipeline_mode<synchronous>, transform_indices = @transform_2, window_bounds = array<i64: 1, 256>}, {pipeline_mode = #tpu.pipeline_mode<synchronous>, transform_indices = @transform_3, window_bounds = array<i64: 2, 256, 256>}, {pipeline_mode = #tpu.pipeline_mode<synchronous>, transform_indices = @transform_4, window_bounds = array<i64: 2, 1, 256>}, {pipeline_mode = #tpu.pipeline_mode<synchronous>, transform_indices = @transform_5, window_bounds = array<i64: 2, 1, 256>}, {pipeline_mode = #tpu.pipeline_mode<synchronous>, transform_indices = @transform_6, window_bounds = array<i64: 2, 1, 256>}, {pipeline_mode = #tpu.pipeline_mode<synchronous>, transform_indices = @transform_7, window_bounds = array<i64: 2, 256, 2048>}, {pipeline_mode = #tpu.pipeline_mode<synchronous>, transform_indices = @transform_8, window_bounds = array<i64: 2, 1, 2048>}, {pipeline_mode = #tpu.pipeline_mode<synchronous>, transform_indices = @transform_9, window_bounds = array<i64: 2, 2048, 256>}, {pipeline_mode = #tpu.pipeline_mode<synchronous>, transform_indices = @transform_10, window_bounds = array<i64: 2, 1, 256>}, {pipeline_mode = #tpu.pipeline_mode<synchronous>, transform_indices = @transform_11, window_bounds = array<i64: 2, 1, 256>}, {pipeline_mode = #tpu.pipeline_mode<synchronous>, transform_indices = @transform_12, window_bounds = array<i64: 2, 1, 256>}, {pipeline_mode = #tpu.pipeline_mode<synchronous>, transform_indices = @transform_13, window_bounds = array<i64: 256, 64>}, {pipeline_mode = #tpu.pipeline_mode<synchronous>, transform_indices = @transform_14, window_bounds = array<i64: 1, 64>}, {pipeline_mode = #tpu.pipeline_mode<synchronous>, transform_indices = @transform_15, window_bounds = array<i64: 64, 128>}, {pipeline_mode = #tpu.pipeline_mode<synchronous>, transform_indices = @transform_16, window_bounds = array<i64: 1, 128>}, {pipeline_mode = #tpu.pipeline_mode<synchronous>, transform_indices = @transform_17, window_bounds = array<i64: 1, 64>}, {pipeline_mode = #tpu.pipeline_mode<synchronous>, transform_indices = @transform_18, window_bounds = array<i64: 1, 1>}, {transform_indices = @transform_19, window_bounds = array<i64: 8, 128>}]} {
    %c0 = arith.constant 0 : index
    %c0_0 = arith.constant 0 : index
    %0 = vector.load %arg1[%c0, %c0_0] : memref<8x5000xf32, #tpu.memory_space<vmem>>, vector<8x5000xf32>
    %1 = arith.truncf %0 : vector<8x5000xf32> to vector<8x5000xbf16>
    %c0_1 = arith.constant 0 : index
    %c0_2 = arith.constant 0 : index
    %2 = vector.load %arg2[%c0_1, %c0_2] : memref<5000x256xbf16, #tpu.memory_space<vmem>>, vector<5000x256xbf16>
    %cst = arith.constant dense<0.000000e+00> : vector<8x256xf32>
    %3 = tpu.matmul %1, %2, %cst {dimension_numbers = #tpu.dot_dimension_numbers<[1], [0], [0], [1], [0, 0, 1, 1], [], []>} : vector<8x5000xbf16>, vector<5000x256xbf16>, vector<8x256xf32> -> vector<8x256xf32>
    %c0_3 = arith.constant 0 : index
    %c0_4 = arith.constant 0 : index
    %4 = vector.load %arg3[%c0_3, %c0_4] : memref<1x256xf32, #tpu.memory_space<vmem>>, vector<1x256xf32>
    %5 = vector.broadcast %4 : vector<1x256xf32> to vector<8x256xf32>
    %6 = arith.addf %3, %5 : vector<8x256xf32>
    %cst_5 = arith.constant 0.000000e+00 : f32
    %7 = vector.broadcast %cst_5 : f32 to vector<8x256xf32>
    %8 = arith.maximumf %6, %7 : vector<8x256xf32>
    %9 = arith.truncf %8 : vector<8x256xf32> to vector<8x256xbf16>
    %c0_6 = arith.constant 0 : index
    %c0_7 = arith.constant 0 : index
    %c0_8 = arith.constant 0 : index
    %10 = vector.load %arg4[%c0_6, %c0_7, %c0_8] : memref<2x256x256xbf16, #tpu.memory_space<vmem>>, vector<1x256x256xbf16>
    %11 = vector.shape_cast %10 : vector<1x256x256xbf16> to vector<256x256xbf16>
    %cst_9 = arith.constant dense<0.000000e+00> : vector<8x256xf32>
    %12 = tpu.matmul %9, %11, %cst_9 {dimension_numbers = #tpu.dot_dimension_numbers<[1], [0], [0], [1], [0, 0, 1, 1], [], []>} : vector<8x256xbf16>, vector<256x256xbf16>, vector<8x256xf32> -> vector<8x256xf32>
    %c0_10 = arith.constant 0 : index
    %c0_11 = arith.constant 0 : index
    %c0_12 = arith.constant 0 : index
    %13 = vector.load %arg5[%c0_10, %c0_11, %c0_12] : memref<2x1x256xf32, #tpu.memory_space<vmem>>, vector<1x1x256xf32>
    %14 = vector.shape_cast %13 : vector<1x1x256xf32> to vector<1x256xf32>
    %15 = vector.broadcast %14 : vector<1x256xf32> to vector<8x256xf32>
    %16 = arith.addf %12, %15 : vector<8x256xf32>
    %17 = arith.addf %8, %16 : vector<8x256xf32>
    %c0_13 = arith.constant 0 : index
    %c0_14 = arith.constant 0 : index
    %c0_15 = arith.constant 0 : index
    %18 = vector.load %arg6[%c0_13, %c0_14, %c0_15] : memref<2x1x256xf32, #tpu.memory_space<vmem>>, vector<1x1x256xf32>
    %19 = vector.shape_cast %18 : vector<1x1x256xf32> to vector<1x256xf32>
    %c0_16 = arith.constant 0 : index
    %c0_17 = arith.constant 0 : index
    %c0_18 = arith.constant 0 : index
    %20 = vector.load %arg7[%c0_16, %c0_17, %c0_18] : memref<2x1x256xf32, #tpu.memory_space<vmem>>, vector<1x1x256xf32>
    %21 = vector.shape_cast %20 : vector<1x1x256xf32> to vector<1x256xf32>
    %cst_19 = arith.constant dense<0.000000e+00> : vector<8xf32>
    %22 = vector.multi_reduction <add>, %17, %cst_19 [1] : vector<8x256xf32> to vector<8xf32>
    %23 = vector.shape_cast %22 : vector<8xf32> to vector<8x1xf32>
    %cst_20 = arith.constant 2.560000e+02 : f32
    %24 = vector.broadcast %cst_20 : f32 to vector<8x1xf32>
    %25 = arith.divf %23, %24 : vector<8x1xf32>
    %26 = vector.broadcast %25 : vector<8x1xf32> to vector<8x256xf32>
    %27 = arith.subf %17, %26 : vector<8x256xf32>
    %28 = arith.mulf %27, %27 : vector<8x256xf32>
    %cst_21 = arith.constant dense<0.000000e+00> : vector<8xf32>
    %29 = vector.multi_reduction <add>, %28, %cst_21 [1] : vector<8x256xf32> to vector<8xf32>
    %30 = vector.shape_cast %29 : vector<8xf32> to vector<8x1xf32>
    %cst_22 = arith.constant 2.560000e+02 : f32
    %31 = vector.broadcast %cst_22 : f32 to vector<8x1xf32>
    %32 = arith.divf %30, %31 : vector<8x1xf32>
    %33 = vector.broadcast %25 : vector<8x1xf32> to vector<8x256xf32>
    %34 = arith.subf %17, %33 : vector<8x256xf32>
    %cst_23 = arith.constant 9.99999974E-6 : f32
    %35 = vector.broadcast %cst_23 : f32 to vector<8x1xf32>
    %36 = arith.addf %32, %35 : vector<8x1xf32>
    %37 = math.rsqrt %36 : vector<8x1xf32>
    %38 = vector.broadcast %37 : vector<8x1xf32> to vector<8x256xf32>
    %39 = arith.mulf %34, %38 : vector<8x256xf32>
    %40 = vector.broadcast %19 : vector<1x256xf32> to vector<8x256xf32>
    %41 = arith.mulf %39, %40 : vector<8x256xf32>
    %42 = vector.broadcast %21 : vector<1x256xf32> to vector<8x256xf32>
    %43 = arith.addf %41, %42 : vector<8x256xf32>
    %44 = arith.truncf %43 : vector<8x256xf32> to vector<8x256xbf16>
    %c0_24 = arith.constant 0 : index
    %c0_25 = arith.constant 0 : index
    %c0_26 = arith.constant 0 : index
    %45 = vector.load %arg8[%c0_24, %c0_25, %c0_26] : memref<2x256x2048xbf16, #tpu.memory_space<vmem>>, vector<1x256x2048xbf16>
    %46 = vector.shape_cast %45 : vector<1x256x2048xbf16> to vector<256x2048xbf16>
    %cst_27 = arith.constant dense<0.000000e+00> : vector<8x2048xf32>
    %47 = tpu.matmul %44, %46, %cst_27 {dimension_numbers = #tpu.dot_dimension_numbers<[1], [0], [0], [1], [0, 0, 1, 1], [], []>} : vector<8x256xbf16>, vector<256x2048xbf16>, vector<8x2048xf32> -> vector<8x2048xf32>
    %c0_28 = arith.constant 0 : index
    %c0_29 = arith.constant 0 : index
    %c0_30 = arith.constant 0 : index
    %48 = vector.load %arg9[%c0_28, %c0_29, %c0_30] : memref<2x1x2048xf32, #tpu.memory_space<vmem>>, vector<1x1x2048xf32>
    %49 = vector.shape_cast %48 : vector<1x1x2048xf32> to vector<1x2048xf32>
    %50 = vector.broadcast %49 : vector<1x2048xf32> to vector<8x2048xf32>
    %51 = arith.addf %47, %50 : vector<8x2048xf32>
    %cst_31 = arith.constant 0.000000e+00 : f32
    %52 = vector.broadcast %cst_31 : f32 to vector<8x2048xf32>
    %53 = arith.maximumf %51, %52 : vector<8x2048xf32>
    %54 = arith.truncf %53 : vector<8x2048xf32> to vector<8x2048xbf16>
    %c0_32 = arith.constant 0 : index
    %c0_33 = arith.constant 0 : index
    %c0_34 = arith.constant 0 : index
    %55 = vector.load %arg10[%c0_32, %c0_33, %c0_34] : memref<2x2048x256xbf16, #tpu.memory_space<vmem>>, vector<1x2048x256xbf16>
    %56 = vector.shape_cast %55 : vector<1x2048x256xbf16> to vector<2048x256xbf16>
    %cst_35 = arith.constant dense<0.000000e+00> : vector<8x256xf32>
    %57 = tpu.matmul %54, %56, %cst_35 {dimension_numbers = #tpu.dot_dimension_numbers<[1], [0], [0], [1], [0, 0, 1, 1], [], []>} : vector<8x2048xbf16>, vector<2048x256xbf16>, vector<8x256xf32> -> vector<8x256xf32>
    %c0_36 = arith.constant 0 : index
    %c0_37 = arith.constant 0 : index
    %c0_38 = arith.constant 0 : index
    %58 = vector.load %arg11[%c0_36, %c0_37, %c0_38] : memref<2x1x256xf32, #tpu.memory_space<vmem>>, vector<1x1x256xf32>
    %59 = vector.shape_cast %58 : vector<1x1x256xf32> to vector<1x256xf32>
    %60 = vector.broadcast %59 : vector<1x256xf32> to vector<8x256xf32>
    %61 = arith.addf %57, %60 : vector<8x256xf32>
    %62 = arith.addf %43, %61 : vector<8x256xf32>
    %c0_39 = arith.constant 0 : index
    %c0_40 = arith.constant 0 : index
    %c0_41 = arith.constant 0 : index
    %63 = vector.load %arg12[%c0_39, %c0_40, %c0_41] : memref<2x1x256xf32, #tpu.memory_space<vmem>>, vector<1x1x256xf32>
    %64 = vector.shape_cast %63 : vector<1x1x256xf32> to vector<1x256xf32>
    %c0_42 = arith.constant 0 : index
    %c0_43 = arith.constant 0 : index
    %c0_44 = arith.constant 0 : index
    %65 = vector.load %arg13[%c0_42, %c0_43, %c0_44] : memref<2x1x256xf32, #tpu.memory_space<vmem>>, vector<1x1x256xf32>
    %66 = vector.shape_cast %65 : vector<1x1x256xf32> to vector<1x256xf32>
    %cst_45 = arith.constant dense<0.000000e+00> : vector<8xf32>
    %67 = vector.multi_reduction <add>, %62, %cst_45 [1] : vector<8x256xf32> to vector<8xf32>
    %68 = vector.shape_cast %67 : vector<8xf32> to vector<8x1xf32>
    %cst_46 = arith.constant 2.560000e+02 : f32
    %69 = vector.broadcast %cst_46 : f32 to vector<8x1xf32>
    %70 = arith.divf %68, %69 : vector<8x1xf32>
    %71 = vector.broadcast %70 : vector<8x1xf32> to vector<8x256xf32>
    %72 = arith.subf %62, %71 : vector<8x256xf32>
    %73 = arith.mulf %72, %72 : vector<8x256xf32>
    %cst_47 = arith.constant dense<0.000000e+00> : vector<8xf32>
    %74 = vector.multi_reduction <add>, %73, %cst_47 [1] : vector<8x256xf32> to vector<8xf32>
    %75 = vector.shape_cast %74 : vector<8xf32> to vector<8x1xf32>
    %cst_48 = arith.constant 2.560000e+02 : f32
    %76 = vector.broadcast %cst_48 : f32 to vector<8x1xf32>
    %77 = arith.divf %75, %76 : vector<8x1xf32>
    %78 = vector.broadcast %70 : vector<8x1xf32> to vector<8x256xf32>
    %79 = arith.subf %62, %78 : vector<8x256xf32>
    %cst_49 = arith.constant 9.99999974E-6 : f32
    %80 = vector.broadcast %cst_49 : f32 to vector<8x1xf32>
    %81 = arith.addf %77, %80 : vector<8x1xf32>
    %82 = math.rsqrt %81 : vector<8x1xf32>
    %83 = vector.broadcast %82 : vector<8x1xf32> to vector<8x256xf32>
    %84 = arith.mulf %79, %83 : vector<8x256xf32>
    %85 = vector.broadcast %64 : vector<1x256xf32> to vector<8x256xf32>
    %86 = arith.mulf %84, %85 : vector<8x256xf32>
    %87 = vector.broadcast %66 : vector<1x256xf32> to vector<8x256xf32>
    %88 = arith.addf %86, %87 : vector<8x256xf32>
    %89 = arith.truncf %88 : vector<8x256xf32> to vector<8x256xbf16>
    %c1 = arith.constant 1 : index
    %c0_50 = arith.constant 0 : index
    %c0_51 = arith.constant 0 : index
    %90 = vector.load %arg4[%c1, %c0_50, %c0_51] : memref<2x256x256xbf16, #tpu.memory_space<vmem>>, vector<1x256x256xbf16>
    %91 = vector.shape_cast %90 : vector<1x256x256xbf16> to vector<256x256xbf16>
    %cst_52 = arith.constant dense<0.000000e+00> : vector<8x256xf32>
    %92 = tpu.matmul %89, %91, %cst_52 {dimension_numbers = #tpu.dot_dimension_numbers<[1], [0], [0], [1], [0, 0, 1, 1], [], []>} : vector<8x256xbf16>, vector<256x256xbf16>, vector<8x256xf32> -> vector<8x256xf32>
    %c1_53 = arith.constant 1 : index
    %c0_54 = arith.constant 0 : index
    %c0_55 = arith.constant 0 : index
    %93 = vector.load %arg5[%c1_53, %c0_54, %c0_55] : memref<2x1x256xf32, #tpu.memory_space<vmem>>, vector<1x1x256xf32>
    %94 = vector.shape_cast %93 : vector<1x1x256xf32> to vector<1x256xf32>
    %95 = vector.broadcast %94 : vector<1x256xf32> to vector<8x256xf32>
    %96 = arith.addf %92, %95 : vector<8x256xf32>
    %97 = arith.addf %88, %96 : vector<8x256xf32>
    %c1_56 = arith.constant 1 : index
    %c0_57 = arith.constant 0 : index
    %c0_58 = arith.constant 0 : index
    %98 = vector.load %arg6[%c1_56, %c0_57, %c0_58] : memref<2x1x256xf32, #tpu.memory_space<vmem>>, vector<1x1x256xf32>
    %99 = vector.shape_cast %98 : vector<1x1x256xf32> to vector<1x256xf32>
    %c1_59 = arith.constant 1 : index
    %c0_60 = arith.constant 0 : index
    %c0_61 = arith.constant 0 : index
    %100 = vector.load %arg7[%c1_59, %c0_60, %c0_61] : memref<2x1x256xf32, #tpu.memory_space<vmem>>, vector<1x1x256xf32>
    %101 = vector.shape_cast %100 : vector<1x1x256xf32> to vector<1x256xf32>
    %cst_62 = arith.constant dense<0.000000e+00> : vector<8xf32>
    %102 = vector.multi_reduction <add>, %97, %cst_62 [1] : vector<8x256xf32> to vector<8xf32>
    %103 = vector.shape_cast %102 : vector<8xf32> to vector<8x1xf32>
    %cst_63 = arith.constant 2.560000e+02 : f32
    %104 = vector.broadcast %cst_63 : f32 to vector<8x1xf32>
    %105 = arith.divf %103, %104 : vector<8x1xf32>
    %106 = vector.broadcast %105 : vector<8x1xf32> to vector<8x256xf32>
    %107 = arith.subf %97, %106 : vector<8x256xf32>
    %108 = arith.mulf %107, %107 : vector<8x256xf32>
    %cst_64 = arith.constant dense<0.000000e+00> : vector<8xf32>
    %109 = vector.multi_reduction <add>, %108, %cst_64 [1] : vector<8x256xf32> to vector<8xf32>
    %110 = vector.shape_cast %109 : vector<8xf32> to vector<8x1xf32>
    %cst_65 = arith.constant 2.560000e+02 : f32
    %111 = vector.broadcast %cst_65 : f32 to vector<8x1xf32>
    %112 = arith.divf %110, %111 : vector<8x1xf32>
    %113 = vector.broadcast %105 : vector<8x1xf32> to vector<8x256xf32>
    %114 = arith.subf %97, %113 : vector<8x256xf32>
    %cst_66 = arith.constant 9.99999974E-6 : f32
    %115 = vector.broadcast %cst_66 : f32 to vector<8x1xf32>
    %116 = arith.addf %112, %115 : vector<8x1xf32>
    %117 = math.rsqrt %116 : vector<8x1xf32>
    %118 = vector.broadcast %117 : vector<8x1xf32> to vector<8x256xf32>
    %119 = arith.mulf %114, %118 : vector<8x256xf32>
    %120 = vector.broadcast %99 : vector<1x256xf32> to vector<8x256xf32>
    %121 = arith.mulf %119, %120 : vector<8x256xf32>
    %122 = vector.broadcast %101 : vector<1x256xf32> to vector<8x256xf32>
    %123 = arith.addf %121, %122 : vector<8x256xf32>
    %124 = arith.truncf %123 : vector<8x256xf32> to vector<8x256xbf16>
    %c1_67 = arith.constant 1 : index
    %c0_68 = arith.constant 0 : index
    %c0_69 = arith.constant 0 : index
    %125 = vector.load %arg8[%c1_67, %c0_68, %c0_69] : memref<2x256x2048xbf16, #tpu.memory_space<vmem>>, vector<1x256x2048xbf16>
    %126 = vector.shape_cast %125 : vector<1x256x2048xbf16> to vector<256x2048xbf16>
    %cst_70 = arith.constant dense<0.000000e+00> : vector<8x2048xf32>
    %127 = tpu.matmul %124, %126, %cst_70 {dimension_numbers = #tpu.dot_dimension_numbers<[1], [0], [0], [1], [0, 0, 1, 1], [], []>} : vector<8x256xbf16>, vector<256x2048xbf16>, vector<8x2048xf32> -> vector<8x2048xf32>
    %c1_71 = arith.constant 1 : index
    %c0_72 = arith.constant 0 : index
    %c0_73 = arith.constant 0 : index
    %128 = vector.load %arg9[%c1_71, %c0_72, %c0_73] : memref<2x1x2048xf32, #tpu.memory_space<vmem>>, vector<1x1x2048xf32>
    %129 = vector.shape_cast %128 : vector<1x1x2048xf32> to vector<1x2048xf32>
    %130 = vector.broadcast %129 : vector<1x2048xf32> to vector<8x2048xf32>
    %131 = arith.addf %127, %130 : vector<8x2048xf32>
    %cst_74 = arith.constant 0.000000e+00 : f32
    %132 = vector.broadcast %cst_74 : f32 to vector<8x2048xf32>
    %133 = arith.maximumf %131, %132 : vector<8x2048xf32>
    %134 = arith.truncf %133 : vector<8x2048xf32> to vector<8x2048xbf16>
    %c1_75 = arith.constant 1 : index
    %c0_76 = arith.constant 0 : index
    %c0_77 = arith.constant 0 : index
    %135 = vector.load %arg10[%c1_75, %c0_76, %c0_77] : memref<2x2048x256xbf16, #tpu.memory_space<vmem>>, vector<1x2048x256xbf16>
    %136 = vector.shape_cast %135 : vector<1x2048x256xbf16> to vector<2048x256xbf16>
    %cst_78 = arith.constant dense<0.000000e+00> : vector<8x256xf32>
    %137 = tpu.matmul %134, %136, %cst_78 {dimension_numbers = #tpu.dot_dimension_numbers<[1], [0], [0], [1], [0, 0, 1, 1], [], []>} : vector<8x2048xbf16>, vector<2048x256xbf16>, vector<8x256xf32> -> vector<8x256xf32>
    %c1_79 = arith.constant 1 : index
    %c0_80 = arith.constant 0 : index
    %c0_81 = arith.constant 0 : index
    %138 = vector.load %arg11[%c1_79, %c0_80, %c0_81] : memref<2x1x256xf32, #tpu.memory_space<vmem>>, vector<1x1x256xf32>
    %139 = vector.shape_cast %138 : vector<1x1x256xf32> to vector<1x256xf32>
    %140 = vector.broadcast %139 : vector<1x256xf32> to vector<8x256xf32>
    %141 = arith.addf %137, %140 : vector<8x256xf32>
    %142 = arith.addf %123, %141 : vector<8x256xf32>
    %c1_82 = arith.constant 1 : index
    %c0_83 = arith.constant 0 : index
    %c0_84 = arith.constant 0 : index
    %143 = vector.load %arg12[%c1_82, %c0_83, %c0_84] : memref<2x1x256xf32, #tpu.memory_space<vmem>>, vector<1x1x256xf32>
    %144 = vector.shape_cast %143 : vector<1x1x256xf32> to vector<1x256xf32>
    %c1_85 = arith.constant 1 : index
    %c0_86 = arith.constant 0 : index
    %c0_87 = arith.constant 0 : index
    %145 = vector.load %arg13[%c1_85, %c0_86, %c0_87] : memref<2x1x256xf32, #tpu.memory_space<vmem>>, vector<1x1x256xf32>
    %146 = vector.shape_cast %145 : vector<1x1x256xf32> to vector<1x256xf32>
    %cst_88 = arith.constant dense<0.000000e+00> : vector<8xf32>
    %147 = vector.multi_reduction <add>, %142, %cst_88 [1] : vector<8x256xf32> to vector<8xf32>
    %148 = vector.shape_cast %147 : vector<8xf32> to vector<8x1xf32>
    %cst_89 = arith.constant 2.560000e+02 : f32
    %149 = vector.broadcast %cst_89 : f32 to vector<8x1xf32>
    %150 = arith.divf %148, %149 : vector<8x1xf32>
    %151 = vector.broadcast %150 : vector<8x1xf32> to vector<8x256xf32>
    %152 = arith.subf %142, %151 : vector<8x256xf32>
    %153 = arith.mulf %152, %152 : vector<8x256xf32>
    %cst_90 = arith.constant dense<0.000000e+00> : vector<8xf32>
    %154 = vector.multi_reduction <add>, %153, %cst_90 [1] : vector<8x256xf32> to vector<8xf32>
    %155 = vector.shape_cast %154 : vector<8xf32> to vector<8x1xf32>
    %cst_91 = arith.constant 2.560000e+02 : f32
    %156 = vector.broadcast %cst_91 : f32 to vector<8x1xf32>
    %157 = arith.divf %155, %156 : vector<8x1xf32>
    %158 = vector.broadcast %150 : vector<8x1xf32> to vector<8x256xf32>
    %159 = arith.subf %142, %158 : vector<8x256xf32>
    %cst_92 = arith.constant 9.99999974E-6 : f32
    %160 = vector.broadcast %cst_92 : f32 to vector<8x1xf32>
    %161 = arith.addf %157, %160 : vector<8x1xf32>
    %162 = math.rsqrt %161 : vector<8x1xf32>
    %163 = vector.broadcast %162 : vector<8x1xf32> to vector<8x256xf32>
    %164 = arith.mulf %159, %163 : vector<8x256xf32>
    %165 = vector.broadcast %144 : vector<1x256xf32> to vector<8x256xf32>
    %166 = arith.mulf %164, %165 : vector<8x256xf32>
    %167 = vector.broadcast %146 : vector<1x256xf32> to vector<8x256xf32>
    %168 = arith.addf %166, %167 : vector<8x256xf32>
    %169 = arith.truncf %168 : vector<8x256xf32> to vector<8x256xbf16>
    %c0_93 = arith.constant 0 : index
    %c0_94 = arith.constant 0 : index
    %170 = vector.load %arg14[%c0_93, %c0_94] : memref<256x64xbf16, #tpu.memory_space<vmem>>, vector<256x64xbf16>
    %cst_95 = arith.constant dense<0.000000e+00> : vector<8x64xf32>
    %171 = tpu.matmul %169, %170, %cst_95 {dimension_numbers = #tpu.dot_dimension_numbers<[1], [0], [0], [1], [0, 0, 1, 1], [], []>} : vector<8x256xbf16>, vector<256x64xbf16>, vector<8x64xf32> -> vector<8x64xf32>
    %c0_96 = arith.constant 0 : index
    %c0_97 = arith.constant 0 : index
    %172 = vector.load %arg15[%c0_96, %c0_97] : memref<1x64xf32, #tpu.memory_space<vmem>>, vector<1x64xf32>
    %173 = vector.broadcast %172 : vector<1x64xf32> to vector<8x64xf32>
    %174 = arith.addf %171, %173 : vector<8x64xf32>
    %cst_98 = arith.constant 0.000000e+00 : f32
    %175 = vector.broadcast %cst_98 : f32 to vector<8x64xf32>
    %176 = arith.maximumf %174, %175 : vector<8x64xf32>
    %177 = arith.truncf %176 : vector<8x64xf32> to vector<8x64xbf16>
    %c0_99 = arith.constant 0 : index
    %c0_100 = arith.constant 0 : index
    %178 = vector.load %arg16[%c0_99, %c0_100] : memref<64x128xbf16, #tpu.memory_space<vmem>>, vector<64x128xbf16>
    %cst_101 = arith.constant dense<0.000000e+00> : vector<8x128xf32>
    %179 = tpu.matmul %177, %178, %cst_101 {dimension_numbers = #tpu.dot_dimension_numbers<[1], [0], [0], [1], [0, 0, 1, 1], [], []>} : vector<8x64xbf16>, vector<64x128xbf16>, vector<8x128xf32> -> vector<8x128xf32>
    %c0_102 = arith.constant 0 : index
    %c0_103 = arith.constant 0 : index
    %180 = vector.load %arg17[%c0_102, %c0_103] : memref<1x128xf32, #tpu.memory_space<vmem>>, vector<1x128xf32>
    %181 = vector.broadcast %180 : vector<1x128xf32> to vector<8x128xf32>
    %182 = arith.addf %179, %181 : vector<8x128xf32>
    %183 = vector.extract_strided_slice %182 {offsets = [0, 0], sizes = [8, 64], strides = [1, 1]} : vector<8x128xf32> to vector<8x64xf32>
    %184 = math.tanh %183 : vector<8x64xf32>
    %185 = vector.extract_strided_slice %182 {offsets = [0, 64], sizes = [8, 64], strides = [1, 1]} : vector<8x128xf32> to vector<8x64xf32>
    %186 = arith.negf %185 : vector<8x64xf32>
    %187 = math.exp %186 : vector<8x64xf32>
    %cst_104 = arith.constant 1.000000e+00 : f32
    %188 = vector.broadcast %cst_104 : f32 to vector<8x64xf32>
    %189 = arith.addf %188, %187 : vector<8x64xf32>
    %190 = arith.divf %188, %189 : vector<8x64xf32>
    %191 = arith.mulf %184, %190 : vector<8x64xf32>
    %c0_105 = arith.constant 0 : index
    %c0_106 = arith.constant 0 : index
    %192 = vector.load %arg18[%c0_105, %c0_106] : memref<1x64xf32, #tpu.memory_space<vmem>>, vector<1x64xf32>
    %193 = vector.broadcast %192 : vector<1x64xf32> to vector<8x64xf32>
    %194 = arith.mulf %191, %193 : vector<8x64xf32>
    %cst_107 = arith.constant dense<0.000000e+00> : vector<8xf32>
    %195 = vector.multi_reduction <add>, %194, %cst_107 [1] : vector<8x64xf32> to vector<8xf32>
    %196 = vector.shape_cast %195 : vector<8xf32> to vector<8x1xf32>
    %c0_108 = arith.constant 0 : index
    %c0_109 = arith.constant 0 : index
    %197 = vector.load %arg19[%c0_108, %c0_109] : memref<1x1xf32, #tpu.memory_space<vmem>>, vector<1x1xf32>
    %198 = vector.broadcast %197 : vector<1x1xf32> to vector<8x1xf32>
    %199 = arith.addf %196, %198 : vector<8x1xf32>
    %200 = vector.shape_cast %199 : vector<8x1xf32> to vector<8x1xf32>
    %201 = vector.broadcast %200 : vector<8x1xf32> to vector<8x64xf32>
    %202 = tpu.concatenate %176, %201 in 1 : vector<8x64xf32>, vector<8x64xf32> -> vector<8x128xf32>
    %c0_110 = arith.constant 0 : index
    %c0_111 = arith.constant 0 : index
    %203 = vector.load %arg20[%c0_110, %c0_111] : memref<8x128xf32, #tpu.memory_space<vmem>>, vector<8x128xf32>
    tpu.vector_store %arg20[%c0_110, %c0_111], %202 {strides = array<i32>} : memref<8x128xf32, #tpu.memory_space<vmem>>, vector<8x128xf32>,
    return
  }
  func.func @transform_0(%arg0: i32) -> (i32, i32) {
    %c0_i32 = arith.constant 0 : i32
    %c0_i32_0 = arith.constant 0 : i32
    return %arg0, %c0_i32 : i32, i32
  }
  func.func @transform_1(%arg0: i32) -> (i32, i32) {
    %c0_i32 = arith.constant 0 : i32
    %c0_i32_0 = arith.constant 0 : i32
    %c0_i32_1 = arith.constant 0 : i32
    return %c0_i32, %c0_i32_0 : i32, i32
  }
  func.func @transform_2(%arg0: i32) -> (i32, i32) {
    %c0_i32 = arith.constant 0 : i32
    %c0_i32_0 = arith.constant 0 : i32
    %c0_i32_1 = arith.constant 0 : i32
    return %c0_i32, %c0_i32_0 : i32, i32
  }
  func.func @transform_3(%arg0: i32) -> (i32, i32, i32) {
    %c0_i32 = arith.constant 0 : i32
    %c0_i32_0 = arith.constant 0 : i32
    %c0_i32_1 = arith.constant 0 : i32
    %c0_i32_2 = arith.constant 0 : i32
    return %c0_i32, %c0_i32_0, %c0_i32_1 : i32, i32, i32
  }
  func.func @transform_4(%arg0: i32) -> (i32, i32, i32) {
    %c0_i32 = arith.constant 0 : i32
    %c0_i32_0 = arith.constant 0 : i32
    %c0_i32_1 = arith.constant 0 : i32
    %c0_i32_2 = arith.constant 0 : i32
    return %c0_i32, %c0_i32_0, %c0_i32_1 : i32, i32, i32
  }
  func.func @transform_5(%arg0: i32) -> (i32, i32, i32) {
    %c0_i32 = arith.constant 0 : i32
    %c0_i32_0 = arith.constant 0 : i32
    %c0_i32_1 = arith.constant 0 : i32
    %c0_i32_2 = arith.constant 0 : i32
    return %c0_i32, %c0_i32_0, %c0_i32_1 : i32, i32, i32
  }
  func.func @transform_6(%arg0: i32) -> (i32, i32, i32) {
    %c0_i32 = arith.constant 0 : i32
    %c0_i32_0 = arith.constant 0 : i32
    %c0_i32_1 = arith.constant 0 : i32
    %c0_i32_2 = arith.constant 0 : i32
    return %c0_i32, %c0_i32_0, %c0_i32_1 : i32, i32, i32
  }
  func.func @transform_7(%arg0: i32) -> (i32, i32, i32) {
    %c0_i32 = arith.constant 0 : i32
    %c0_i32_0 = arith.constant 0 : i32
    %c0_i32_1 = arith.constant 0 : i32
    %c0_i32_2 = arith.constant 0 : i32
    return %c0_i32, %c0_i32_0, %c0_i32_1 : i32, i32, i32
  }
  func.func @transform_8(%arg0: i32) -> (i32, i32, i32) {
    %c0_i32 = arith.constant 0 : i32
    %c0_i32_0 = arith.constant 0 : i32
    %c0_i32_1 = arith.constant 0 : i32
    %c0_i32_2 = arith.constant 0 : i32
    return %c0_i32, %c0_i32_0, %c0_i32_1 : i32, i32, i32
  }
  func.func @transform_9(%arg0: i32) -> (i32, i32, i32) {
    %c0_i32 = arith.constant 0 : i32
    %c0_i32_0 = arith.constant 0 : i32
    %c0_i32_1 = arith.constant 0 : i32
    %c0_i32_2 = arith.constant 0 : i32
    return %c0_i32, %c0_i32_0, %c0_i32_1 : i32, i32, i32
  }
  func.func @transform_10(%arg0: i32) -> (i32, i32, i32) {
    %c0_i32 = arith.constant 0 : i32
    %c0_i32_0 = arith.constant 0 : i32
    %c0_i32_1 = arith.constant 0 : i32
    %c0_i32_2 = arith.constant 0 : i32
    return %c0_i32, %c0_i32_0, %c0_i32_1 : i32, i32, i32
  }
  func.func @transform_11(%arg0: i32) -> (i32, i32, i32) {
    %c0_i32 = arith.constant 0 : i32
    %c0_i32_0 = arith.constant 0 : i32
    %c0_i32_1 = arith.constant 0 : i32
    %c0_i32_2 = arith.constant 0 : i32
    return %c0_i32, %c0_i32_0, %c0_i32_1 : i32, i32, i32
  }
  func.func @transform_12(%arg0: i32) -> (i32, i32, i32) {
    %c0_i32 = arith.constant 0 : i32
    %c0_i32_0 = arith.constant 0 : i32
    %c0_i32_1 = arith.constant 0 : i32
    %c0_i32_2 = arith.constant 0 : i32
    return %c0_i32, %c0_i32_0, %c0_i32_1 : i32, i32, i32
  }
  func.func @transform_13(%arg0: i32) -> (i32, i32) {
    %c0_i32 = arith.constant 0 : i32
    %c0_i32_0 = arith.constant 0 : i32
    %c0_i32_1 = arith.constant 0 : i32
    return %c0_i32, %c0_i32_0 : i32, i32
  }
  func.func @transform_14(%arg0: i32) -> (i32, i32) {
    %c0_i32 = arith.constant 0 : i32
    %c0_i32_0 = arith.constant 0 : i32
    %c0_i32_1 = arith.constant 0 : i32
    return %c0_i32, %c0_i32_0 : i32, i32
  }
  func.func @transform_15(%arg0: i32) -> (i32, i32) {
    %c0_i32 = arith.constant 0 : i32
    %c0_i32_0 = arith.constant 0 : i32
    %c0_i32_1 = arith.constant 0 : i32
    return %c0_i32, %c0_i32_0 : i32, i32
  }
  func.func @transform_16(%arg0: i32) -> (i32, i32) {
    %c0_i32 = arith.constant 0 : i32
    %c0_i32_0 = arith.constant 0 : i32
    %c0_i32_1 = arith.constant 0 : i32
    return %c0_i32, %c0_i32_0 : i32, i32
  }
  func.func @transform_17(%arg0: i32) -> (i32, i32) {
    %c0_i32 = arith.constant 0 : i32
    %c0_i32_0 = arith.constant 0 : i32
    %c0_i32_1 = arith.constant 0 : i32
    return %c0_i32, %c0_i32_0 : i32, i32
  }
  func.func @transform_18(%arg0: i32) -> (i32, i32) {
    %c0_i32 = arith.constant 0 : i32
    %c0_i32_0 = arith.constant 0 : i32
    %c0_i32_1 = arith.constant 0 : i32
    return %c0_i32, %c0_i32_0 : i32, i32
  }
  func.func @transform_19(%arg0: i32) -> (i32, i32) {
    %c0_i32 = arith.constant 0 : i32
    %c0_i32_0 = arith.constant 0 : i32
    return %arg0, %c0_i32 : i32, i32
  }
}

</mosaic_0001>

<bundles_post_ra>
// kernel: scmil_forward.1
= control target key start
LH: loop header
LB: loop body
LE: loop exit
PB: predicated region body
PF: predicated region fallthrough
CT: control target
= control target key end

     0   :  { %s18535_s0 = inlined_call_operand.hbm [shape: f32[8,5000], index: 0, kind: input, shape index: {}]   ;;  %s18536_s1 = inlined_call_operand.hbm [shape: bf16[5000,256], index: 1, kind: input, shape index: {}]   ;;  %s18537_s2 = inlined_call_operand.hbm [shape: f32[1,256], index: 2, kind: input, shape index: {}]   ;;  %s18538_s3 = inlined_call_operand.hbm [shape: bf16[2,256,256], index: 3, kind: input, shape index: {}]   ;;  %s18539_s4 = inlined_call_operand.hbm [shape: f32[2,1,256], index: 4, kind: input, shape index: {}]   ;;  %s18540_s5 = inlined_call_operand.hbm [shape: f32[2,1,256], index: 5, kind: input, shape index: {}]   ;;  %s18541_s6 = inlined_call_operand.hbm [shape: f32[2,1,256], index: 6, kind: input, shape index: {}]   ;;  %s18542_s7 = inlined_call_operand.hbm [shape: bf16[2,256,2048], index: 7, kind: input, shape index: {}]   ;;  %s18543_s8 = inlined_call_operand.hbm [shape: f32[2,1,2048], index: 8, kind: input, shape index: {}]   ;;  %s18544_s9 = inlined_call_operand.hbm [shape: bf16[2,2048,256], index: 9, kind: input, shape index: {}]   ;;  %s18545_s10 = inlined_call_operand.hbm [shape: f32[2,1,256], index: 10, kind: input, shape index: {}]   ;;  %s18546_s11 = inlined_call_operand.hbm [shape: f32[2,1,256], index: 11, kind: input, shape index: {}]   ;;  %s18547_s12 = inlined_call_operand.hbm [shape: f32[2,1,256], index: 12, kind: input, shape index: {}]   ;;  %s18548_s13 = inlined_call_operand.vmem [shape: bf16[256,64], index: 13, kind: input, shape index: {}]   ;;  %s18549_s14 = inlined_call_operand.hbm [shape: f32[1,64], index: 14, kind: input, shape index: {}]   ;;  %s18550_s15 = inlined_call_operand.hbm [shape: bf16[64,128], index: 15, kind: input, shape index: {}]   ;;  %s18551_s16 = inlined_call_operand.hbm [shape: f32[1,128], index: 16, kind: input, shape index: {}]   ;;  %s18552_s17 = inlined_call_operand.hbm [shape: f32[1,64], index: 17, kind: input, shape index: {}]   ;;  %s18553_s18 = inlined_call_operand.<no memory space> [shape: f32[1,1], index: 18, kind: input, shape index: {}]   ;;  %s18554_s19 = inlined_call_operand.vmem [shape: f32[8,128], index: 19, kind: output, shape index: {}]  }
   0x1   :  { %18563 = sst [smem:[#allocation38_spill]] %s18535_s0  ;;  %v24_v0 = vstv %s18553_s18 }
   0x2   :  { %18564 = sst [smem:[#allocation39_spill]] %s18536_s1  ;;  %25 = vst [vmem:[#allocation2] sm:$0x1] %v24_v0 }
   0x3   :  { %18565 = sst [smem:[#allocation40_spill]] %s18537_s2 }
   0x4   :  { %18566 = sst [smem:[#allocation41_spill]] %s18538_s3 }
   0x5   :  { %18567 = sst [smem:[#allocation42_spill]] %s18554_s19 }
   0x6   :  { %26 = vsyncpa [#allocation4], 0 }
   0x7   :  { %27 = vsyncpa [#allocation6], 0 }
   0x8   :  { %28 = vsyncpa [#allocation9], 0 }
   0x9   :  { %29 = vsyncpa [#allocation12], 0 }
   0xa   :  { %30 = vsyncpa [#allocation15], 0 }
   0xb   :  { %31 = vsyncpa [#allocation18], 0 }
   0xc   :  { %32 = vsyncpa [#allocation21], 0 }
   0xd   :  { %33 = vsyncpa [#allocation24], 0 }
   0xe   :  { %34 = vsyncpa [#allocation27], 0  ;;  %s17796_s20 = smov [#allocation5]   ;;  %s18568_s2 = sld [smem:[#allocation39_spill]] }
   0xf   :  { %s50_s21 = sshll.u32 %s17796_s20, 4  ;;  %s51_s21 = int_to_ptr.vmem [resolvable:$true] %s50_s21 }
  0x14   :  { %s17404_s23 = scalar_lea.hbm %s18568_s2, 80000 }
  0x15   :  { %p17405_p0 = scmp.ne.s32.totalorder %s18568_s2, %s17404_s23  ;;  %p17408_p1 = scmp.lt.u32.totalorder %s17404_s23, %s18568_s2 }
  0x17   :  { %p17410_p2 = pnand %p17408_p1, %p17405_p0 }
  0x19   :  { %17413 = shalt.err (!%p17410_p2)
}
  0x1a   :  { %s17414_s26 = scalar_lea.vmem %s51_s21, 80000  ;;  %p17419_p4 = scmp.lt.s32.totalorder %s51_s21, %s51_s21 }
  0x1b   :  { %p17415_p3 = scmp.ne.s32.totalorder %s51_s21, %s17414_s26  ;;  %p17420_p5 = scmp.lt.s32.totalorder %s17414_s26, %s17414_s26 }
  0x1d   :  { %p17421_p6 = por %p17420_p5, %p17419_p4 }
  0x1f   :  { %p17422_p7 = pnand %p17421_p6, %p17415_p3 }
  0x21   :  { %17425 = shalt.err (!%p17422_p7)
}
  0x22   :  { %s17797_s27 = smov 128   ;;  %s17798_s28 = smov 8  }
  0x23   :  { %56 = dma.hbm_to_vmem [thread:$0]  %s18568_s2, 80000, %s51_s21, [#allocation6], %s17797_s27, %s17797_s27, %s17798_s28  }
  0x24   :  { %s17799_s30 = smov [#allocation8]   ;;  %s18569_s23 = sld [smem:[#allocation41_spill]] }
  0x25   :  { %s72_s20 = sshll.u32 %s17799_s30, 4  ;;  %s73_s20 = int_to_ptr.vmem [resolvable:$true] %s72_s20 }
  0x2a   :  { %s17426_s24 = scalar_lea.hbm %s18569_s23, 8192 }
  0x2b   :  { %p17427_p8 = scmp.ne.s32.totalorder %s18569_s23, %s17426_s24  ;;  %p17430_p9 = scmp.lt.u32.totalorder %s17426_s24, %s18569_s23 }
  0x2d   :  { %p17432_p10 = pnand %p17430_p9, %p17427_p8 }
  0x2f   :  { %17435 = shalt.err (!%p17432_p10)
}
  0x30   :  { %s17436_s19 = scalar_lea.vmem %s73_s20, 8192  ;;  %p17441_p12 = scmp.lt.s32.totalorder %s73_s20, %s73_s20 }
  0x31   :  { %p17437_p11 = scmp.ne.s32.totalorder %s73_s20, %s17436_s19  ;;  %p17442_p13 = scmp.lt.s32.totalorder %s17436_s19, %s17436_s19 }
  0x33   :  { %p17443_p0 = por %p17442_p13, %p17441_p12 }
  0x35   :  { %p17444_p1 = pnand %p17443_p0, %p17437_p11 }
  0x37   :  { %17447 = shalt.err (!%p17444_p1)
}
  0x38   :  { %78 = dma.hbm_to_vmem [thread:$0]  %s18569_s23, 8192, %s73_s20, [#allocation9], %s17797_s27, %s17797_s27, %s17798_s28  }
  0x39   :  { %s17800_s29 = smov [#allocation11]   ;;  %s17801_s30 = smov [#allocation14]  }
  0x3a   :  { %s96_s0 = sshll.u32 %s17800_s29, 4  ;;  %s120_s1 = sshll.u32 %s17801_s30, 4  ;;  %s97_s0 = int_to_ptr.vmem [resolvable:$true] %s96_s0  ;;  %s17958_s1 = int_to_ptr.vmem [resolvable:$true] %s120_s1 }
  0x3b   :  { %s17448_s19 = scalar_lea.hbm %s18540_s5, 64 }
  0x3c   :  { %p17449_p2 = scmp.ne.s32.totalorder %s18540_s5, %s17448_s19  ;;  %p17452_p3 = scmp.lt.u32.totalorder %s17448_s19, %s18540_s5 }
  0x3e   :  { %p17454_p4 = pnand %p17452_p3, %p17449_p2 }
  0x40   :  { %17457 = shalt.err (!%p17454_p4)
}
  0x41   :  { %s17458_s20 = scalar_lea.vmem %s97_s0, 64  ;;  %p17463_p6 = scmp.lt.s32.totalorder %s97_s0, %s97_s0 }
  0x42   :  { %p17459_p5 = scmp.ne.s32.totalorder %s97_s0, %s17458_s20  ;;  %p17464_p7 = scmp.lt.s32.totalorder %s17458_s20, %s17458_s20 }
  0x44   :  { %p17465_p8 = por %p17464_p7, %p17463_p6 }
  0x46   :  { %p17466_p9 = pnand %p17465_p8, %p17459_p5 }
  0x48   :  { %17469 = shalt.err (!%p17466_p9)
}
  0x49   :  { %s18559_s23 = smov 32   ;;  %s18561_s21 = smov 2  }
  0x4a   :  { %102 = dma.hbm_to_vmem [thread:$0]  %s18540_s5, 64, %s97_s0, [#allocation12], %s18559_s23, %s18559_s23, %s18561_s21  }
  0x4b   :  { %s17470_s24 = scalar_lea.hbm %s18542_s7, 65536 }
  0x4c   :  { %p17471_p10 = scmp.ne.s32.totalorder %s18542_s7, %s17470_s24  ;;  %p17474_p11 = scmp.lt.u32.totalorder %s17470_s24, %s18542_s7 }
  0x4e   :  { %p17476_p12 = pnand %p17474_p11, %p17471_p10 }
  0x50   :  { %17479 = shalt.err (!%p17476_p12)
}
  0x51   :  { %s17480_s26 = scalar_lea.vmem %s17958_s1, 65536  ;;  %p17485_p0 = scmp.lt.s32.totalorder %s17958_s1, %s17958_s1 }
  0x52   :  { %p17481_p13 = scmp.ne.s32.totalorder %s17958_s1, %s17480_s26  ;;  %p17486_p1 = scmp.lt.s32.totalorder %s17480_s26, %s17480_s26 }
  0x54   :  { %p17487_p2 = por %p17486_p1, %p17485_p0 }
  0x56   :  { %p17488_p3 = pnand %p17487_p2, %p17481_p13 }
  0x58   :  { %17491 = shalt.err (!%p17488_p3)
}
  0x59   :  { %s17804_s5 = smov 1024   ;;  %s17805_s0 = smov 64  }
  0x5a   :  { %126 = dma.hbm_to_vmem [thread:$0]  %s18542_s7, 65536, %s17958_s1, [#allocation15], %s17804_s5, %s17804_s5, %s17805_s0  }
  0x5b   :  { %s17806_s29 = smov [#allocation17]   ;;  %s17807_s22 = smov [#allocation20]  }
  0x5c   :  { %s144_s30 = sshll.u32 %s17806_s29, 4  ;;  %s168_s24 = sshll.u32 %s17807_s22, 4  ;;  %s145_s30 = int_to_ptr.vmem [resolvable:$true] %s144_s30  ;;  %s17993_s24 = int_to_ptr.vmem [resolvable:$true] %s168_s24 }
  0x5d   :  { %s17492_s18 = scalar_lea.hbm %s18544_s9, 65536 }
  0x5e   :  { %p17493_p4 = scmp.ne.s32.totalorder %s18544_s9, %s17492_s18  ;;  %p17496_p5 = scmp.lt.u32.totalorder %s17492_s18, %s18544_s9 }
  0x60   :  { %p17498_p6 = pnand %p17496_p5, %p17493_p4 }
  0x62   :  { %17501 = shalt.err (!%p17498_p6)
}
  0x63   :  { %s17502_s7 = scalar_lea.vmem %s145_s30, 65536  ;;  %p17507_p8 = scmp.lt.s32.totalorder %s145_s30, %s145_s30 }
  0x64   :  { %p17503_p7 = scmp.ne.s32.totalorder %s145_s30, %s17502_s7  ;;  %p17508_p9 = scmp.lt.s32.totalorder %s17502_s7, %s17502_s7 }
  0x66   :  { %p17509_p10 = por %p17508_p9, %p17507_p8 }
  0x68   :  { %p17510_p11 = pnand %p17509_p10, %p17503_p7 }
  0x6a   :  { %17513 = shalt.err (!%p17510_p11)
}
  0x6b   :  { %150 = dma.hbm_to_vmem [thread:$0]  %s18544_s9, 65536, %s145_s30, [#allocation18], %s17797_s27, %s17797_s27, %s17798_s28  }
  0x6c   :  { %s17514_s23 = scalar_lea.hbm %s18546_s11, 64 }
  0x6d   :  { %p17515_p12 = scmp.ne.s32.totalorder %s18546_s11, %s17514_s23  ;;  %p17518_p13 = scmp.lt.u32.totalorder %s17514_s23, %s18546_s11 }
  0x6f   :  { %p17520_p0 = pnand %p17518_p13, %p17515_p12 }
  0x71   :  { %17523 = shalt.err (!%p17520_p0)
}
  0x72   :  { %s17524_s25 = scalar_lea.vmem %s17993_s24, 64  ;;  %p17529_p2 = scmp.lt.s32.totalorder %s17993_s24, %s17993_s24 }
  0x73   :  { %p17525_p1 = scmp.ne.s32.totalorder %s17993_s24, %s17524_s25  ;;  %p17530_p3 = scmp.lt.s32.totalorder %s17524_s25, %s17524_s25 }
  0x75   :  { %p17531_p4 = por %p17530_p3, %p17529_p2 }
  0x77   :  { %p17532_p5 = pnand %p17531_p4, %p17525_p1 }
  0x79   :  { %17535 = shalt.err (!%p17532_p5)
}
  0x7a   :  { %s18570_s9 = smov 2   ;;  %s18571_s27 = smov 32  }
  0x7b   :  { %174 = dma.hbm_to_vmem [thread:$0]  %s18546_s11, 64, %s17993_s24, [#allocation21], %s18571_s27, %s18571_s27, %s18570_s9  }
  0x7c   :  { %s17808_s18 = smov [#allocation23]   ;;  %s17809_s26 = smov [#allocation26]  }
  0x7d   :  { %s195_s3 = sshll.u32 %s17808_s18, 4  ;;  %s217_s7 = sshll.u32 %s17809_s26, 4  ;;  %s196_s3 = int_to_ptr.vmem [resolvable:$true] %s195_s3  ;;  %s218_s7 = int_to_ptr.vmem [resolvable:$true] %s217_s7 }
  0x7e   :  { %s17536_s20 = scalar_lea.hbm %s18549_s14, 16 }
  0x7f   :  { %p17537_p6 = scmp.ne.s32.totalorder %s18549_s14, %s17536_s20  ;;  %p17540_p7 = scmp.lt.u32.totalorder %s17536_s20, %s18549_s14 }
  0x81   :  { %p17542_p8 = pnand %p17540_p7, %p17537_p6 }
  0x83   :  { %17545 = shalt.err (!%p17542_p8)
}
  0x84   :  { %s17546_s11 = scalar_lea.vmem %s196_s3, 16  ;;  %s17550_s24 = scalar_lea.vmem %s196_s3, 32 }
  0x85   :  { %p17547_p9 = scmp.ne.s32.totalorder %s196_s3, %s17546_s11  ;;  %p17551_p10 = scmp.lt.s32.totalorder %s196_s3, %s196_s3 }
  0x86   :  { %p17552_p11 = scmp.lt.s32.totalorder %s17550_s24, %s17546_s11 }
  0x88   :  { %p17553_p12 = por %p17552_p11, %p17551_p10 }
  0x8a   :  { %p17554_p13 = pnand %p17553_p12, %p17547_p9 }
  0x8c   :  { %17557 = shalt.err (!%p17554_p13)
}
  0x8d   :  { %198 = dma.hbm_to_vmem [thread:$0]  %s18549_s14, 16, %s196_s3, [#allocation24]  }
  0x8e   :  { %s17558_s30 = scalar_lea.hbm %s18551_s16, 16 }
  0x8f   :  { %p17559_p0 = scmp.ne.s32.totalorder %s18551_s16, %s17558_s30  ;;  %p17562_p1 = scmp.lt.u32.totalorder %s17558_s30, %s18551_s16 }
  0x91   :  { %p17564_p2 = pnand %p17562_p1, %p17559_p0 }
  0x93   :  { %17567 = shalt.err (!%p17564_p2)
}
  0x94   :  { %s17568_s20 = scalar_lea.vmem %s218_s7, 16  ;;  %s17572_s2 = scalar_lea.vmem %s218_s7, 32 }
  0x95   :  { %p17569_p3 = scmp.ne.s32.totalorder %s218_s7, %s17568_s20  ;;  %p17573_p4 = scmp.lt.s32.totalorder %s218_s7, %s218_s7 }
  0x96   :  { %p17574_p5 = scmp.lt.s32.totalorder %s17572_s2, %s17568_s20 }
  0x98   :  { %p17575_p6 = por %p17574_p5, %p17573_p4 }
  0x9a   :  { %p17576_p7 = pnand %p17575_p6, %p17569_p3 }
  0x9c   :  { %17579 = shalt.err (!%p17576_p7)
}
  0x9d   :  { %220 = dma.hbm_to_vmem [thread:$0]  %s18551_s16, 16, %s218_s7, [#allocation27]  }
  0x9e   :  { %s17810_s23 = smov [#allocation3]   ;;  %s17811_s29 = smov [#allocation7]  }
  0x9f   :  { %s41_s21 = sshll.u32 %s17810_s23, 4  ;;  %s63_s11 = sshll.u32 %s17811_s29, 4  ;;  %s42_s21 = int_to_ptr.vmem [resolvable:$true] %s41_s21  ;;  %s64_s11 = int_to_ptr.vmem [resolvable:$true] %s63_s11 }
  0xa0   :  { %s18572_s19 = sld [smem:[#allocation38_spill]] }
  0xa6   :  { %s17580_s25 = scalar_lea.hbm %s18572_s19, 5120 }
  0xa7   :  { %p17581_p8 = scmp.ne.s32.totalorder %s18572_s19, %s17580_s25  ;;  %p17584_p9 = scmp.lt.u32.totalorder %s17580_s25, %s18572_s19 }
  0xa9   :  { %p17586_p10 = pnand %p17584_p9, %p17581_p8 }
  0xab   :  { %17589 = shalt.err (!%p17586_p10)
}
  0xac   :  { %s17590_s16 = scalar_lea.vmem %s42_s21, 5120  ;;  %p17595_p12 = scmp.lt.s32.totalorder %s42_s21, %s42_s21 }
  0xad   :  { %p17591_p11 = scmp.ne.s32.totalorder %s42_s21, %s17590_s16  ;;  %p17596_p13 = scmp.lt.s32.totalorder %s17590_s16, %s17590_s16 }
  0xaf   :  { %p17597_p0 = por %p17596_p13, %p17595_p12 }
  0xb1   :  { %p17598_p1 = pnand %p17597_p0, %p17591_p11 }
  0xb3   :  { %17601 = shalt.err (!%p17598_p1)
}
  0xb4   :  { %44 = dma.hbm_to_vmem [thread:$0]  %s18572_s19, 5120, %s42_s21, [#allocation4]  }
  0xb5   :  { %s18573_s2 = sld [smem:[#allocation40_spill]] }
  0xbb   :  { %s17602_s14 = scalar_lea.hbm %s18573_s2, 32 }
  0xbc   :  { %p17603_p2 = scmp.ne.s32.totalorder %s18573_s2, %s17602_s14  ;;  %p17606_p3 = scmp.lt.u32.totalorder %s17602_s14, %s18573_s2 }
  0xbe   :  { %p17608_p4 = pnand %p17606_p3, %p17603_p2 }
  0xc0   :  { %17611 = shalt.err (!%p17608_p4)
}
  0xc1   :  { %s17612_s22 = scalar_lea.vmem %s64_s11, 32  ;;  %p17617_p6 = scmp.lt.s32.totalorder %s64_s11, %s64_s11 }
  0xc2   :  { %p17613_p5 = scmp.ne.s32.totalorder %s64_s11, %s17612_s22  ;;  %p17618_p7 = scmp.lt.s32.totalorder %s17612_s22, %s17612_s22 }
  0xc4   :  { %p17619_p8 = por %p17618_p7, %p17617_p6 }
  0xc6   :  { %p17620_p9 = pnand %p17619_p8, %p17613_p5 }
  0xc8   :  { %17623 = shalt.err (!%p17620_p9)
}
  0xc9   :  { %66 = dma.hbm_to_vmem [thread:$0]  %s18573_s2, 32, %s64_s11, [#allocation6]  }
  0xca   :  { %s17812_s25 = smov [#allocation10]   ;;  %s17813_s30 = smov [#allocation13]  }
  0xcb   :  { %s84_s28 = sshll.u32 %s17812_s25, 4  ;;  %s108_s18 = sshll.u32 %s17813_s30, 4  ;;  %s85_s28 = int_to_ptr.vmem [resolvable:$true] %s84_s28  ;;  %s18078_s18 = int_to_ptr.vmem [resolvable:$true] %s108_s18 }
  0xcc   :  { %s17624_s7 = scalar_lea.hbm %s18539_s4, 64 }
  0xcd   :  { %p17625_p10 = scmp.ne.s32.totalorder %s18539_s4, %s17624_s7  ;;  %p17628_p11 = scmp.lt.u32.totalorder %s17624_s7, %s18539_s4 }
  0xcf   :  { %p17630_p12 = pnand %p17628_p11, %p17625_p10 }
  0xd1   :  { %17633 = shalt.err (!%p17630_p12)
}
  0xd2   :  { %s17634_s11 = scalar_lea.vmem %s85_s28, 64  ;;  %p17639_p0 = scmp.lt.s32.totalorder %s85_s28, %s85_s28 }
  0xd3   :  { %p17635_p13 = scmp.ne.s32.totalorder %s85_s28, %s17634_s11  ;;  %p17640_p1 = scmp.lt.s32.totalorder %s17634_s11, %s17634_s11 }
  0xd5   :  { %p17641_p2 = por %p17640_p1, %p17639_p0 }
  0xd7   :  { %p17642_p3 = pnand %p17641_p2, %p17635_p13 }
  0xd9   :  { %17645 = shalt.err (!%p17642_p3)
}
  0xda   :  { %90 = dma.hbm_to_vmem [thread:$0]  %s18539_s4, 64, %s85_s28, [#allocation9], %s18571_s27, %s18571_s27, %s18570_s9  }
  0xdb   :  { %s17646_s24 = scalar_lea.hbm %s18541_s6, 64 }
  0xdc   :  { %p17647_p4 = scmp.ne.s32.totalorder %s18541_s6, %s17646_s24  ;;  %p17650_p5 = scmp.lt.u32.totalorder %s17646_s24, %s18541_s6 }
  0xde   :  { %p17652_p6 = pnand %p17650_p5, %p17647_p4 }
  0xe0   :  { %17655 = shalt.err (!%p17652_p6)
}
  0xe1   :  { %s17656_s30 = scalar_lea.vmem %s18078_s18, 64  ;;  %p17661_p8 = scmp.lt.s32.totalorder %s18078_s18, %s18078_s18 }
  0xe2   :  { %p17657_p7 = scmp.ne.s32.totalorder %s18078_s18, %s17656_s30  ;;  %p17662_p9 = scmp.lt.s32.totalorder %s17656_s30, %s17656_s30 }
  0xe4   :  { %p17663_p10 = por %p17662_p9, %p17661_p8 }
  0xe6   :  { %p17664_p11 = pnand %p17663_p10, %p17657_p7 }
  0xe8   :  { %17667 = shalt.err (!%p17664_p11)
}
  0xe9   :  { %114 = dma.hbm_to_vmem [thread:$0]  %s18541_s6, 64, %s18078_s18, [#allocation12], %s18571_s27, %s18571_s27, %s18570_s9  }
  0xea   :  { %s17814_s26 = smov [#allocation16]   ;;  %s17668_s5 = scalar_lea.hbm %s18543_s8, 512 }
  0xeb   :  { %s132_s16 = sshll.u32 %s17814_s26, 4  ;;  %p17669_p12 = scmp.ne.s32.totalorder %s18543_s8, %s17668_s5  ;;  %s133_s16 = int_to_ptr.vmem [resolvable:$true] %s132_s16 }
  0xec   :  { %p17672_p13 = scmp.lt.u32.totalorder %s17668_s5, %s18543_s8 }
  0xee   :  { %p17674_p0 = pnand %p17672_p13, %p17669_p12 }
  0xf0   :  { %17677 = shalt.err (!%p17674_p0)
}
  0xf1   :  { %s17678_s3 = scalar_lea.vmem %s133_s16, 512  ;;  %p17683_p2 = scmp.lt.s32.totalorder %s133_s16, %s133_s16 }
  0xf2   :  { %p17679_p1 = scmp.ne.s32.totalorder %s133_s16, %s17678_s3  ;;  %p17684_p3 = scmp.lt.s32.totalorder %s17678_s3, %s17678_s3 }
  0xf4   :  { %p17685_p4 = por %p17684_p3, %p17683_p2 }
  0xf6   :  { %p17686_p5 = pnand %p17685_p4, %p17679_p1 }
  0xf8   :  { %17689 = shalt.err (!%p17686_p5)
}
  0xf9   :  { %s17815_s6 = smov 256   ;;  %s17816_s18 = smov 16  }
  0xfa   :  { %138 = dma.hbm_to_vmem [thread:$0]  %s18543_s8, 512, %s133_s16, [#allocation15], %s17815_s6, %s17815_s6, %s17816_s18  }
  0xfb   :  { %s17817_s24 = smov [#allocation19]   ;;  %s17818_s21 = smov [#allocation22]  }
  0xfc   :  { %s156_s22 = sshll.u32 %s17817_s24, 4  ;;  %s180_s19 = sshll.u32 %s17818_s21, 4  ;;  %s157_s22 = int_to_ptr.vmem [resolvable:$true] %s156_s22  ;;  %s181_s19 = int_to_ptr.vmem [resolvable:$true] %s180_s19 }
  0xfd   :  { %s17690_s4 = scalar_lea.hbm %s18545_s10, 64 }
  0xfe   :  { %p17691_p6 = scmp.ne.s32.totalorder %s18545_s10, %s17690_s4  ;;  %p17694_p7 = scmp.lt.u32.totalorder %s17690_s4, %s18545_s10 }
 0x100   :  { %p17696_p8 = pnand %p17694_p7, %p17691_p6 }
 0x102   :  { %17699 = shalt.err (!%p17696_p8)
}
 0x103   :  { %s17700_s8 = scalar_lea.vmem %s157_s22, 64  ;;  %p17705_p10 = scmp.lt.s32.totalorder %s157_s22, %s157_s22 }
 0x104   :  { %p17701_p9 = scmp.ne.s32.totalorder %s157_s22, %s17700_s8  ;;  %p17706_p11 = scmp.lt.s32.totalorder %s17700_s8, %s17700_s8 }
 0x106   :  { %p17707_p12 = por %p17706_p11, %p17705_p10 }
 0x108   :  { %p17708_p13 = pnand %p17707_p12, %p17701_p9 }
 0x10a   :  { %17711 = shalt.err (!%p17708_p13)
}
 0x10b   :  { %162 = dma.hbm_to_vmem [thread:$0]  %s18545_s10, 64, %s157_s22, [#allocation18], %s18571_s27, %s18571_s27, %s18570_s9  }
 0x10c   :  { %s17712_s11 = scalar_lea.hbm %s18547_s12, 64 }
 0x10d   :  { %p17713_p0 = scmp.ne.s32.totalorder %s18547_s12, %s17712_s11  ;;  %p17716_p1 = scmp.lt.u32.totalorder %s17712_s11, %s18547_s12 }
 0x10f   :  { %p17718_p2 = pnand %p17716_p1, %p17713_p0 }
 0x111   :  { %17721 = shalt.err (!%p17718_p2)
}
 0x112   :  { %s17722_s23 = scalar_lea.vmem %s181_s19, 64  ;;  %p17727_p4 = scmp.lt.s32.totalorder %s181_s19, %s181_s19 }
 0x113   :  { %p17723_p3 = scmp.ne.s32.totalorder %s181_s19, %s17722_s23  ;;  %p17728_p5 = scmp.lt.s32.totalorder %s17722_s23, %s17722_s23 }
 0x115   :  { %p17729_p6 = por %p17728_p5, %p17727_p4 }
 0x117   :  { %p17730_p7 = pnand %p17729_p6, %p17723_p3 }
 0x119   :  { %17733 = shalt.err (!%p17730_p7)
}
 0x11a   :  { %186 = dma.hbm_to_vmem [thread:$0]  %s18547_s12, 64, %s181_s19, [#allocation21], %s18571_s27, %s18571_s27, %s18570_s9  }
 0x11b   :  { %s17819_s24 = smov [#allocation25]   ;;  %s17734_s30 = scalar_lea.hbm %s18550_s15, 512 }
 0x11c   :  { %s204_s22 = sshll.u32 %s17819_s24, 4  ;;  %p17735_p8 = scmp.ne.s32.totalorder %s18550_s15, %s17734_s30  ;;  %s205_s22 = int_to_ptr.vmem [resolvable:$true] %s204_s22 }
 0x11d   :  { %p17738_p9 = scmp.lt.u32.totalorder %s17734_s30, %s18550_s15 }
 0x11f   :  { %p17740_p10 = pnand %p17738_p9, %p17735_p8 }
 0x121   :  { %17743 = shalt.err (!%p17740_p10)
}
 0x122   :  { %s17744_s1 = scalar_lea.vmem %s205_s22, 512  ;;  %p17749_p12 = scmp.lt.s32.totalorder %s205_s22, %s205_s22 }
 0x123   :  { %p17745_p11 = scmp.ne.s32.totalorder %s205_s22, %s17744_s1  ;;  %p17750_p13 = scmp.lt.s32.totalorder %s17744_s1, %s17744_s1 }
 0x125   :  { %p17751_p0 = por %p17750_p13, %p17749_p12 }
 0x127   :  { %p17752_p1 = pnand %p17751_p0, %p17745_p11 }
 0x129   :  { %17755 = shalt.err (!%p17752_p1)
}
 0x12a   :  { %s17820_s12 = smov 4   ;;  %s17821_s19 = smov [#allocation28]  }
 0x12b   :  { %210 = dma.hbm_to_vmem [thread:$0]  %s18550_s15, 512, %s205_s22, [#allocation24], %s17805_s0, %s17805_s0, %s17820_s12  }
 0x12c   :  { %s227_s8 = sshll.u32 %s17821_s19, 4  ;;  %s17756_s20 = scalar_lea.hbm %s18552_s17, 16  ;;  %s228_s8 = int_to_ptr.vmem [resolvable:$true] %s227_s8 }
 0x12d   :  { %p17757_p2 = scmp.ne.s32.totalorder %s18552_s17, %s17756_s20  ;;  %p17760_p3 = scmp.lt.u32.totalorder %s17756_s20, %s18552_s17 }
 0x12f   :  { %p17762_p4 = pnand %p17760_p3, %p17757_p2 }
 0x131   :  { %17765 = shalt.err (!%p17762_p4)
}
 0x132   :  { %s17766_s6 = scalar_lea.vmem %s228_s8, 16  ;;  %s17770_s15 = scalar_lea.vmem %s228_s8, 32 }
 0x133   :  { %p17767_p5 = scmp.ne.s32.totalorder %s228_s8, %s17766_s6  ;;  %p17771_p6 = scmp.lt.s32.totalorder %s228_s8, %s228_s8 }
 0x134   :  { %p17772_p7 = scmp.lt.s32.totalorder %s17770_s15, %s17766_s6 }
 0x136   :  { %p17773_p8 = por %p17772_p7, %p17771_p6 }
 0x138   :  { %p17774_p9 = pnand %p17773_p8, %p17767_p5 }
 0x13a   :  { %17777 = shalt.err (!%p17774_p9)
}
 0x13b   :  { %230 = dma.hbm_to_vmem [thread:$0]  %s18552_s17, 16, %s228_s8, [#allocation27]  }
 0x13c   :  { %17778 = dma.done.wait [#allocation4], 5120  }
 0x13d   :  { %17779 = vsyncadd [#allocation4], 4294962176 }
 0x13e   :  { %17780 = dma.done.wait [#allocation6], 80032  }
 0x13f   :  { %17781 = vsyncadd [#allocation6], 4294887264 }
 0x140   :  { %17782 = dma.done.wait [#allocation9], 8256  }
 0x141   :  { %17783 = vsyncadd [#allocation9], 4294959040 }
 0x142   :  { %17784 = dma.done.wait [#allocation12], 128  }
 0x143   :  { %17785 = vsyncadd [#allocation12], 4294967168 }
 0x144   :  { %17786 = dma.done.wait [#allocation15], 66048  }
 0x145   :  { %17787 = vsyncadd [#allocation15], 4294901248 }
 0x146   :  { %17788 = dma.done.wait [#allocation18], 65600  }
 0x147   :  { %17789 = vsyncadd [#allocation18], 4294901696 }
 0x148   :  { %17790 = dma.done.wait [#allocation21], 128  }
 0x149   :  { %17791 = vsyncadd [#allocation21], 4294967168 }
 0x14a   :  { %17792 = dma.done.wait [#allocation24], 528  }
 0x14b   :  { %17793 = vsyncadd [#allocation24], 4294966768 }
 0x14c   :  { %17794 = dma.done.wait [#allocation27], 32  }
 0x14d   :  { %17795 = vsyncadd [#allocation27], 4294967264  ;;  %v15568_v1 = vld [vmem:[#allocation5 + $0x4] ss:$8 sps:$4 sm:$0xff]   ;;  %v15570_v2 = vld [vmem:[#allocation5] ss:$8 sps:$4 sm:$0xff]  }
 0x14e   :  { %4138 = vmatprep.subr.bf16.mxu0 %v15568_v1  ;;  %v15571_v3 = vld [vmem:[#allocation5 + $0x14] ss:$8 sps:$4 sm:$0xff]   ;;  %v15573_v4 = vld [vmem:[#allocation5 + $0x10] ss:$8 sps:$4 sm:$0xff]   ;;  %v15574_v5 = vld [vmem:[#allocation5 + $0x24] ss:$8 sps:$4 sm:$0xff]  }
 0x14f   :  { %4139 = vmatpush1.bf16.msra.mxu0 %v15570_v2  ;;  %v15576_v6 = vld [vmem:[#allocation5 + $0x20] ss:$8 sps:$4 sm:$0xff]   ;;  %v15577_v7 = vld [vmem:[#allocation5 + $0x34] ss:$8 sps:$4 sm:$0xff]   ;;  %v15579_v8 = vld [vmem:[#allocation5 + $0x30] ss:$8 sps:$4 sm:$0xff]  }
 0x150   :  { %4140 = vmatprep.subr.bf16.mxu0 %v15571_v3  ;;  %v15580_v9 = vld [vmem:[#allocation5 + $0x44] ss:$8 sps:$4 sm:$0xff]   ;;  %v15582_v10 = vld [vmem:[#allocation5 + $0x40] ss:$8 sps:$4 sm:$0xff]   ;;  %v15583_v11 = vld [vmem:[#allocation5 + $0x54] ss:$8 sps:$4 sm:$0xff]  }
 0x151   :  { %v15585_v12 = vld [vmem:[#allocation5 + $0x50] ss:$8 sps:$4 sm:$0xff]   ;;  %v15586_v13 = vld [vmem:[#allocation5 + $0x64] ss:$8 sps:$4 sm:$0xff]   ;;  %v15588_v16 = vld [vmem:[#allocation5 + $0x60] ss:$8 sps:$4 sm:$0xff]  }
 0x152   :  { %v286_v14 = vld [vmem:[#allocation3 + $0x8] sm:$0xff]  ;;  %v15589_v17 = vld [vmem:[#allocation5 + $0x74] ss:$8 sps:$4 sm:$0xff]   ;;  %v15591_v18 = vld [vmem:[#allocation5 + $0x70] ss:$8 sps:$4 sm:$0xff]   ;;  %vm4127_vm0 = vcmask 64512  }
 0x153   :  { %4141 = vmatpush1.bf16.msra.mxu0 %v15573_v4  ;;  %v326_v15 = vpack.c.bf16 %v286_v14, %v286_v14  ;;  %v15592_v19 = vld [vmem:[#allocation5 + $0x84] ss:$8 sps:$4 sm:$0xff]   ;;  %v15594_v20 = vld [vmem:[#allocation5 + $0x80] ss:$8 sps:$4 sm:$0xff]   ;;  %v15595_v21 = vld [vmem:[#allocation5 + $0x94] ss:$8 sps:$4 sm:$0xff]  }
 0x154   :  { %4142 = vmatprep.subr.bf16.mxu0 %v15574_v5  ;;  %v15597_v22 = vld [vmem:[#allocation5 + $0x90] ss:$8 sps:$4 sm:$0xff]   ;;  %v15598_v23 = vld [vmem:[#allocation5 + $0xa4] ss:$8 sps:$4 sm:$0xff]   ;;  %v15600_v24 = vld [vmem:[#allocation5 + $0xa0] ss:$8 sps:$4 sm:$0xff]  }
 0x155   :  { %4170 = vmatprep.mubr.bf16.mxu0 %v326_v15  ;;  %v15601_v25 = vld [vmem:[#allocation5 + $0xb4] ss:$8 sps:$4 sm:$0xff]   ;;  %v15603_v26 = vld [vmem:[#allocation5 + $0xb0] ss:$8 sps:$4 sm:$0xff]   ;;  %v15604_v27 = vld [vmem:[#allocation5 + $0xc4] ss:$8 sps:$4 sm:$0xff]  }
 0x156   :  { %v15606_v28 = vld [vmem:[#allocation5 + $0xc0] ss:$8 sps:$4 sm:$0xff]   ;;  %v15607_v29 = vld [vmem:[#allocation5 + $0xd4] ss:$8 sps:$4 sm:$0xff]   ;;  %v15609_v30 = vld [vmem:[#allocation5 + $0xd0] ss:$8 sps:$4 sm:$0xff]  }
 0x157   :  { %4143 = vmatpush1.bf16.msra.mxu0 %v15576_v6  ;;  %v15610_v31 = vld [vmem:[#allocation5 + $0xe4] ss:$8 sps:$4 sm:$0xff]   ;;  %v15612_v32 = vld [vmem:[#allocation5 + $0xe0] ss:$8 sps:$4 sm:$0xff]   ;;  %v15613_v33 = vld [vmem:[#allocation5 + $0xf4] ss:$8 sps:$4 sm:$0xff]  }
 0x158   :  { %4144 = vmatprep.subr.bf16.mxu0 %v15577_v7  ;;  %v15615_v34 = vld [vmem:[#allocation5 + $0xf0] ss:$8 sps:$4 sm:$0xff]   ;;  %v15618_v35 = vld [vmem:[#allocation5 + $0x104] ss:$8 sps:$4 sm:$0xff]   ;;  %v15616_v39 = vld [vmem:[#allocation5 + $0x100] ss:$8 sps:$4 sm:$0xff]  }
 0x159   :  { %v285_v36 = vld [vmem:[#allocation3] sm:$0xff]  ;;  %v288_v37 = vld [vmem:[#allocation3 + $0x18] sm:$0xff]  ;;  %vm4131_vm1 = vcmask 1043456   ;;  %vm17823_vm2 = vmmov 0   ;;  %vm13583_vm3 = vcmask 523264   ;;  %s18574_s24 = sld [smem:[#allocation42_spill]] }
 0x15a   :  { %v325_v38 = vpack.c.bf16 %v285_v36, %v285_v36  ;;  %v328_v40 = vpack.c.bf16 %v288_v37, %v288_v37  ;;  %v15621_v41 = vld [vmem:[#allocation5 + $0x114] ss:$8 sps:$4 sm:$0xff]   ;;  %v15619_v42 = vld [vmem:[#allocation5 + $0x110] ss:$8 sps:$4 sm:$0xff]   ;;  %v15624_v43 = vld [vmem:[#allocation5 + $0x124] ss:$8 sps:$4 sm:$0xff]  }
 0x15b   :  { %4145 = vmatpush1.bf16.msra.mxu0 %v15579_v8  ;;  %v15622_v44 = vld [vmem:[#allocation5 + $0x120] ss:$8 sps:$4 sm:$0xff]   ;;  %v15627_v45 = vld [vmem:[#allocation5 + $0x134] ss:$8 sps:$4 sm:$0xff]   ;;  %v15625_v46 = vld [vmem:[#allocation5 + $0x130] ss:$8 sps:$4 sm:$0xff]  }
 0x15c   :  { %4146 = vmatprep.subr.bf16.mxu0 %v15580_v9  ;;  %v15630_v47 = vld [vmem:[#allocation5 + $0x144] ss:$8 sps:$4 sm:$0xff]   ;;  %v15628_v48 = vld [vmem:[#allocation5 + $0x140] ss:$8 sps:$4 sm:$0xff]   ;;  %v15633_v49 = vld [vmem:[#allocation5 + $0x154] ss:$8 sps:$4 sm:$0xff]  }
 0x15d   :  { %v15631_v50 = vld [vmem:[#allocation5 + $0x150] ss:$8 sps:$4 sm:$0xff]   ;;  %v15636_v51 = vld [vmem:[#allocation5 + $0x164] ss:$8 sps:$4 sm:$0xff]   ;;  %v15634_v52 = vld [vmem:[#allocation5 + $0x160] ss:$8 sps:$4 sm:$0xff]  }
 0x15e   :  { %v15639_v53 = vld [vmem:[#allocation5 + $0x174] ss:$8 sps:$4 sm:$0xff]   ;;  %v15637_v54 = vld [vmem:[#allocation5 + $0x170] ss:$8 sps:$4 sm:$0xff]   ;;  %v15642_v55 = vld [vmem:[#allocation5 + $0x184] ss:$8 sps:$4 sm:$0xff]  }
 0x15f   :  { %4147 = vmatpush1.bf16.msra.mxu0 %v15582_v10  ;;  %v15640_v56 = vld [vmem:[#allocation5 + $0x180] ss:$8 sps:$4 sm:$0xff]   ;;  %v15645_v57 = vld [vmem:[#allocation5 + $0x194] ss:$8 sps:$4 sm:$0xff]   ;;  %v15643_v58 = vld [vmem:[#allocation5 + $0x190] ss:$8 sps:$4 sm:$0xff]  }
 0x160   :  { %4148 = vmatprep.subr.bf16.mxu0 %v15583_v11  ;;  %v15648_v59 = vld [vmem:[#allocation5 + $0x1a4] ss:$8 sps:$4 sm:$0xff]   ;;  %v15646_v60 = vld [vmem:[#allocation5 + $0x1a0] ss:$8 sps:$4 sm:$0xff]   ;;  %v15651_v61 = vld [vmem:[#allocation5 + $0x1b4] ss:$8 sps:$4 sm:$0xff]  }
 0x161   :  { %v15649_v62 = vld [vmem:[#allocation5 + $0x1b0] ss:$8 sps:$4 sm:$0xff]   ;;  %v15654_v63 = vld [vmem:[#allocation5 + $0x1c4] ss:$8 sps:$4 sm:$0xff]   ;;  %v15652_v0 = vld [vmem:[#allocation5 + $0x1c0] ss:$8 sps:$4 sm:$0xff]  }
 0x162   :  { %v15657_v1 = vld [vmem:[#allocation5 + $0x1d4] ss:$8 sps:$4 sm:$0xff]   ;;  %v15655_v2 = vld [vmem:[#allocation5 + $0x1d0] ss:$8 sps:$4 sm:$0xff]   ;;  %v15660_v3 = vld [vmem:[#allocation5 + $0x1e4] ss:$8 sps:$4 sm:$0xff]  }
 0x163   :  { %4149 = vmatpush1.bf16.msra.mxu0 %v15585_v12  ;;  %v15658_v4 = vld [vmem:[#allocation5 + $0x1e0] ss:$8 sps:$4 sm:$0xff]   ;;  %v15663_v5 = vld [vmem:[#allocation5 + $0x1f4] ss:$8 sps:$4 sm:$0xff]   ;;  %v15661_v6 = vld [vmem:[#allocation5 + $0x1f0] ss:$8 sps:$4 sm:$0xff]  }
 0x164   :  { %4150 = vmatprep.subr.bf16.mxu0 %v15586_v13  ;;  %v15666_v7 = vld [vmem:[#allocation5 + $0x204] ss:$8 sps:$4 sm:$0xff]   ;;  %v287_v8 = vld [vmem:[#allocation3 + $0x10] sm:$0xff]  ;;  %v15664_v11 = vld [vmem:[#allocation5 + $0x200] ss:$8 sps:$4 sm:$0xff]  }
 0x165   :  { %v290_v9 = vld [vmem:[#allocation3 + $0x28] sm:$0xff]  ;;  %v327_v10 = vpack.c.bf16 %v287_v8, %v287_v8  ;;  %v15669_v13 = vld [vmem:[#allocation5 + $0x214] ss:$8 sps:$4 sm:$0xff]   ;;  %v15667_v14 = vld [vmem:[#allocation5 + $0x210] ss:$8 sps:$4 sm:$0xff]  }
 0x166   :  { %v330_v12 = vpack.c.bf16 %v290_v9, %v290_v9  ;;  %v15672_v15 = vld [vmem:[#allocation5 + $0x224] ss:$8 sps:$4 sm:$0xff]   ;;  %v15700_v36 = vld [vmem:[#allocation5 + $0x2c0] ss:$8 sps:$4 sm:$0xff]   ;;  %v15705_v37 = vld [vmem:[#allocation5 + $0x2d4] ss:$8 sps:$4 sm:$0xff]  }
 0x167   :  { %4151 = vmatpush1.bf16.msra.mxu0 %v15588_v16  ;;  %v15670_v16 = vld [vmem:[#allocation5 + $0x220] ss:$8 sps:$4 sm:$0xff]   ;;  %v15753_v9 = vld [vmem:[#allocation5 + $0x3d4] ss:$8 sps:$4 sm:$0xff]  }
 0x168   :  { %4152 = vmatprep.subr.bf16.mxu0 %v15589_v17  ;;  %v15675_v17 = vld [vmem:[#allocation5 + $0x234] ss:$8 sps:$4 sm:$0xff]   ;;  %v15748_v8 = vld [vmem:[#allocation5 + $0x3c0] ss:$8 sps:$4 sm:$0xff]  }
 0x16b   :  { %4153 = vmatpush1.bf16.msra.mxu0 %v15591_v18  ;;  %v15673_v18 = vld [vmem:[#allocation5 + $0x230] ss:$8 sps:$4 sm:$0xff]  }
 0x16c   :  { %4154 = vmatprep.subr.bf16.mxu0 %v15592_v19  ;;  %v15678_v19 = vld [vmem:[#allocation5 + $0x244] ss:$8 sps:$4 sm:$0xff]  }
 0x16f   :  { %4155 = vmatpush1.bf16.msra.mxu0 %v15594_v20  ;;  %v15676_v20 = vld [vmem:[#allocation5 + $0x240] ss:$8 sps:$4 sm:$0xff]  }
 0x170   :  { %4156 = vmatprep.subr.bf16.mxu0 %v15595_v21  ;;  %v15681_v21 = vld [vmem:[#allocation5 + $0x254] ss:$8 sps:$4 sm:$0xff]  }
 0x173   :  { %4157 = vmatpush1.bf16.msra.mxu0 %v15597_v22  ;;  %v15679_v22 = vld [vmem:[#allocation5 + $0x250] ss:$8 sps:$4 sm:$0xff]  }
 0x174   :  { %4158 = vmatprep.subr.bf16.mxu0 %v15598_v23  ;;  %v15684_v23 = vld [vmem:[#allocation5 + $0x264] ss:$8 sps:$4 sm:$0xff]  }
 0x177   :  { %4159 = vmatpush1.bf16.msra.mxu0 %v15600_v24  ;;  %v15682_v24 = vld [vmem:[#allocation5 + $0x260] ss:$8 sps:$4 sm:$0xff]  }
 0x178   :  { %4160 = vmatprep.subr.bf16.mxu0 %v15601_v25  ;;  %v15687_v25 = vld [vmem:[#allocation5 + $0x274] ss:$8 sps:$4 sm:$0xff]  }
 0x17b   :  { %4161 = vmatpush1.bf16.msra.mxu0 %v15603_v26  ;;  %v15685_v26 = vld [vmem:[#allocation5 + $0x270] ss:$8 sps:$4 sm:$0xff]  }
 0x17c   :  { %4162 = vmatprep.subr.bf16.mxu0 %v15604_v27  ;;  %v15690_v27 = vld [vmem:[#allocation5 + $0x284] ss:$8 sps:$4 sm:$0xff]  }
 0x17f   :  { %4163 = vmatpush1.bf16.msra.mxu0 %v15606_v28  ;;  %v15688_v28 = vld [vmem:[#allocation5 + $0x280] ss:$8 sps:$4 sm:$0xff]  }
 0x180   :  { %4164 = vmatprep.subr.bf16.mxu0 %v15607_v29  ;;  %v15693_v29 = vld [vmem:[#allocation5 + $0x294] ss:$8 sps:$4 sm:$0xff]  }
 0x183   :  { %4165 = vmatpush1.bf16.msra.mxu0 %v15609_v30  ;;  %v15691_v30 = vld [vmem:[#allocation5 + $0x290] ss:$8 sps:$4 sm:$0xff]  }
 0x184   :  { %4166 = vmatprep.subr.bf16.mxu0 %v15610_v31  ;;  %v15696_v31 = vld [vmem:[#allocation5 + $0x2a4] ss:$8 sps:$4 sm:$0xff]  }
 0x187   :  { %4167 = vmatpush1.bf16.msra.mxu0 %v15612_v32  ;;  %v15694_v32 = vld [vmem:[#allocation5 + $0x2a0] ss:$8 sps:$4 sm:$0xff]  }
 0x188   :  { %4168 = vmatprep.subr.bf16.mxu0 %v15613_v33  ;;  %v15699_v33 = vld [vmem:[#allocation5 + $0x2b4] ss:$8 sps:$4 sm:$0xff]  }
 0x18b   :  { %4169 = vmatpush1.bf16.msra.mxu0 %v15615_v34  ;;  %v15697_v34 = vld [vmem:[#allocation5 + $0x2b0] ss:$8 sps:$4 sm:$0xff]  }
 0x18c   :  { %4179 = vmatprep.subr.bf16.mxu0 %v15618_v35  ;;  %v15702_v35 = vld [vmem:[#allocation5 + $0x2c4] ss:$8 sps:$4 sm:$0xff]  }
 0x18e   :  { %4171 = vmatmul.mubr.bf16.vlgmr.msra.gmra.mrb[0].mxu0 %v325_v38  ;;  %v15703_v38 = vld [vmem:[#allocation5 + $0x2d0] ss:$8 sps:$4 sm:$0xff]  }
 0x18f   :  { %4180 = vmatpush1.bf16.msra.mxu0 %v15616_v39  ;;  %4211 = vmatprep.mubr.bf16.mxu0 %v328_v40  ;;  %v15708_v39 = vld [vmem:[#allocation5 + $0x2e4] ss:$8 sps:$4 sm:$0xff]   ;;  %v15706_v40 = vld [vmem:[#allocation5 + $0x2e0] ss:$8 sps:$4 sm:$0xff]  }
 0x190   :  { %4181 = vmatprep.subr.bf16.mxu0 %v15621_v41  ;;  %v15711_v41 = vld [vmem:[#allocation5 + $0x2f4] ss:$8 sps:$4 sm:$0xff]  }
 0x193   :  { %4182 = vmatpush1.bf16.msra.mxu0 %v15619_v42  ;;  %v15709_v42 = vld [vmem:[#allocation5 + $0x2f0] ss:$8 sps:$4 sm:$0xff]  }
 0x194   :  { %4183 = vmatprep.subr.bf16.mxu0 %v15624_v43  ;;  %v15714_v43 = vld [vmem:[#allocation5 + $0x304] ss:$8 sps:$4 sm:$0xff]  }
 0x197   :  { %4184 = vmatpush1.bf16.msra.mxu0 %v15622_v44  ;;  %v289_v44 = vld [vmem:[#allocation3 + $0x20] sm:$0xff] }
 0x198   :  { %4185 = vmatprep.subr.bf16.mxu0 %v15627_v45  ;;  %v292_v45 = vld [vmem:[#allocation3 + $0x38] sm:$0xff] }
 0x19b   :  { %4186 = vmatpush1.bf16.msra.mxu0 %v15625_v46  ;;  %v329_v46 = vpack.c.bf16 %v289_v44, %v289_v44  ;;  %v15796_v44 = vld [vmem:[#allocation5 + $0x4c0] ss:$8 sps:$4 sm:$0xff]  }
 0x19c   :  { %4187 = vmatprep.subr.bf16.mxu0 %v15630_v47  ;;  %v15712_v47 = vld [vmem:[#allocation5 + $0x300] ss:$8 sps:$4 sm:$0xff]  }
 0x19f   :  { %4188 = vmatpush1.bf16.msra.mxu0 %v15628_v48  ;;  %v332_v48 = vpack.c.bf16 %v292_v45, %v292_v45  ;;  %v15801_v45 = vld [vmem:[#allocation5 + $0x4d4] ss:$8 sps:$4 sm:$0xff]  }
 0x1a0   :  { %4189 = vmatprep.subr.bf16.mxu0 %v15633_v49  ;;  %v15717_v49 = vld [vmem:[#allocation5 + $0x314] ss:$8 sps:$4 sm:$0xff]  }
 0x1a3   :  { %4190 = vmatpush1.bf16.msra.mxu0 %v15631_v50  ;;  %v15715_v50 = vld [vmem:[#allocation5 + $0x310] ss:$8 sps:$4 sm:$0xff]  }
 0x1a4   :  { %4191 = vmatprep.subr.bf16.mxu0 %v15636_v51  ;;  %v15720_v51 = vld [vmem:[#allocation5 + $0x324] ss:$8 sps:$4 sm:$0xff]  }
 0x1a7   :  { %4192 = vmatpush1.bf16.msra.mxu0 %v15634_v52  ;;  %v15718_v52 = vld [vmem:[#allocation5 + $0x320] ss:$8 sps:$4 sm:$0xff]  }
 0x1a8   :  { %4193 = vmatprep.subr.bf16.mxu0 %v15639_v53  ;;  %v15723_v53 = vld [vmem:[#allocation5 + $0x334] ss:$8 sps:$4 sm:$0xff]  }
 0x1ab   :  { %4194 = vmatpush1.bf16.msra.mxu0 %v15637_v54  ;;  %v15721_v54 = vld [vmem:[#allocation5 + $0x330] ss:$8 sps:$4 sm:$0xff]  }
 0x1ac   :  { %4195 = vmatprep.subr.bf16.mxu0 %v15642_v55  ;;  %v15726_v55 = vld [vmem:[#allocation5 + $0x344] ss:$8 sps:$4 sm:$0xff]  }
 0x1af   :  { %4196 = vmatpush1.bf16.msra.mxu0 %v15640_v56  ;;  %v15724_v56 = vld [vmem:[#allocation5 + $0x340] ss:$8 sps:$4 sm:$0xff]  }
 0x1b0   :  { %4197 = vmatprep.subr.bf16.mxu0 %v15645_v57  ;;  %v15729_v57 = vld [vmem:[#allocation5 + $0x354] ss:$8 sps:$4 sm:$0xff]  }
 0x1b3   :  { %4198 = vmatpush1.bf16.msra.mxu0 %v15643_v58  ;;  %v15727_v58 = vld [vmem:[#allocation5 + $0x350] ss:$8 sps:$4 sm:$0xff]  }
 0x1b4   :  { %4199 = vmatprep.subr.bf16.mxu0 %v15648_v59  ;;  %v15732_v59 = vld [vmem:[#allocation5 + $0x364] ss:$8 sps:$4 sm:$0xff]  }
 0x1b7   :  { %4200 = vmatpush1.bf16.msra.mxu0 %v15646_v60  ;;  %v15730_v60 = vld [vmem:[#allocation5 + $0x360] ss:$8 sps:$4 sm:$0xff]  }
 0x1b8   :  { %4201 = vmatprep.subr.bf16.mxu0 %v15651_v61  ;;  %v15735_v61 = vld [vmem:[#allocation5 + $0x374] ss:$8 sps:$4 sm:$0xff]  }
 0x1bb   :  { %4202 = vmatpush1.bf16.msra.mxu0 %v15649_v62  ;;  %v15733_v62 = vld [vmem:[#allocation5 + $0x370] ss:$8 sps:$4 sm:$0xff]  }
 0x1bc   :  { %4203 = vmatprep.subr.bf16.mxu0 %v15654_v63  ;;  %v15738_v63 = vld [vmem:[#allocation5 + $0x384] ss:$8 sps:$4 sm:$0xff]  }
 0x1bf   :  { %4204 = vmatpush1.bf16.msra.mxu0 %v15652_v0  ;;  %v15736_v0 = vld [vmem:[#allocation5 + $0x380] ss:$8 sps:$4 sm:$0xff]  }
 0x1c0   :  { %4205 = vmatprep.subr.bf16.mxu0 %v15657_v1  ;;  %v15741_v1 = vld [vmem:[#allocation5 + $0x394] ss:$8 sps:$4 sm:$0xff]  }
 0x1c3   :  { %4206 = vmatpush1.bf16.msra.mxu0 %v15655_v2  ;;  %v15739_v2 = vld [vmem:[#allocation5 + $0x390] ss:$8 sps:$4 sm:$0xff]  }
 0x1c4   :  { %4207 = vmatprep.subr.bf16.mxu0 %v15660_v3  ;;  %v15744_v3 = vld [vmem:[#allocation5 + $0x3a4] ss:$8 sps:$4 sm:$0xff]  }
 0x1c7   :  { %4208 = vmatpush1.bf16.msra.mxu0 %v15658_v4  ;;  %v15742_v4 = vld [vmem:[#allocation5 + $0x3a0] ss:$8 sps:$4 sm:$0xff]  }
 0x1c8   :  { %4209 = vmatprep.subr.bf16.mxu0 %v15663_v5  ;;  %v15747_v5 = vld [vmem:[#allocation5 + $0x3b4] ss:$8 sps:$4 sm:$0xff]  }
 0x1cb   :  { %4210 = vmatpush1.bf16.msra.mxu0 %v15661_v6  ;;  %v15745_v6 = vld [vmem:[#allocation5 + $0x3b0] ss:$8 sps:$4 sm:$0xff]  }
 0x1cc   :  { %4220 = vmatprep.subr.bf16.mxu0 %v15666_v7  ;;  %v15750_v7 = vld [vmem:[#allocation5 + $0x3c4] ss:$8 sps:$4 sm:$0xff]  }
 0x1ce   :  { %4212 = vmatmul.mubr.bf16.vlgmr.msra.gmra.mrb[0].mxu0 %v327_v10  ;;  %v15751_v10 = vld [vmem:[#allocation5 + $0x3d0] ss:$8 sps:$4 sm:$0xff]  }
 0x1cf   :  { %4221 = vmatpush1.bf16.msra.mxu0 %v15664_v11  ;;  %4252 = vmatprep.mubr.bf16.mxu0 %v330_v12  ;;  %v15756_v11 = vld [vmem:[#allocation5 + $0x3e4] ss:$8 sps:$4 sm:$0xff]   ;;  %v15754_v12 = vld [vmem:[#allocation5 + $0x3e0] ss:$8 sps:$4 sm:$0xff]  }
 0x1d0   :  { %4222 = vmatprep.subr.bf16.mxu0 %v15669_v13  ;;  %v15759_v13 = vld [vmem:[#allocation5 + $0x3f4] ss:$8 sps:$4 sm:$0xff]  }
 0x1d3   :  { %4223 = vmatpush1.bf16.msra.mxu0 %v15667_v14  ;;  %v15757_v14 = vld [vmem:[#allocation5 + $0x3f0] ss:$8 sps:$4 sm:$0xff]  }
 0x1d4   :  { %4224 = vmatprep.subr.bf16.mxu0 %v15672_v15  ;;  %v15762_v15 = vld [vmem:[#allocation5 + $0x404] ss:$8 sps:$4 sm:$0xff]  }
 0x1d7   :  { %4225 = vmatpush1.bf16.msra.mxu0 %v15670_v16  ;;  %v291_v16 = vld [vmem:[#allocation3 + $0x30] sm:$0xff] }
 0x1d8   :  { %4226 = vmatprep.subr.bf16.mxu0 %v15675_v17  ;;  %v294_v17 = vld [vmem:[#allocation3 + $0x48] sm:$0xff] }
 0x1db   :  { %4227 = vmatpush1.bf16.msra.mxu0 %v15673_v18  ;;  %v331_v18 = vpack.c.bf16 %v291_v16, %v291_v16  ;;  %v15844_v16 = vld [vmem:[#allocation5 + $0x5c0] ss:$8 sps:$4 sm:$0xff]  }
 0x1dc   :  { %4228 = vmatprep.subr.bf16.mxu0 %v15678_v19  ;;  %v15760_v19 = vld [vmem:[#allocation5 + $0x400] ss:$8 sps:$4 sm:$0xff]  }
 0x1df   :  { %4229 = vmatpush1.bf16.msra.mxu0 %v15676_v20  ;;  %v334_v20 = vpack.c.bf16 %v294_v17, %v294_v17  ;;  %v15849_v17 = vld [vmem:[#allocation5 + $0x5d4] ss:$8 sps:$4 sm:$0xff]  }
 0x1e0   :  { %4230 = vmatprep.subr.bf16.mxu0 %v15681_v21  ;;  %v15765_v21 = vld [vmem:[#allocation5 + $0x414] ss:$8 sps:$4 sm:$0xff]  }
 0x1e3   :  { %4231 = vmatpush1.bf16.msra.mxu0 %v15679_v22  ;;  %v15763_v22 = vld [vmem:[#allocation5 + $0x410] ss:$8 sps:$4 sm:$0xff]  }
 0x1e4   :  { %4232 = vmatprep.subr.bf16.mxu0 %v15684_v23  ;;  %v15768_v23 = vld [vmem:[#allocation5 + $0x424] ss:$8 sps:$4 sm:$0xff]  }
 0x1e7   :  { %4233 = vmatpush1.bf16.msra.mxu0 %v15682_v24  ;;  %v15766_v24 = vld [vmem:[#allocation5 + $0x420] ss:$8 sps:$4 sm:$0xff]  }
 0x1e8   :  { %4234 = vmatprep.subr.bf16.mxu0 %v15687_v25  ;;  %v15771_v25 = vld [vmem:[#allocation5 + $0x434] ss:$8 sps:$4 sm:$0xff]  }
 0x1eb   :  { %4235 = vmatpush1.bf16.msra.mxu0 %v15685_v26  ;;  %v15769_v26 = vld [vmem:[#allocation5 + $0x430] ss:$8 sps:$4 sm:$0xff]  }
 0x1ec   :  { %4236 = vmatprep.subr.bf16.mxu0 %v15690_v27  ;;  %v15774_v27 = vld [vmem:[#allocation5 + $0x444] ss:$8 sps:$4 sm:$0xff]  }
 0x1ef   :  { %4237 = vmatpush1.bf16.msra.mxu0 %v15688_v28  ;;  %v15772_v28 = vld [vmem:[#allocation5 + $0x440] ss:$8 sps:$4 sm:$0xff]  }
 0x1f0   :  { %4238 = vmatprep.subr.bf16.mxu0 %v15693_v29  ;;  %v15777_v29 = vld [vmem:[#allocation5 + $0x454] ss:$8 sps:$4 sm:$0xff]  }
 0x1f3   :  { %4239 = vmatpush1.bf16.msra.mxu0 %v15691_v30  ;;  %v15775_v30 = vld [vmem:[#allocation5 + $0x450] ss:$8 sps:$4 sm:$0xff]  }
 0x1f4   :  { %4240 = vmatprep.subr.bf16.mxu0 %v15696_v31  ;;  %v15780_v31 = vld [vmem:[#allocation5 + $0x464] ss:$8 sps:$4 sm:$0xff]  }
 0x1f7   :  { %4241 = vmatpush1.bf16.msra.mxu0 %v15694_v32  ;;  %v15778_v32 = vld [vmem:[#allocation5 + $0x460] ss:$8 sps:$4 sm:$0xff]  }
 0x1f8   :  { %4242 = vmatprep.subr.bf16.mxu0 %v15699_v33  ;;  %v15783_v33 = vld [vmem:[#allocation5 + $0x474] ss:$8 sps:$4 sm:$0xff]  }
 0x1fb   :  { %4243 = vmatpush1.bf16.msra.mxu0 %v15697_v34  ;;  %v15781_v34 = vld [vmem:[#allocation5 + $0x470] ss:$8 sps:$4 sm:$0xff]  }
 0x1fc   :  { %4244 = vmatprep.subr.bf16.mxu0 %v15702_v35  ;;  %v15786_v35 = vld [vmem:[#allocation5 + $0x484] ss:$8 sps:$4 sm:$0xff]  }
 0x1ff   :  { %4245 = vmatpush1.bf16.msra.mxu0 %v15700_v36  ;;  %v15784_v36 = vld [vmem:[#allocation5 + $0x480] ss:$8 sps:$4 sm:$0xff]  }
 0x200   :  { %4246 = vmatprep.subr.bf16.mxu0 %v15705_v37  ;;  %v15789_v37 = vld [vmem:[#allocation5 + $0x494] ss:$8 sps:$4 sm:$0xff]  }
 0x203   :  { %4247 = vmatpush1.bf16.msra.mxu0 %v15703_v38  ;;  %v15787_v38 = vld [vmem:[#allocation5 + $0x490] ss:$8 sps:$4 sm:$0xff]  }
 0x204   :  { %4248 = vmatprep.subr.bf16.mxu0 %v15708_v39  ;;  %v15792_v39 = vld [vmem:[#allocation5 + $0x4a4] ss:$8 sps:$4 sm:$0xff]  }
 0x207   :  { %4249 = vmatpush1.bf16.msra.mxu0 %v15706_v40  ;;  %v15790_v40 = vld [vmem:[#allocation5 + $0x4a0] ss:$8 sps:$4 sm:$0xff]  }
 0x208   :  { %4250 = vmatprep.subr.bf16.mxu0 %v15711_v41  ;;  %v15795_v41 = vld [vmem:[#allocation5 + $0x4b4] ss:$8 sps:$4 sm:$0xff]  }
 0x20b   :  { %4251 = vmatpush1.bf16.msra.mxu0 %v15709_v42  ;;  %v15793_v42 = vld [vmem:[#allocation5 + $0x4b0] ss:$8 sps:$4 sm:$0xff]  }
 0x20c   :  { %4261 = vmatprep.subr.bf16.mxu0 %v15714_v43  ;;  %v15798_v43 = vld [vmem:[#allocation5 + $0x4c4] ss:$8 sps:$4 sm:$0xff]  }
 0x20e   :  { %4253 = vmatmul.mubr.bf16.vlgmr.msra.gmra.mrb[0].mxu0 %v329_v46  ;;  %v15799_v46 = vld [vmem:[#allocation5 + $0x4d0] ss:$8 sps:$4 sm:$0xff]  }
 0x20f   :  { %4262 = vmatpush1.bf16.msra.mxu0 %v15712_v47  ;;  %4293 = vmatprep.mubr.bf16.mxu0 %v332_v48  ;;  %v15804_v47 = vld [vmem:[#allocation5 + $0x4e4] ss:$8 sps:$4 sm:$0xff]   ;;  %v15802_v48 = vld [vmem:[#allocation5 + $0x4e0] ss:$8 sps:$4 sm:$0xff]  }
 0x210   :  { %4263 = vmatprep.subr.bf16.mxu0 %v15717_v49  ;;  %v15807_v49 = vld [vmem:[#allocation5 + $0x4f4] ss:$8 sps:$4 sm:$0xff]  }
 0x213   :  { %4264 = vmatpush1.bf16.msra.mxu0 %v15715_v50  ;;  %v15805_v50 = vld [vmem:[#allocation5 + $0x4f0] ss:$8 sps:$4 sm:$0xff]  }
 0x214   :  { %4265 = vmatprep.subr.bf16.mxu0 %v15720_v51  ;;  %v15810_v51 = vld [vmem:[#allocation5 + $0x504] ss:$8 sps:$4 sm:$0xff]  }
 0x217   :  { %4266 = vmatpush1.bf16.msra.mxu0 %v15718_v52  ;;  %v293_v52 = vld [vmem:[#allocation3 + $0x40] sm:$0xff] }
 0x218   :  { %4267 = vmatprep.subr.bf16.mxu0 %v15723_v53  ;;  %v296_v53 = vld [vmem:[#allocation3 + $0x58] sm:$0xff] }
 0x21b   :  { %4268 = vmatpush1.bf16.msra.mxu0 %v15721_v54  ;;  %v333_v54 = vpack.c.bf16 %v293_v52, %v293_v52  ;;  %v15892_v52 = vld [vmem:[#allocation5 + $0x6c0] ss:$8 sps:$4 sm:$0xff]  }
 0x21c   :  { %4269 = vmatprep.subr.bf16.mxu0 %v15726_v55  ;;  %v15808_v55 = vld [vmem:[#allocation5 + $0x500] ss:$8 sps:$4 sm:$0xff]  }
 0x21f   :  { %4270 = vmatpush1.bf16.msra.mxu0 %v15724_v56  ;;  %v336_v56 = vpack.c.bf16 %v296_v53, %v296_v53  ;;  %v15897_v53 = vld [vmem:[#allocation5 + $0x6d4] ss:$8 sps:$4 sm:$0xff]  }
 0x220   :  { %4271 = vmatprep.subr.bf16.mxu0 %v15729_v57  ;;  %v15813_v57 = vld [vmem:[#allocation5 + $0x514] ss:$8 sps:$4 sm:$0xff]  }
 0x223   :  { %4272 = vmatpush1.bf16.msra.mxu0 %v15727_v58  ;;  %v15811_v58 = vld [vmem:[#allocation5 + $0x510] ss:$8 sps:$4 sm:$0xff]  }
 0x224   :  { %4273 = vmatprep.subr.bf16.mxu0 %v15732_v59  ;;  %v15816_v59 = vld [vmem:[#allocation5 + $0x524] ss:$8 sps:$4 sm:$0xff]  }
 0x227   :  { %4274 = vmatpush1.bf16.msra.mxu0 %v15730_v60  ;;  %v15814_v60 = vld [vmem:[#allocation5 + $0x520] ss:$8 sps:$4 sm:$0xff]  }
 0x228   :  { %4275 = vmatprep.subr.bf16.mxu0 %v15735_v61  ;;  %v15819_v61 = vld [vmem:[#allocation5 + $0x534] ss:$8 sps:$4 sm:$0xff]  }
 0x22b   :  { %4276 = vmatpush1.bf16.msra.mxu0 %v15733_v62  ;;  %v15817_v62 = vld [vmem:[#allocation5 + $0x530] ss:$8 sps:$4 sm:$0xff]  }
 0x22c   :  { %4277 = vmatprep.subr.bf16.mxu0 %v15738_v63  ;;  %v15822_v63 = vld [vmem:[#allocation5 + $0x544] ss:$8 sps:$4 sm:$0xff]  }
 0x22f   :  { %4278 = vmatpush1.bf16.msra.mxu0 %v15736_v0  ;;  %v15820_v0 = vld [vmem:[#allocation5 + $0x540] ss:$8 sps:$4 sm:$0xff]  }
 0x230   :  { %4279 = vmatprep.subr.bf16.mxu0 %v15741_v1  ;;  %v15825_v1 = vld [vmem:[#allocation5 + $0x554] ss:$8 sps:$4 sm:$0xff]  }
 0x233   :  { %4280 = vmatpush1.bf16.msra.mxu0 %v15739_v2  ;;  %v15823_v2 = vld [vmem:[#allocation5 + $0x550] ss:$8 sps:$4 sm:$0xff]  }
 0x234   :  { %4281 = vmatprep.subr.bf16.mxu0 %v15744_v3  ;;  %v15828_v3 = vld [vmem:[#allocation5 + $0x564] ss:$8 sps:$4 sm:$0xff]  }
 0x237   :  { %4282 = vmatpush1.bf16.msra.mxu0 %v15742_v4  ;;  %v15826_v4 = vld [vmem:[#allocation5 + $0x560] ss:$8 sps:$4 sm:$0xff]  }
 0x238   :  { %4283 = vmatprep.subr.bf16.mxu0 %v15747_v5  ;;  %v15831_v5 = vld [vmem:[#allocation5 + $0x574] ss:$8 sps:$4 sm:$0xff]  }
 0x23b   :  { %4284 = vmatpush1.bf16.msra.mxu0 %v15745_v6  ;;  %v15829_v6 = vld [vmem:[#allocation5 + $0x570] ss:$8 sps:$4 sm:$0xff]  }
 0x23c   :  { %4285 = vmatprep.subr.bf16.mxu0 %v15750_v7  ;;  %v15834_v7 = vld [vmem:[#allocation5 + $0x584] ss:$8 sps:$4 sm:$0xff]  }
 0x23f   :  { %4286 = vmatpush1.bf16.msra.mxu0 %v15748_v8  ;;  %v15832_v8 = vld [vmem:[#allocation5 + $0x580] ss:$8 sps:$4 sm:$0xff]  }
 0x240   :  { %4287 = vmatprep.subr.bf16.mxu0 %v15753_v9  ;;  %v15837_v9 = vld [vmem:[#allocation5 + $0x594] ss:$8 sps:$4 sm:$0xff]  }
 0x243   :  { %4288 = vmatpush1.bf16.msra.mxu0 %v15751_v10  ;;  %v15835_v10 = vld [vmem:[#allocation5 + $0x590] ss:$8 sps:$4 sm:$0xff]  }
 0x244   :  { %4289 = vmatprep.subr.bf16.mxu0 %v15756_v11  ;;  %v15840_v11 = vld [vmem:[#allocation5 + $0x5a4] ss:$8 sps:$4 sm:$0xff]  }
 0x247   :  { %4290 = vmatpush1.bf16.msra.mxu0 %v15754_v12  ;;  %v15838_v12 = vld [vmem:[#allocation5 + $0x5a0] ss:$8 sps:$4 sm:$0xff]  }
 0x248   :  { %4291 = vmatprep.subr.bf16.mxu0 %v15759_v13  ;;  %v15843_v13 = vld [vmem:[#allocation5 + $0x5b4] ss:$8 sps:$4 sm:$0xff]  }
 0x24b   :  { %4292 = vmatpush1.bf16.msra.mxu0 %v15757_v14  ;;  %v15841_v14 = vld [vmem:[#allocation5 + $0x5b0] ss:$8 sps:$4 sm:$0xff]  }
 0x24c   :  { %4302 = vmatprep.subr.bf16.mxu0 %v15762_v15  ;;  %v15846_v15 = vld [vmem:[#allocation5 + $0x5c4] ss:$8 sps:$4 sm:$0xff]  }
 0x24e   :  { %4294 = vmatmul.mubr.bf16.vlgmr.msra.gmra.mrb[0].mxu0 %v331_v18  ;;  %v15847_v18 = vld [vmem:[#allocation5 + $0x5d0] ss:$8 sps:$4 sm:$0xff]  }
 0x24f   :  { %4303 = vmatpush1.bf16.msra.mxu0 %v15760_v19  ;;  %4334 = vmatprep.mubr.bf16.mxu0 %v334_v20  ;;  %v15852_v19 = vld [vmem:[#allocation5 + $0x5e4] ss:$8 sps:$4 sm:$0xff]   ;;  %v15850_v20 = vld [vmem:[#allocation5 + $0x5e0] ss:$8 sps:$4 sm:$0xff]  }
 0x250   :  { %4304 = vmatprep.subr.bf16.mxu0 %v15765_v21  ;;  %v15855_v21 = vld [vmem:[#allocation5 + $0x5f4] ss:$8 sps:$4 sm:$0xff]  }
 0x253   :  { %4305 = vmatpush1.bf16.msra.mxu0 %v15763_v22  ;;  %v15853_v22 = vld [vmem:[#allocation5 + $0x5f0] ss:$8 sps:$4 sm:$0xff]  }
 0x254   :  { %4306 = vmatprep.subr.bf16.mxu0 %v15768_v23  ;;  %v15858_v23 = vld [vmem:[#allocation5 + $0x604] ss:$8 sps:$4 sm:$0xff]  }
 0x257   :  { %4307 = vmatpush1.bf16.msra.mxu0 %v15766_v24  ;;  %v295_v24 = vld [vmem:[#allocation3 + $0x50] sm:$0xff] }
 0x258   :  { %4308 = vmatprep.subr.bf16.mxu0 %v15771_v25  ;;  %v298_v25 = vld [vmem:[#allocation3 + $0x68] sm:$0xff] }
 0x25b   :  { %4309 = vmatpush1.bf16.msra.mxu0 %v15769_v26  ;;  %v335_v26 = vpack.c.bf16 %v295_v24, %v295_v24  ;;  %v15940_v24 = vld [vmem:[#allocation5 + $0x7c0] ss:$8 sps:$4 sm:$0xff]  }
 0x25c   :  { %4310 = vmatprep.subr.bf16.mxu0 %v15774_v27  ;;  %v15856_v27 = vld [vmem:[#allocation5 + $0x600] ss:$8 sps:$4 sm:$0xff]  }
 0x25f   :  { %4311 = vmatpush1.bf16.msra.mxu0 %v15772_v28  ;;  %v338_v28 = vpack.c.bf16 %v298_v25, %v298_v25  ;;  %v15945_v25 = vld [vmem:[#allocation5 + $0x7d4] ss:$8 sps:$4 sm:$0xff]  }
 0x260   :  { %4312 = vmatprep.subr.bf16.mxu0 %v15777_v29  ;;  %v15861_v29 = vld [vmem:[#allocation5 + $0x614] ss:$8 sps:$4 sm:$0xff]  }
 0x263   :  { %4313 = vmatpush1.bf16.msra.mxu0 %v15775_v30  ;;  %v15859_v30 = vld [vmem:[#allocation5 + $0x610] ss:$8 sps:$4 sm:$0xff]  }
 0x264   :  { %4314 = vmatprep.subr.bf16.mxu0 %v15780_v31  ;;  %v15864_v31 = vld [vmem:[#allocation5 + $0x624] ss:$8 sps:$4 sm:$0xff]  }
 0x267   :  { %4315 = vmatpush1.bf16.msra.mxu0 %v15778_v32  ;;  %v15862_v32 = vld [vmem:[#allocation5 + $0x620] ss:$8 sps:$4 sm:$0xff]  }
 0x268   :  { %4316 = vmatprep.subr.bf16.mxu0 %v15783_v33  ;;  %v15867_v33 = vld [vmem:[#allocation5 + $0x634] ss:$8 sps:$4 sm:$0xff]  }
 0x26b   :  { %4317 = vmatpush1.bf16.msra.mxu0 %v15781_v34  ;;  %v15865_v34 = vld [vmem:[#allocation5 + $0x630] ss:$8 sps:$4 sm:$0xff]  }
 0x26c   :  { %4318 = vmatprep.subr.bf16.mxu0 %v15786_v35  ;;  %v15870_v35 = vld [vmem:[#allocation5 + $0x644] ss:$8 sps:$4 sm:$0xff]  }
 0x26f   :  { %4319 = vmatpush1.bf16.msra.mxu0 %v15784_v36  ;;  %v15868_v36 = vld [vmem:[#allocation5 + $0x640] ss:$8 sps:$4 sm:$0xff]  }
 0x270   :  { %4320 = vmatprep.subr.bf16.mxu0 %v15789_v37  ;;  %v15873_v37 = vld [vmem:[#allocation5 + $0x654] ss:$8 sps:$4 sm:$0xff]  }
 0x273   :  { %4321 = vmatpush1.bf16.msra.mxu0 %v15787_v38  ;;  %v15871_v38 = vld [vmem:[#allocation5 + $0x650] ss:$8 sps:$4 sm:$0xff]  }
 0x274   :  { %4322 = vmatprep.subr.bf16.mxu0 %v15792_v39  ;;  %v15876_v39 = vld [vmem:[#allocation5 + $0x664] ss:$8 sps:$4 sm:$0xff]  }
 0x277   :  { %4323 = vmatpush1.bf16.msra.mxu0 %v15790_v40  ;;  %v15874_v40 = vld [vmem:[#allocation5 + $0x660] ss:$8 sps:$4 sm:$0xff]  }
 0x278   :  { %4324 = vmatprep.subr.bf16.mxu0 %v15795_v41  ;;  %v15879_v41 = vld [vmem:[#allocation5 + $0x674] ss:$8 sps:$4 sm:$0xff]  }
 0x27b   :  { %4325 = vmatpush1.bf16.msra.mxu0 %v15793_v42  ;;  %v15877_v42 = vld [vmem:[#allocation5 + $0x670] ss:$8 sps:$4 sm:$0xff]  }
 0x27c   :  { %4326 = vmatprep.subr.bf16.mxu0 %v15798_v43  ;;  %v15882_v43 = vld [vmem:[#allocation5 + $0x684] ss:$8 sps:$4 sm:$0xff]  }
 0x27f   :  { %4327 = vmatpush1.bf16.msra.mxu0 %v15796_v44  ;;  %v15880_v44 = vld [vmem:[#allocation5 + $0x680] ss:$8 sps:$4 sm:$0xff]  }
 0x280   :  { %4328 = vmatprep.subr.bf16.mxu0 %v15801_v45  ;;  %v15885_v45 = vld [vmem:[#allocation5 + $0x694] ss:$8 sps:$4 sm:$0xff]  }
 0x283   :  { %4329 = vmatpush1.bf16.msra.mxu0 %v15799_v46  ;;  %v15883_v46 = vld [vmem:[#allocation5 + $0x690] ss:$8 sps:$4 sm:$0xff]  }
 0x284   :  { %4330 = vmatprep.subr.bf16.mxu0 %v15804_v47  ;;  %v15888_v47 = vld [vmem:[#allocation5 + $0x6a4] ss:$8 sps:$4 sm:$0xff]  }
 0x287   :  { %4331 = vmatpush1.bf16.msra.mxu0 %v15802_v48  ;;  %v15886_v48 = vld [vmem:[#allocation5 + $0x6a0] ss:$8 sps:$4 sm:$0xff]  }
 0x288   :  { %4332 = vmatprep.subr.bf16.mxu0 %v15807_v49  ;;  %v15891_v49 = vld [vmem:[#allocation5 + $0x6b4] ss:$8 sps:$4 sm:$0xff]  }
 0x28b   :  { %4333 = vmatpush1.bf16.msra.mxu0 %v15805_v50  ;;  %v15889_v50 = vld [vmem:[#allocation5 + $0x6b0] ss:$8 sps:$4 sm:$0xff]  }
 0x28c   :  { %4343 = vmatprep.subr.bf16.mxu0 %v15810_v51  ;;  %v15894_v51 = vld [vmem:[#allocation5 + $0x6c4] ss:$8 sps:$4 sm:$0xff]  }
 0x28e   :  { %4335 = vmatmul.mubr.bf16.vlgmr.msra.gmra.mrb[0].mxu0 %v333_v54  ;;  %v15895_v54 = vld [vmem:[#allocation5 + $0x6d0] ss:$8 sps:$4 sm:$0xff]  }
 0x28f   :  { %4344 = vmatpush1.bf16.msra.mxu0 %v15808_v55  ;;  %4375 = vmatprep.mubr.bf16.mxu0 %v336_v56  ;;  %v15900_v55 = vld [vmem:[#allocation5 + $0x6e4] ss:$8 sps:$4 sm:$0xff]   ;;  %v15898_v56 = vld [vmem:[#allocation5 + $0x6e0] ss:$8 sps:$4 sm:$0xff]  }
 0x290   :  { %4345 = vmatprep.subr.bf16.mxu0 %v15813_v57  ;;  %v15903_v57 = vld [vmem:[#allocation5 + $0x6f4] ss:$8 sps:$4 sm:$0xff]  }
 0x293   :  { %4346 = vmatpush1.bf16.msra.mxu0 %v15811_v58  ;;  %v15901_v58 = vld [vmem:[#allocation5 + $0x6f0] ss:$8 sps:$4 sm:$0xff]  }
 0x294   :  { %4347 = vmatprep.subr.bf16.mxu0 %v15816_v59  ;;  %v15906_v59 = vld [vmem:[#allocation5 + $0x704] ss:$8 sps:$4 sm:$0xff]  }
 0x297   :  { %4348 = vmatpush1.bf16.msra.mxu0 %v15814_v60  ;;  %v297_v60 = vld [vmem:[#allocation3 + $0x60] sm:$0xff] }
 0x298   :  { %4349 = vmatprep.subr.bf16.mxu0 %v15819_v61  ;;  %v300_v61 = vld [vmem:[#allocation3 + $0x78] sm:$0xff] }
 0x29b   :  { %4350 = vmatpush1.bf16.msra.mxu0 %v15817_v62  ;;  %v337_v62 = vpack.c.bf16 %v297_v60, %v297_v60  ;;  %v15988_v60 = vld [vmem:[#allocation5 + $0x8c0] ss:$8 sps:$4 sm:$0xff]  }
 0x29c   :  { %4351 = vmatprep.subr.bf16.mxu0 %v15822_v63  ;;  %v15904_v63 = vld [vmem:[#allocation5 + $0x700] ss:$8 sps:$4 sm:$0xff]  }
 0x29f   :  { %4352 = vmatpush1.bf16.msra.mxu0 %v15820_v0  ;;  %v340_v0 = vpack.c.bf16 %v300_v61, %v300_v61  ;;  %v15993_v61 = vld [vmem:[#allocation5 + $0x8d4] ss:$8 sps:$4 sm:$0xff]  }
 0x2a0   :  { %4353 = vmatprep.subr.bf16.mxu0 %v15825_v1  ;;  %v15909_v1 = vld [vmem:[#allocation5 + $0x714] ss:$8 sps:$4 sm:$0xff]  }
 0x2a3   :  { %4354 = vmatpush1.bf16.msra.mxu0 %v15823_v2  ;;  %v15907_v2 = vld [vmem:[#allocation5 + $0x710] ss:$8 sps:$4 sm:$0xff]  }
 0x2a4   :  { %4355 = vmatprep.subr.bf16.mxu0 %v15828_v3  ;;  %v15912_v3 = vld [vmem:[#allocation5 + $0x724] ss:$8 sps:$4 sm:$0xff]  }
 0x2a7   :  { %4356 = vmatpush1.bf16.msra.mxu0 %v15826_v4  ;;  %v15910_v4 = vld [vmem:[#allocation5 + $0x720] ss:$8 sps:$4 sm:$0xff]  }
 0x2a8   :  { %4357 = vmatprep.subr.bf16.mxu0 %v15831_v5  ;;  %v15915_v5 = vld [vmem:[#allocation5 + $0x734] ss:$8 sps:$4 sm:$0xff]  }
 0x2ab   :  { %4358 = vmatpush1.bf16.msra.mxu0 %v15829_v6  ;;  %v15913_v6 = vld [vmem:[#allocation5 + $0x730] ss:$8 sps:$4 sm:$0xff]  }
 0x2ac   :  { %4359 = vmatprep.subr.bf16.mxu0 %v15834_v7  ;;  %v15918_v7 = vld [vmem:[#allocation5 + $0x744] ss:$8 sps:$4 sm:$0xff]  }
 0x2af   :  { %4360 = vmatpush1.bf16.msra.mxu0 %v15832_v8  ;;  %v15916_v8 = vld [vmem:[#allocation5 + $0x740] ss:$8 sps:$4 sm:$0xff]  }
 0x2b0   :  { %4361 = vmatprep.subr.bf16.mxu0 %v15837_v9  ;;  %v15921_v9 = vld [vmem:[#allocation5 + $0x754] ss:$8 sps:$4 sm:$0xff]  }
 0x2b3   :  { %4362 = vmatpush1.bf16.msra.mxu0 %v15835_v10  ;;  %v15919_v10 = vld [vmem:[#allocation5 + $0x750] ss:$8 sps:$4 sm:$0xff]  }
 0x2b4   :  { %4363 = vmatprep.subr.bf16.mxu0 %v15840_v11  ;;  %v15924_v11 = vld [vmem:[#allocation5 + $0x764] ss:$8 sps:$4 sm:$0xff]  }
 0x2b7   :  { %4364 = vmatpush1.bf16.msra.mxu0 %v15838_v12  ;;  %v15922_v12 = vld [vmem:[#allocation5 + $0x760] ss:$8 sps:$4 sm:$0xff]  }
 0x2b8   :  { %4365 = vmatprep.subr.bf16.mxu0 %v15843_v13  ;;  %v15927_v13 = vld [vmem:[#allocation5 + $0x774] ss:$8 sps:$4 sm:$0xff]  }
 0x2bb   :  { %4366 = vmatpush1.bf16.msra.mxu0 %v15841_v14  ;;  %v15925_v14 = vld [vmem:[#allocation5 + $0x770] ss:$8 sps:$4 sm:$0xff]  }
 0x2bc   :  { %4367 = vmatprep.subr.bf16.mxu0 %v15846_v15  ;;  %v15930_v15 = vld [vmem:[#allocation5 + $0x784] ss:$8 sps:$4 sm:$0xff]  }
 0x2bf   :  { %4368 = vmatpush1.bf16.msra.mxu0 %v15844_v16  ;;  %v15928_v16 = vld [vmem:[#allocation5 + $0x780] ss:$8 sps:$4 sm:$0xff]  }
 0x2c0   :  { %4369 = vmatprep.subr.bf16.mxu0 %v15849_v17  ;;  %v15933_v17 = vld [vmem:[#allocation5 + $0x794] ss:$8 sps:$4 sm:$0xff]  }
 0x2c3   :  { %4370 = vmatpush1.bf16.msra.mxu0 %v15847_v18  ;;  %v15931_v18 = vld [vmem:[#allocation5 + $0x790] ss:$8 sps:$4 sm:$0xff]  }
 0x2c4   :  { %4371 = vmatprep.subr.bf16.mxu0 %v15852_v19  ;;  %v15936_v19 = vld [vmem:[#allocation5 + $0x7a4] ss:$8 sps:$4 sm:$0xff]  }
 0x2c7   :  { %4372 = vmatpush1.bf16.msra.mxu0 %v15850_v20  ;;  %v15934_v20 = vld [vmem:[#allocation5 + $0x7a0] ss:$8 sps:$4 sm:$0xff]  }
 0x2c8   :  { %4373 = vmatprep.subr.bf16.mxu0 %v15855_v21  ;;  %v15939_v21 = vld [vmem:[#allocation5 + $0x7b4] ss:$8 sps:$4 sm:$0xff]  }
 0x2cb   :  { %4374 = vmatpush1.bf16.msra.mxu0 %v15853_v22  ;;  %v15937_v22 = vld [vmem:[#allocation5 + $0x7b0] ss:$8 sps:$4 sm:$0xff]  }
 0x2cc   :  { %4384 = vmatprep.subr.bf16.mxu0 %v15858_v23  ;;  %v15942_v23 = vld [vmem:[#allocation5 + $0x7c4] ss:$8 sps:$4 sm:$0xff]  }
 0x2ce   :  { %4376 = vmatmul.mubr.bf16.vlgmr.msra.gmra.mrb[0].mxu0 %v335_v26  ;;  %v15943_v26 = vld [vmem:[#allocation5 + $0x7d0] ss:$8 sps:$4 sm:$0xff]  }
 0x2cf   :  { %4385 = vmatpush1.bf16.msra.mxu0 %v15856_v27  ;;  %4416 = vmatprep.mubr.bf16.mxu0 %v338_v28  ;;  %v15948_v27 = vld [vmem:[#allocation5 + $0x7e4] ss:$8 sps:$4 sm:$0xff]   ;;  %v15946_v28 = vld [vmem:[#allocation5 + $0x7e0] ss:$8 sps:$4 sm:$0xff]  }
 0x2d0   :  { %4386 = vmatprep.subr.bf16.mxu0 %v15861_v29  ;;  %v15951_v29 = vld [vmem:[#allocation5 + $0x7f4] ss:$8 sps:$4 sm:$0xff]  }
 0x2d3   :  { %4387 = vmatpush1.bf16.msra.mxu0 %v15859_v30  ;;  %v15949_v30 = vld [vmem:[#allocation5 + $0x7f0] ss:$8 sps:$4 sm:$0xff]  }
 0x2d4   :  { %4388 = vmatprep.subr.bf16.mxu0 %v15864_v31  ;;  %v15954_v31 = vld [vmem:[#allocation5 + $0x804] ss:$8 sps:$4 sm:$0xff]  }
 0x2d7   :  { %4389 = vmatpush1.bf16.msra.mxu0 %v15862_v32  ;;  %v299_v32 = vld [vmem:[#allocation3 + $0x70] sm:$0xff] }
 0x2d8   :  { %4390 = vmatprep.subr.bf16.mxu0 %v15867_v33  ;;  %v302_v33 = vld [vmem:[#allocation3 + $0x88] sm:$0xff] }
 0x2db   :  { %4391 = vmatpush1.bf16.msra.mxu0 %v15865_v34  ;;  %v339_v34 = vpack.c.bf16 %v299_v32, %v299_v32  ;;  %v16036_v32 = vld [vmem:[#allocation5 + $0x9c0] ss:$8 sps:$4 sm:$0xff]  }
 0x2dc   :  { %4392 = vmatprep.subr.bf16.mxu0 %v15870_v35  ;;  %v15952_v35 = vld [vmem:[#allocation5 + $0x800] ss:$8 sps:$4 sm:$0xff]  }
 0x2df   :  { %4393 = vmatpush1.bf16.msra.mxu0 %v15868_v36  ;;  %v342_v36 = vpack.c.bf16 %v302_v33, %v302_v33  ;;  %v16041_v33 = vld [vmem:[#allocation5 + $0x9d4] ss:$8 sps:$4 sm:$0xff]  }
 0x2e0   :  { %4394 = vmatprep.subr.bf16.mxu0 %v15873_v37  ;;  %v15957_v37 = vld [vmem:[#allocation5 + $0x814] ss:$8 sps:$4 sm:$0xff]  }
 0x2e3   :  { %4395 = vmatpush1.bf16.msra.mxu0 %v15871_v38  ;;  %v15955_v38 = vld [vmem:[#allocation5 + $0x810] ss:$8 sps:$4 sm:$0xff]  }
 0x2e4   :  { %4396 = vmatprep.subr.bf16.mxu0 %v15876_v39  ;;  %v15960_v39 = vld [vmem:[#allocation5 + $0x824] ss:$8 sps:$4 sm:$0xff]  }
 0x2e7   :  { %4397 = vmatpush1.bf16.msra.mxu0 %v15874_v40  ;;  %v15958_v40 = vld [vmem:[#allocation5 + $0x820] ss:$8 sps:$4 sm:$0xff]  }
 0x2e8   :  { %4398 = vmatprep.subr.bf16.mxu0 %v15879_v41  ;;  %v15963_v41 = vld [vmem:[#allocation5 + $0x834] ss:$8 sps:$4 sm:$0xff]  }
 0x2eb   :  { %4399 = vmatpush1.bf16.msra.mxu0 %v15877_v42  ;;  %v15961_v42 = vld [vmem:[#allocation5 + $0x830] ss:$8 sps:$4 sm:$0xff]  }
 0x2ec   :  { %4400 = vmatprep.subr.bf16.mxu0 %v15882_v43  ;;  %v15966_v43 = vld [vmem:[#allocation5 + $0x844] ss:$8 sps:$4 sm:$0xff]  }
 0x2ef   :  { %4401 = vmatpush1.bf16.msra.mxu0 %v15880_v44  ;;  %v15964_v44 = vld [vmem:[#allocation5 + $0x840] ss:$8 sps:$4 sm:$0xff]  }
 0x2f0   :  { %4402 = vmatprep.subr.bf16.mxu0 %v15885_v45  ;;  %v15969_v45 = vld [vmem:[#allocation5 + $0x854] ss:$8 sps:$4 sm:$0xff]  }
 0x2f3   :  { %4403 = vmatpush1.bf16.msra.mxu0 %v15883_v46  ;;  %v15967_v46 = vld [vmem:[#allocation5 + $0x850] ss:$8 sps:$4 sm:$0xff]  }
 0x2f4   :  { %4404 = vmatprep.subr.bf16.mxu0 %v15888_v47  ;;  %v15972_v47 = vld [vmem:[#allocation5 + $0x864] ss:$8 sps:$4 sm:$0xff]  }
 0x2f7   :  { %4405 = vmatpush1.bf16.msra.mxu0 %v15886_v48  ;;  %v15970_v48 = vld [vmem:[#allocation5 + $0x860] ss:$8 sps:$4 sm:$0xff]  }
 0x2f8   :  { %4406 = vmatprep.subr.bf16.mxu0 %v15891_v49  ;;  %v15975_v49 = vld [vmem:[#allocation5 + $0x874] ss:$8 sps:$4 sm:$0xff]  }
 0x2fb   :  { %4407 = vmatpush1.bf16.msra.mxu0 %v15889_v50  ;;  %v15973_v50 = vld [vmem:[#allocation5 + $0x870] ss:$8 sps:$4 sm:$0xff]  }
 0x2fc   :  { %4408 = vmatprep.subr.bf16.mxu0 %v15894_v51  ;;  %v15978_v51 = vld [vmem:[#allocation5 + $0x884] ss:$8 sps:$4 sm:$0xff]  }
 0x2ff   :  { %4409 = vmatpush1.bf16.msra.mxu0 %v15892_v52  ;;  %v15976_v52 = vld [vmem:[#allocation5 + $0x880] ss:$8 sps:$4 sm:$0xff]  }
 0x300   :  { %4410 = vmatprep.subr.bf16.mxu0 %v15897_v53  ;;  %v15981_v53 = vld [vmem:[#allocation5 + $0x894] ss:$8 sps:$4 sm:$0xff]  }
 0x303   :  { %4411 = vmatpush1.bf16.msra.mxu0 %v15895_v54  ;;  %v15979_v54 = vld [vmem:[#allocation5 + $0x890] ss:$8 sps:$4 sm:$0xff]  }
 0x304   :  { %4412 = vmatprep.subr.bf16.mxu0 %v15900_v55  ;;  %v15984_v55 = vld [vmem:[#allocation5 + $0x8a4] ss:$8 sps:$4 sm:$0xff]  }
 0x307   :  { %4413 = vmatpush1.bf16.msra.mxu0 %v15898_v56  ;;  %v15982_v56 = vld [vmem:[#allocation5 + $0x8a0] ss:$8 sps:$4 sm:$0xff]  }
 0x308   :  { %4414 = vmatprep.subr.bf16.mxu0 %v15903_v57  ;;  %v15987_v57 = vld [vmem:[#allocation5 + $0x8b4] ss:$8 sps:$4 sm:$0xff]  }
 0x30b   :  { %4415 = vmatpush1.bf16.msra.mxu0 %v15901_v58  ;;  %v15985_v58 = vld [vmem:[#allocation5 + $0x8b0] ss:$8 sps:$4 sm:$0xff]  }
 0x30c   :  { %4425 = vmatprep.subr.bf16.mxu0 %v15906_v59  ;;  %v15990_v59 = vld [vmem:[#allocation5 + $0x8c4] ss:$8 sps:$4 sm:$0xff]  }
 0x30e   :  { %4417 = vmatmul.mubr.bf16.vlgmr.msra.gmra.mrb[0].mxu0 %v337_v62  ;;  %v15991_v62 = vld [vmem:[#allocation5 + $0x8d0] ss:$8 sps:$4 sm:$0xff]  }
 0x30f   :  { %4426 = vmatpush1.bf16.msra.mxu0 %v15904_v63  ;;  %4457 = vmatprep.mubr.bf16.mxu0 %v340_v0  ;;  %v15996_v63 = vld [vmem:[#allocation5 + $0x8e4] ss:$8 sps:$4 sm:$0xff]   ;;  %v15994_v0 = vld [vmem:[#allocation5 + $0x8e0] ss:$8 sps:$4 sm:$0xff]  }
 0x310   :  { %4427 = vmatprep.subr.bf16.mxu0 %v15909_v1  ;;  %v15999_v1 = vld [vmem:[#allocation5 + $0x8f4] ss:$8 sps:$4 sm:$0xff]  }
 0x313   :  { %4428 = vmatpush1.bf16.msra.mxu0 %v15907_v2  ;;  %v15997_v2 = vld [vmem:[#allocation5 + $0x8f0] ss:$8 sps:$4 sm:$0xff]  }
 0x314   :  { %4429 = vmatprep.subr.bf16.mxu0 %v15912_v3  ;;  %v301_v3 = vld [vmem:[#allocation3 + $0x80] sm:$0xff] }
 0x317   :  { %4430 = vmatpush1.bf16.msra.mxu0 %v15910_v4  ;;  %v16002_v4 = vld [vmem:[#allocation5 + $0x904] ss:$8 sps:$4 sm:$0xff]  }
 0x318   :  { %4431 = vmatprep.subr.bf16.mxu0 %v15915_v5  ;;  %v304_v5 = vld [vmem:[#allocation3 + $0x98] sm:$0xff] }
 0x31b   :  { %4432 = vmatpush1.bf16.msra.mxu0 %v15913_v6  ;;  %v341_v6 = vpack.c.bf16 %v301_v3, %v301_v3  ;;  %v16086_v3 = vld [vmem:[#allocation5 + $0xac4] ss:$8 sps:$4 sm:$0xff]  }
 0x31c   :  { %4433 = vmatprep.subr.bf16.mxu0 %v15918_v7  ;;  %v16000_v7 = vld [vmem:[#allocation5 + $0x900] ss:$8 sps:$4 sm:$0xff]  }
 0x31f   :  { %4434 = vmatpush1.bf16.msra.mxu0 %v15916_v8  ;;  %v344_v8 = vpack.c.bf16 %v304_v5, %v304_v5  ;;  %v16089_v5 = vld [vmem:[#allocation5 + $0xad4] ss:$8 sps:$4 sm:$0xff]  }
 0x320   :  { %4435 = vmatprep.subr.bf16.mxu0 %v15921_v9  ;;  %v16005_v9 = vld [vmem:[#allocation5 + $0x914] ss:$8 sps:$4 sm:$0xff]  }
 0x323   :  { %4436 = vmatpush1.bf16.msra.mxu0 %v15919_v10  ;;  %v16003_v10 = vld [vmem:[#allocation5 + $0x910] ss:$8 sps:$4 sm:$0xff]  }
 0x324   :  { %4437 = vmatprep.subr.bf16.mxu0 %v15924_v11  ;;  %v16008_v11 = vld [vmem:[#allocation5 + $0x924] ss:$8 sps:$4 sm:$0xff]  }
 0x327   :  { %4438 = vmatpush1.bf16.msra.mxu0 %v15922_v12  ;;  %v16006_v12 = vld [vmem:[#allocation5 + $0x920] ss:$8 sps:$4 sm:$0xff]  }
 0x328   :  { %4439 = vmatprep.subr.bf16.mxu0 %v15927_v13  ;;  %v16011_v13 = vld [vmem:[#allocation5 + $0x934] ss:$8 sps:$4 sm:$0xff]  }
 0x32b   :  { %4440 = vmatpush1.bf16.msra.mxu0 %v15925_v14  ;;  %v16009_v14 = vld [vmem:[#allocation5 + $0x930] ss:$8 sps:$4 sm:$0xff]  }
 0x32c   :  { %4441 = vmatprep.subr.bf16.mxu0 %v15930_v15  ;;  %v16014_v15 = vld [vmem:[#allocation5 + $0x944] ss:$8 sps:$4 sm:$0xff]  }
 0x32f   :  { %4442 = vmatpush1.bf16.msra.mxu0 %v15928_v16  ;;  %v16012_v16 = vld [vmem:[#allocation5 + $0x940] ss:$8 sps:$4 sm:$0xff]  }
 0x330   :  { %4443 = vmatprep.subr.bf16.mxu0 %v15933_v17  ;;  %v16017_v17 = vld [vmem:[#allocation5 + $0x954] ss:$8 sps:$4 sm:$0xff]  }
 0x333   :  { %4444 = vmatpush1.bf16.msra.mxu0 %v15931_v18  ;;  %v16015_v18 = vld [vmem:[#allocation5 + $0x950] ss:$8 sps:$4 sm:$0xff]  }
 0x334   :  { %4445 = vmatprep.subr.bf16.mxu0 %v15936_v19  ;;  %v16020_v19 = vld [vmem:[#allocation5 + $0x964] ss:$8 sps:$4 sm:$0xff]  }
 0x337   :  { %4446 = vmatpush1.bf16.msra.mxu0 %v15934_v20  ;;  %v16018_v20 = vld [vmem:[#allocation5 + $0x960] ss:$8 sps:$4 sm:$0xff]  }
 0x338   :  { %4447 = vmatprep.subr.bf16.mxu0 %v15939_v21  ;;  %v16023_v21 = vld [vmem:[#allocation5 + $0x974] ss:$8 sps:$4 sm:$0xff]  }
 0x33b   :  { %4448 = vmatpush1.bf16.msra.mxu0 %v15937_v22  ;;  %v16021_v22 = vld [vmem:[#allocation5 + $0x970] ss:$8 sps:$4 sm:$0xff]  }
 0x33c   :  { %4449 = vmatprep.subr.bf16.mxu0 %v15942_v23  ;;  %v16026_v23 = vld [vmem:[#allocation5 + $0x984] ss:$8 sps:$4 sm:$0xff]  }
 0x33f   :  { %4450 = vmatpush1.bf16.msra.mxu0 %v15940_v24  ;;  %v16024_v24 = vld [vmem:[#allocation5 + $0x980] ss:$8 sps:$4 sm:$0xff]  }
 0x340   :  { %4451 = vmatprep.subr.bf16.mxu0 %v15945_v25  ;;  %v16029_v25 = vld [vmem:[#allocation5 + $0x994] ss:$8 sps:$4 sm:$0xff]  }
 0x343   :  { %4452 = vmatpush1.bf16.msra.mxu0 %v15943_v26  ;;  %v16027_v26 = vld [vmem:[#allocation5 + $0x990] ss:$8 sps:$4 sm:$0xff]  }
 0x344   :  { %4453 = vmatprep.subr.bf16.mxu0 %v15948_v27  ;;  %v16032_v27 = vld [vmem:[#allocation5 + $0x9a4] ss:$8 sps:$4 sm:$0xff]  }
 0x347   :  { %4454 = vmatpush1.bf16.msra.mxu0 %v15946_v28  ;;  %v16030_v28 = vld [vmem:[#allocation5 + $0x9a0] ss:$8 sps:$4 sm:$0xff]  }
 0x348   :  { %4455 = vmatprep.subr.bf16.mxu0 %v15951_v29  ;;  %v16035_v29 = vld [vmem:[#allocation5 + $0x9b4] ss:$8 sps:$4 sm:$0xff]  }
 0x34b   :  { %4456 = vmatpush1.bf16.msra.mxu0 %v15949_v30  ;;  %v16033_v30 = vld [vmem:[#allocation5 + $0x9b0] ss:$8 sps:$4 sm:$0xff]  }
 0x34c   :  { %4466 = vmatprep.subr.bf16.mxu0 %v15954_v31  ;;  %v16038_v31 = vld [vmem:[#allocation5 + $0x9c4] ss:$8 sps:$4 sm:$0xff]  }
 0x34e   :  { %4458 = vmatmul.mubr.bf16.vlgmr.msra.gmra.mrb[0].mxu0 %v339_v34  ;;  %v16039_v34 = vld [vmem:[#allocation5 + $0x9d0] ss:$8 sps:$4 sm:$0xff]  }
 0x34f   :  { %4467 = vmatpush1.bf16.msra.mxu0 %v15952_v35  ;;  %4498 = vmatprep.mubr.bf16.mxu0 %v342_v36  ;;  %v16044_v35 = vld [vmem:[#allocation5 + $0x9e4] ss:$8 sps:$4 sm:$0xff]   ;;  %v16042_v36 = vld [vmem:[#allocation5 + $0x9e0] ss:$8 sps:$4 sm:$0xff]  }
 0x350   :  { %4468 = vmatprep.subr.bf16.mxu0 %v15957_v37  ;;  %v16047_v37 = vld [vmem:[#allocation5 + $0x9f4] ss:$8 sps:$4 sm:$0xff]  }
 0x353   :  { %4469 = vmatpush1.bf16.msra.mxu0 %v15955_v38  ;;  %v16045_v38 = vld [vmem:[#allocation5 + $0x9f0] ss:$8 sps:$4 sm:$0xff]  }
 0x354   :  { %4470 = vmatprep.subr.bf16.mxu0 %v15960_v39  ;;  %v303_v39 = vld [vmem:[#allocation3 + $0x90] sm:$0xff] }
 0x357   :  { %4471 = vmatpush1.bf16.msra.mxu0 %v15958_v40  ;;  %v16050_v40 = vld [vmem:[#allocation5 + $0xa04] ss:$8 sps:$4 sm:$0xff]  }
 0x358   :  { %4472 = vmatprep.subr.bf16.mxu0 %v15963_v41  ;;  %v306_v41 = vld [vmem:[#allocation3 + $0xa8] sm:$0xff] }
 0x35b   :  { %4473 = vmatpush1.bf16.msra.mxu0 %v15961_v42  ;;  %v343_v42 = vpack.c.bf16 %v303_v39, %v303_v39  ;;  %v16134_v39 = vld [vmem:[#allocation5 + $0xbc4] ss:$8 sps:$4 sm:$0xff]  }
 0x35c   :  { %4474 = vmatprep.subr.bf16.mxu0 %v15966_v43  ;;  %v16048_v43 = vld [vmem:[#allocation5 + $0xa00] ss:$8 sps:$4 sm:$0xff]  }
 0x35f   :  { %4475 = vmatpush1.bf16.msra.mxu0 %v15964_v44  ;;  %v346_v44 = vpack.c.bf16 %v306_v41, %v306_v41  ;;  %v16137_v41 = vld [vmem:[#allocation5 + $0xbd4] ss:$8 sps:$4 sm:$0xff]  }
 0x360   :  { %4476 = vmatprep.subr.bf16.mxu0 %v15969_v45  ;;  %v16053_v45 = vld [vmem:[#allocation5 + $0xa14] ss:$8 sps:$4 sm:$0xff]  }
 0x363   :  { %4477 = vmatpush1.bf16.msra.mxu0 %v15967_v46  ;;  %v16051_v46 = vld [vmem:[#allocation5 + $0xa10] ss:$8 sps:$4 sm:$0xff]  }
 0x364   :  { %4478 = vmatprep.subr.bf16.mxu0 %v15972_v47  ;;  %v16056_v47 = vld [vmem:[#allocation5 + $0xa24] ss:$8 sps:$4 sm:$0xff]  }
 0x367   :  { %4479 = vmatpush1.bf16.msra.mxu0 %v15970_v48  ;;  %v16054_v48 = vld [vmem:[#allocation5 + $0xa20] ss:$8 sps:$4 sm:$0xff]  }
 0x368   :  { %4480 = vmatprep.subr.bf16.mxu0 %v15975_v49  ;;  %v16059_v49 = vld [vmem:[#allocation5 + $0xa34] ss:$8 sps:$4 sm:$0xff]  }
 0x36b   :  { %4481 = vmatpush1.bf16.msra.mxu0 %v15973_v50  ;;  %v16057_v50 = vld [vmem:[#allocation5 + $0xa30] ss:$8 sps:$4 sm:$0xff]  }
 0x36c   :  { %4482 = vmatprep.subr.bf16.mxu0 %v15978_v51  ;;  %v16062_v51 = vld [vmem:[#allocation5 + $0xa44] ss:$8 sps:$4 sm:$0xff]  }
 0x36f   :  { %4483 = vmatpush1.bf16.msra.mxu0 %v15976_v52  ;;  %v16060_v52 = vld [vmem:[#allocation5 + $0xa40] ss:$8 sps:$4 sm:$0xff]  }
 0x370   :  { %4484 = vmatprep.subr.bf16.mxu0 %v15981_v53  ;;  %v16065_v53 = vld [vmem:[#allocation5 + $0xa54] ss:$8 sps:$4 sm:$0xff]  }
 0x373   :  { %4485 = vmatpush1.bf16.msra.mxu0 %v15979_v54  ;;  %v16063_v54 = vld [vmem:[#allocation5 + $0xa50] ss:$8 sps:$4 sm:$0xff]  }
 0x374   :  { %4486 = vmatprep.subr.bf16.mxu0 %v15984_v55  ;;  %v16068_v55 = vld [vmem:[#allocation5 + $0xa64] ss:$8 sps:$4 sm:$0xff]  }
 0x377   :  { %4487 = vmatpush1.bf16.msra.mxu0 %v15982_v56  ;;  %v16066_v56 = vld [vmem:[#allocation5 + $0xa60] ss:$8 sps:$4 sm:$0xff]  }
 0x378   :  { %4488 = vmatprep.subr.bf16.mxu0 %v15987_v57  ;;  %v16071_v57 = vld [vmem:[#allocation5 + $0xa74] ss:$8 sps:$4 sm:$0xff]  }
 0x37b   :  { %4489 = vmatpush1.bf16.msra.mxu0 %v15985_v58  ;;  %v16069_v58 = vld [vmem:[#allocation5 + $0xa70] ss:$8 sps:$4 sm:$0xff]  }
 0x37c   :  { %4490 = vmatprep.subr.bf16.mxu0 %v15990_v59  ;;  %v16074_v59 = vld [vmem:[#allocation5 + $0xa84] ss:$8 sps:$4 sm:$0xff]  }
 0x37f   :  { %4491 = vmatpush1.bf16.msra.mxu0 %v15988_v60  ;;  %v16072_v60 = vld [vmem:[#allocation5 + $0xa80] ss:$8 sps:$4 sm:$0xff]  }
 0x380   :  { %4492 = vmatprep.subr.bf16.mxu0 %v15993_v61  ;;  %v16077_v61 = vld [vmem:[#allocation5 + $0xa94] ss:$8 sps:$4 sm:$0xff]  }
 0x383   :  { %4493 = vmatpush1.bf16.msra.mxu0 %v15991_v62  ;;  %v16075_v62 = vld [vmem:[#allocation5 + $0xa90] ss:$8 sps:$4 sm:$0xff]  }
 0x384   :  { %4494 = vmatprep.subr.bf16.mxu0 %v15996_v63  ;;  %v16080_v63 = vld [vmem:[#allocation5 + $0xaa4] ss:$8 sps:$4 sm:$0xff]  }
 0x387   :  { %4495 = vmatpush1.bf16.msra.mxu0 %v15994_v0  ;;  %v16078_v0 = vld [vmem:[#allocation5 + $0xaa0] ss:$8 sps:$4 sm:$0xff]  }
 0x388   :  { %4496 = vmatprep.subr.bf16.mxu0 %v15999_v1  ;;  %v16083_v1 = vld [vmem:[#allocation5 + $0xab4] ss:$8 sps:$4 sm:$0xff]  }
 0x38b   :  { %4497 = vmatpush1.bf16.msra.mxu0 %v15997_v2  ;;  %v16081_v2 = vld [vmem:[#allocation5 + $0xab0] ss:$8 sps:$4 sm:$0xff]  }
 0x38c   :  { %4507 = vmatprep.subr.bf16.mxu0 %v16002_v4  ;;  %v16084_v4 = vld [vmem:[#allocation5 + $0xac0] ss:$8 sps:$4 sm:$0xff]  }
 0x38e   :  { %4499 = vmatmul.mubr.bf16.vlgmr.msra.gmra.mrb[0].mxu0 %v341_v6  ;;  %v16087_v6 = vld [vmem:[#allocation5 + $0xad0] ss:$8 sps:$4 sm:$0xff]  }
 0x38f   :  { %4508 = vmatpush1.bf16.msra.mxu0 %v16000_v7  ;;  %4539 = vmatprep.mubr.bf16.mxu0 %v344_v8  ;;  %v16092_v7 = vld [vmem:[#allocation5 + $0xae4] ss:$8 sps:$4 sm:$0xff]   ;;  %v16090_v8 = vld [vmem:[#allocation5 + $0xae0] ss:$8 sps:$4 sm:$0xff]  }
 0x390   :  { %4509 = vmatprep.subr.bf16.mxu0 %v16005_v9  ;;  %v16095_v9 = vld [vmem:[#allocation5 + $0xaf4] ss:$8 sps:$4 sm:$0xff]  }
 0x393   :  { %4510 = vmatpush1.bf16.msra.mxu0 %v16003_v10  ;;  %v16093_v10 = vld [vmem:[#allocation5 + $0xaf0] ss:$8 sps:$4 sm:$0xff]  }
 0x394   :  { %4511 = vmatprep.subr.bf16.mxu0 %v16008_v11  ;;  %v305_v11 = vld [vmem:[#allocation3 + $0xa0] sm:$0xff] }
 0x397   :  { %4512 = vmatpush1.bf16.msra.mxu0 %v16006_v12  ;;  %v16098_v12 = vld [vmem:[#allocation5 + $0xb04] ss:$8 sps:$4 sm:$0xff]  }
 0x398   :  { %4513 = vmatprep.subr.bf16.mxu0 %v16011_v13  ;;  %v308_v13 = vld [vmem:[#allocation3 + $0xb8] sm:$0xff] }
 0x39b   :  { %4514 = vmatpush1.bf16.msra.mxu0 %v16009_v14  ;;  %v345_v14 = vpack.c.bf16 %v305_v11, %v305_v11  ;;  %v16182_v11 = vld [vmem:[#allocation5 + $0xcc4] ss:$8 sps:$4 sm:$0xff]  }
 0x39c   :  { %4515 = vmatprep.subr.bf16.mxu0 %v16014_v15  ;;  %v16096_v15 = vld [vmem:[#allocation5 + $0xb00] ss:$8 sps:$4 sm:$0xff]  }
 0x39f   :  { %4516 = vmatpush1.bf16.msra.mxu0 %v16012_v16  ;;  %v348_v16 = vpack.c.bf16 %v308_v13, %v308_v13  ;;  %v16185_v13 = vld [vmem:[#allocation5 + $0xcd4] ss:$8 sps:$4 sm:$0xff]  }
 0x3a0   :  { %4517 = vmatprep.subr.bf16.mxu0 %v16017_v17  ;;  %v16101_v17 = vld [vmem:[#allocation5 + $0xb14] ss:$8 sps:$4 sm:$0xff]  }
 0x3a3   :  { %4518 = vmatpush1.bf16.msra.mxu0 %v16015_v18  ;;  %v16099_v18 = vld [vmem:[#allocation5 + $0xb10] ss:$8 sps:$4 sm:$0xff]  }
 0x3a4   :  { %4519 = vmatprep.subr.bf16.mxu0 %v16020_v19  ;;  %v16104_v19 = vld [vmem:[#allocation5 + $0xb24] ss:$8 sps:$4 sm:$0xff]  }
 0x3a7   :  { %4520 = vmatpush1.bf16.msra.mxu0 %v16018_v20  ;;  %v16102_v20 = vld [vmem:[#allocation5 + $0xb20] ss:$8 sps:$4 sm:$0xff]  }
 0x3a8   :  { %4521 = vmatprep.subr.bf16.mxu0 %v16023_v21  ;;  %v16107_v21 = vld [vmem:[#allocation5 + $0xb34] ss:$8 sps:$4 sm:$0xff]  }
 0x3ab   :  { %4522 = vmatpush1.bf16.msra.mxu0 %v16021_v22  ;;  %v16105_v22 = vld [vmem:[#allocation5 + $0xb30] ss:$8 sps:$4 sm:$0xff]  }
 0x3ac   :  { %4523 = vmatprep.subr.bf16.mxu0 %v16026_v23  ;;  %v16110_v23 = vld [vmem:[#allocation5 + $0xb44] ss:$8 sps:$4 sm:$0xff]  }
 0x3af   :  { %4524 = vmatpush1.bf16.msra.mxu0 %v16024_v24  ;;  %v16108_v24 = vld [vmem:[#allocation5 + $0xb40] ss:$8 sps:$4 sm:$0xff]  }
 0x3b0   :  { %4525 = vmatprep.subr.bf16.mxu0 %v16029_v25  ;;  %v16113_v25 = vld [vmem:[#allocation5 + $0xb54] ss:$8 sps:$4 sm:$0xff]  }
 0x3b3   :  { %4526 = vmatpush1.bf16.msra.mxu0 %v16027_v26  ;;  %v16111_v26 = vld [vmem:[#allocation5 + $0xb50] ss:$8 sps:$4 sm:$0xff]  }
 0x3b4   :  { %4527 = vmatprep.subr.bf16.mxu0 %v16032_v27  ;;  %v16116_v27 = vld [vmem:[#allocation5 + $0xb64] ss:$8 sps:$4 sm:$0xff]  }
 0x3b7   :  { %4528 = vmatpush1.bf16.msra.mxu0 %v16030_v28  ;;  %v16114_v28 = vld [vmem:[#allocation5 + $0xb60] ss:$8 sps:$4 sm:$0xff]  }
 0x3b8   :  { %4529 = vmatprep.subr.bf16.mxu0 %v16035_v29  ;;  %v16119_v29 = vld [vmem:[#allocation5 + $0xb74] ss:$8 sps:$4 sm:$0xff]  }
 0x3bb   :  { %4530 = vmatpush1.bf16.msra.mxu0 %v16033_v30  ;;  %v16117_v30 = vld [vmem:[#allocation5 + $0xb70] ss:$8 sps:$4 sm:$0xff]  }
 0x3bc   :  { %4531 = vmatprep.subr.bf16.mxu0 %v16038_v31  ;;  %v16122_v31 = vld [vmem:[#allocation5 + $0xb84] ss:$8 sps:$4 sm:$0xff]  }
 0x3bf   :  { %4532 = vmatpush1.bf16.msra.mxu0 %v16036_v32  ;;  %v16120_v32 = vld [vmem:[#allocation5 + $0xb80] ss:$8 sps:$4 sm:$0xff]  }
 0x3c0   :  { %4533 = vmatprep.subr.bf16.mxu0 %v16041_v33  ;;  %v16125_v33 = vld [vmem:[#allocation5 + $0xb94] ss:$8 sps:$4 sm:$0xff]  }
 0x3c3   :  { %4534 = vmatpush1.bf16.msra.mxu0 %v16039_v34  ;;  %v16123_v34 = vld [vmem:[#allocation5 + $0xb90] ss:$8 sps:$4 sm:$0xff]  }
 0x3c4   :  { %4535 = vmatprep.subr.bf16.mxu0 %v16044_v35  ;;  %v16128_v35 = vld [vmem:[#allocation5 + $0xba4] ss:$8 sps:$4 sm:$0xff]  }
 0x3c7   :  { %4536 = vmatpush1.bf16.msra.mxu0 %v16042_v36  ;;  %v16126_v36 = vld [vmem:[#allocation5 + $0xba0] ss:$8 sps:$4 sm:$0xff]  }
 0x3c8   :  { %4537 = vmatprep.subr.bf16.mxu0 %v16047_v37  ;;  %v16131_v37 = vld [vmem:[#allocation5 + $0xbb4] ss:$8 sps:$4 sm:$0xff]  }
 0x3cb   :  { %4538 = vmatpush1.bf16.msra.mxu0 %v16045_v38  ;;  %v16129_v38 = vld [vmem:[#allocation5 + $0xbb0] ss:$8 sps:$4 sm:$0xff]  }
 0x3cc   :  { %4548 = vmatprep.subr.bf16.mxu0 %v16050_v40  ;;  %v16132_v40 = vld [vmem:[#allocation5 + $0xbc0] ss:$8 sps:$4 sm:$0xff]  }
 0x3ce   :  { %4540 = vmatmul.mubr.bf16.vlgmr.msra.gmra.mrb[0].mxu0 %v343_v42  ;;  %v16135_v42 = vld [vmem:[#allocation5 + $0xbd0] ss:$8 sps:$4 sm:$0xff]  }
 0x3cf   :  { %4549 = vmatpush1.bf16.msra.mxu0 %v16048_v43  ;;  %4580 = vmatprep.mubr.bf16.mxu0 %v346_v44  ;;  %v16140_v43 = vld [vmem:[#allocation5 + $0xbe4] ss:$8 sps:$4 sm:$0xff]   ;;  %v16138_v44 = vld [vmem:[#allocation5 + $0xbe0] ss:$8 sps:$4 sm:$0xff]  }
 0x3d0   :  { %4550 = vmatprep.subr.bf16.mxu0 %v16053_v45  ;;  %v16143_v45 = vld [vmem:[#allocation5 + $0xbf4] ss:$8 sps:$4 sm:$0xff]  }
 0x3d3   :  { %4551 = vmatpush1.bf16.msra.mxu0 %v16051_v46  ;;  %v16141_v46 = vld [vmem:[#allocation5 + $0xbf0] ss:$8 sps:$4 sm:$0xff]  }
 0x3d4   :  { %4552 = vmatprep.subr.bf16.mxu0 %v16056_v47  ;;  %v307_v47 = vld [vmem:[#allocation3 + $0xb0] sm:$0xff] }
 0x3d7   :  { %4553 = vmatpush1.bf16.msra.mxu0 %v16054_v48  ;;  %v16146_v48 = vld [vmem:[#allocation5 + $0xc04] ss:$8 sps:$4 sm:$0xff]  }
 0x3d8   :  { %4554 = vmatprep.subr.bf16.mxu0 %v16059_v49  ;;  %v310_v49 = vld [vmem:[#allocation3 + $0xc8] sm:$0xff] }
 0x3db   :  { %4555 = vmatpush1.bf16.msra.mxu0 %v16057_v50  ;;  %v347_v50 = vpack.c.bf16 %v307_v47, %v307_v47  ;;  %v16230_v47 = vld [vmem:[#allocation5 + $0xdc4] ss:$8 sps:$4 sm:$0xff]  }
 0x3dc   :  { %4556 = vmatprep.subr.bf16.mxu0 %v16062_v51  ;;  %v16144_v51 = vld [vmem:[#allocation5 + $0xc00] ss:$8 sps:$4 sm:$0xff]  }
 0x3df   :  { %4557 = vmatpush1.bf16.msra.mxu0 %v16060_v52  ;;  %v350_v52 = vpack.c.bf16 %v310_v49, %v310_v49  ;;  %v16233_v49 = vld [vmem:[#allocation5 + $0xdd4] ss:$8 sps:$4 sm:$0xff]  }
 0x3e0   :  { %4558 = vmatprep.subr.bf16.mxu0 %v16065_v53  ;;  %v16149_v53 = vld [vmem:[#allocation5 + $0xc14] ss:$8 sps:$4 sm:$0xff]  }
 0x3e3   :  { %4559 = vmatpush1.bf16.msra.mxu0 %v16063_v54  ;;  %v16147_v54 = vld [vmem:[#allocation5 + $0xc10] ss:$8 sps:$4 sm:$0xff]  }
 0x3e4   :  { %4560 = vmatprep.subr.bf16.mxu0 %v16068_v55  ;;  %v16152_v55 = vld [vmem:[#allocation5 + $0xc24] ss:$8 sps:$4 sm:$0xff]  }
 0x3e7   :  { %4561 = vmatpush1.bf16.msra.mxu0 %v16066_v56  ;;  %v16150_v56 = vld [vmem:[#allocation5 + $0xc20] ss:$8 sps:$4 sm:$0xff]  }
 0x3e8   :  { %4562 = vmatprep.subr.bf16.mxu0 %v16071_v57  ;;  %v16155_v57 = vld [vmem:[#allocation5 + $0xc34] ss:$8 sps:$4 sm:$0xff]  }
 0x3eb   :  { %4563 = vmatpush1.bf16.msra.mxu0 %v16069_v58  ;;  %v16153_v58 = vld [vmem:[#allocation5 + $0xc30] ss:$8 sps:$4 sm:$0xff]  }
 0x3ec   :  { %4564 = vmatprep.subr.bf16.mxu0 %v16074_v59  ;;  %v16158_v59 = vld [vmem:[#allocation5 + $0xc44] ss:$8 sps:$4 sm:$0xff]  }
 0x3ef   :  { %4565 = vmatpush1.bf16.msra.mxu0 %v16072_v60  ;;  %v16156_v60 = vld [vmem:[#allocation5 + $0xc40] ss:$8 sps:$4 sm:$0xff]  }
 0x3f0   :  { %4566 = vmatprep.subr.bf16.mxu0 %v16077_v61  ;;  %v16161_v61 = vld [vmem:[#allocation5 + $0xc54] ss:$8 sps:$4 sm:$0xff]  }
 0x3f3   :  { %4567 = vmatpush1.bf16.msra.mxu0 %v16075_v62  ;;  %v16159_v62 = vld [vmem:[#allocation5 + $0xc50] ss:$8 sps:$4 sm:$0xff]  }
 0x3f4   :  { %4568 = vmatprep.subr.bf16.mxu0 %v16080_v63  ;;  %v16164_v63 = vld [vmem:[#allocation5 + $0xc64] ss:$8 sps:$4 sm:$0xff]  }
 0x3f7   :  { %4569 = vmatpush1.bf16.msra.mxu0 %v16078_v0  ;;  %v16162_v0 = vld [vmem:[#allocation5 + $0xc60] ss:$8 sps:$4 sm:$0xff]  }
 0x3f8   :  { %4570 = vmatprep.subr.bf16.mxu0 %v16083_v1  ;;  %v16167_v1 = vld [vmem:[#allocation5 + $0xc74] ss:$8 sps:$4 sm:$0xff]  }
 0x3fb   :  { %4571 = vmatpush1.bf16.msra.mxu0 %v16081_v2  ;;  %v16165_v2 = vld [vmem:[#allocation5 + $0xc70] ss:$8 sps:$4 sm:$0xff]  }
 0x3fc   :  { %4572 = vmatprep.subr.bf16.mxu0 %v16086_v3  ;;  %v16170_v3 = vld [vmem:[#allocation5 + $0xc84] ss:$8 sps:$4 sm:$0xff]  }
 0x3ff   :  { %4573 = vmatpush1.bf16.msra.mxu0 %v16084_v4  ;;  %v16168_v4 = vld [vmem:[#allocation5 + $0xc80] ss:$8 sps:$4 sm:$0xff]  }
 0x400   :  { %4574 = vmatprep.subr.bf16.mxu0 %v16089_v5  ;;  %v16173_v5 = vld [vmem:[#allocation5 + $0xc94] ss:$8 sps:$4 sm:$0xff]  }
 0x403   :  { %4575 = vmatpush1.bf16.msra.mxu0 %v16087_v6  ;;  %v16171_v6 = vld [vmem:[#allocation5 + $0xc90] ss:$8 sps:$4 sm:$0xff]  }
 0x404   :  { %4576 = vmatprep.subr.bf16.mxu0 %v16092_v7  ;;  %v16176_v7 = vld [vmem:[#allocation5 + $0xca4] ss:$8 sps:$4 sm:$0xff]  }
 0x407   :  { %4577 = vmatpush1.bf16.msra.mxu0 %v16090_v8  ;;  %v16174_v8 = vld [vmem:[#allocation5 + $0xca0] ss:$8 sps:$4 sm:$0xff]  }
 0x408   :  { %4578 = vmatprep.subr.bf16.mxu0 %v16095_v9  ;;  %v16179_v9 = vld [vmem:[#allocation5 + $0xcb4] ss:$8 sps:$4 sm:$0xff]  }
 0x40b   :  { %4579 = vmatpush1.bf16.msra.mxu0 %v16093_v10  ;;  %v16177_v10 = vld [vmem:[#allocation5 + $0xcb0] ss:$8 sps:$4 sm:$0xff]  }
 0x40c   :  { %4589 = vmatprep.subr.bf16.mxu0 %v16098_v12  ;;  %v16180_v12 = vld [vmem:[#allocation5 + $0xcc0] ss:$8 sps:$4 sm:$0xff]  }
 0x40e   :  { %4581 = vmatmul.mubr.bf16.vlgmr.msra.gmra.mrb[0].mxu0 %v345_v14  ;;  %v16183_v14 = vld [vmem:[#allocation5 + $0xcd0] ss:$8 sps:$4 sm:$0xff]  }
 0x40f   :  { %4590 = vmatpush1.bf16.msra.mxu0 %v16096_v15  ;;  %4621 = vmatprep.mubr.bf16.mxu0 %v348_v16  ;;  %v16188_v15 = vld [vmem:[#allocation5 + $0xce4] ss:$8 sps:$4 sm:$0xff]   ;;  %v16186_v16 = vld [vmem:[#allocation5 + $0xce0] ss:$8 sps:$4 sm:$0xff]  }
 0x410   :  { %4591 = vmatprep.subr.bf16.mxu0 %v16101_v17  ;;  %v16191_v17 = vld [vmem:[#allocation5 + $0xcf4] ss:$8 sps:$4 sm:$0xff]  }
 0x413   :  { %4592 = vmatpush1.bf16.msra.mxu0 %v16099_v18  ;;  %v16189_v18 = vld [vmem:[#allocation5 + $0xcf0] ss:$8 sps:$4 sm:$0xff]  }
 0x414   :  { %4593 = vmatprep.subr.bf16.mxu0 %v16104_v19  ;;  %v309_v19 = vld [vmem:[#allocation3 + $0xc0] sm:$0xff] }
 0x417   :  { %4594 = vmatpush1.bf16.msra.mxu0 %v16102_v20  ;;  %v16194_v20 = vld [vmem:[#allocation5 + $0xd04] ss:$8 sps:$4 sm:$0xff]  }
 0x418   :  { %4595 = vmatprep.subr.bf16.mxu0 %v16107_v21  ;;  %v312_v21 = vld [vmem:[#allocation3 + $0xd8] sm:$0xff] }
 0x41b   :  { %4596 = vmatpush1.bf16.msra.mxu0 %v16105_v22  ;;  %v349_v22 = vpack.c.bf16 %v309_v19, %v309_v19  ;;  %v16278_v19 = vld [vmem:[#allocation5 + $0xec4] ss:$8 sps:$4 sm:$0xff]  }
 0x41c   :  { %4597 = vmatprep.subr.bf16.mxu0 %v16110_v23  ;;  %v16192_v23 = vld [vmem:[#allocation5 + $0xd00] ss:$8 sps:$4 sm:$0xff]  }
 0x41f   :  { %4598 = vmatpush1.bf16.msra.mxu0 %v16108_v24  ;;  %v352_v24 = vpack.c.bf16 %v312_v21, %v312_v21  ;;  %v16281_v21 = vld [vmem:[#allocation5 + $0xed4] ss:$8 sps:$4 sm:$0xff]  }
 0x420   :  { %4599 = vmatprep.subr.bf16.mxu0 %v16113_v25  ;;  %v16197_v25 = vld [vmem:[#allocation5 + $0xd14] ss:$8 sps:$4 sm:$0xff]  }
 0x423   :  { %4600 = vmatpush1.bf16.msra.mxu0 %v16111_v26  ;;  %v16195_v26 = vld [vmem:[#allocation5 + $0xd10] ss:$8 sps:$4 sm:$0xff]  }
 0x424   :  { %4601 = vmatprep.subr.bf16.mxu0 %v16116_v27  ;;  %v16200_v27 = vld [vmem:[#allocation5 + $0xd24] ss:$8 sps:$4 sm:$0xff]  }
 0x427   :  { %4602 = vmatpush1.bf16.msra.mxu0 %v16114_v28  ;;  %v16198_v28 = vld [vmem:[#allocation5 + $0xd20] ss:$8 sps:$4 sm:$0xff]  }
 0x428   :  { %4603 = vmatprep.subr.bf16.mxu0 %v16119_v29  ;;  %v16203_v29 = vld [vmem:[#allocation5 + $0xd34] ss:$8 sps:$4 sm:$0xff]  }
 0x42b   :  { %4604 = vmatpush1.bf16.msra.mxu0 %v16117_v30  ;;  %v16201_v30 = vld [vmem:[#allocation5 + $0xd30] ss:$8 sps:$4 sm:$0xff]  }
 0x42c   :  { %4605 = vmatprep.subr.bf16.mxu0 %v16122_v31  ;;  %v16206_v31 = vld [vmem:[#allocation5 + $0xd44] ss:$8 sps:$4 sm:$0xff]  }
 0x42f   :  { %4606 = vmatpush1.bf16.msra.mxu0 %v16120_v32  ;;  %v16204_v32 = vld [vmem:[#allocation5 + $0xd40] ss:$8 sps:$4 sm:$0xff]  }
 0x430   :  { %4607 = vmatprep.subr.bf16.mxu0 %v16125_v33  ;;  %v16209_v33 = vld [vmem:[#allocation5 + $0xd54] ss:$8 sps:$4 sm:$0xff]  }
 0x433   :  { %4608 = vmatpush1.bf16.msra.mxu0 %v16123_v34  ;;  %v16207_v34 = vld [vmem:[#allocation5 + $0xd50] ss:$8 sps:$4 sm:$0xff]  }
 0x434   :  { %4609 = vmatprep.subr.bf16.mxu0 %v16128_v35  ;;  %v16212_v35 = vld [vmem:[#allocation5 + $0xd64] ss:$8 sps:$4 sm:$0xff]  }
 0x437   :  { %4610 = vmatpush1.bf16.msra.mxu0 %v16126_v36  ;;  %v16210_v36 = vld [vmem:[#allocation5 + $0xd60] ss:$8 sps:$4 sm:$0xff]  }
 0x438   :  { %4611 = vmatprep.subr.bf16.mxu0 %v16131_v37  ;;  %v16215_v37 = vld [vmem:[#allocation5 + $0xd74] ss:$8 sps:$4 sm:$0xff]  }
 0x43b   :  { %4612 = vmatpush1.bf16.msra.mxu0 %v16129_v38  ;;  %v16213_v38 = vld [vmem:[#allocation5 + $0xd70] ss:$8 sps:$4 sm:$0xff]  }
 0x43c   :  { %4613 = vmatprep.subr.bf16.mxu0 %v16134_v39  ;;  %v16218_v39 = vld [vmem:[#allocation5 + $0xd84] ss:$8 sps:$4 sm:$0xff]  }
 0x43f   :  { %4614 = vmatpush1.bf16.msra.mxu0 %v16132_v40  ;;  %v16216_v40 = vld [vmem:[#allocation5 + $0xd80] ss:$8 sps:$4 sm:$0xff]  }
 0x440   :  { %4615 = vmatprep.subr.bf16.mxu0 %v16137_v41  ;;  %v16221_v41 = vld [vmem:[#allocation5 + $0xd94] ss:$8 sps:$4 sm:$0xff]  }
 0x443   :  { %4616 = vmatpush1.bf16.msra.mxu0 %v16135_v42  ;;  %v16219_v42 = vld [vmem:[#allocation5 + $0xd90] ss:$8 sps:$4 sm:$0xff]  }
 0x444   :  { %4617 = vmatprep.subr.bf16.mxu0 %v16140_v43  ;;  %v16224_v43 = vld [vmem:[#allocation5 + $0xda4] ss:$8 sps:$4 sm:$0xff]  }
 0x447   :  { %4618 = vmatpush1.bf16.msra.mxu0 %v16138_v44  ;;  %v16222_v44 = vld [vmem:[#allocation5 + $0xda0] ss:$8 sps:$4 sm:$0xff]  }
 0x448   :  { %4619 = vmatprep.subr.bf16.mxu0 %v16143_v45  ;;  %v16227_v45 = vld [vmem:[#allocation5 + $0xdb4] ss:$8 sps:$4 sm:$0xff]  }
 0x44b   :  { %4620 = vmatpush1.bf16.msra.mxu0 %v16141_v46  ;;  %v16225_v46 = vld [vmem:[#allocation5 + $0xdb0] ss:$8 sps:$4 sm:$0xff]  }
 0x44c   :  { %4630 = vmatprep.subr.bf16.mxu0 %v16146_v48  ;;  %v16228_v48 = vld [vmem:[#allocation5 + $0xdc0] ss:$8 sps:$4 sm:$0xff]  }
 0x44e   :  { %4622 = vmatmul.mubr.bf16.vlgmr.msra.gmra.mrb[0].mxu0 %v347_v50  ;;  %v16231_v50 = vld [vmem:[#allocation5 + $0xdd0] ss:$8 sps:$4 sm:$0xff]  }
 0x44f   :  { %4631 = vmatpush1.bf16.msra.mxu0 %v16144_v51  ;;  %4662 = vmatprep.mubr.bf16.mxu0 %v350_v52  ;;  %v16236_v51 = vld [vmem:[#allocation5 + $0xde4] ss:$8 sps:$4 sm:$0xff]   ;;  %v16234_v52 = vld [vmem:[#allocation5 + $0xde0] ss:$8 sps:$4 sm:$0xff]  }
 0x450   :  { %4632 = vmatprep.subr.bf16.mxu0 %v16149_v53  ;;  %v16239_v53 = vld [vmem:[#allocation5 + $0xdf4] ss:$8 sps:$4 sm:$0xff]  }
 0x453   :  { %4633 = vmatpush1.bf16.msra.mxu0 %v16147_v54  ;;  %v16237_v54 = vld [vmem:[#allocation5 + $0xdf0] ss:$8 sps:$4 sm:$0xff]  }
 0x454   :  { %4634 = vmatprep.subr.bf16.mxu0 %v16152_v55  ;;  %v311_v55 = vld [vmem:[#allocation3 + $0xd0] sm:$0xff] }
 0x457   :  { %4635 = vmatpush1.bf16.msra.mxu0 %v16150_v56  ;;  %v16242_v56 = vld [vmem:[#allocation5 + $0xe04] ss:$8 sps:$4 sm:$0xff]  }
 0x458   :  { %4636 = vmatprep.subr.bf16.mxu0 %v16155_v57  ;;  %v314_v57 = vld [vmem:[#allocation3 + $0xe8] sm:$0xff] }
 0x45b   :  { %4637 = vmatpush1.bf16.msra.mxu0 %v16153_v58  ;;  %v351_v58 = vpack.c.bf16 %v311_v55, %v311_v55  ;;  %v16326_v55 = vld [vmem:[#allocation5 + $0xfc4] ss:$8 sps:$4 sm:$0xff]  }
 0x45c   :  { %4638 = vmatprep.subr.bf16.mxu0 %v16158_v59  ;;  %v16240_v59 = vld [vmem:[#allocation5 + $0xe00] ss:$8 sps:$4 sm:$0xff]  }
 0x45f   :  { %4639 = vmatpush1.bf16.msra.mxu0 %v16156_v60  ;;  %v354_v60 = vpack.c.bf16 %v314_v57, %v314_v57  ;;  %v16329_v57 = vld [vmem:[#allocation5 + $0xfd4] ss:$8 sps:$4 sm:$0xff]  }
 0x460   :  { %4640 = vmatprep.subr.bf16.mxu0 %v16161_v61  ;;  %v16245_v61 = vld [vmem:[#allocation5 + $0xe14] ss:$8 sps:$4 sm:$0xff]  }
 0x463   :  { %4641 = vmatpush1.bf16.msra.mxu0 %v16159_v62  ;;  %v16243_v62 = vld [vmem:[#allocation5 + $0xe10] ss:$8 sps:$4 sm:$0xff]  }
 0x464   :  { %4642 = vmatprep.subr.bf16.mxu0 %v16164_v63  ;;  %v16248_v63 = vld [vmem:[#allocation5 + $0xe24] ss:$8 sps:$4 sm:$0xff]  }
 0x467   :  { %4643 = vmatpush1.bf16.msra.mxu0 %v16162_v0  ;;  %v16246_v0 = vld [vmem:[#allocation5 + $0xe20] ss:$8 sps:$4 sm:$0xff]  }
 0x468   :  { %4644 = vmatprep.subr.bf16.mxu0 %v16167_v1  ;;  %v16251_v1 = vld [vmem:[#allocation5 + $0xe34] ss:$8 sps:$4 sm:$0xff]  }
 0x46b   :  { %4645 = vmatpush1.bf16.msra.mxu0 %v16165_v2  ;;  %v16249_v2 = vld [vmem:[#allocation5 + $0xe30] ss:$8 sps:$4 sm:$0xff]  }
 0x46c   :  { %4646 = vmatprep.subr.bf16.mxu0 %v16170_v3  ;;  %v16254_v3 = vld [vmem:[#allocation5 + $0xe44] ss:$8 sps:$4 sm:$0xff]  }
 0x46f   :  { %4647 = vmatpush1.bf16.msra.mxu0 %v16168_v4  ;;  %v16252_v4 = vld [vmem:[#allocation5 + $0xe40] ss:$8 sps:$4 sm:$0xff]  }
 0x470   :  { %4648 = vmatprep.subr.bf16.mxu0 %v16173_v5  ;;  %v16257_v5 = vld [vmem:[#allocation5 + $0xe54] ss:$8 sps:$4 sm:$0xff]  }
 0x473   :  { %4649 = vmatpush1.bf16.msra.mxu0 %v16171_v6  ;;  %v16255_v6 = vld [vmem:[#allocation5 + $0xe50] ss:$8 sps:$4 sm:$0xff]  }
 0x474   :  { %4650 = vmatprep.subr.bf16.mxu0 %v16176_v7  ;;  %v16260_v7 = vld [vmem:[#allocation5 + $0xe64] ss:$8 sps:$4 sm:$0xff]  }
 0x477   :  { %4651 = vmatpush1.bf16.msra.mxu0 %v16174_v8  ;;  %v16258_v8 = vld [vmem:[#allocation5 + $0xe60] ss:$8 sps:$4 sm:$0xff]  }
 0x478   :  { %4652 = vmatprep.subr.bf16.mxu0 %v16179_v9  ;;  %v16263_v9 = vld [vmem:[#allocation5 + $0xe74] ss:$8 sps:$4 sm:$0xff]  }
 0x47b   :  { %4653 = vmatpush1.bf16.msra.mxu0 %v16177_v10  ;;  %v16261_v10 = vld [vmem:[#allocation5 + $0xe70] ss:$8 sps:$4 sm:$0xff]  }
 0x47c   :  { %4654 = vmatprep.subr.bf16.mxu0 %v16182_v11  ;;  %v16266_v11 = vld [vmem:[#allocation5 + $0xe84] ss:$8 sps:$4 sm:$0xff]  }
 0x47f   :  { %4655 = vmatpush1.bf16.msra.mxu0 %v16180_v12  ;;  %v16264_v12 = vld [vmem:[#allocation5 + $0xe80] ss:$8 sps:$4 sm:$0xff]  }
 0x480   :  { %4656 = vmatprep.subr.bf16.mxu0 %v16185_v13  ;;  %v16269_v13 = vld [vmem:[#allocation5 + $0xe94] ss:$8 sps:$4 sm:$0xff]  }
 0x483   :  { %4657 = vmatpush1.bf16.msra.mxu0 %v16183_v14  ;;  %v16267_v14 = vld [vmem:[#allocation5 + $0xe90] ss:$8 sps:$4 sm:$0xff]  }
 0x484   :  { %4658 = vmatprep.subr.bf16.mxu0 %v16188_v15  ;;  %v16272_v15 = vld [vmem:[#allocation5 + $0xea4] ss:$8 sps:$4 sm:$0xff]  }
 0x487   :  { %4659 = vmatpush1.bf16.msra.mxu0 %v16186_v16  ;;  %v16270_v16 = vld [vmem:[#allocation5 + $0xea0] ss:$8 sps:$4 sm:$0xff]  }
 0x488   :  { %4660 = vmatprep.subr.bf16.mxu0 %v16191_v17  ;;  %v16275_v17 = vld [vmem:[#allocation5 + $0xeb4] ss:$8 sps:$4 sm:$0xff]  }
 0x48b   :  { %4661 = vmatpush1.bf16.msra.mxu0 %v16189_v18  ;;  %v16273_v18 = vld [vmem:[#allocation5 + $0xeb0] ss:$8 sps:$4 sm:$0xff]  }
 0x48c   :  { %4671 = vmatprep.subr.bf16.mxu0 %v16194_v20  ;;  %v16276_v20 = vld [vmem:[#allocation5 + $0xec0] ss:$8 sps:$4 sm:$0xff]  }
 0x48e   :  { %4663 = vmatmul.mubr.bf16.vlgmr.msra.gmra.mrb[0].mxu0 %v349_v22  ;;  %v16279_v22 = vld [vmem:[#allocation5 + $0xed0] ss:$8 sps:$4 sm:$0xff]  }
 0x48f   :  { %4672 = vmatpush1.bf16.msra.mxu0 %v16192_v23  ;;  %4703 = vmatprep.mubr.bf16.mxu0 %v352_v24  ;;  %v16284_v23 = vld [vmem:[#allocation5 + $0xee4] ss:$8 sps:$4 sm:$0xff]   ;;  %v16282_v24 = vld [vmem:[#allocation5 + $0xee0] ss:$8 sps:$4 sm:$0xff]  }
 0x490   :  { %4673 = vmatprep.subr.bf16.mxu0 %v16197_v25  ;;  %v16287_v25 = vld [vmem:[#allocation5 + $0xef4] ss:$8 sps:$4 sm:$0xff]  }
 0x493   :  { %4674 = vmatpush1.bf16.msra.mxu0 %v16195_v26  ;;  %v16285_v26 = vld [vmem:[#allocation5 + $0xef0] ss:$8 sps:$4 sm:$0xff]  }
 0x494   :  { %4675 = vmatprep.subr.bf16.mxu0 %v16200_v27  ;;  %v313_v27 = vld [vmem:[#allocation3 + $0xe0] sm:$0xff] }
 0x497   :  { %4676 = vmatpush1.bf16.msra.mxu0 %v16198_v28  ;;  %v16290_v28 = vld [vmem:[#allocation5 + $0xf04] ss:$8 sps:$4 sm:$0xff]  }
 0x498   :  { %4677 = vmatprep.subr.bf16.mxu0 %v16203_v29  ;;  %v316_v29 = vld [vmem:[#allocation3 + $0xf8] sm:$0xff] }
 0x49b   :  { %4678 = vmatpush1.bf16.msra.mxu0 %v16201_v30  ;;  %v353_v30 = vpack.c.bf16 %v313_v27, %v313_v27  ;;  %v16374_v27 = vld [vmem:[#allocation5 + $0x10c4] ss:$8 sps:$4 sm:$0xff]  }
 0x49c   :  { %4679 = vmatprep.subr.bf16.mxu0 %v16206_v31  ;;  %v16288_v31 = vld [vmem:[#allocation5 + $0xf00] ss:$8 sps:$4 sm:$0xff]  }
 0x49f   :  { %4680 = vmatpush1.bf16.msra.mxu0 %v16204_v32  ;;  %v356_v32 = vpack.c.bf16 %v316_v29, %v316_v29  ;;  %v16377_v29 = vld [vmem:[#allocation5 + $0x10d4] ss:$8 sps:$4 sm:$0xff]  }
 0x4a0   :  { %4681 = vmatprep.subr.bf16.mxu0 %v16209_v33  ;;  %v16293_v33 = vld [vmem:[#allocation5 + $0xf14] ss:$8 sps:$4 sm:$0xff]  }
 0x4a3   :  { %4682 = vmatpush1.bf16.msra.mxu0 %v16207_v34  ;;  %v16291_v34 = vld [vmem:[#allocation5 + $0xf10] ss:$8 sps:$4 sm:$0xff]  }
 0x4a4   :  { %4683 = vmatprep.subr.bf16.mxu0 %v16212_v35  ;;  %v16296_v35 = vld [vmem:[#allocation5 + $0xf24] ss:$8 sps:$4 sm:$0xff]  }
 0x4a7   :  { %4684 = vmatpush1.bf16.msra.mxu0 %v16210_v36  ;;  %v16294_v36 = vld [vmem:[#allocation5 + $0xf20] ss:$8 sps:$4 sm:$0xff]  }
 0x4a8   :  { %4685 = vmatprep.subr.bf16.mxu0 %v16215_v37  ;;  %v16299_v37 = vld [vmem:[#allocation5 + $0xf34] ss:$8 sps:$4 sm:$0xff]  }
 0x4ab   :  { %4686 = vmatpush1.bf16.msra.mxu0 %v16213_v38  ;;  %v16297_v38 = vld [vmem:[#allocation5 + $0xf30] ss:$8 sps:$4 sm:$0xff]  }
 0x4ac   :  { %4687 = vmatprep.subr.bf16.mxu0 %v16218_v39  ;;  %v16302_v39 = vld [vmem:[#allocation5 + $0xf44] ss:$8 sps:$4 sm:$0xff]  }
 0x4af   :  { %4688 = vmatpush1.bf16.msra.mxu0 %v16216_v40  ;;  %v16300_v40 = vld [vmem:[#allocation5 + $0xf40] ss:$8 sps:$4 sm:$0xff]  }
 0x4b0   :  { %4689 = vmatprep.subr.bf16.mxu0 %v16221_v41  ;;  %v16305_v41 = vld [vmem:[#allocation5 + $0xf54] ss:$8 sps:$4 sm:$0xff]  }
 0x4b3   :  { %4690 = vmatpush1.bf16.msra.mxu0 %v16219_v42  ;;  %v16303_v42 = vld [vmem:[#allocation5 + $0xf50] ss:$8 sps:$4 sm:$0xff]  }
 0x4b4   :  { %4691 = vmatprep.subr.bf16.mxu0 %v16224_v43  ;;  %v16308_v43 = vld [vmem:[#allocation5 + $0xf64] ss:$8 sps:$4 sm:$0xff]  }
 0x4b7   :  { %4692 = vmatpush1.bf16.msra.mxu0 %v16222_v44  ;;  %v16306_v44 = vld [vmem:[#allocation5 + $0xf60] ss:$8 sps:$4 sm:$0xff]  }
 0x4b8   :  { %4693 = vmatprep.subr.bf16.mxu0 %v16227_v45  ;;  %v16311_v45 = vld [vmem:[#allocation5 + $0xf74] ss:$8 sps:$4 sm:$0xff]  }
 0x4bb   :  { %4694 = vmatpush1.bf16.msra.mxu0 %v16225_v46  ;;  %v16309_v46 = vld [vmem:[#allocation5 + $0xf70] ss:$8 sps:$4 sm:$0xff]  }
 0x4bc   :  { %4695 = vmatprep.subr.bf16.mxu0 %v16230_v47  ;;  %v16314_v47 = vld [vmem:[#allocation5 + $0xf84] ss:$8 sps:$4 sm:$0xff]  }
 0x4bf   :  { %4696 = vmatpush1.bf16.msra.mxu0 %v16228_v48  ;;  %v16312_v48 = vld [vmem:[#allocation5 + $0xf80] ss:$8 sps:$4 sm:$0xff]  }
 0x4c0   :  { %4697 = vmatprep.subr.bf16.mxu0 %v16233_v49  ;;  %v16317_v49 = vld [vmem:[#allocation5 + $0xf94] ss:$8 sps:$4 sm:$0xff]  }
 0x4c3   :  { %4698 = vmatpush1.bf16.msra.mxu0 %v16231_v50  ;;  %v16315_v50 = vld [vmem:[#allocation5 + $0xf90] ss:$8 sps:$4 sm:$0xff]  }
 0x4c4   :  { %4699 = vmatprep.subr.bf16.mxu0 %v16236_v51  ;;  %v16320_v51 = vld [vmem:[#allocation5 + $0xfa4] ss:$8 sps:$4 sm:$0xff]  }
 0x4c7   :  { %4700 = vmatpush1.bf16.msra.mxu0 %v16234_v52  ;;  %v16318_v52 = vld [vmem:[#allocation5 + $0xfa0] ss:$8 sps:$4 sm:$0xff]  }
 0x4c8   :  { %4701 = vmatprep.subr.bf16.mxu0 %v16239_v53  ;;  %v16323_v53 = vld [vmem:[#allocation5 + $0xfb4] ss:$8 sps:$4 sm:$0xff]  }
 0x4cb   :  { %4702 = vmatpush1.bf16.msra.mxu0 %v16237_v54  ;;  %v16321_v54 = vld [vmem:[#allocation5 + $0xfb0] ss:$8 sps:$4 sm:$0xff]  }
 0x4cc   :  { %4712 = vmatprep.subr.bf16.mxu0 %v16242_v56  ;;  %v16324_v56 = vld [vmem:[#allocation5 + $0xfc0] ss:$8 sps:$4 sm:$0xff]  }
 0x4ce   :  { %4704 = vmatmul.mubr.bf16.vlgmr.msra.gmra.mrb[0].mxu0 %v351_v58  ;;  %v16327_v58 = vld [vmem:[#allocation5 + $0xfd0] ss:$8 sps:$4 sm:$0xff]  }
 0x4cf   :  { %4713 = vmatpush1.bf16.msra.mxu0 %v16240_v59  ;;  %4744 = vmatprep.mubr.bf16.mxu0 %v354_v60  ;;  %v16332_v59 = vld [vmem:[#allocation5 + $0xfe4] ss:$8 sps:$4 sm:$0xff]   ;;  %v16330_v60 = vld [vmem:[#allocation5 + $0xfe0] ss:$8 sps:$4 sm:$0xff]  }
 0x4d0   :  { %4714 = vmatprep.subr.bf16.mxu0 %v16245_v61  ;;  %v16335_v61 = vld [vmem:[#allocation5 + $0xff4] ss:$8 sps:$4 sm:$0xff]  }
 0x4d3   :  { %4715 = vmatpush1.bf16.msra.mxu0 %v16243_v62  ;;  %v16333_v62 = vld [vmem:[#allocation5 + $0xff0] ss:$8 sps:$4 sm:$0xff]  }
 0x4d4   :  { %4716 = vmatprep.subr.bf16.mxu0 %v16248_v63  ;;  %v315_v63 = vld [vmem:[#allocation3 + $0xf0] sm:$0xff] }
 0x4d7   :  { %4717 = vmatpush1.bf16.msra.mxu0 %v16246_v0  ;;  %v16338_v0 = vld [vmem:[#allocation5 + $0x1004] ss:$8 sps:$4 sm:$0xff]  }
 0x4d8   :  { %4718 = vmatprep.subr.bf16.mxu0 %v16251_v1  ;;  %v318_v1 = vld [vmem:[#allocation3 + $0x108] sm:$0xff] }
 0x4db   :  { %4719 = vmatpush1.bf16.msra.mxu0 %v16249_v2  ;;  %v355_v2 = vpack.c.bf16 %v315_v63, %v315_v63  ;;  %v16414_v63 = vld [vmem:[#allocation5 + $0x11a0] ss:$8 sps:$4 sm:$0xff]  }
 0x4dc   :  { %4720 = vmatprep.subr.bf16.mxu0 %v16254_v3  ;;  %v16336_v3 = vld [vmem:[#allocation5 + $0x1000] ss:$8 sps:$4 sm:$0xff]  }
 0x4df   :  { %4721 = vmatpush1.bf16.msra.mxu0 %v16252_v4  ;;  %v358_v4 = vpack.c.bf16 %v318_v1, %v318_v1  ;;  %v16511_v1 = vld [vmem:[#allocation8 + $0x10] ss:$8 sps:$4 sm:$0xff]  }
 0x4e0   :  { %4722 = vmatprep.subr.bf16.mxu0 %v16257_v5  ;;  %v16341_v5 = vld [vmem:[#allocation5 + $0x1014] ss:$8 sps:$4 sm:$0xff]  }
 0x4e3   :  { %4723 = vmatpush1.bf16.msra.mxu0 %v16255_v6  ;;  %v16339_v6 = vld [vmem:[#allocation5 + $0x1010] ss:$8 sps:$4 sm:$0xff]  }
 0x4e4   :  { %4724 = vmatprep.subr.bf16.mxu0 %v16260_v7  ;;  %v16344_v7 = vld [vmem:[#allocation5 + $0x1024] ss:$8 sps:$4 sm:$0xff]  }
 0x4e7   :  { %4725 = vmatpush1.bf16.msra.mxu0 %v16258_v8  ;;  %v16342_v8 = vld [vmem:[#allocation5 + $0x1020] ss:$8 sps:$4 sm:$0xff]  }
 0x4e8   :  { %4726 = vmatprep.subr.bf16.mxu0 %v16263_v9  ;;  %v16347_v9 = vld [vmem:[#allocation5 + $0x1034] ss:$8 sps:$4 sm:$0xff]  }
 0x4eb   :  { %4727 = vmatpush1.bf16.msra.mxu0 %v16261_v10  ;;  %v16345_v10 = vld [vmem:[#allocation5 + $0x1030] ss:$8 sps:$4 sm:$0xff]  }
 0x4ec   :  { %4728 = vmatprep.subr.bf16.mxu0 %v16266_v11  ;;  %v16350_v11 = vld [vmem:[#allocation5 + $0x1044] ss:$8 sps:$4 sm:$0xff]  }
 0x4ef   :  { %4729 = vmatpush1.bf16.msra.mxu0 %v16264_v12  ;;  %v16348_v12 = vld [vmem:[#allocation5 + $0x1040] ss:$8 sps:$4 sm:$0xff]  }
 0x4f0   :  { %4730 = vmatprep.subr.bf16.mxu0 %v16269_v13  ;;  %v16353_v13 = vld [vmem:[#allocation5 + $0x1054] ss:$8 sps:$4 sm:$0xff]  }
 0x4f3   :  { %4731 = vmatpush1.bf16.msra.mxu0 %v16267_v14  ;;  %v16351_v14 = vld [vmem:[#allocation5 + $0x1050] ss:$8 sps:$4 sm:$0xff]  }
 0x4f4   :  { %4732 = vmatprep.subr.bf16.mxu0 %v16272_v15  ;;  %v16356_v15 = vld [vmem:[#allocation5 + $0x1064] ss:$8 sps:$4 sm:$0xff]  }
 0x4f7   :  { %4733 = vmatpush1.bf16.msra.mxu0 %v16270_v16  ;;  %v16354_v16 = vld [vmem:[#allocation5 + $0x1060] ss:$8 sps:$4 sm:$0xff]  }
 0x4f8   :  { %4734 = vmatprep.subr.bf16.mxu0 %v16275_v17  ;;  %v16359_v17 = vld [vmem:[#allocation5 + $0x1074] ss:$8 sps:$4 sm:$0xff]  }
 0x4fb   :  { %4735 = vmatpush1.bf16.msra.mxu0 %v16273_v18  ;;  %v16357_v18 = vld [vmem:[#allocation5 + $0x1070] ss:$8 sps:$4 sm:$0xff]  }
 0x4fc   :  { %4736 = vmatprep.subr.bf16.mxu0 %v16278_v19  ;;  %v16362_v19 = vld [vmem:[#allocation5 + $0x1084] ss:$8 sps:$4 sm:$0xff]  }
 0x4ff   :  { %4737 = vmatpush1.bf16.msra.mxu0 %v16276_v20  ;;  %v16360_v20 = vld [vmem:[#allocation5 + $0x1080] ss:$8 sps:$4 sm:$0xff]  }
 0x500   :  { %4738 = vmatprep.subr.bf16.mxu0 %v16281_v21  ;;  %v16365_v21 = vld [vmem:[#allocation5 + $0x1094] ss:$8 sps:$4 sm:$0xff]  }
 0x503   :  { %4739 = vmatpush1.bf16.msra.mxu0 %v16279_v22  ;;  %v16363_v22 = vld [vmem:[#allocation5 + $0x1090] ss:$8 sps:$4 sm:$0xff]  }
 0x504   :  { %4740 = vmatprep.subr.bf16.mxu0 %v16284_v23  ;;  %v16368_v23 = vld [vmem:[#allocation5 + $0x10a4] ss:$8 sps:$4 sm:$0xff]  }
 0x507   :  { %4741 = vmatpush1.bf16.msra.mxu0 %v16282_v24  ;;  %v16366_v24 = vld [vmem:[#allocation5 + $0x10a0] ss:$8 sps:$4 sm:$0xff]  }
 0x508   :  { %4742 = vmatprep.subr.bf16.mxu0 %v16287_v25  ;;  %v16371_v25 = vld [vmem:[#allocation5 + $0x10b4] ss:$8 sps:$4 sm:$0xff]  }
 0x50b   :  { %4743 = vmatpush1.bf16.msra.mxu0 %v16285_v26  ;;  %v16369_v26 = vld [vmem:[#allocation5 + $0x10b0] ss:$8 sps:$4 sm:$0xff]  }
 0x50c   :  { %4753 = vmatprep.subr.bf16.mxu0 %v16290_v28  ;;  %v16372_v28 = vld [vmem:[#allocation5 + $0x10c0] ss:$8 sps:$4 sm:$0xff]  }
 0x50e   :  { %4745 = vmatmul.mubr.bf16.vlgmr.msra.gmra.mrb[0].mxu0 %v353_v30  ;;  %v16375_v30 = vld [vmem:[#allocation5 + $0x10d0] ss:$8 sps:$4 sm:$0xff]  }
 0x50f   :  { %4754 = vmatpush1.bf16.msra.mxu0 %v16288_v31  ;;  %4785 = vmatprep.mubr.bf16.mxu0 %v356_v32  ;;  %v16380_v31 = vld [vmem:[#allocation5 + $0x10e4] ss:$8 sps:$4 sm:$0xff]   ;;  %v16378_v32 = vld [vmem:[#allocation5 + $0x10e0] ss:$8 sps:$4 sm:$0xff]  }
 0x510   :  { %4755 = vmatprep.subr.bf16.mxu0 %v16293_v33  ;;  %v16383_v33 = vld [vmem:[#allocation5 + $0x10f4] ss:$8 sps:$4 sm:$0xff]  }
 0x513   :  { %4756 = vmatpush1.bf16.msra.mxu0 %v16291_v34  ;;  %v16381_v34 = vld [vmem:[#allocation5 + $0x10f0] ss:$8 sps:$4 sm:$0xff]  }
 0x514   :  { %4757 = vmatprep.subr.bf16.mxu0 %v16296_v35  ;;  %v317_v35 = vld [vmem:[#allocation3 + $0x100] sm:$0xff] }
 0x517   :  { %4758 = vmatpush1.bf16.msra.mxu0 %v16294_v36  ;;  %v16386_v36 = vld [vmem:[#allocation5 + $0x1104] ss:$8 sps:$4 sm:$0xff]  }
 0x518   :  { %4759 = vmatprep.subr.bf16.mxu0 %v16299_v37  ;;  %v320_v37 = vld [vmem:[#allocation3 + $0x118] sm:$0xff] }
 0x51b   :  { %4760 = vmatpush1.bf16.msra.mxu0 %v16297_v38  ;;  %v357_v38 = vpack.c.bf16 %v317_v35, %v317_v35  ;;  %v16438_v35 = vld [vmem:[#allocation5 + $0x1220] ss:$8 sps:$4 sm:$0xff]  }
 0x51c   :  { %4761 = vmatprep.subr.bf16.mxu0 %v16302_v39  ;;  %v16384_v39 = vld [vmem:[#allocation5 + $0x1100] ss:$8 sps:$4 sm:$0xff]  }
 0x51f   :  { %4762 = vmatpush1.bf16.msra.mxu0 %v16300_v40  ;;  %v360_v40 = vpack.c.bf16 %v320_v37, %v320_v37  ;;  %v16535_v37 = vld [vmem:[#allocation8 + $0x90] ss:$8 sps:$4 sm:$0xff]  }
 0x520   :  { %4763 = vmatprep.subr.bf16.mxu0 %v16305_v41  ;;  %v16389_v41 = vld [vmem:[#allocation5 + $0x1114] ss:$8 sps:$4 sm:$0xff]  }
 0x523   :  { %4764 = vmatpush1.bf16.msra.mxu0 %v16303_v42  ;;  %v16387_v42 = vld [vmem:[#allocation5 + $0x1110] ss:$8 sps:$4 sm:$0xff]  }
 0x524   :  { %4765 = vmatprep.subr.bf16.mxu0 %v16308_v43  ;;  %v16392_v43 = vld [vmem:[#allocation5 + $0x1124] ss:$8 sps:$4 sm:$0xff]  }
 0x527   :  { %4766 = vmatpush1.bf16.msra.mxu0 %v16306_v44  ;;  %v16390_v44 = vld [vmem:[#allocation5 + $0x1120] ss:$8 sps:$4 sm:$0xff]  }
 0x528   :  { %4767 = vmatprep.subr.bf16.mxu0 %v16311_v45  ;;  %v16395_v45 = vld [vmem:[#allocation5 + $0x1134] ss:$8 sps:$4 sm:$0xff]  }
 0x52b   :  { %4768 = vmatpush1.bf16.msra.mxu0 %v16309_v46  ;;  %v16393_v46 = vld [vmem:[#allocation5 + $0x1130] ss:$8 sps:$4 sm:$0xff]  }
 0x52c   :  { %4769 = vmatprep.subr.bf16.mxu0 %v16314_v47  ;;  %v16398_v47 = vld [vmem:[#allocation5 + $0x1144] ss:$8 sps:$4 sm:$0xff]  }
 0x52f   :  { %4770 = vmatpush1.bf16.msra.mxu0 %v16312_v48  ;;  %v16396_v48 = vld [vmem:[#allocation5 + $0x1140] ss:$8 sps:$4 sm:$0xff]  }
 0x530   :  { %4771 = vmatprep.subr.bf16.mxu0 %v16317_v49  ;;  %v16401_v49 = vld [vmem:[#allocation5 + $0x1154] ss:$8 sps:$4 sm:$0xff]  }
 0x533   :  { %4772 = vmatpush1.bf16.msra.mxu0 %v16315_v50  ;;  %v16399_v50 = vld [vmem:[#allocation5 + $0x1150] ss:$8 sps:$4 sm:$0xff]  }
 0x534   :  { %4773 = vmatprep.subr.bf16.mxu0 %v16320_v51  ;;  %v16404_v51 = vld [vmem:[#allocation5 + $0x1164] ss:$8 sps:$4 sm:$0xff]  }
 0x537   :  { %4774 = vmatpush1.bf16.msra.mxu0 %v16318_v52  ;;  %v16402_v52 = vld [vmem:[#allocation5 + $0x1160] ss:$8 sps:$4 sm:$0xff]  }
 0x538   :  { %4775 = vmatprep.subr.bf16.mxu0 %v16323_v53  ;;  %v16407_v53 = vld [vmem:[#allocation5 + $0x1174] ss:$8 sps:$4 sm:$0xff]  }
 0x53b   :  { %4776 = vmatpush1.bf16.msra.mxu0 %v16321_v54  ;;  %v16405_v54 = vld [vmem:[#allocation5 + $0x1170] ss:$8 sps:$4 sm:$0xff]  }
 0x53c   :  { %4777 = vmatprep.subr.bf16.mxu0 %v16326_v55  ;;  %v16410_v55 = vld [vmem:[#allocation5 + $0x1184] ss:$8 sps:$4 sm:$0xff]  }
 0x53f   :  { %4778 = vmatpush1.bf16.msra.mxu0 %v16324_v56  ;;  %v16408_v56 = vld [vmem:[#allocation5 + $0x1180] ss:$8 sps:$4 sm:$0xff]  }
 0x540   :  { %4779 = vmatprep.subr.bf16.mxu0 %v16329_v57  ;;  %v16413_v57 = vld [vmem:[#allocation5 + $0x1194] ss:$8 sps:$4 sm:$0xff]  }
 0x543   :  { %4780 = vmatpush1.bf16.msra.mxu0 %v16327_v58  ;;  %v16411_v58 = vld [vmem:[#allocation5 + $0x1190] ss:$8 sps:$4 sm:$0xff]  }
 0x544   :  { %4781 = vmatprep.subr.bf16.mxu0 %v16332_v59  ;;  %v16416_v59 = vld [vmem:[#allocation5 + $0x11a4] ss:$8 sps:$4 sm:$0xff]  }
 0x547   :  { %4782 = vmatpush1.bf16.msra.mxu0 %v16330_v60  ;;  %v16506_v60 = vld [vmem:[#allocation8 + $0x4] ss:$8 sps:$4 sm:$0xff]  }
 0x548   :  { %4783 = vmatprep.subr.bf16.mxu0 %v16335_v61  ;;  %v16508_v61 = vld [vmem:[#allocation8] ss:$8 sps:$4 sm:$0xff]   ;;  %5166 = vmatprep.subr.bf16.mxu1 %v16506_v60 }
 0x549   :  { %5167 = vmatpush1.bf16.msra.mxu1 %v16508_v61  ;;  %v16462_v60 = vld [vmem:[#allocation5 + $0x12a0] ss:$8 sps:$4 sm:$0xff]   ;;  %v16467_v61 = vld [vmem:[#allocation5 + $0x12b4] ss:$8 sps:$4 sm:$0xff]  }
 0x54b   :  { %4784 = vmatpush1.bf16.msra.mxu0 %v16333_v62  ;;  %v16509_v62 = vld [vmem:[#allocation8 + $0x14] ss:$8 sps:$4 sm:$0xff]  }
 0x54c   :  { %4794 = vmatprep.subr.bf16.mxu0 %v16338_v0  ;;  %v16419_v0 = vld [vmem:[#allocation5 + $0x11b4] ss:$8 sps:$4 sm:$0xff]   ;;  %5168 = vmatprep.subr.bf16.mxu1 %v16509_v62  ;;  %v16465_v62 = vld [vmem:[#allocation5 + $0x12b0] ss:$8 sps:$4 sm:$0xff]  }
 0x54d   :  { %5169 = vmatpush1.bf16.msra.mxu1 %v16511_v1  ;;  %v16473_v1 = vld [vmem:[#allocation5 + $0x12d4] ss:$8 sps:$4 sm:$0xff]  }
 0x54e   :  { %4786 = vmatmul.mubr.bf16.vlgmr.msra.gmra.mrb[0].mxu0 %v355_v2  ;;  %v16512_v2 = vld [vmem:[#allocation8 + $0x24] ss:$8 sps:$4 sm:$0xff]  }
 0x54f   :  { %4795 = vmatpush1.bf16.msra.mxu0 %v16336_v3  ;;  %4826 = vmatprep.mubr.bf16.mxu0 %v358_v4  ;;  %v16417_v3 = vld [vmem:[#allocation5 + $0x11b0] ss:$8 sps:$4 sm:$0xff]   ;;  %v16422_v4 = vld [vmem:[#allocation5 + $0x11c4] ss:$8 sps:$4 sm:$0xff]  }
 0x550   :  { %4796 = vmatprep.subr.bf16.mxu0 %v16341_v5  ;;  %v16514_v5 = vld [vmem:[#allocation8 + $0x20] ss:$8 sps:$4 sm:$0xff]   ;;  %5170 = vmatprep.subr.bf16.mxu1 %v16512_v2 }
 0x551   :  { %5171 = vmatpush1.bf16.msra.mxu1 %v16514_v5  ;;  %v16471_v2 = vld [vmem:[#allocation5 + $0x12d0] ss:$8 sps:$4 sm:$0xff]   ;;  %v16479_v5 = vld [vmem:[#allocation5 + $0x12f4] ss:$8 sps:$4 sm:$0xff]  }
 0x553   :  { %4797 = vmatpush1.bf16.msra.mxu0 %v16339_v6  ;;  %v16515_v6 = vld [vmem:[#allocation8 + $0x34] ss:$8 sps:$4 sm:$0xff]  }
 0x554   :  { %4798 = vmatprep.subr.bf16.mxu0 %v16344_v7  ;;  %v16420_v7 = vld [vmem:[#allocation5 + $0x11c0] ss:$8 sps:$4 sm:$0xff]   ;;  %5172 = vmatprep.subr.bf16.mxu1 %v16515_v6  ;;  %v16477_v6 = vld [vmem:[#allocation5 + $0x12f0] ss:$8 sps:$4 sm:$0xff]  }
 0x557   :  { %4799 = vmatpush1.bf16.msra.mxu0 %v16342_v8  ;;  %v16425_v8 = vld [vmem:[#allocation5 + $0x11d4] ss:$8 sps:$4 sm:$0xff]  }
 0x558   :  { %4800 = vmatprep.subr.bf16.mxu0 %v16347_v9  ;;  %v16517_v9 = vld [vmem:[#allocation8 + $0x30] ss:$8 sps:$4 sm:$0xff]  }
 0x559   :  { %5173 = vmatpush1.bf16.msra.mxu1 %v16517_v9  ;;  %v324_v9 = vld [vmem:[#allocation3 + $0x138] sm:$0xff] }
 0x55b   :  { %4801 = vmatpush1.bf16.msra.mxu0 %v16345_v10  ;;  %v16518_v10 = vld [vmem:[#allocation8 + $0x44] ss:$8 sps:$4 sm:$0xff]  }
 0x55c   :  { %4802 = vmatprep.subr.bf16.mxu0 %v16350_v11  ;;  %v16423_v11 = vld [vmem:[#allocation5 + $0x11d0] ss:$8 sps:$4 sm:$0xff]   ;;  %5174 = vmatprep.subr.bf16.mxu1 %v16518_v10 }
 0x55f   :  { %4803 = vmatpush1.bf16.msra.mxu0 %v16348_v12  ;;  %v16428_v12 = vld [vmem:[#allocation5 + $0x11e4] ss:$8 sps:$4 sm:$0xff]  }
 0x560   :  { %4804 = vmatprep.subr.bf16.mxu0 %v16353_v13  ;;  %v16520_v13 = vld [vmem:[#allocation8 + $0x40] ss:$8 sps:$4 sm:$0xff]  }
 0x561   :  { %5175 = vmatpush1.bf16.msra.mxu1 %v16520_v13  ;;  %v16485_v13 = vld [vmem:[#allocation5 + $0x1314] ss:$8 sps:$4 sm:$0xff]  }
 0x563   :  { %4805 = vmatpush1.bf16.msra.mxu0 %v16351_v14  ;;  %v16521_v14 = vld [vmem:[#allocation8 + $0x54] ss:$8 sps:$4 sm:$0xff]  }
 0x564   :  { %4806 = vmatprep.subr.bf16.mxu0 %v16356_v15  ;;  %v16426_v15 = vld [vmem:[#allocation5 + $0x11e0] ss:$8 sps:$4 sm:$0xff]   ;;  %5176 = vmatprep.subr.bf16.mxu1 %v16521_v14  ;;  %v16483_v14 = vld [vmem:[#allocation5 + $0x1310] ss:$8 sps:$4 sm:$0xff]  }
 0x567   :  { %4807 = vmatpush1.bf16.msra.mxu0 %v16354_v16  ;;  %v16431_v16 = vld [vmem:[#allocation5 + $0x11f4] ss:$8 sps:$4 sm:$0xff]  }
 0x568   :  { %4808 = vmatprep.subr.bf16.mxu0 %v16359_v17  ;;  %v16523_v17 = vld [vmem:[#allocation8 + $0x50] ss:$8 sps:$4 sm:$0xff]  }
 0x569   :  { %5177 = vmatpush1.bf16.msra.mxu1 %v16523_v17  ;;  %v16491_v17 = vld [vmem:[#allocation5 + $0x1334] ss:$8 sps:$4 sm:$0xff]  }
 0x56b   :  { %4809 = vmatpush1.bf16.msra.mxu0 %v16357_v18  ;;  %v16524_v18 = vld [vmem:[#allocation8 + $0x64] ss:$8 sps:$4 sm:$0xff]  }
 0x56c   :  { %4810 = vmatprep.subr.bf16.mxu0 %v16362_v19  ;;  %v16429_v19 = vld [vmem:[#allocation5 + $0x11f0] ss:$8 sps:$4 sm:$0xff]   ;;  %5178 = vmatprep.subr.bf16.mxu1 %v16524_v18 }
 0x56d   :  { %v16489_v18 = vld [vmem:[#allocation5 + $0x1330] ss:$8 sps:$4 sm:$0xff]  }
 0x56f   :  { %4811 = vmatpush1.bf16.msra.mxu0 %v16360_v20  ;;  %v319_v20 = vld [vmem:[#allocation3 + $0x110] sm:$0xff] }
 0x570   :  { %4812 = vmatprep.subr.bf16.mxu0 %v16365_v21  ;;  %v16434_v21 = vld [vmem:[#allocation5 + $0x1204] ss:$8 sps:$4 sm:$0xff]  }
 0x573   :  { %4813 = vmatpush1.bf16.msra.mxu0 %v16363_v22  ;;  %v322_v22 = vld [vmem:[#allocation3 + $0x128] sm:$0xff] }
 0x574   :  { %4814 = vmatprep.subr.bf16.mxu0 %v16368_v23  ;;  %v16526_v23 = vld [vmem:[#allocation8 + $0x60] ss:$8 sps:$4 sm:$0xff]  }
 0x575   :  { %5179 = vmatpush1.bf16.msra.mxu1 %v16526_v23  ;;  %v16500_v23 = vld [vmem:[#allocation5 + $0x1364] ss:$8 sps:$4 sm:$0xff]  }
 0x577   :  { %4815 = vmatpush1.bf16.msra.mxu0 %v16366_v24  ;;  %v359_v24 = vpack.c.bf16 %v319_v20, %v319_v20  ;;  %v16492_v20 = vld [vmem:[#allocation5 + $0x1340] ss:$8 sps:$4 sm:$0xff]  }
 0x578   :  { %4816 = vmatprep.subr.bf16.mxu0 %v16371_v25  ;;  %v16527_v25 = vld [vmem:[#allocation8 + $0x74] ss:$8 sps:$4 sm:$0xff]  }
 0x579   :  { %5180 = vmatprep.subr.bf16.mxu1 %v16527_v25  ;;  %v16503_v25 = vld [vmem:[#allocation5 + $0x1374] ss:$8 sps:$4 sm:$0xff]  }
 0x57b   :  { %4817 = vmatpush1.bf16.msra.mxu0 %v16369_v26  ;;  %v16432_v26 = vld [vmem:[#allocation5 + $0x1200] ss:$8 sps:$4 sm:$0xff]  }
 0x57c   :  { %4818 = vmatprep.subr.bf16.mxu0 %v16374_v27  ;;  %v362_v27 = vpack.c.bf16 %v322_v22, %v322_v22  ;;  %v16495_v22 = vld [vmem:[#allocation5 + $0x1350] ss:$8 sps:$4 sm:$0xff]  }
 0x57f   :  { %4819 = vmatpush1.bf16.msra.mxu0 %v16372_v28  ;;  %v16437_v28 = vld [vmem:[#allocation5 + $0x1214] ss:$8 sps:$4 sm:$0xff]  }
 0x580   :  { %4820 = vmatprep.subr.bf16.mxu0 %v16377_v29  ;;  %v16529_v29 = vld [vmem:[#allocation8 + $0x70] ss:$8 sps:$4 sm:$0xff]  }
 0x581   :  { %5181 = vmatpush1.bf16.msra.mxu1 %v16529_v29 }
 0x583   :  { %4821 = vmatpush1.bf16.msra.mxu0 %v16375_v30  ;;  %v16530_v30 = vld [vmem:[#allocation8 + $0x84] ss:$8 sps:$4 sm:$0xff]  }
 0x584   :  { %4822 = vmatprep.subr.bf16.mxu0 %v16380_v31  ;;  %v16435_v31 = vld [vmem:[#allocation5 + $0x1210] ss:$8 sps:$4 sm:$0xff]   ;;  %5182 = vmatprep.subr.bf16.mxu1 %v16530_v30 }
 0x585   :  { %v323_v30 = vld [vmem:[#allocation3 + $0x130] sm:$0xff] }
 0x587   :  { %4823 = vmatpush1.bf16.msra.mxu0 %v16378_v32  ;;  %v16440_v32 = vld [vmem:[#allocation5 + $0x1224] ss:$8 sps:$4 sm:$0xff]  }
 0x588   :  { %4824 = vmatprep.subr.bf16.mxu0 %v16383_v33  ;;  %v16532_v33 = vld [vmem:[#allocation8 + $0x80] ss:$8 sps:$4 sm:$0xff]  }
 0x589   :  { %5183 = vmatpush1.bf16.msra.mxu1 %v16532_v33  ;;  %v16548_v33 = vld [vmem:[#allocation8 + $0xe4] ss:$8 sps:$4 sm:$0xff]  }
 0x58b   :  { %4825 = vmatpush1.bf16.msra.mxu0 %v16381_v34  ;;  %v16533_v34 = vld [vmem:[#allocation8 + $0x94] ss:$8 sps:$4 sm:$0xff]  }
 0x58c   :  { %4835 = vmatprep.subr.bf16.mxu0 %v16386_v36  ;;  %v16443_v36 = vld [vmem:[#allocation5 + $0x1234] ss:$8 sps:$4 sm:$0xff]   ;;  %5184 = vmatprep.subr.bf16.mxu1 %v16533_v34 }
 0x58d   :  { %5185 = vmatpush1.bf16.msra.mxu1 %v16535_v37  ;;  %v16550_v34 = vld [vmem:[#allocation8 + $0xe0] ss:$8 sps:$4 sm:$0xff]   ;;  %v992_v37 = vlaneseq }
 0x58e   :  { %4827 = vmatmul.mubr.bf16.vlgmr.msra.gmra.mrb[0].mxu0 %v357_v38  ;;  %v16536_v38 = vld [vmem:[#allocation8 + $0xa4] ss:$8 sps:$4 sm:$0xff]  }
 0x58f   :  { %4836 = vmatpush1.bf16.msra.mxu0 %v16384_v39  ;;  %4867 = vmatprep.mubr.bf16.mxu0 %v360_v40  ;;  %v16441_v39 = vld [vmem:[#allocation5 + $0x1230] ss:$8 sps:$4 sm:$0xff]   ;;  %v16446_v40 = vld [vmem:[#allocation5 + $0x1244] ss:$8 sps:$4 sm:$0xff]  }
 0x590   :  { %4837 = vmatprep.subr.bf16.mxu0 %v16389_v41  ;;  %v16538_v41 = vld [vmem:[#allocation8 + $0xa0] ss:$8 sps:$4 sm:$0xff]   ;;  %5186 = vmatprep.subr.bf16.mxu1 %v16536_v38  ;;  %v18183_v38 = vshrl.u32 %v992_v37, 7  ;;  %v5400_v37 = vld [vmem:[#allocation14 + $0x480] sm:$0xff] }
 0x591   :  { %5187 = vmatpush1.bf16.msra.mxu1 %v16538_v41 }
 0x592   :  { %v18189_v41 = vsub.s32 1, %v18183_v38 }
 0x593   :  { %4838 = vmatpush1.bf16.msra.mxu0 %v16387_v42  ;;  %v16539_v42 = vld [vmem:[#allocation8 + $0xb4] ss:$8 sps:$4 sm:$0xff]  }
 0x594   :  { %4839 = vmatprep.subr.bf16.mxu0 %v16392_v43  ;;  %v16444_v43 = vld [vmem:[#allocation5 + $0x1240] ss:$8 sps:$4 sm:$0xff]   ;;  %5188 = vmatprep.subr.bf16.mxu1 %v16539_v42 }
 0x597   :  { %4840 = vmatpush1.bf16.msra.mxu0 %v16390_v44  ;;  %v16449_v44 = vld [vmem:[#allocation5 + $0x1254] ss:$8 sps:$4 sm:$0xff]  }
 0x598   :  { %4841 = vmatprep.subr.bf16.mxu0 %v16395_v45  ;;  %v16541_v45 = vld [vmem:[#allocation8 + $0xb0] ss:$8 sps:$4 sm:$0xff]  }
 0x599   :  { %5189 = vmatpush1.bf16.msra.mxu1 %v16541_v45 }
 0x59b   :  { %4842 = vmatpush1.bf16.msra.mxu0 %v16393_v46  ;;  %v16542_v46 = vld [vmem:[#allocation8 + $0xc4] ss:$8 sps:$4 sm:$0xff]  }
 0x59c   :  { %4843 = vmatprep.subr.bf16.mxu0 %v16398_v47  ;;  %v16447_v47 = vld [vmem:[#allocation5 + $0x1250] ss:$8 sps:$4 sm:$0xff]   ;;  %5190 = vmatprep.subr.bf16.mxu1 %v16542_v46 }
 0x59f   :  { %4844 = vmatpush1.bf16.msra.mxu0 %v16396_v48  ;;  %v16452_v48 = vld [vmem:[#allocation5 + $0x1264] ss:$8 sps:$4 sm:$0xff]  }
 0x5a0   :  { %4845 = vmatprep.subr.bf16.mxu0 %v16401_v49  ;;  %v16544_v49 = vld [vmem:[#allocation8 + $0xc0] ss:$8 sps:$4 sm:$0xff]  }
 0x5a1   :  { %5191 = vmatpush1.bf16.msra.mxu1 %v16544_v49 }
 0x5a3   :  { %4846 = vmatpush1.bf16.msra.mxu0 %v16399_v50  ;;  %v16545_v50 = vld [vmem:[#allocation8 + $0xd4] ss:$8 sps:$4 sm:$0xff]  }
 0x5a4   :  { %4847 = vmatprep.subr.bf16.mxu0 %v16404_v51  ;;  %v16450_v51 = vld [vmem:[#allocation5 + $0x1260] ss:$8 sps:$4 sm:$0xff]   ;;  %5192 = vmatprep.subr.bf16.mxu1 %v16545_v50 }
 0x5a7   :  { %4848 = vmatpush1.bf16.msra.mxu0 %v16402_v52  ;;  %v16455_v52 = vld [vmem:[#allocation5 + $0x1274] ss:$8 sps:$4 sm:$0xff]  }
 0x5a8   :  { %4849 = vmatprep.subr.bf16.mxu0 %v16407_v53  ;;  %v16547_v53 = vld [vmem:[#allocation8 + $0xd0] ss:$8 sps:$4 sm:$0xff]  }
 0x5a9   :  { %5193 = vmatpush1.bf16.msra.mxu1 %v16547_v53 }
 0x5aa   :  { %5194 = vmatprep.subr.bf16.mxu1 %v16548_v33  ;;  %v5384_v33 = vld [vmem:[#allocation14 + $0x400] sm:$0xff] }
 0x5ab   :  { %4850 = vmatpush1.bf16.msra.mxu0 %v16405_v54  ;;  %v16453_v54 = vld [vmem:[#allocation5 + $0x1270] ss:$8 sps:$4 sm:$0xff]  }
 0x5ac   :  { %4851 = vmatprep.subr.bf16.mxu0 %v16410_v55  ;;  %v16458_v55 = vld [vmem:[#allocation5 + $0x1284] ss:$8 sps:$4 sm:$0xff]  }
 0x5ad   :  { %5195 = vmatpush1.bf16.msra.mxu1 %v16550_v34  ;;  %v5392_v34 = vld [vmem:[#allocation14 + $0x440] sm:$0xff] }
 0x5af   :  { %4852 = vmatpush1.bf16.msra.mxu0 %v16408_v56  ;;  %v16456_v56 = vld [vmem:[#allocation5 + $0x1280] ss:$8 sps:$4 sm:$0xff]  }
 0x5b0   :  { %4853 = vmatprep.subr.bf16.mxu0 %v16413_v57  ;;  %v16461_v57 = vld [vmem:[#allocation5 + $0x1294] ss:$8 sps:$4 sm:$0xff]  }
 0x5b3   :  { %4854 = vmatpush1.bf16.msra.mxu0 %v16411_v58  ;;  %v16459_v58 = vld [vmem:[#allocation5 + $0x1290] ss:$8 sps:$4 sm:$0xff]  }
 0x5b4   :  { %4855 = vmatprep.subr.bf16.mxu0 %v16416_v59  ;;  %v16464_v59 = vld [vmem:[#allocation5 + $0x12a4] ss:$8 sps:$4 sm:$0xff]  }
 0x5b7   :  { %4856 = vmatpush1.bf16.msra.mxu0 %v16414_v63  ;;  %v16470_v63 = vld [vmem:[#allocation5 + $0x12c4] ss:$8 sps:$4 sm:$0xff]  }
 0x5b8   :  { %4857 = vmatprep.subr.bf16.mxu0 %v16419_v0  ;;  %v16468_v0 = vld [vmem:[#allocation5 + $0x12c0] ss:$8 sps:$4 sm:$0xff]  }
 0x5bb   :  { %4858 = vmatpush1.bf16.msra.mxu0 %v16417_v3  ;;  %v16476_v3 = vld [vmem:[#allocation5 + $0x12e4] ss:$8 sps:$4 sm:$0xff]  }
 0x5bc   :  { %4859 = vmatprep.subr.bf16.mxu0 %v16422_v4  ;;  %v16474_v4 = vld [vmem:[#allocation5 + $0x12e0] ss:$8 sps:$4 sm:$0xff]  }
 0x5bf   :  { %4860 = vmatpush1.bf16.msra.mxu0 %v16420_v7  ;;  %v321_v7 = vld [vmem:[#allocation3 + $0x120] sm:$0xff] }
 0x5c0   :  { %4861 = vmatprep.subr.bf16.mxu0 %v16425_v8  ;;  %v16482_v8 = vld [vmem:[#allocation5 + $0x1304] ss:$8 sps:$4 sm:$0xff]   ;;  %v361_v10 = vpack.c.bf16 %v321_v7, %v321_v7  ;;  %v5280_v7 = vld [vmem:[#allocation14 + $0xc0] sm:$0xff] }
 0x5c3   :  { %4862 = vmatpush1.bf16.msra.mxu0 %v16423_v11  ;;  %v16480_v11 = vld [vmem:[#allocation5 + $0x1300] ss:$8 sps:$4 sm:$0xff]  }
 0x5c4   :  { %4863 = vmatprep.subr.bf16.mxu0 %v16428_v12  ;;  %v364_v12 = vpack.c.bf16 %v324_v9, %v324_v9  ;;  %v5288_v9 = vld [vmem:[#allocation14 + $0x100] sm:$0xff] }
 0x5c7   :  { %4864 = vmatpush1.bf16.msra.mxu0 %v16426_v15  ;;  %v16488_v15 = vld [vmem:[#allocation5 + $0x1324] ss:$8 sps:$4 sm:$0xff]  }
 0x5c8   :  { %4865 = vmatprep.subr.bf16.mxu0 %v16431_v16  ;;  %v16486_v16 = vld [vmem:[#allocation5 + $0x1320] ss:$8 sps:$4 sm:$0xff]  }
 0x5cb   :  { %4866 = vmatpush1.bf16.msra.mxu0 %v16429_v19  ;;  %v16494_v19 = vld [vmem:[#allocation5 + $0x1344] ss:$8 sps:$4 sm:$0xff]  }
 0x5cc   :  { %4876 = vmatprep.subr.bf16.mxu0 %v16434_v21  ;;  %v16497_v21 = vld [vmem:[#allocation5 + $0x1354] ss:$8 sps:$4 sm:$0xff]  }
 0x5ce   :  { %4868 = vmatmul.mubr.bf16.vlgmr.msra.gmra.mrb[0].mxu0 %v359_v24  ;;  %v16498_v24 = vld [vmem:[#allocation5 + $0x1360] ss:$8 sps:$4 sm:$0xff]  }
 0x5cf   :  { %4877 = vmatpush1.bf16.msra.mxu0 %v16432_v26  ;;  %4908 = vmatprep.mubr.bf16.mxu0 %v362_v27  ;;  %v989_v26 = vld [vmem:[#allocation5 + $0x1380] sm:$0xff]  ;;  %v16501_v27 = vld [vmem:[#allocation5 + $0x1370] ss:$8 sps:$4 sm:$0xff]  }
 0x5d0   :  { %4878 = vmatprep.subr.bf16.mxu0 %v16437_v28  ;;  %v14303_v28 = vcombine.high %v989_v26, %v989_v26  ;;  %v14302_v29 = vcombine.low %v989_v26, %v989_v26  ;;  %v5360_v26 = vld [vmem:[#allocation14 + $0x340] sm:$0xff] }
 0x5d3   :  { %4879 = vmatpush1.bf16.msra.mxu0 %v16435_v31  ;;  %v4133_v31 = vsel %vm4131_vm1, %v14302_v29, 0  ;;  %v5368_v29 = vld [vmem:[#allocation14 + $0x380] sm:$0xff] }
 0x5d4   :  { %4880 = vmatprep.subr.bf16.mxu0 %v16440_v32  ;;  %v363_v32 = vpack.c.bf16 %v323_v30, %v323_v30  ;;  %v5376_v30 = vld [vmem:[#allocation14 + $0x3c0] sm:$0xff] }
 0x5d7   :  { %4881 = vmatpush1.bf16.msra.mxu0 %v16438_v35  ;;  %v16551_v35 = vld [vmem:[#allocation8 + $0xf4] ss:$8 sps:$4 sm:$0xff]  }
 0x5d8   :  { %4882 = vmatprep.subr.bf16.mxu0 %v16443_v36  ;;  %v16553_v36 = vld [vmem:[#allocation8 + $0xf0] ss:$8 sps:$4 sm:$0xff]   ;;  %5196 = vmatprep.subr.bf16.mxu1 %v16551_v35  ;;  %v14450_v35 = vcombine.low %v5368_v29, %v5376_v30 }
 0x5d9   :  { %5197 = vmatpush1.bf16.msra.mxu1 %v16553_v36  ;;  %v14467_v36 = vcombine.high %v5384_v33, %v5392_v34 }
 0x5db   :  { %4883 = vmatpush1.bf16.msra.mxu0 %v16441_v39  ;;  %v18186_v39 = vsub.s32 0, %v18183_v38 }
 0x5dc   :  { %4884 = vmatprep.subr.bf16.mxu0 %v16446_v40  ;;  %v990_v40 = vld [vmem:[#allocation7] sm:$0x3] }
 0x5dd   :  { %v995_v42 = vrot.slane %v990_v40, %v18186_v39 }
 0x5df   :  { %4885 = vmatpush1.bf16.msra.mxu0 %v16444_v43  ;;  %v999_v43 = vrot.slane %v990_v40, %v18189_v41  ;;  %v5408_v40 = vld [vmem:[#allocation14 + $0x4c0] sm:$0xff] }
 0x5e0   :  { %4886 = vmatprep.subr.bf16.mxu0 %v16449_v44 }
 0x5e3   :  { %4887 = vmatpush1.bf16.msra.mxu0 %v16447_v47 }
 0x5e4   :  { %4888 = vmatprep.subr.bf16.mxu0 %v16452_v48 }
 0x5e7   :  { %4889 = vmatpush1.bf16.msra.mxu0 %v16450_v51 }
 0x5e8   :  { %4890 = vmatprep.subr.bf16.mxu0 %v16455_v52 }
 0x5eb   :  { %4891 = vmatpush1.bf16.msra.mxu0 %v16453_v54  ;;  %v4994_v54 = vld [vmem:[#allocation10] sm:$0x3] }
 0x5ec   :  { %4892 = vmatprep.subr.bf16.mxu0 %v16458_v55  ;;  %v4999_v55 = vrot.slane %v4994_v54, %v18186_v39 }
 0x5ef   :  { %4893 = vmatpush1.bf16.msra.mxu0 %v16456_v56  ;;  %v5003_v56 = vrot.slane %v4994_v54, %v18189_v41 }
 0x5f0   :  { %4894 = vmatprep.subr.bf16.mxu0 %v16461_v57 }
 0x5f3   :  { %4895 = vmatpush1.bf16.msra.mxu0 %v16459_v58 }
 0x5f4   :  { %4896 = vmatprep.subr.bf16.mxu0 %v16464_v59 }
 0x5f7   :  { %4897 = vmatpush1.bf16.msra.mxu0 %v16462_v60 }
 0x5f8   :  { %4898 = vmatprep.subr.bf16.mxu0 %v16467_v61 }
 0x5fb   :  { %4899 = vmatpush1.bf16.msra.mxu0 %v16465_v62 }
 0x5fc   :  { %4900 = vmatprep.subr.bf16.mxu0 %v16470_v63 }
 0x5ff   :  { %4901 = vmatpush1.bf16.msra.mxu0 %v16468_v0 }
 0x600   :  { %4902 = vmatprep.subr.bf16.mxu0 %v16473_v1 }
 0x603   :  { %4903 = vmatpush1.bf16.msra.mxu0 %v16471_v2  ;;  %v5256_v2 = vld [vmem:[#allocation14] sm:$0xff] }
 0x604   :  { %4904 = vmatprep.subr.bf16.mxu0 %v16476_v3  ;;  %v5264_v3 = vld [vmem:[#allocation14 + $0x40] sm:$0xff] }
 0x607   :  { %4905 = vmatpush1.bf16.msra.mxu0 %v16474_v4  ;;  %v5272_v4 = vld [vmem:[#allocation14 + $0x80] sm:$0xff] }
 0x608   :  { %4906 = vmatprep.subr.bf16.mxu0 %v16479_v5  ;;  %v14338_v5 = vcombine.low %v5256_v2, %v5264_v3 }
 0x60b   :  { %4907 = vmatpush1.bf16.msra.mxu0 %v16477_v6  ;;  %v14339_v6 = vcombine.high %v5256_v2, %v5264_v3  ;;  %v5464_v2 = vld [vmem:[#allocation14 + $0x680] sm:$0xff] }
 0x60c   :  { %4917 = vmatprep.subr.bf16.mxu0 %v16482_v8  ;;  %v14355_v8 = vcombine.high %v5272_v4, %v5280_v7 }
 0x60d   :  { %6876 = vmatprep.subr.bf16.mxu1 %v14339_v6 }
 0x60e   :  { %4909 = vmatmul.mubr.bf16.vlgmr.msra.gmra.mrb[0].mxu0 %v361_v10  ;;  %v5296_v10 = vld [vmem:[#allocation14 + $0x140] sm:$0xff] }
 0x60f   :  { %4918 = vmatpush1.bf16.msra.mxu0 %v16480_v11  ;;  %14305 = vmatprep.mubr.msk.bf16.mxu0 %vm4127_vm0, %v364_v12  ;;  %v14354_v11 = vcombine.low %v5272_v4, %v5280_v7  ;;  %v14371_v12 = vcombine.high %v5288_v9, %v5296_v10  ;;  %v5480_v4 = vld [vmem:[#allocation14 + $0x700] sm:$0xff] }
 0x610   :  { %4919 = vmatprep.subr.bf16.mxu0 %v16485_v13  ;;  %v5304_v13 = vld [vmem:[#allocation14 + $0x180] sm:$0xff] }
 0x613   :  { %4920 = vmatpush1.bf16.msra.mxu0 %v16483_v14  ;;  %v5312_v14 = vld [vmem:[#allocation14 + $0x1c0] sm:$0xff] }
 0x614   :  { %4921 = vmatprep.subr.bf16.mxu0 %v16488_v15  ;;  %v14370_v15 = vcombine.low %v5288_v9, %v5296_v10  ;;  %v5504_v9 = vld [vmem:[#allocation14 + $0x7c0] sm:$0xff] }
 0x617   :  { %4922 = vmatpush1.bf16.msra.mxu0 %v16486_v16  ;;  %v14387_v16 = vcombine.high %v5304_v13, %v5312_v14 }
 0x618   :  { %4923 = vmatprep.subr.bf16.mxu0 %v16491_v17  ;;  %v5320_v17 = vld [vmem:[#allocation14 + $0x200] sm:$0xff] }
 0x61b   :  { %4924 = vmatpush1.bf16.msra.mxu0 %v16489_v18  ;;  %v5328_v18 = vld [vmem:[#allocation14 + $0x240] sm:$0xff] }
 0x61c   :  { %4925 = vmatprep.subr.bf16.mxu0 %v16494_v19  ;;  %v14386_v19 = vcombine.low %v5304_v13, %v5312_v14  ;;  %v5265_v13 = vld [vmem:[#allocation14 + $0x48] sm:$0xff] }
 0x61f   :  { %4926 = vmatpush1.bf16.msra.mxu0 %v16492_v20  ;;  %v14403_v20 = vcombine.high %v5320_v17, %v5328_v18 }
 0x620   :  { %4927 = vmatprep.subr.bf16.mxu0 %v16497_v21  ;;  %v5336_v21 = vld [vmem:[#allocation14 + $0x280] sm:$0xff] }
 0x623   :  { %4928 = vmatpush1.bf16.msra.mxu0 %v16495_v22  ;;  %v5344_v22 = vld [vmem:[#allocation14 + $0x2c0] sm:$0xff] }
 0x624   :  { %4929 = vmatprep.subr.bf16.mxu0 %v16500_v23  ;;  %v14402_v23 = vcombine.low %v5320_v17, %v5328_v18 }
 0x627   :  { %4930 = vmatpush1.bf16.msra.mxu0 %v16498_v24  ;;  %v14419_v24 = vcombine.high %v5336_v21, %v5344_v22 }
 0x628   :  { %4931 = vmatprep.subr.bf16.mxu0 %v16503_v25  ;;  %v5352_v25 = vld [vmem:[#allocation14 + $0x300] sm:$0xff] }
 0x62b   :  { %4932 = vmatpush1.bf16.msra.mxu0 %v16501_v27  ;;  %v14418_v27 = vcombine.low %v5336_v21, %v5344_v22 }
 0x62c   :  { %14304 = vmatprep.subr.msk.bf16.mxu0 %vm4131_vm1, %v14303_v28  ;;  %v14435_v28 = vcombine.high %v5352_v25, %v5360_v26 }
 0x62f   :  { %4934 = vmatpush1.bf16.msra.mxu0 %v4133_v31  ;;  %v14434_v31 = vcombine.low %v5352_v25, %v5360_v26 }
 0x632   :  { %4950 = vmatmul.mubr.bf16.vlgmr.msra.gmra.mrb[0].mxu0 %v363_v32  ;;  %v14451_v32 = vcombine.high %v5368_v29, %v5376_v30 }
 0x705   :  { %v4951_v44 = vpop.f32.mrb[0].mxu0 }
 0x706   :  { %v15459_v45 = vadd.f32 %v4951_v44, %v995_v42  ;;  %v4953_v46 = vpop.f32.mrb[1].mxu0  ;;  %v14466_v42 = vcombine.low %v5384_v33, %v5392_v34  ;;  %v5416_v44 = vld [vmem:[#allocation14 + $0x500] sm:$0xff]  ;;  %v5281_v33 = vld [vmem:[#allocation14 + $0xc8] sm:$0xff] }
 0x707   :  { %v15460_v47 = vadd.f32 %v4953_v46, %v999_v43  ;;  %v4955_v48 = vpop.f32.mrb[2].mxu0  ;;  %v14483_v43 = vcombine.high %v5400_v37, %v5408_v40  ;;  %v14482_v46 = vcombine.low %v5400_v37, %v5408_v40  ;;  %v5289_v37 = vld [vmem:[#allocation14 + $0x108] sm:$0xff] }
 0x708   :  { %v4958_v49 = vmax.f32 %v15459_v45, 0.0  ;;  %v4956_v50 = vpop.f32.mrb[3].mxu0  ;;  %v5424_v45 = vld [vmem:[#allocation14 + $0x540] sm:$0xff]  ;;  %v5297_v40 = vld [vmem:[#allocation14 + $0x148] sm:$0xff] }
 0x709   :  { %v4959_v51 = vmax.f32 %v15460_v47, 0.0  ;;  %v14499_v47 = vcombine.high %v5416_v44, %v5424_v45  ;;  %v14498_v48 = vcombine.low %v5416_v44, %v5424_v45  ;;  %v5305_v44 = vld [vmem:[#allocation14 + $0x188] sm:$0xff] }
 0x70a   :  { %v4960_v53 = vpack.c.bf16 %v4958_v49, %v4958_v49  ;;  %v5313_v45 = vld [vmem:[#allocation14 + $0x1c8] sm:$0xff] }
 0x70b   :  { %v4961_v52 = vpack.c.bf16 %v4959_v51, %v4959_v51 }
 0x70d   :  { %5198 = vmatprep.mubr.bf16.mxu1 %v4961_v52 }
 0x70e   :  { %5199 = vmatmul.mubr.bf16.vlgmr.msra.gmra.mrb[0].mxu1 %v4960_v53 }
 0x70f   :  { %6877 = vmatpush1.bf16.msra.mxu1 %v14338_v5  ;;  %v5488_v5 = vld [vmem:[#allocation14 + $0x740] sm:$0xff] }
 0x710   :  { %6878 = vmatprep.subr.bf16.mxu1 %v14355_v8  ;;  %v14563_v6 = vcombine.high %v5480_v4, %v5488_v5  ;;  %v14562_v7 = vcombine.low %v5480_v4, %v5488_v5  ;;  %v5496_v8 = vld [vmem:[#allocation14 + $0x780] sm:$0xff]  ;;  %v5401_v4 = vld [vmem:[#allocation14 + $0x488] sm:$0xff] }
 0x711   :  { %v14579_v10 = vcombine.high %v5496_v8, %v5504_v9  ;;  %v5409_v5 = vld [vmem:[#allocation14 + $0x4c8] sm:$0xff] }
 0x713   :  { %6879 = vmatpush1.bf16.msra.mxu1 %v14354_v11  ;;  %v14578_v11 = vcombine.low %v5496_v8, %v5504_v9  ;;  %v5417_v8 = vld [vmem:[#allocation14 + $0x508] sm:$0xff] }
 0x714   :  { %6880 = vmatprep.subr.bf16.mxu1 %v14371_v12  ;;  %v5257_v12 = vld [vmem:[#allocation14 + $0x8] sm:$0xff] }
 0x715   :  { %v14341_v14 = vcombine.high %v5257_v12, %v5265_v13  ;;  %v5425_v9 = vld [vmem:[#allocation14 + $0x548] sm:$0xff] }
 0x717   :  { %6881 = vmatpush1.bf16.msra.mxu1 %v14370_v15  ;;  %v14340_v15 = vcombine.low %v5257_v12, %v5265_v13  ;;  %v5433_v12 = vld [vmem:[#allocation14 + $0x588] sm:$0xff] }
 0x718   :  { %6882 = vmatprep.subr.bf16.mxu1 %v14387_v16  ;;  %v5441_v13 = vld [vmem:[#allocation14 + $0x5c8] sm:$0xff] }
 0x71b   :  { %6883 = vmatpush1.bf16.msra.mxu1 %v14386_v19  ;;  %v5209_v19 = vld [vmem:[#allocation11] sm:$0x3] }
 0x71c   :  { %6884 = vmatprep.subr.bf16.mxu1 %v14403_v20  ;;  %v5210_v20 = vld [vmem:[#allocation13] sm:$0x3]  ;;  %v5232_v21 = vrot.slane %v5209_v19, %v18186_v39  ;;  %v5236_v22 = vrot.slane %v5209_v19, %v18189_v41 }
 0x71d   :  { %v5249_v25 = vrot.slane %v5210_v20, %v18189_v41 }
 0x71f   :  { %6885 = vmatpush1.bf16.msra.mxu1 %v14402_v23 }
 0x720   :  { %6886 = vmatprep.subr.bf16.mxu1 %v14419_v24  ;;  %v5245_v24 = vrot.slane %v5210_v20, %v18186_v39  ;;  %v5465_v20 = vld [vmem:[#allocation14 + $0x688] sm:$0xff] }
 0x723   :  { %6887 = vmatpush1.bf16.msra.mxu1 %v14418_v27 }
 0x724   :  { %6888 = vmatprep.subr.bf16.mxu1 %v14435_v28 }
 0x727   :  { %6889 = vmatpush1.bf16.msra.mxu1 %v14434_v31 }
 0x728   :  { %6890 = vmatprep.subr.bf16.mxu1 %v14451_v32  ;;  %v5273_v32 = vld [vmem:[#allocation14 + $0x88] sm:$0xff] }
 0x72b   :  { %6891 = vmatpush1.bf16.msra.mxu1 %v14450_v35 }
 0x72c   :  { %6892 = vmatprep.subr.bf16.mxu1 %v14467_v36  ;;  %v14357_v36 = vcombine.high %v5273_v32, %v5281_v33 }
 0x72f   :  { %6893 = vmatpush1.bf16.msra.mxu1 %v14466_v42  ;;  %v14356_v42 = vcombine.low %v5273_v32, %v5281_v33 }
 0x730   :  { %6894 = vmatprep.subr.bf16.mxu1 %v14483_v43  ;;  %v14373_v43 = vcombine.high %v5289_v37, %v5297_v40 }
 0x733   :  { %6895 = vmatpush1.bf16.msra.mxu1 %v14482_v46  ;;  %v14372_v46 = vcombine.low %v5289_v37, %v5297_v40  ;;  %v5266_v37 = vld [vmem:[#allocation14 + $0x50] sm:$0xff] }
 0x734   :  { %6896 = vmatprep.subr.bf16.mxu1 %v14499_v47  ;;  %v14389_v47 = vcombine.high %v5305_v44, %v5313_v45 }
 0x737   :  { %6897 = vmatpush1.bf16.msra.mxu1 %v14498_v48  ;;  %v5321_v48 = vld [vmem:[#allocation14 + $0x208] sm:$0xff] }
 0x7e1   :  { %v5200_v57 = vpop.f32.mrb[0].mxu1 }
 0x7e2   :  { %v5201_v58 = vadd.f32 %v5200_v57, %v4999_v55  ;;  %v5202_v59 = vpop.f32.mrb[1].mxu1  ;;  %v5440_v57 = vld [vmem:[#allocation14 + $0x5c0] sm:$0xff] }
 0x7e3   :  { %v5203_v60 = vadd.f32 %v5202_v59, %v5003_v56  ;;  %v5204_v61 = vpop.f32.mrb[2].mxu1  ;;  %v5432_v56 = vld [vmem:[#allocation14 + $0x580] sm:$0xff] }
 0x7e4   :  { %v5205_v62 = vpop.f32.mrb[3].mxu1  ;;  %v18195_v63 = vadd.f32 %v5201_v58, %v4958_v49  ;;  %v14515_v58 = vcombine.high %v5432_v56, %v5440_v57  ;;  %v14514_v59 = vcombine.low %v5432_v56, %v5440_v57  ;;  %v5456_v61 = vld [vmem:[#allocation14 + $0x640] sm:$0xff]  ;;  %v5353_v56 = vld [vmem:[#allocation14 + $0x308] sm:$0xff] }
 0x7e5   :  { %v18197_v0 = vadd.f32 %v5203_v60, %v4959_v51  ;;  %v5448_v60 = vld [vmem:[#allocation14 + $0x600] sm:$0xff]  ;;  %v5361_v57 = vld [vmem:[#allocation14 + $0x348] sm:$0xff] }
 0x7e6   :  { %6898 = vmatprep.subr.bf16.mxu1 %v14515_v58  ;;  %v14531_v62 = vcombine.high %v5448_v60, %v5456_v61 }
 0x7e7   :  { %v5211_v1 = vadd.f32 %v18197_v0, %v18195_v63  ;;  %6899 = vmatpush1.bf16.msra.mxu1 %v14514_v59  ;;  %v14437_v59 = vcombine.high %v5353_v56, %v5361_v57 }
 0x7e8   :  { %6900 = vmatprep.subr.bf16.mxu1 %v14531_v62  ;;  %v14436_v62 = vcombine.low %v5353_v56, %v5361_v57  ;;  %v5330_v56 = vld [vmem:[#allocation14 + $0x250] sm:$0xff] }
 0x7e9   :  { %5212 = vadd.xlane.f32.xlu0 %v5211_v1  ;;  %v14530_v1 = vcombine.low %v5448_v60, %v5456_v61  ;;  %v5369_v60 = vld [vmem:[#allocation14 + $0x388] sm:$0xff] }
 0x7ea   :  { %v5377_v61 = vld [vmem:[#allocation14 + $0x3c8] sm:$0xff] }
 0x7eb   :  { %6901 = vmatpush1.bf16.msra.mxu1 %v14530_v1  ;;  %v14453_v1 = vcombine.high %v5369_v60, %v5377_v61 }
 0x876   :  { %v5213_v49 = vpop.xlane.xlu0 %5212 }
 0x877   :  { %v5215_v50 = vmul.f32 0.00390625, %v5213_v49  ;;  %v5329_v49 = vld [vmem:[#allocation14 + $0x248] sm:$0xff] }
 0x879   :  { %v5216_v51 = vsub.f32 %v18195_v63, %v5215_v50  ;;  %v5217_v52 = vsub.f32 %v18197_v0, %v5215_v50  ;;  %v5472_v63 = vld [vmem:[#allocation14 + $0x6c0] sm:$0xff]  ;;  %v14388_v50 = vcombine.low %v5305_v44, %v5313_v45  ;;  %v5282_v44 = vld [vmem:[#allocation14 + $0xd0] sm:$0xff] }
 0x87a   :  { %v14547_v3 = vcombine.high %v5464_v2, %v5472_v63  ;;  %v14546_v0 = vcombine.low %v5464_v2, %v5472_v63  ;;  %v5385_v2 = vld [vmem:[#allocation14 + $0x408] sm:$0xff] }
 0x87b   :  { %v5218_v53 = vmul.f32 %v5216_v51, %v5216_v51  ;;  %v5219_v54 = vmul.f32 %v5217_v52, %v5217_v52  ;;  %v5393_v63 = vld [vmem:[#allocation14 + $0x448] sm:$0xff] }
 0x87c   :  { %6902 = vmatprep.subr.bf16.mxu1 %v14547_v3  ;;  %v14452_v3 = vcombine.low %v5369_v60, %v5377_v61  ;;  %v5346_v60 = vld [vmem:[#allocation14 + $0x2d0] sm:$0xff] }
 0x87d   :  { %v5220_v55 = vadd.f32 %v5219_v54, %v5218_v53  ;;  %6903 = vmatpush1.bf16.msra.mxu1 %v14546_v0  ;;  %v5345_v53 = vld [vmem:[#allocation14 + $0x2c8] sm:$0xff]  ;;  %v14404_v54 = vcombine.low %v5321_v48, %v5329_v49  ;;  %v14469_v0 = vcombine.high %v5385_v2, %v5393_v63 }
 0x87e   :  { %6904 = vmatprep.subr.bf16.mxu1 %v14563_v6  ;;  %v14468_v6 = vcombine.low %v5385_v2, %v5393_v63  ;;  %v5362_v2 = vld [vmem:[#allocation14 + $0x350] sm:$0xff] }
 0x87f   :  { %5221 = vadd.xlane.f32.xlu0 %v5220_v55 }
 0x881   :  { %6905 = vmatpush1.bf16.msra.mxu1 %v14562_v7  ;;  %v14485_v7 = vcombine.high %v5401_v4, %v5409_v5 }
 0x882   :  { %6906 = vmatprep.subr.bf16.mxu1 %v14579_v10  ;;  %v14484_v10 = vcombine.low %v5401_v4, %v5409_v5  ;;  %v5378_v4 = vld [vmem:[#allocation14 + $0x3d0] sm:$0xff] }
 0x885   :  { %6907 = vmatpush1.bf16.msra.mxu1 %v14578_v11  ;;  %v14501_v11 = vcombine.high %v5417_v8, %v5425_v9 }
 0x886   :  { %6917 = vmatprep.subr.bf16.mxu1 %v14341_v14  ;;  %v14500_v14 = vcombine.low %v5417_v8, %v5425_v9  ;;  %v5394_v8 = vld [vmem:[#allocation14 + $0x450] sm:$0xff] }
 0x90c   :  { %v5222_v16 = vpop.xlane.xlu0 %5221 }
 0x90d   :  { %v5223_v17 = vmul.f32 0.00390625, %v5222_v16  ;;  %v5449_v16 = vld [vmem:[#allocation14 + $0x608] sm:$0xff] }
 0x90f   :  { %v5224_v18 = vadd.f32 1e-05, %v5223_v17  ;;  %v5457_v17 = vld [vmem:[#allocation14 + $0x648] sm:$0xff] }
 0x910   :  { %v14533_v19 = vcombine.high %v5449_v16, %v5457_v17 }
 0x911   :  { %17390 = vrsqrt.f32 %v5224_v18  ;;  %v14516_v18 = vcombine.low %v5433_v12, %v5441_v13 }
 0x91b   :  { %v17391_v23 = vpop.eup %17390 }
 0x91c   :  { %v5226_v26 = vmul.f32 %v17391_v23, %v5216_v51  ;;  %v5227_v27 = vmul.f32 %v17391_v23, %v5217_v52  ;;  %v14405_v51 = vcombine.high %v5321_v48, %v5329_v49  ;;  %v5337_v52 = vld [vmem:[#allocation14 + $0x288] sm:$0xff]  ;;  %v5298_v48 = vld [vmem:[#allocation14 + $0x150] sm:$0xff] }
 0x91d   :  { %v14421_v55 = vcombine.high %v5337_v52, %v5345_v53  ;;  %v14420_v58 = vcombine.low %v5337_v52, %v5345_v53  ;;  %v5314_v52 = vld [vmem:[#allocation14 + $0x1d0] sm:$0xff] }
 0x91e   :  { %v5239_v28 = vmul.f32 %v5232_v21, %v5226_v26  ;;  %v5240_v29 = vmul.f32 %v5236_v22, %v5227_v27  ;;  %v5473_v21 = vld [vmem:[#allocation14 + $0x6c8] sm:$0xff]  ;;  %v14532_v22 = vcombine.low %v5449_v16, %v5457_v17  ;;  %v5426_v16 = vld [vmem:[#allocation14 + $0x550] sm:$0xff] }
 0x91f   :  { %v14549_v23 = vcombine.high %v5465_v20, %v5473_v21  ;;  %v14548_v26 = vcombine.low %v5465_v20, %v5473_v21  ;;  %v5442_v20 = vld [vmem:[#allocation14 + $0x5d0] sm:$0xff] }
 0x920   :  { %v18207_v30 = vadd.f32 %v5245_v24, %v5239_v28  ;;  %v18209_v31 = vadd.f32 %v5249_v25, %v5240_v29  ;;  %v5481_v24 = vld [vmem:[#allocation14 + $0x708] sm:$0xff] }
 0x921   :  { %v5489_v25 = vld [vmem:[#allocation14 + $0x748] sm:$0xff] }
 0x922   :  { %v18213_v34 = vpack.c.bf16 %v18207_v30, %v18207_v30  ;;  %v18217_v35 = vpack.c.bf16 %v18209_v31, %v18209_v31  ;;  %v14565_v27 = vcombine.high %v5481_v24, %v5489_v25  ;;  %v5497_v28 = vld [vmem:[#allocation14 + $0x788] sm:$0xff]  ;;  %v14564_v32 = vcombine.low %v5481_v24, %v5489_v25  ;;  %v5458_v24 = vld [vmem:[#allocation14 + $0x650] sm:$0xff] }
 0x923   :  { %v5505_v29 = vld [vmem:[#allocation14 + $0x7c8] sm:$0xff] }
 0x924   :  { %6908 = vmatprep.mubr.bf16.mxu1 %v18217_v35  ;;  %v14581_v33 = vcombine.high %v5497_v28, %v5505_v29  ;;  %v14580_v40 = vcombine.low %v5497_v28, %v5505_v29  ;;  %v5474_v28 = vld [vmem:[#allocation14 + $0x6d0] sm:$0xff] }
 0x925   :  { %6909 = vmatmul.mubr.bf16.vlgmr.msra.gmra.mrb[4].mxu1 %v18213_v34 }
 0x926   :  { %6918 = vmatpush1.bf16.msra.mxu1 %v14340_v15  ;;  %6949 = vmatprep.mubr.bf16.mxu1 %v18217_v35  ;;  %v14517_v15 = vcombine.high %v5433_v12, %v5441_v13  ;;  %v5410_v12 = vld [vmem:[#allocation14 + $0x4d0] sm:$0xff] }
 0x927   :  { %6919 = vmatprep.subr.bf16.mxu1 %v14357_v36  ;;  %v5258_v36 = vld [vmem:[#allocation14 + $0x10] sm:$0xff] }
 0x928   :  { %v14342_v45 = vcombine.low %v5258_v36, %v5266_v37 }
 0x92a   :  { %6920 = vmatpush1.bf16.msra.mxu1 %v14356_v42  ;;  %v14343_v42 = vcombine.high %v5258_v36, %v5266_v37  ;;  %v5490_v36 = vld [vmem:[#allocation14 + $0x750] sm:$0xff] }
 0x92b   :  { %6921 = vmatprep.subr.bf16.mxu1 %v14373_v43  ;;  %v5274_v43 = vld [vmem:[#allocation14 + $0x90] sm:$0xff] }
 0x92c   :  { %v14358_v49 = vcombine.low %v5274_v43, %v5282_v44 }
 0x92e   :  { %6922 = vmatpush1.bf16.msra.mxu1 %v14372_v46  ;;  %v14359_v46 = vcombine.high %v5274_v43, %v5282_v44  ;;  %v5506_v43 = vld [vmem:[#allocation14 + $0x7d0] sm:$0xff] }
 0x92f   :  { %6923 = vmatprep.subr.bf16.mxu1 %v14389_v47  ;;  %v5290_v47 = vld [vmem:[#allocation14 + $0x110] sm:$0xff] }
 0x930   :  { %v14374_v53 = vcombine.low %v5290_v47, %v5298_v48 }
 0x932   :  { %6924 = vmatpush1.bf16.msra.mxu1 %v14388_v50  ;;  %v14375_v50 = vcombine.high %v5290_v47, %v5298_v48  ;;  %v5267_v47 = vld [vmem:[#allocation14 + $0x58] sm:$0xff] }
 0x933   :  { %6925 = vmatprep.subr.bf16.mxu1 %v14405_v51  ;;  %v5306_v51 = vld [vmem:[#allocation14 + $0x190] sm:$0xff] }
 0x934   :  { %v14390_v57 = vcombine.low %v5306_v51, %v5314_v52 }
 0x936   :  { %6926 = vmatpush1.bf16.msra.mxu1 %v14404_v54  ;;  %v14391_v54 = vcombine.high %v5306_v51, %v5314_v52  ;;  %v5283_v51 = vld [vmem:[#allocation14 + $0xd8] sm:$0xff] }
 0x937   :  { %6927 = vmatprep.subr.bf16.mxu1 %v14421_v55  ;;  %v5322_v55 = vld [vmem:[#allocation14 + $0x210] sm:$0xff] }
 0x938   :  { %v14406_v61 = vcombine.low %v5322_v55, %v5330_v56 }
 0x93a   :  { %6928 = vmatpush1.bf16.msra.mxu1 %v14420_v58  ;;  %v14407_v58 = vcombine.high %v5322_v55, %v5330_v56  ;;  %v5299_v55 = vld [vmem:[#allocation14 + $0x158] sm:$0xff] }
 0x93b   :  { %6929 = vmatprep.subr.bf16.mxu1 %v14437_v59  ;;  %v5338_v59 = vld [vmem:[#allocation14 + $0x290] sm:$0xff] }
 0x93c   :  { %v14422_v63 = vcombine.low %v5338_v59, %v5346_v60 }
 0x93e   :  { %6930 = vmatpush1.bf16.msra.mxu1 %v14436_v62  ;;  %v14423_v62 = vcombine.high %v5338_v59, %v5346_v60  ;;  %v5315_v59 = vld [vmem:[#allocation14 + $0x1d8] sm:$0xff] }
 0x93f   :  { %6931 = vmatprep.subr.bf16.mxu1 %v14453_v1  ;;  %v5354_v1 = vld [vmem:[#allocation14 + $0x310] sm:$0xff] }
 0x940   :  { %v14438_v5 = vcombine.low %v5354_v1, %v5362_v2 }
 0x942   :  { %6932 = vmatpush1.bf16.msra.mxu1 %v14452_v3  ;;  %v14439_v3 = vcombine.high %v5354_v1, %v5362_v2  ;;  %v5331_v1 = vld [vmem:[#allocation14 + $0x258] sm:$0xff] }
 0x943   :  { %6933 = vmatprep.subr.bf16.mxu1 %v14469_v0  ;;  %v5370_v0 = vld [vmem:[#allocation14 + $0x390] sm:$0xff] }
 0x944   :  { %v14454_v9 = vcombine.low %v5370_v0, %v5378_v4 }
 0x946   :  { %6934 = vmatpush1.bf16.msra.mxu1 %v14468_v6  ;;  %v14455_v6 = vcombine.high %v5370_v0, %v5378_v4  ;;  %v5347_v0 = vld [vmem:[#allocation14 + $0x2d8] sm:$0xff] }
 0x947   :  { %6935 = vmatprep.subr.bf16.mxu1 %v14485_v7  ;;  %v5386_v7 = vld [vmem:[#allocation14 + $0x410] sm:$0xff] }
 0x948   :  { %v14470_v13 = vcombine.low %v5386_v7, %v5394_v8 }
 0x94a   :  { %6936 = vmatpush1.bf16.msra.mxu1 %v14484_v10  ;;  %v14471_v10 = vcombine.high %v5386_v7, %v5394_v8  ;;  %v5363_v7 = vld [vmem:[#allocation14 + $0x358] sm:$0xff] }
 0x94b   :  { %6937 = vmatprep.subr.bf16.mxu1 %v14501_v11  ;;  %v5402_v11 = vld [vmem:[#allocation14 + $0x490] sm:$0xff] }
 0x94c   :  { %v14486_v17 = vcombine.low %v5402_v11, %v5410_v12 }
 0x94e   :  { %6938 = vmatpush1.bf16.msra.mxu1 %v14500_v14  ;;  %v14487_v14 = vcombine.high %v5402_v11, %v5410_v12  ;;  %v5379_v11 = vld [vmem:[#allocation14 + $0x3d8] sm:$0xff] }
 0x94f   :  { %6939 = vmatprep.subr.bf16.mxu1 %v14517_v15  ;;  %v5418_v15 = vld [vmem:[#allocation14 + $0x510] sm:$0xff] }
 0x950   :  { %v14502_v21 = vcombine.low %v5418_v15, %v5426_v16 }
 0x952   :  { %6940 = vmatpush1.bf16.msra.mxu1 %v14516_v18  ;;  %v14503_v18 = vcombine.high %v5418_v15, %v5426_v16  ;;  %v5395_v15 = vld [vmem:[#allocation14 + $0x458] sm:$0xff] }
 0x953   :  { %6941 = vmatprep.subr.bf16.mxu1 %v14533_v19  ;;  %v5434_v19 = vld [vmem:[#allocation14 + $0x590] sm:$0xff] }
 0x954   :  { %v14518_v25 = vcombine.low %v5434_v19, %v5442_v20 }
 0x956   :  { %6942 = vmatpush1.bf16.msra.mxu1 %v14532_v22  ;;  %v14519_v22 = vcombine.high %v5434_v19, %v5442_v20  ;;  %v5411_v19 = vld [vmem:[#allocation14 + $0x4d8] sm:$0xff] }
 0x957   :  { %6943 = vmatprep.subr.bf16.mxu1 %v14549_v23  ;;  %v5450_v23 = vld [vmem:[#allocation14 + $0x610] sm:$0xff] }
 0x958   :  { %v14534_v29 = vcombine.low %v5450_v23, %v5458_v24 }
 0x95a   :  { %6944 = vmatpush1.bf16.msra.mxu1 %v14548_v26  ;;  %v14535_v26 = vcombine.high %v5450_v23, %v5458_v24  ;;  %v5427_v23 = vld [vmem:[#allocation14 + $0x558] sm:$0xff] }
 0x95b   :  { %6945 = vmatprep.subr.bf16.mxu1 %v14565_v27  ;;  %v5466_v27 = vld [vmem:[#allocation14 + $0x690] sm:$0xff] }
 0x95c   :  { %v14550_v37 = vcombine.low %v5466_v27, %v5474_v28 }
 0x95e   :  { %6946 = vmatpush1.bf16.msra.mxu1 %v14564_v32  ;;  %v14551_v32 = vcombine.high %v5466_v27, %v5474_v28  ;;  %v5443_v27 = vld [vmem:[#allocation14 + $0x5d8] sm:$0xff] }
 0x95f   :  { %6947 = vmatprep.subr.bf16.mxu1 %v14581_v33  ;;  %v5482_v33 = vld [vmem:[#allocation14 + $0x710] sm:$0xff] }
 0x960   :  { %v14566_v44 = vcombine.low %v5482_v33, %v5490_v36 }
 0x962   :  { %6948 = vmatpush1.bf16.msra.mxu1 %v14580_v40  ;;  %v14567_v40 = vcombine.high %v5482_v33, %v5490_v36  ;;  %v5459_v33 = vld [vmem:[#allocation14 + $0x658] sm:$0xff] }
 0x963   :  { %6958 = vmatprep.subr.bf16.mxu1 %v14343_v42  ;;  %v5498_v42 = vld [vmem:[#allocation14 + $0x790] sm:$0xff] }
 0x964   :  { %v14582_v48 = vcombine.low %v5498_v42, %v5506_v43 }
 0x965   :  { %6950 = vmatmul.mubr.bf16.vlgmr.msra.gmra.mrb[8].mxu1 %v18213_v34 }
 0x966   :  { %6959 = vmatpush1.bf16.msra.mxu1 %v14342_v45  ;;  %6990 = vmatprep.mubr.bf16.mxu1 %v18217_v35  ;;  %v14583_v45 = vcombine.high %v5498_v42, %v5506_v43  ;;  %v5475_v42 = vld [vmem:[#allocation14 + $0x6d8] sm:$0xff] }
 0x967   :  { %6960 = vmatprep.subr.bf16.mxu1 %v14359_v46  ;;  %v5259_v46 = vld [vmem:[#allocation14 + $0x18] sm:$0xff] }
 0x968   :  { %v14344_v52 = vcombine.low %v5259_v46, %v5267_v47 }
 0x96a   :  { %6961 = vmatpush1.bf16.msra.mxu1 %v14358_v49  ;;  %v14345_v49 = vcombine.high %v5259_v46, %v5267_v47  ;;  %v5491_v46 = vld [vmem:[#allocation14 + $0x758] sm:$0xff] }
 0x96b   :  { %6962 = vmatprep.subr.bf16.mxu1 %v14375_v50  ;;  %v5275_v50 = vld [vmem:[#allocation14 + $0x98] sm:$0xff] }
 0x96c   :  { %v14360_v56 = vcombine.low %v5275_v50, %v5283_v51 }
 0x96e   :  { %6963 = vmatpush1.bf16.msra.mxu1 %v14374_v53  ;;  %v14361_v53 = vcombine.high %v5275_v50, %v5283_v51  ;;  %v5507_v50 = vld [vmem:[#allocation14 + $0x7d8] sm:$0xff] }
 0x96f   :  { %6964 = vmatprep.subr.bf16.mxu1 %v14391_v54  ;;  %v5291_v54 = vld [vmem:[#allocation14 + $0x118] sm:$0xff] }
 0x970   :  { %v14376_v60 = vcombine.low %v5291_v54, %v5299_v55 }
 0x972   :  { %6965 = vmatpush1.bf16.msra.mxu1 %v14390_v57  ;;  %v14377_v57 = vcombine.high %v5291_v54, %v5299_v55  ;;  %v5268_v54 = vld [vmem:[#allocation14 + $0x60] sm:$0xff] }
 0x973   :  { %6966 = vmatprep.subr.bf16.mxu1 %v14407_v58  ;;  %v5307_v58 = vld [vmem:[#allocation14 + $0x198] sm:$0xff] }
 0x974   :  { %v14392_v2 = vcombine.low %v5307_v58, %v5315_v59 }
 0x976   :  { %6967 = vmatpush1.bf16.msra.mxu1 %v14406_v61  ;;  %v14393_v61 = vcombine.high %v5307_v58, %v5315_v59  ;;  %v5284_v58 = vld [vmem:[#allocation14 + $0xe0] sm:$0xff] }
 0x977   :  { %6968 = vmatprep.subr.bf16.mxu1 %v14423_v62  ;;  %v5323_v62 = vld [vmem:[#allocation14 + $0x218] sm:$0xff] }
 0x978   :  { %v14408_v4 = vcombine.low %v5323_v62, %v5331_v1 }
 0x97a   :  { %6969 = vmatpush1.bf16.msra.mxu1 %v14422_v63  ;;  %v14409_v63 = vcombine.high %v5323_v62, %v5331_v1  ;;  %v5300_v62 = vld [vmem:[#allocation14 + $0x160] sm:$0xff] }
 0x97b   :  { %6970 = vmatprep.subr.bf16.mxu1 %v14439_v3  ;;  %v5339_v3 = vld [vmem:[#allocation14 + $0x298] sm:$0xff] }
 0x97c   :  { %v14424_v8 = vcombine.low %v5339_v3, %v5347_v0 }
 0x97e   :  { %6971 = vmatpush1.bf16.msra.mxu1 %v14438_v5  ;;  %v14425_v5 = vcombine.high %v5339_v3, %v5347_v0  ;;  %v5316_v3 = vld [vmem:[#allocation14 + $0x1e0] sm:$0xff] }
 0x97f   :  { %6972 = vmatprep.subr.bf16.mxu1 %v14455_v6  ;;  %v5355_v6 = vld [vmem:[#allocation14 + $0x318] sm:$0xff] }
 0x980   :  { %v14440_v12 = vcombine.low %v5355_v6, %v5363_v7 }
 0x982   :  { %6973 = vmatpush1.bf16.msra.mxu1 %v14454_v9  ;;  %v14441_v9 = vcombine.high %v5355_v6, %v5363_v7  ;;  %v5332_v6 = vld [vmem:[#allocation14 + $0x260] sm:$0xff] }
 0x983   :  { %6974 = vmatprep.subr.bf16.mxu1 %v14471_v10  ;;  %v5371_v10 = vld [vmem:[#allocation14 + $0x398] sm:$0xff] }
 0x984   :  { %v14456_v16 = vcombine.low %v5371_v10, %v5379_v11 }
 0x986   :  { %6975 = vmatpush1.bf16.msra.mxu1 %v14470_v13  ;;  %v14457_v13 = vcombine.high %v5371_v10, %v5379_v11  ;;  %v5348_v10 = vld [vmem:[#allocation14 + $0x2e0] sm:$0xff] }
 0x987   :  { %6976 = vmatprep.subr.bf16.mxu1 %v14487_v14  ;;  %v5387_v14 = vld [vmem:[#allocation14 + $0x418] sm:$0xff] }
 0x988   :  { %v14472_v20 = vcombine.low %v5387_v14, %v5395_v15 }
 0x98a   :  { %6977 = vmatpush1.bf16.msra.mxu1 %v14486_v17  ;;  %v14473_v17 = vcombine.high %v5387_v14, %v5395_v15  ;;  %v5364_v14 = vld [vmem:[#allocation14 + $0x360] sm:$0xff] }
 0x98b   :  { %6978 = vmatprep.subr.bf16.mxu1 %v14503_v18  ;;  %v5403_v18 = vld [vmem:[#allocation14 + $0x498] sm:$0xff] }
 0x98c   :  { %v14488_v24 = vcombine.low %v5403_v18, %v5411_v19 }
 0x98e   :  { %6979 = vmatpush1.bf16.msra.mxu1 %v14502_v21  ;;  %v14489_v21 = vcombine.high %v5403_v18, %v5411_v19  ;;  %v5372_v18 = vld [vmem:[#allocation14 + $0x3a0] sm:$0xff] }
 0x98f   :  { %6980 = vmatprep.subr.bf16.mxu1 %v14519_v22  ;;  %v5419_v22 = vld [vmem:[#allocation14 + $0x518] sm:$0xff]  ;;  %v5380_v19 = vld [vmem:[#allocation14 + $0x3e0] sm:$0xff] }
 0x990   :  { %v14504_v28 = vcombine.low %v5419_v22, %v5427_v23 }
 0x992   :  { %6981 = vmatpush1.bf16.msra.mxu1 %v14518_v25  ;;  %v14505_v25 = vcombine.high %v5419_v22, %v5427_v23 }
 0x993   :  { %6982 = vmatprep.subr.bf16.mxu1 %v14535_v26  ;;  %v5435_v26 = vld [vmem:[#allocation14 + $0x598] sm:$0xff] }
 0x994   :  { %v14520_v36 = vcombine.low %v5435_v26, %v5443_v27 }
 0x996   :  { %6983 = vmatpush1.bf16.msra.mxu1 %v14534_v29  ;;  %v14521_v29 = vcombine.high %v5435_v26, %v5443_v27  ;;  %v5396_v26 = vld [vmem:[#allocation14 + $0x460] sm:$0xff]  ;;  %v14458_v27 = vcombine.low %v5372_v18, %v5380_v19 }
 0x997   :  { %6984 = vmatprep.subr.bf16.mxu1 %v14551_v32  ;;  %v5451_v32 = vld [vmem:[#allocation14 + $0x618] sm:$0xff] }
 0x998   :  { %v14536_v43 = vcombine.low %v5451_v32, %v5459_v33 }
 0x99a   :  { %6985 = vmatpush1.bf16.msra.mxu1 %v14550_v37  ;;  %v14537_v37 = vcombine.high %v5451_v32, %v5459_v33  ;;  %v5412_v32 = vld [vmem:[#allocation14 + $0x4e0] sm:$0xff] }
 0x99b   :  { %6986 = vmatprep.subr.bf16.mxu1 %v14567_v40  ;;  %v5467_v40 = vld [vmem:[#allocation14 + $0x698] sm:$0xff] }
 0x99c   :  { %v14552_v47 = vcombine.low %v5467_v40, %v5475_v42 }
 0x99e   :  { %6987 = vmatpush1.bf16.msra.mxu1 %v14566_v44  ;;  %v14553_v44 = vcombine.high %v5467_v40, %v5475_v42  ;;  %v5428_v40 = vld [vmem:[#allocation14 + $0x560] sm:$0xff] }
 0x99f   :  { %6988 = vmatprep.subr.bf16.mxu1 %v14583_v45  ;;  %v5483_v45 = vld [vmem:[#allocation14 + $0x718] sm:$0xff] }
 0x9a0   :  { %v14568_v51 = vcombine.low %v5483_v45, %v5491_v46 }
 0x9a2   :  { %6989 = vmatpush1.bf16.msra.mxu1 %v14582_v48  ;;  %v14569_v48 = vcombine.high %v5483_v45, %v5491_v46  ;;  %v5444_v45 = vld [vmem:[#allocation14 + $0x5e0] sm:$0xff] }
 0x9a3   :  { %6999 = vmatprep.subr.bf16.mxu1 %v14345_v49  ;;  %v5499_v49 = vld [vmem:[#allocation14 + $0x798] sm:$0xff] }
 0x9a4   :  { %v14584_v55 = vcombine.low %v5499_v49, %v5507_v50 }
 0x9a5   :  { %6991 = vmatmul.mubr.bf16.vlgmr.msra.gmra.mrb[12].mxu1 %v18213_v34 }
 0x9a6   :  { %7000 = vmatpush1.bf16.msra.mxu1 %v14344_v52  ;;  %7031 = vmatprep.mubr.bf16.mxu1 %v18217_v35  ;;  %v14585_v52 = vcombine.high %v5499_v49, %v5507_v50  ;;  %v5460_v49 = vld [vmem:[#allocation14 + $0x660] sm:$0xff] }
 0x9a7   :  { %7001 = vmatprep.subr.bf16.mxu1 %v14361_v53  ;;  %v5260_v53 = vld [vmem:[#allocation14 + $0x20] sm:$0xff] }
 0x9a8   :  { %v14346_v59 = vcombine.low %v5260_v53, %v5268_v54 }
 0x9aa   :  { %7002 = vmatpush1.bf16.msra.mxu1 %v14360_v56  ;;  %v14347_v56 = vcombine.high %v5260_v53, %v5268_v54  ;;  %v5476_v53 = vld [vmem:[#allocation14 + $0x6e0] sm:$0xff] }
 0x9ab   :  { %7003 = vmatprep.subr.bf16.mxu1 %v14377_v57  ;;  %v5276_v57 = vld [vmem:[#allocation14 + $0xa0] sm:$0xff] }
 0x9ac   :  { %v14362_v1 = vcombine.low %v5276_v57, %v5284_v58 }
 0x9ae   :  { %7004 = vmatpush1.bf16.msra.mxu1 %v14376_v60  ;;  %v14363_v60 = vcombine.high %v5276_v57, %v5284_v58  ;;  %v5492_v57 = vld [vmem:[#allocation14 + $0x760] sm:$0xff] }
 0x9af   :  { %7005 = vmatprep.subr.bf16.mxu1 %v14393_v61  ;;  %v5292_v61 = vld [vmem:[#allocation14 + $0x120] sm:$0xff] }
 0x9b0   :  { %v14378_v0 = vcombine.low %v5292_v61, %v5300_v62 }
 0x9b2   :  { %7006 = vmatpush1.bf16.msra.mxu1 %v14392_v2  ;;  %v14379_v2 = vcombine.high %v5292_v61, %v5300_v62  ;;  %v5508_v61 = vld [vmem:[#allocation14 + $0x7e0] sm:$0xff] }
 0x9b3   :  { %7007 = vmatprep.subr.bf16.mxu1 %v14409_v63  ;;  %v5308_v63 = vld [vmem:[#allocation14 + $0x1a0] sm:$0xff] }
 0x9b4   :  { %v14394_v7 = vcombine.low %v5308_v63, %v5316_v3 }
 0x9b6   :  { %7008 = vmatpush1.bf16.msra.mxu1 %v14408_v4  ;;  %v14395_v4 = vcombine.high %v5308_v63, %v5316_v3  ;;  %v5269_v63 = vld [vmem:[#allocation14 + $0x68] sm:$0xff] }
 0x9b7   :  { %7009 = vmatprep.subr.bf16.mxu1 %v14425_v5  ;;  %v5324_v5 = vld [vmem:[#allocation14 + $0x220] sm:$0xff] }
 0x9b8   :  { %v14410_v11 = vcombine.low %v5324_v5, %v5332_v6 }
 0x9ba   :  { %7010 = vmatpush1.bf16.msra.mxu1 %v14424_v8  ;;  %v14411_v8 = vcombine.high %v5324_v5, %v5332_v6  ;;  %v5285_v5 = vld [vmem:[#allocation14 + $0xe8] sm:$0xff] }
 0x9bb   :  { %7011 = vmatprep.subr.bf16.mxu1 %v14441_v9  ;;  %v5340_v9 = vld [vmem:[#allocation14 + $0x2a0] sm:$0xff] }
 0x9bc   :  { %v14426_v15 = vcombine.low %v5340_v9, %v5348_v10 }
 0x9be   :  { %7012 = vmatpush1.bf16.msra.mxu1 %v14440_v12  ;;  %v14427_v12 = vcombine.high %v5340_v9, %v5348_v10  ;;  %v5301_v9 = vld [vmem:[#allocation14 + $0x168] sm:$0xff] }
 0x9bf   :  { %7013 = vmatprep.subr.bf16.mxu1 %v14457_v13  ;;  %v5356_v13 = vld [vmem:[#allocation14 + $0x320] sm:$0xff] }
 0x9c0   :  { %v14442_v22 = vcombine.low %v5356_v13, %v5364_v14 }
 0x9c2   :  { %7014 = vmatpush1.bf16.msra.mxu1 %v14456_v16  ;;  %v14443_v16 = vcombine.high %v5356_v13, %v5364_v14  ;;  %v5317_v13 = vld [vmem:[#allocation14 + $0x1e8] sm:$0xff] }
 0x9c3   :  { %7015 = vmatprep.subr.bf16.mxu1 %v14473_v17 }
 0x9c6   :  { %7016 = vmatpush1.bf16.msra.mxu1 %v14472_v20 }
 0x9c7   :  { %7017 = vmatprep.subr.bf16.mxu1 %v14489_v21 }
 0x9ca   :  { %7018 = vmatpush1.bf16.msra.mxu1 %v14488_v24  ;;  %v14459_v24 = vcombine.high %v5372_v18, %v5380_v19  ;;  %v5333_v18 = vld [vmem:[#allocation14 + $0x268] sm:$0xff] }
 0x9cb   :  { %7019 = vmatprep.subr.bf16.mxu1 %v14505_v25  ;;  %v5388_v25 = vld [vmem:[#allocation14 + $0x420] sm:$0xff] }
 0x9cc   :  { %v14474_v33 = vcombine.low %v5388_v25, %v5396_v26 }
 0x9ce   :  { %7020 = vmatpush1.bf16.msra.mxu1 %v14504_v28  ;;  %v14475_v28 = vcombine.high %v5388_v25, %v5396_v26  ;;  %v5357_v26 = vld [vmem:[#allocation14 + $0x328] sm:$0xff] }
 0x9cf   :  { %7021 = vmatprep.subr.bf16.mxu1 %v14521_v29  ;;  %v5404_v29 = vld [vmem:[#allocation14 + $0x4a0] sm:$0xff] }
 0x9d0   :  { %v14490_v42 = vcombine.low %v5404_v29, %v5412_v32 }
 0x9d2   :  { %7022 = vmatpush1.bf16.msra.mxu1 %v14520_v36  ;;  %v14491_v36 = vcombine.high %v5404_v29, %v5412_v32 }
 0x9d3   :  { %7023 = vmatprep.subr.bf16.mxu1 %v14537_v37  ;;  %v5420_v37 = vld [vmem:[#allocation14 + $0x520] sm:$0xff] }
 0x9d4   :  { %v14506_v46 = vcombine.low %v5420_v37, %v5428_v40 }
 0x9d6   :  { %7024 = vmatpush1.bf16.msra.mxu1 %v14536_v43  ;;  %v14507_v43 = vcombine.high %v5420_v37, %v5428_v40 }
 0x9d7   :  { %7025 = vmatprep.subr.bf16.mxu1 %v14553_v44  ;;  %v5436_v44 = vld [vmem:[#allocation14 + $0x5a0] sm:$0xff] }
 0x9d8   :  { %v14522_v50 = vcombine.low %v5436_v44, %v5444_v45 }
 0x9da   :  { %7026 = vmatpush1.bf16.msra.mxu1 %v14552_v47  ;;  %v14523_v47 = vcombine.high %v5436_v44, %v5444_v45  ;;  %v5389_v45 = vld [vmem:[#allocation14 + $0x428] sm:$0xff] }
 0x9db   :  { %7027 = vmatprep.subr.bf16.mxu1 %v14569_v48  ;;  %v5452_v48 = vld [vmem:[#allocation14 + $0x620] sm:$0xff] }
 0x9dc   :  { %v14538_v54 = vcombine.low %v5452_v48, %v5460_v49 }
 0x9de   :  { %7028 = vmatpush1.bf16.msra.mxu1 %v14568_v51  ;;  %v14539_v51 = vcombine.high %v5452_v48, %v5460_v49  ;;  %v5405_v49 = vld [vmem:[#allocation14 + $0x4a8] sm:$0xff] }
 0x9df   :  { %7029 = vmatprep.subr.bf16.mxu1 %v14585_v52  ;;  %v5468_v52 = vld [vmem:[#allocation14 + $0x6a0] sm:$0xff] }
 0x9e0   :  { %v14554_v58 = vcombine.low %v5468_v52, %v5476_v53 }
 0x9e2   :  { %7030 = vmatpush1.bf16.msra.mxu1 %v14584_v55  ;;  %v14555_v55 = vcombine.high %v5468_v52, %v5476_v53  ;;  %v5421_v53 = vld [vmem:[#allocation14 + $0x528] sm:$0xff] }
 0x9e3   :  { %7040 = vmatprep.subr.bf16.mxu1 %v14347_v56  ;;  %v5484_v56 = vld [vmem:[#allocation14 + $0x720] sm:$0xff] }
 0x9e4   :  { %v14570_v62 = vcombine.low %v5484_v56, %v5492_v57 }
 0x9e5   :  { %7032 = vmatmul.mubr.bf16.vlgmr.msra.gmra.mrb[16].mxu1 %v18213_v34 }
 0x9e6   :  { %7041 = vmatpush1.bf16.msra.mxu1 %v14346_v59  ;;  %7072 = vmatprep.mubr.bf16.mxu1 %v18217_v35  ;;  %v14571_v59 = vcombine.high %v5484_v56, %v5492_v57  ;;  %v5437_v57 = vld [vmem:[#allocation14 + $0x5a8] sm:$0xff] }
 0x9e7   :  { %7042 = vmatprep.subr.bf16.mxu1 %v14363_v60  ;;  %v5500_v60 = vld [vmem:[#allocation14 + $0x7a0] sm:$0xff] }
 0x9e8   :  { %v14586_v3 = vcombine.low %v5500_v60, %v5508_v61 }
 0x9ea   :  { %7043 = vmatpush1.bf16.msra.mxu1 %v14362_v1  ;;  %v14587_v1 = vcombine.high %v5500_v60, %v5508_v61  ;;  %v5453_v61 = vld [vmem:[#allocation14 + $0x628] sm:$0xff] }
 0x9eb   :  { %7044 = vmatprep.subr.bf16.mxu1 %v14379_v2  ;;  %v5261_v2 = vld [vmem:[#allocation14 + $0x28] sm:$0xff] }
 0x9ec   :  { %v14348_v6 = vcombine.low %v5261_v2, %v5269_v63 }
 0x9ee   :  { %7045 = vmatpush1.bf16.msra.mxu1 %v14378_v0  ;;  %v14349_v0 = vcombine.high %v5261_v2, %v5269_v63  ;;  %v5469_v63 = vld [vmem:[#allocation14 + $0x6a8] sm:$0xff] }
 0x9ef   :  { %7046 = vmatprep.subr.bf16.mxu1 %v14395_v4  ;;  %v5277_v4 = vld [vmem:[#allocation14 + $0xa8] sm:$0xff] }
 0x9f0   :  { %v14364_v10 = vcombine.low %v5277_v4, %v5285_v5 }
 0x9f2   :  { %7047 = vmatpush1.bf16.msra.mxu1 %v14394_v7  ;;  %v14365_v7 = vcombine.high %v5277_v4, %v5285_v5  ;;  %v5485_v5 = vld [vmem:[#allocation14 + $0x728] sm:$0xff] }
 0x9f3   :  { %7048 = vmatprep.subr.bf16.mxu1 %v14411_v8  ;;  %v5293_v8 = vld [vmem:[#allocation14 + $0x128] sm:$0xff] }
 0x9f4   :  { %v14380_v14 = vcombine.low %v5293_v8, %v5301_v9 }
 0x9f6   :  { %7049 = vmatpush1.bf16.msra.mxu1 %v14410_v11  ;;  %v14381_v11 = vcombine.high %v5293_v8, %v5301_v9  ;;  %v5501_v9 = vld [vmem:[#allocation14 + $0x7a8] sm:$0xff] }
 0x9f7   :  { %7050 = vmatprep.subr.bf16.mxu1 %v14427_v12  ;;  %v5309_v12 = vld [vmem:[#allocation14 + $0x1a8] sm:$0xff] }
 0x9f8   :  { %v18228_v17 = vpop.f32.mrb[4].mxu1  ;;  %v14396_v19 = vcombine.low %v5309_v12, %v5317_v13 }
 0x9f9   :  { %v18230_v20 = vpop.f32.mrb[5].mxu1 }
 0x9fa   :  { %7051 = vmatpush1.bf16.msra.mxu1 %v14426_v15  ;;  %v6914_v21 = vpop.f32.mrb[6].mxu1  ;;  %v14397_v15 = vcombine.high %v5309_v12, %v5317_v13  ;;  %v5262_v13 = vld [vmem:[#allocation14 + $0x30] sm:$0xff] }
 0x9fb   :  { %v6915_v23 = vpop.f32.mrb[7].mxu1  ;;  %7052 = vmatprep.subr.bf16.mxu1 %v14443_v16  ;;  %v5325_v16 = vld [vmem:[#allocation14 + $0x228] sm:$0xff] }
 0x9fc   :  { %v14413_v21 = vcombine.high %v5325_v16, %v5333_v18  ;;  %v5349_v23 = vld [vmem:[#allocation14 + $0x2e8] sm:$0xff] }
 0x9fe   :  { %7053 = vmatpush1.bf16.msra.mxu1 %v14442_v22  ;;  %v5341_v22 = vld [vmem:[#allocation14 + $0x2a8] sm:$0xff] }
 0x9ff   :  { %7054 = vmatprep.subr.bf16.mxu1 %v14459_v24  ;;  %v14412_v24 = vcombine.low %v5325_v16, %v5333_v18  ;;  %v14429_v25 = vcombine.high %v5341_v22, %v5349_v23  ;;  %v5278_v18 = vld [vmem:[#allocation14 + $0xb0] sm:$0xff] }
 0xa02   :  { %7055 = vmatpush1.bf16.msra.mxu1 %v14458_v27  ;;  %v5365_v27 = vld [vmem:[#allocation14 + $0x368] sm:$0xff] }
 0xa03   :  { %7056 = vmatprep.subr.bf16.mxu1 %v14475_v28  ;;  %v14428_v28 = vcombine.low %v5341_v22, %v5349_v23  ;;  %v14445_v29 = vcombine.high %v5357_v26, %v5365_v27  ;;  %v5294_v23 = vld [vmem:[#allocation14 + $0x130] sm:$0xff] }
 0xa06   :  { %7057 = vmatpush1.bf16.msra.mxu1 %v14474_v33  ;;  %v5373_v33 = vld [vmem:[#allocation14 + $0x3a8] sm:$0xff] }
 0xa07   :  { %7058 = vmatprep.subr.bf16.mxu1 %v14491_v36  ;;  %v5381_v36 = vld [vmem:[#allocation14 + $0x3e8] sm:$0xff] }
 0xa08   :  { %v14461_v44 = vcombine.high %v5373_v33, %v5381_v36 }
 0xa0a   :  { %7059 = vmatpush1.bf16.msra.mxu1 %v14490_v42  ;;  %v14444_v42 = vcombine.low %v5357_v26, %v5365_v27  ;;  %v5310_v27 = vld [vmem:[#allocation14 + $0x1b0] sm:$0xff] }
 0xa0b   :  { %7060 = vmatprep.subr.bf16.mxu1 %v14507_v43 }
 0xa0e   :  { %7061 = vmatpush1.bf16.msra.mxu1 %v14506_v46  ;;  %v5397_v46 = vld [vmem:[#allocation14 + $0x468] sm:$0xff] }
 0xa0f   :  { %7062 = vmatprep.subr.bf16.mxu1 %v14523_v47  ;;  %v14460_v47 = vcombine.low %v5373_v33, %v5381_v36  ;;  %v14477_v48 = vcombine.high %v5389_v45, %v5397_v46  ;;  %v5326_v36 = vld [vmem:[#allocation14 + $0x230] sm:$0xff] }
 0xa12   :  { %7063 = vmatpush1.bf16.msra.mxu1 %v14522_v50  ;;  %v5413_v50 = vld [vmem:[#allocation14 + $0x4e8] sm:$0xff] }
 0xa13   :  { %7064 = vmatprep.subr.bf16.mxu1 %v14539_v51  ;;  %v14476_v51 = vcombine.low %v5389_v45, %v5397_v46  ;;  %v14493_v52 = vcombine.high %v5405_v49, %v5413_v50  ;;  %v5350_v45 = vld [vmem:[#allocation14 + $0x2f0] sm:$0xff] }
 0xa16   :  { %7065 = vmatpush1.bf16.msra.mxu1 %v14538_v54  ;;  %v5429_v54 = vld [vmem:[#allocation14 + $0x568] sm:$0xff] }
 0xa17   :  { %7066 = vmatprep.subr.bf16.mxu1 %v14555_v55  ;;  %v14492_v55 = vcombine.low %v5405_v49, %v5413_v50  ;;  %v14509_v56 = vcombine.high %v5421_v53, %v5429_v54  ;;  %v5366_v49 = vld [vmem:[#allocation14 + $0x370] sm:$0xff] }
 0xa1a   :  { %7067 = vmatpush1.bf16.msra.mxu1 %v14554_v58  ;;  %v5445_v58 = vld [vmem:[#allocation14 + $0x5e8] sm:$0xff] }
 0xa1b   :  { %7068 = vmatprep.subr.bf16.mxu1 %v14571_v59  ;;  %v14508_v59 = vcombine.low %v5421_v53, %v5429_v54  ;;  %v14525_v60 = vcombine.high %v5437_v57, %v5445_v58  ;;  %v5374_v53 = vld [vmem:[#allocation14 + $0x3b0] sm:$0xff] }
 0xa1c   :  { %v5382_v54 = vld [vmem:[#allocation14 + $0x3f0] sm:$0xff] }
 0xa1e   :  { %7069 = vmatpush1.bf16.msra.mxu1 %v14570_v62  ;;  %v5461_v62 = vld [vmem:[#allocation14 + $0x668] sm:$0xff] }
 0xa1f   :  { %7070 = vmatprep.subr.bf16.mxu1 %v14587_v1  ;;  %v14524_v1 = vcombine.low %v5437_v57, %v5445_v58  ;;  %v14541_v2 = vcombine.high %v5453_v61, %v5461_v62 }
 0xa22   :  { %7071 = vmatpush1.bf16.msra.mxu1 %v14586_v3  ;;  %v5477_v3 = vld [vmem:[#allocation14 + $0x6e8] sm:$0xff] }
 0xa23   :  { %7081 = vmatprep.subr.bf16.mxu1 %v14349_v0  ;;  %v14540_v0 = vcombine.low %v5453_v61, %v5461_v62  ;;  %v14557_v4 = vcombine.high %v5469_v63, %v5477_v3  ;;  %v5398_v61 = vld [vmem:[#allocation14 + $0x470] sm:$0xff]  ;;  %v14462_v62 = vcombine.low %v5374_v53, %v5382_v54 }
 0xa25   :  { %7073 = vmatmul.mubr.bf16.vlgmr.msra.gmra.mrb[20].mxu1 %v18213_v34 }
 0xa26   :  { %7082 = vmatpush1.bf16.msra.mxu1 %v14348_v6  ;;  %7113 = vmatprep.mubr.bf16.mxu1 %v18217_v35  ;;  %v5493_v6 = vld [vmem:[#allocation14 + $0x768] sm:$0xff] }
 0xa27   :  { %7083 = vmatprep.subr.bf16.mxu1 %v14365_v7  ;;  %v14556_v7 = vcombine.low %v5469_v63, %v5477_v3  ;;  %v14573_v8 = vcombine.high %v5485_v5, %v5493_v6  ;;  %v5414_v63 = vld [vmem:[#allocation14 + $0x4f0] sm:$0xff] }
 0xa2a   :  { %7084 = vmatpush1.bf16.msra.mxu1 %v14364_v10  ;;  %v5509_v10 = vld [vmem:[#allocation14 + $0x7e8] sm:$0xff] }
 0xa2b   :  { %7085 = vmatprep.subr.bf16.mxu1 %v14381_v11  ;;  %v14572_v11 = vcombine.low %v5485_v5, %v5493_v6  ;;  %v14589_v12 = vcombine.high %v5501_v9, %v5509_v10  ;;  %v5430_v5 = vld [vmem:[#allocation14 + $0x570] sm:$0xff] }
 0xa2e   :  { %7086 = vmatpush1.bf16.msra.mxu1 %v14380_v14  ;;  %v5270_v14 = vld [vmem:[#allocation14 + $0x70] sm:$0xff] }
 0xa2f   :  { %7087 = vmatprep.subr.bf16.mxu1 %v14397_v15  ;;  %v14588_v15 = vcombine.low %v5501_v9, %v5509_v10  ;;  %v14351_v16 = vcombine.high %v5262_v13, %v5270_v14  ;;  %v5446_v9 = vld [vmem:[#allocation14 + $0x5f0] sm:$0xff] }
 0xa32   :  { %7088 = vmatpush1.bf16.msra.mxu1 %v14396_v19  ;;  %v5286_v19 = vld [vmem:[#allocation14 + $0xf0] sm:$0xff] }
 0xa33   :  { %7089 = vmatprep.subr.bf16.mxu1 %v14413_v21  ;;  %v14350_v21 = vcombine.low %v5262_v13, %v5270_v14  ;;  %v14367_v22 = vcombine.high %v5278_v18, %v5286_v19  ;;  %v5462_v13 = vld [vmem:[#allocation14 + $0x670] sm:$0xff] }
 0xa36   :  { %7090 = vmatpush1.bf16.msra.mxu1 %v14412_v24  ;;  %v5302_v24 = vld [vmem:[#allocation14 + $0x170] sm:$0xff] }
 0xa37   :  { %7091 = vmatprep.subr.bf16.mxu1 %v14429_v25  ;;  %v14366_v25 = vcombine.low %v5278_v18, %v5286_v19  ;;  %v14383_v26 = vcombine.high %v5294_v23, %v5302_v24  ;;  %v5478_v18 = vld [vmem:[#allocation14 + $0x6f0] sm:$0xff] }
 0xa38   :  { %v18234_v32 = vpop.f32.mrb[8].mxu1 }
 0xa39   :  { %v18236_v37 = vpop.f32.mrb[9].mxu1 }
 0xa3a   :  { %v6955_v40 = vpop.f32.mrb[10].mxu1  ;;  %7092 = vmatpush1.bf16.msra.mxu1 %v14428_v28  ;;  %v5318_v28 = vld [vmem:[#allocation14 + $0x1f0] sm:$0xff] }
 0xa3b   :  { %v6956_v43 = vpop.f32.mrb[11].mxu1  ;;  %7093 = vmatprep.subr.bf16.mxu1 %v14445_v29  ;;  %v14382_v29 = vcombine.low %v5294_v23, %v5302_v24  ;;  %v14399_v33 = vcombine.high %v5310_v27, %v5318_v28  ;;  %v5334_v40 = vld [vmem:[#allocation14 + $0x270] sm:$0xff] }
 0xa3c   :  { %v14415_v43 = vcombine.high %v5326_v36, %v5334_v40  ;;  %v14414_v46 = vcombine.low %v5326_v36, %v5334_v40  ;;  %v5494_v23 = vld [vmem:[#allocation14 + $0x770] sm:$0xff]  ;;  %v5271_v36 = vld [vmem:[#allocation14 + $0x78] sm:$0xff] }
 0xa3e   :  { %7094 = vmatpush1.bf16.msra.mxu1 %v14444_v42  ;;  %v14398_v42 = vcombine.low %v5310_v27, %v5318_v28  ;;  %v5510_v27 = vld [vmem:[#allocation14 + $0x7f0] sm:$0xff] }
 0xa3f   :  { %7095 = vmatprep.subr.bf16.mxu1 %v14461_v44  ;;  %v5342_v44 = vld [vmem:[#allocation14 + $0x2b0] sm:$0xff] }
 0xa40   :  { %v14430_v50 = vcombine.low %v5342_v44, %v5350_v45 }
 0xa42   :  { %7096 = vmatpush1.bf16.msra.mxu1 %v14460_v47  ;;  %v14431_v47 = vcombine.high %v5342_v44, %v5350_v45  ;;  %v5287_v44 = vld [vmem:[#allocation14 + $0xf8] sm:$0xff] }
 0xa43   :  { %7097 = vmatprep.subr.bf16.mxu1 %v14477_v48  ;;  %v5358_v48 = vld [vmem:[#allocation14 + $0x330] sm:$0xff] }
 0xa44   :  { %v14446_v57 = vcombine.low %v5358_v48, %v5366_v49 }
 0xa46   :  { %7098 = vmatpush1.bf16.msra.mxu1 %v14476_v51  ;;  %v14447_v51 = vcombine.high %v5358_v48, %v5366_v49  ;;  %v5303_v48 = vld [vmem:[#allocation14 + $0x178] sm:$0xff] }
 0xa47   :  { %7099 = vmatprep.subr.bf16.mxu1 %v14493_v52 }
 0xa4a   :  { %7100 = vmatpush1.bf16.msra.mxu1 %v14492_v55 }
 0xa4b   :  { %7101 = vmatprep.subr.bf16.mxu1 %v14509_v56 }
 0xa4e   :  { %7102 = vmatpush1.bf16.msra.mxu1 %v14508_v59  ;;  %v14463_v59 = vcombine.high %v5374_v53, %v5382_v54  ;;  %v5319_v53 = vld [vmem:[#allocation14 + $0x1f8] sm:$0xff] }
 0xa4f   :  { %7103 = vmatprep.subr.bf16.mxu1 %v14525_v60  ;;  %v5390_v60 = vld [vmem:[#allocation14 + $0x430] sm:$0xff] }
 0xa50   :  { %v14478_v3 = vcombine.low %v5390_v60, %v5398_v61 }
 0xa52   :  { %7104 = vmatpush1.bf16.msra.mxu1 %v14524_v1  ;;  %v14479_v1 = vcombine.high %v5390_v60, %v5398_v61  ;;  %v5343_v61 = vld [vmem:[#allocation14 + $0x2b8] sm:$0xff] }
 0xa53   :  { %7105 = vmatprep.subr.bf16.mxu1 %v14541_v2  ;;  %v5406_v2 = vld [vmem:[#allocation14 + $0x4b0] sm:$0xff] }
 0xa54   :  { %v14494_v6 = vcombine.low %v5406_v2, %v5414_v63 }
 0xa56   :  { %7106 = vmatpush1.bf16.msra.mxu1 %v14540_v0  ;;  %v14495_v0 = vcombine.high %v5406_v2, %v5414_v63  ;;  %v5359_v2 = vld [vmem:[#allocation14 + $0x338] sm:$0xff] }
 0xa57   :  { %7107 = vmatprep.subr.bf16.mxu1 %v14557_v4  ;;  %v5422_v4 = vld [vmem:[#allocation14 + $0x530] sm:$0xff]  ;;  %v5367_v63 = vld [vmem:[#allocation14 + $0x378] sm:$0xff] }
 0xa58   :  { %v14510_v10 = vcombine.low %v5422_v4, %v5430_v5 }
 0xa5a   :  { %7108 = vmatpush1.bf16.msra.mxu1 %v14556_v7  ;;  %v14511_v7 = vcombine.high %v5422_v4, %v5430_v5  ;;  %v5375_v5 = vld [vmem:[#allocation14 + $0x3b8] sm:$0xff] }
 0xa5b   :  { %7109 = vmatprep.subr.bf16.mxu1 %v14573_v8  ;;  %v5438_v8 = vld [vmem:[#allocation14 + $0x5b0] sm:$0xff] }
 0xa5c   :  { %v14526_v14 = vcombine.low %v5438_v8, %v5446_v9 }
 0xa5e   :  { %7110 = vmatpush1.bf16.msra.mxu1 %v14572_v11  ;;  %v14527_v11 = vcombine.high %v5438_v8, %v5446_v9  ;;  %v14448_v9 = vcombine.low %v5359_v2, %v5367_v63 }
 0xa5f   :  { %7111 = vmatprep.subr.bf16.mxu1 %v14589_v12  ;;  %v5454_v12 = vld [vmem:[#allocation14 + $0x630] sm:$0xff] }
 0xa60   :  { %v14542_v19 = vcombine.low %v5454_v12, %v5462_v13 }
 0xa62   :  { %7112 = vmatpush1.bf16.msra.mxu1 %v14588_v15  ;;  %v14543_v15 = vcombine.high %v5454_v12, %v5462_v13  ;;  %v5391_v12 = vld [vmem:[#allocation14 + $0x438] sm:$0xff] }
 0xa63   :  { %7122 = vmatprep.subr.bf16.mxu1 %v14351_v16  ;;  %v5470_v16 = vld [vmem:[#allocation14 + $0x6b0] sm:$0xff]  ;;  %v5399_v13 = vld [vmem:[#allocation14 + $0x478] sm:$0xff] }
 0xa64   :  { %v14558_v24 = vcombine.low %v5470_v16, %v5478_v18 }
 0xa65   :  { %7114 = vmatmul.mubr.bf16.vlgmr.msra.gmra.mrb[24].mxu1 %v18213_v34 }
 0xa66   :  { %7123 = vmatpush1.bf16.msra.mxu1 %v14350_v21  ;;  %7154 = vmatprep.mubr.bf16.mxu1 %v18217_v35  ;;  %v14559_v21 = vcombine.high %v5470_v16, %v5478_v18  ;;  %v5407_v16 = vld [vmem:[#allocation14 + $0x4b8] sm:$0xff] }
 0xa67   :  { %7124 = vmatprep.subr.bf16.mxu1 %v14367_v22  ;;  %v5486_v22 = vld [vmem:[#allocation14 + $0x730] sm:$0xff]  ;;  %v5415_v18 = vld [vmem:[#allocation14 + $0x4f8] sm:$0xff] }
 0xa68   :  { %v14574_v28 = vcombine.low %v5486_v22, %v5494_v23 }
 0xa6a   :  { %7125 = vmatpush1.bf16.msra.mxu1 %v14366_v25  ;;  %v14575_v25 = vcombine.high %v5486_v22, %v5494_v23  ;;  %v5423_v22 = vld [vmem:[#allocation14 + $0x538] sm:$0xff] }
 0xa6b   :  { %7126 = vmatprep.subr.bf16.mxu1 %v14383_v26  ;;  %v5502_v26 = vld [vmem:[#allocation14 + $0x7b0] sm:$0xff]  ;;  %v5431_v23 = vld [vmem:[#allocation14 + $0x578] sm:$0xff] }
 0xa6c   :  { %v14590_v40 = vcombine.low %v5502_v26, %v5510_v27 }
 0xa6e   :  { %7127 = vmatpush1.bf16.msra.mxu1 %v14382_v29  ;;  %v14591_v29 = vcombine.high %v5502_v26, %v5510_v27  ;;  %v5439_v26 = vld [vmem:[#allocation14 + $0x5b8] sm:$0xff] }
 0xa6f   :  { %7128 = vmatprep.subr.bf16.mxu1 %v14399_v33  ;;  %v5263_v33 = vld [vmem:[#allocation14 + $0x38] sm:$0xff] }
 0xa70   :  { %v14352_v45 = vcombine.low %v5263_v33, %v5271_v36  ;;  %v5447_v27 = vld [vmem:[#allocation14 + $0x5f8] sm:$0xff] }
 0xa72   :  { %7129 = vmatpush1.bf16.msra.mxu1 %v14398_v42  ;;  %v14353_v42 = vcombine.high %v5263_v33, %v5271_v36  ;;  %v5455_v33 = vld [vmem:[#allocation14 + $0x638] sm:$0xff] }
 0xa73   :  { %7130 = vmatprep.subr.bf16.mxu1 %v14415_v43  ;;  %v5279_v43 = vld [vmem:[#allocation14 + $0xb8] sm:$0xff] }
 0xa74   :  { %v14368_v49 = vcombine.low %v5279_v43, %v5287_v44  ;;  %v5463_v36 = vld [vmem:[#allocation14 + $0x678] sm:$0xff] }
 0xa76   :  { %7131 = vmatpush1.bf16.msra.mxu1 %v14414_v46  ;;  %v14369_v46 = vcombine.high %v5279_v43, %v5287_v44  ;;  %v5471_v43 = vld [vmem:[#allocation14 + $0x6b8] sm:$0xff] }
 0xa77   :  { %7132 = vmatprep.subr.bf16.mxu1 %v14431_v47  ;;  %v5295_v47 = vld [vmem:[#allocation14 + $0x138] sm:$0xff] }
 0xa78   :  { %v18240_v52 = vpop.f32.mrb[12].mxu1  ;;  %v14384_v54 = vcombine.low %v5295_v47, %v5303_v48  ;;  %v5479_v44 = vld [vmem:[#allocation14 + $0x6f8] sm:$0xff] }
 0xa79   :  { %v18242_v55 = vpop.f32.mrb[13].mxu1 }
 0xa7a   :  { %v6996_v56 = vpop.f32.mrb[14].mxu1  ;;  %7133 = vmatpush1.bf16.msra.mxu1 %v14430_v50  ;;  %v14385_v50 = vcombine.high %v5295_v47, %v5303_v48  ;;  %v5487_v47 = vld [vmem:[#allocation14 + $0x738] sm:$0xff] }
 0xa7b   :  { %v6997_v58 = vpop.f32.mrb[15].mxu1  ;;  %7134 = vmatprep.subr.bf16.mxu1 %v14447_v51  ;;  %v5311_v51 = vld [vmem:[#allocation14 + $0x1b8] sm:$0xff] }
 0xa7c   :  { %v14401_v56 = vcombine.high %v5311_v51, %v5319_v53  ;;  %v5335_v58 = vld [vmem:[#allocation14 + $0x278] sm:$0xff] }
 0xa7d   :  { %v5495_v48 = vld [vmem:[#allocation14 + $0x778] sm:$0xff] }
 0xa7e   :  { %7135 = vmatpush1.bf16.msra.mxu1 %v14446_v57  ;;  %v5327_v57 = vld [vmem:[#allocation14 + $0x238] sm:$0xff] }
 0xa7f   :  { %7136 = vmatprep.subr.bf16.mxu1 %v14463_v59  ;;  %v14400_v59 = vcombine.low %v5311_v51, %v5319_v53  ;;  %v14417_v60 = vcombine.high %v5327_v57, %v5335_v58  ;;  %v14577_v51 = vcombine.high %v5487_v47, %v5495_v48 }
 0xa82   :  { %7137 = vmatpush1.bf16.msra.mxu1 %v14462_v62  ;;  %v5351_v62 = vld [vmem:[#allocation14 + $0x2f8] sm:$0xff] }
 0xa83   :  { %7138 = vmatprep.subr.bf16.mxu1 %v14479_v1  ;;  %v14416_v1 = vcombine.low %v5327_v57, %v5335_v58  ;;  %v14576_v57 = vcombine.low %v5487_v47, %v5495_v48  ;;  %v16601_v47 = vld [vmem:[#allocation17 + $0xf4] ss:$8 sps:$4 sm:$0xff]  }
 0xa86   :  { %7139 = vmatpush1.bf16.msra.mxu1 %v14478_v3  ;;  %v14432_v3 = vcombine.low %v5343_v61, %v5351_v62 }
 0xa87   :  { %7140 = vmatprep.subr.bf16.mxu1 %v14495_v0  ;;  %v14449_v0 = vcombine.high %v5359_v2, %v5367_v63  ;;  %v16557_v63 = vld [vmem:[#allocation17 + $0x10] ss:$8 sps:$4 sm:$0xff]  }
 0xa8a   :  { %7141 = vmatpush1.bf16.msra.mxu1 %v14494_v6  ;;  %v5383_v6 = vld [vmem:[#allocation14 + $0x3f8] sm:$0xff] }
 0xa8b   :  { %7142 = vmatprep.subr.bf16.mxu1 %v14511_v7 }
 0xa8e   :  { %7143 = vmatpush1.bf16.msra.mxu1 %v14510_v10 }
 0xa8f   :  { %7144 = vmatprep.subr.bf16.mxu1 %v14527_v11  ;;  %v14465_v11 = vcombine.high %v5375_v5, %v5383_v6 }
 0xa92   :  { %7145 = vmatpush1.bf16.msra.mxu1 %v14526_v14  ;;  %v14464_v14 = vcombine.low %v5375_v5, %v5383_v6  ;;  %v16563_v5 = vld [vmem:[#allocation17 + $0x30] ss:$8 sps:$4 sm:$0xff]   ;;  %v16568_v6 = vld [vmem:[#allocation17 + $0x44] ss:$8 sps:$4 sm:$0xff]  }
 0xa93   :  { %7146 = vmatprep.subr.bf16.mxu1 %v14543_v15  ;;  %v14481_v15 = vcombine.high %v5391_v12, %v5399_v13 }
 0xa96   :  { %7147 = vmatpush1.bf16.msra.mxu1 %v14542_v19  ;;  %v14480_v19 = vcombine.low %v5391_v12, %v5399_v13 }
 0xa97   :  { %7148 = vmatprep.subr.bf16.mxu1 %v14559_v21  ;;  %v14497_v21 = vcombine.high %v5407_v16, %v5415_v18 }
 0xa9a   :  { %7149 = vmatpush1.bf16.msra.mxu1 %v14558_v24  ;;  %v14496_v24 = vcombine.low %v5407_v16, %v5415_v18  ;;  %v16577_v16 = vld [vmem:[#allocation17 + $0x74] ss:$8 sps:$4 sm:$0xff]   ;;  %v16575_v18 = vld [vmem:[#allocation17 + $0x70] ss:$8 sps:$4 sm:$0xff]  }
 0xa9b   :  { %7150 = vmatprep.subr.bf16.mxu1 %v14575_v25  ;;  %v14513_v25 = vcombine.high %v5423_v22, %v5431_v23 }
 0xa9e   :  { %7151 = vmatpush1.bf16.msra.mxu1 %v14574_v28  ;;  %v14512_v28 = vcombine.low %v5423_v22, %v5431_v23  ;;  %v16583_v22 = vld [vmem:[#allocation17 + $0x94] ss:$8 sps:$4 sm:$0xff]   ;;  %v16581_v23 = vld [vmem:[#allocation17 + $0x90] ss:$8 sps:$4 sm:$0xff]  }
 0xa9f   :  { %7152 = vmatprep.subr.bf16.mxu1 %v14591_v29  ;;  %v14529_v29 = vcombine.high %v5439_v26, %v5447_v27 }
 0xaa2   :  { %7153 = vmatpush1.bf16.msra.mxu1 %v14590_v40  ;;  %v14528_v40 = vcombine.low %v5439_v26, %v5447_v27  ;;  %v16589_v26 = vld [vmem:[#allocation17 + $0xb4] ss:$8 sps:$4 sm:$0xff]   ;;  %v16587_v27 = vld [vmem:[#allocation17 + $0xb0] ss:$8 sps:$4 sm:$0xff]  }
 0xaa3   :  { %7163 = vmatprep.subr.bf16.mxu1 %v14353_v42  ;;  %v14545_v42 = vcombine.high %v5455_v33, %v5463_v36 }
 0xaa5   :  { %7155 = vmatmul.mubr.bf16.vlgmr.msra.gmra.mrb[28].mxu1 %v18213_v34 }
 0xaa6   :  { %7164 = vmatpush1.bf16.msra.mxu1 %v14352_v45  ;;  %7195 = vmatprep.mubr.bf16.mxu1 %v18217_v35  ;;  %v14433_v35 = vcombine.high %v5343_v61, %v5351_v62  ;;  %v14544_v45 = vcombine.low %v5455_v33, %v5463_v36  ;;  %v16556_v61 = vld [vmem:[#allocation17 + $0x4] ss:$8 sps:$4 sm:$0xff]   ;;  %v16595_v33 = vld [vmem:[#allocation17 + $0xd4] ss:$8 sps:$4 sm:$0xff]   ;;  %v18261_v36 = vsub.s32 3, %v18183_v38 }
 0xaa7   :  { %7165 = vmatprep.subr.bf16.mxu1 %v14369_v46  ;;  %v14561_v46 = vcombine.high %v5471_v43, %v5479_v44 }
 0xaaa   :  { %7166 = vmatpush1.bf16.msra.mxu1 %v14368_v49  ;;  %v18250_v49 = vld [vmem:[#allocation16] sm:$0xff] }
 0xaab   :  { %7167 = vmatprep.subr.bf16.mxu1 %v14385_v50  ;;  %v14560_v50 = vcombine.low %v5471_v43, %v5479_v44  ;;  %v5523_v53 = vrot.slane %v18250_v49, %v18189_v41  ;;  %v16598_v43 = vld [vmem:[#allocation17 + $0xe4] ss:$8 sps:$4 sm:$0xff]   ;;  %v5531_v44 = vrot.slane %v18250_v49, %v18261_v36 }
 0xaad   :  { %v6954_v48 = vadd.f32 %v18236_v37, %v5531_v44  ;;  %v16608_v37 = vld [vmem:[#allocation17 + $0x120] ss:$8 sps:$4 sm:$0xff]  }
 0xaae   :  { %7168 = vmatpush1.bf16.msra.mxu1 %v14384_v54  ;;  %v5503_v54 = vld [vmem:[#allocation14 + $0x7b8] sm:$0xff] }
 0xaaf   :  { %7169 = vmatprep.subr.bf16.mxu1 %v14401_v56  ;;  %v5511_v56 = vld [vmem:[#allocation14 + $0x7f8] sm:$0xff] }
 0xab0   :  { %v14593_v58 = vcombine.high %v5503_v54, %v5511_v56 }
 0xab2   :  { %7170 = vmatpush1.bf16.msra.mxu1 %v14400_v59  ;;  %v6913_v59 = vadd.f32 %v18230_v20, %v5523_v53  ;;  %v16565_v20 = vld [vmem:[#allocation17 + $0x34] ss:$8 sps:$4 sm:$0xff]   ;;  %v16604_v53 = vld [vmem:[#allocation17 + $0x104] ss:$8 sps:$4 sm:$0xff]  }
 0xab3   :  { %7171 = vmatprep.subr.bf16.mxu1 %v14417_v60  ;;  %v14592_v60 = vcombine.low %v5503_v54, %v5511_v56  ;;  %v7207_v54 = vmax.f32 %v6954_v48, 0.0  ;;  %v16602_v56 = vld [vmem:[#allocation17 + $0x100] ss:$8 sps:$4 sm:$0xff]  }
 0xab4   :  { %v7205_v62 = vmax.f32 %v6913_v59, 0.0 }
 0xab5   :  { %v7223_v59 = vpack.c.bf16 %v7207_v54, %v7207_v54 }
 0xab6   :  { %7172 = vmatpush1.bf16.msra.mxu1 %v14416_v1  ;;  %v16554_v1 = vld [vmem:[#allocation17] ss:$8 sps:$4 sm:$0xff]   ;;  %v7221_v2 = vpack.c.bf16 %v7205_v62, %v7205_v62  ;;  %v16611_v62 = vld [vmem:[#allocation17 + $0x130] ss:$8 sps:$4 sm:$0xff]  }
 0xab7   :  { %7173 = vmatprep.subr.bf16.mxu1 %v14433_v35  ;;  %v16559_v35 = vld [vmem:[#allocation17 + $0x14] ss:$8 sps:$4 sm:$0xff]  }
 0xab8   :  { %v18246_v4 = vpop.f32.mrb[16].mxu1 }
 0xab9   :  { %v18248_v7 = vpop.f32.mrb[17].mxu1 }
 0xaba   :  { %v7037_v8 = vpop.f32.mrb[18].mxu1  ;;  %7174 = vmatpush1.bf16.msra.mxu1 %v14432_v3  ;;  %v16562_v3 = vld [vmem:[#allocation17 + $0x24] ss:$8 sps:$4 sm:$0xff]  }
 0xabb   :  { %v7038_v10 = vpop.f32.mrb[19].mxu1  ;;  %7175 = vmatprep.subr.bf16.mxu1 %v14449_v0  ;;  %v16560_v0 = vld [vmem:[#allocation17 + $0x20] ss:$8 sps:$4 sm:$0xff]  }
 0xabc   :  { %v16566_v8 = vld [vmem:[#allocation17 + $0x40] ss:$8 sps:$4 sm:$0xff]   ;;  %v16569_v10 = vld [vmem:[#allocation17 + $0x50] ss:$8 sps:$4 sm:$0xff]  }
 0xabe   :  { %7176 = vmatpush1.bf16.msra.mxu1 %v14448_v9  ;;  %v16571_v9 = vld [vmem:[#allocation17 + $0x54] ss:$8 sps:$4 sm:$0xff]  }
 0xabf   :  { %7177 = vmatprep.subr.bf16.mxu1 %v14465_v11 }
 0xac2   :  { %7178 = vmatpush1.bf16.msra.mxu1 %v14464_v14  ;;  %v16572_v14 = vld [vmem:[#allocation17 + $0x60] ss:$8 sps:$4 sm:$0xff]  }
 0xac3   :  { %7179 = vmatprep.subr.bf16.mxu1 %v14481_v15 }
 0xac6   :  { %7180 = vmatpush1.bf16.msra.mxu1 %v14480_v19  ;;  %v16580_v19 = vld [vmem:[#allocation17 + $0x84] ss:$8 sps:$4 sm:$0xff]  }
 0xac7   :  { %7181 = vmatprep.subr.bf16.mxu1 %v14497_v21  ;;  %v16578_v21 = vld [vmem:[#allocation17 + $0x80] ss:$8 sps:$4 sm:$0xff]  }
 0xaca   :  { %7182 = vmatpush1.bf16.msra.mxu1 %v14496_v24  ;;  %v16586_v24 = vld [vmem:[#allocation17 + $0xa4] ss:$8 sps:$4 sm:$0xff]  }
 0xacb   :  { %7183 = vmatprep.subr.bf16.mxu1 %v14513_v25  ;;  %v16584_v25 = vld [vmem:[#allocation17 + $0xa0] ss:$8 sps:$4 sm:$0xff]  }
 0xace   :  { %7184 = vmatpush1.bf16.msra.mxu1 %v14512_v28  ;;  %v16592_v28 = vld [vmem:[#allocation17 + $0xc4] ss:$8 sps:$4 sm:$0xff]  }
 0xacf   :  { %7185 = vmatprep.subr.bf16.mxu1 %v14529_v29  ;;  %v16590_v29 = vld [vmem:[#allocation17 + $0xc0] ss:$8 sps:$4 sm:$0xff]  }
 0xad2   :  { %7186 = vmatpush1.bf16.msra.mxu1 %v14528_v40  ;;  %v16593_v40 = vld [vmem:[#allocation17 + $0xd0] ss:$8 sps:$4 sm:$0xff]  }
 0xad3   :  { %7187 = vmatprep.subr.bf16.mxu1 %v14545_v42  ;;  %v5519_v42 = vrot.slane %v18250_v49, %v18186_v39 }
 0xad6   :  { %7188 = vmatpush1.bf16.msra.mxu1 %v14544_v45  ;;  %v16596_v45 = vld [vmem:[#allocation17 + $0xe0] ss:$8 sps:$4 sm:$0xff]  }
 0xad7   :  { %7189 = vmatprep.subr.bf16.mxu1 %v14561_v46  ;;  %v6911_v46 = vadd.f32 %v18228_v17, %v5519_v42  ;;  %v16605_v17 = vld [vmem:[#allocation17 + $0x110] ss:$8 sps:$4 sm:$0xff]  }
 0xada   :  { %7190 = vmatpush1.bf16.msra.mxu1 %v14560_v50  ;;  %v16599_v50 = vld [vmem:[#allocation17 + $0xf0] ss:$8 sps:$4 sm:$0xff]  }
 0xadb   :  { %7191 = vmatprep.subr.bf16.mxu1 %v14577_v51  ;;  %v7204_v51 = vmax.f32 %v6911_v46, 0.0 }
 0xade   :  { %7192 = vmatpush1.bf16.msra.mxu1 %v14576_v57  ;;  %v7220_v57 = vpack.c.bf16 %v7204_v51, %v7204_v51 }
 0xadf   :  { %7193 = vmatprep.subr.bf16.mxu1 %v14593_v58  ;;  %v16607_v58 = vld [vmem:[#allocation17 + $0x114] ss:$8 sps:$4 sm:$0xff]  }
 0xae2   :  { %7194 = vmatpush1.bf16.msra.mxu1 %v14592_v60  ;;  %v16610_v60 = vld [vmem:[#allocation17 + $0x124] ss:$8 sps:$4 sm:$0xff]  }
 0xae3   :  { %8784 = vmatprep.subr.bf16.mxu1 %v16556_v61  ;;  %v16613_v61 = vld [vmem:[#allocation17 + $0x134] ss:$8 sps:$4 sm:$0xff]  }
 0xae5   :  { %7196 = vmatmul.mubr.bf16.vlgmr.msra.gmra.mrb[32].mxu1 %v18213_v34  ;;  %v16574_v34 = vld [vmem:[#allocation17 + $0x64] ss:$8 sps:$4 sm:$0xff]  }
 0xae6   :  { %8785 = vmatpush1.bf16.msra.mxu1 %v16554_v1  ;;  %8816 = vmatprep.mubr.bf16.mxu1 %v7221_v2  ;;  %v16616_v1 = vld [vmem:[#allocation17 + $0x144] ss:$8 sps:$4 sm:$0xff]   ;;  %v16619_v2 = vld [vmem:[#allocation17 + $0x154] ss:$8 sps:$4 sm:$0xff]  }
 0xae7   :  { %8786 = vmatprep.subr.bf16.mxu1 %v16559_v35  ;;  %v16614_v35 = vld [vmem:[#allocation17 + $0x140] ss:$8 sps:$4 sm:$0xff]  }
 0xaea   :  { %8787 = vmatpush1.bf16.msra.mxu1 %v16557_v63  ;;  %v16617_v63 = vld [vmem:[#allocation17 + $0x150] ss:$8 sps:$4 sm:$0xff]  }
 0xaeb   :  { %8788 = vmatprep.subr.bf16.mxu1 %v16562_v3  ;;  %v16622_v3 = vld [vmem:[#allocation17 + $0x164] ss:$8 sps:$4 sm:$0xff]  }
 0xaee   :  { %8789 = vmatpush1.bf16.msra.mxu1 %v16560_v0 }
 0xaef   :  { %8790 = vmatprep.subr.bf16.mxu1 %v16565_v20 }
 0xaf2   :  { %8791 = vmatpush1.bf16.msra.mxu1 %v16563_v5 }
 0xaf3   :  { %8792 = vmatprep.subr.bf16.mxu1 %v16568_v6  ;;  %v16620_v6 = vld [vmem:[#allocation17 + $0x160] ss:$8 sps:$4 sm:$0xff]  }
 0xaf6   :  { %8793 = vmatpush1.bf16.msra.mxu1 %v16566_v8 }
 0xaf7   :  { %8794 = vmatprep.subr.bf16.mxu1 %v16571_v9  ;;  %v16625_v9 = vld [vmem:[#allocation17 + $0x174] ss:$8 sps:$4 sm:$0xff]  }
 0xaf8   :  { %v18256_v11 = vpop.f32.mrb[20].mxu1 }
 0xaf9   :  { %v18258_v12 = vpop.f32.mrb[21].mxu1 }
 0xafa   :  { %v7078_v13 = vpop.f32.mrb[22].mxu1  ;;  %8795 = vmatpush1.bf16.msra.mxu1 %v16569_v10  ;;  %v16623_v10 = vld [vmem:[#allocation17 + $0x170] ss:$8 sps:$4 sm:$0xff]  }
 0xafb   :  { %v7079_v15 = vpop.f32.mrb[23].mxu1  ;;  %8796 = vmatprep.subr.bf16.mxu1 %v16574_v34  ;;  %v16628_v34 = vld [vmem:[#allocation17 + $0x184] ss:$8 sps:$4 sm:$0xff]   ;;  %v16626_v13 = vld [vmem:[#allocation17 + $0x180] ss:$8 sps:$4 sm:$0xff]  }
 0xafc   :  { %v16629_v15 = vld [vmem:[#allocation17 + $0x190] ss:$8 sps:$4 sm:$0xff]  }
 0xafe   :  { %8797 = vmatpush1.bf16.msra.mxu1 %v16572_v14  ;;  %v16631_v14 = vld [vmem:[#allocation17 + $0x194] ss:$8 sps:$4 sm:$0xff]  }
 0xaff   :  { %8798 = vmatprep.subr.bf16.mxu1 %v16577_v16  ;;  %v16634_v16 = vld [vmem:[#allocation17 + $0x1a4] ss:$8 sps:$4 sm:$0xff]  }
 0xb02   :  { %8799 = vmatpush1.bf16.msra.mxu1 %v16575_v18  ;;  %v16632_v18 = vld [vmem:[#allocation17 + $0x1a0] ss:$8 sps:$4 sm:$0xff]  }
 0xb03   :  { %8800 = vmatprep.subr.bf16.mxu1 %v16580_v19  ;;  %v16637_v19 = vld [vmem:[#allocation17 + $0x1b4] ss:$8 sps:$4 sm:$0xff]  }
 0xb06   :  { %8801 = vmatpush1.bf16.msra.mxu1 %v16578_v21  ;;  %v16635_v21 = vld [vmem:[#allocation17 + $0x1b0] ss:$8 sps:$4 sm:$0xff]  }
 0xb07   :  { %8802 = vmatprep.subr.bf16.mxu1 %v16583_v22  ;;  %v16640_v22 = vld [vmem:[#allocation17 + $0x1c4] ss:$8 sps:$4 sm:$0xff]  }
 0xb0a   :  { %8803 = vmatpush1.bf16.msra.mxu1 %v16581_v23  ;;  %v16638_v23 = vld [vmem:[#allocation17 + $0x1c0] ss:$8 sps:$4 sm:$0xff]  }
 0xb0b   :  { %8804 = vmatprep.subr.bf16.mxu1 %v16586_v24  ;;  %v18274_v24 = vsub.s32 2, %v18183_v38 }
 0xb0e   :  { %8805 = vmatpush1.bf16.msra.mxu1 %v16584_v25  ;;  %v16643_v25 = vld [vmem:[#allocation17 + $0x1d4] ss:$8 sps:$4 sm:$0xff]  }
 0xb0f   :  { %8806 = vmatprep.subr.bf16.mxu1 %v16589_v26  ;;  %v18277_v26 = vsub.s32 5, %v18183_v38 }
 0xb12   :  { %8807 = vmatpush1.bf16.msra.mxu1 %v16587_v27  ;;  %v16641_v27 = vld [vmem:[#allocation17 + $0x1d0] ss:$8 sps:$4 sm:$0xff]  }
 0xb13   :  { %8808 = vmatprep.subr.bf16.mxu1 %v16592_v28  ;;  %v5527_v28 = vrot.slane %v18250_v49, %v18274_v24 }
 0xb15   :  { %v6952_v42 = vadd.f32 %v18234_v32, %v5527_v28  ;;  %v16653_v32 = vld [vmem:[#allocation17 + $0x210] ss:$8 sps:$4 sm:$0xff]  }
 0xb16   :  { %8809 = vmatpush1.bf16.msra.mxu1 %v16590_v29  ;;  %v16646_v29 = vld [vmem:[#allocation17 + $0x1e4] ss:$8 sps:$4 sm:$0xff]  }
 0xb17   :  { %8810 = vmatprep.subr.bf16.mxu1 %v16595_v33  ;;  %v5539_v33 = vrot.slane %v18250_v49, %v18277_v26  ;;  %v7206_v46 = vmax.f32 %v6952_v42, 0.0 }
 0xb19   :  { %v6995_v44 = vadd.f32 %v18242_v55, %v5539_v33  ;;  %v7222_v51 = vpack.c.bf16 %v7206_v46, %v7206_v46  ;;  %v16656_v55 = vld [vmem:[#allocation17 + $0x220] ss:$8 sps:$4 sm:$0xff]  }
 0xb1a   :  { %8811 = vmatpush1.bf16.msra.mxu1 %v16593_v40  ;;  %v16644_v40 = vld [vmem:[#allocation17 + $0x1e0] ss:$8 sps:$4 sm:$0xff]  }
 0xb1b   :  { %8812 = vmatprep.subr.bf16.mxu1 %v16598_v43  ;;  %v16649_v43 = vld [vmem:[#allocation17 + $0x1f4] ss:$8 sps:$4 sm:$0xff]   ;;  %v7209_v48 = vmax.f32 %v6995_v44, 0.0 }
 0xb1d   :  { %v7225_v54 = vpack.c.bf16 %v7209_v48, %v7209_v48 }
 0xb1e   :  { %8813 = vmatpush1.bf16.msra.mxu1 %v16596_v45  ;;  %v16647_v45 = vld [vmem:[#allocation17 + $0x1f0] ss:$8 sps:$4 sm:$0xff]  }
 0xb1f   :  { %8814 = vmatprep.subr.bf16.mxu1 %v16601_v47  ;;  %v16652_v47 = vld [vmem:[#allocation17 + $0x204] ss:$8 sps:$4 sm:$0xff]  }
 0xb22   :  { %8815 = vmatpush1.bf16.msra.mxu1 %v16599_v50  ;;  %v16650_v50 = vld [vmem:[#allocation17 + $0x200] ss:$8 sps:$4 sm:$0xff]  }
 0xb23   :  { %8825 = vmatprep.subr.bf16.mxu1 %v16604_v53  ;;  %v16655_v53 = vld [vmem:[#allocation17 + $0x214] ss:$8 sps:$4 sm:$0xff]  }
 0xb25   :  { %8817 = vmatmul.mubr.bf16.vlgmr.msra.gmra.mrb[36].mxu1 %v7220_v57  ;;  %v16661_v57 = vld [vmem:[#allocation17 + $0x234] ss:$8 sps:$4 sm:$0xff]  }
 0xb26   :  { %8826 = vmatpush1.bf16.msra.mxu1 %v16602_v56  ;;  %8857 = vmatprep.mubr.bf16.mxu1 %v7223_v59  ;;  %v16658_v56 = vld [vmem:[#allocation17 + $0x224] ss:$8 sps:$4 sm:$0xff]  }
 0xb27   :  { %8827 = vmatprep.subr.bf16.mxu1 %v16607_v58  ;;  %v16659_v58 = vld [vmem:[#allocation17 + $0x230] ss:$8 sps:$4 sm:$0xff]   ;;  %v16664_v59 = vld [vmem:[#allocation17 + $0x244] ss:$8 sps:$4 sm:$0xff]  }
 0xb2a   :  { %8828 = vmatpush1.bf16.msra.mxu1 %v16605_v17  ;;  %v16662_v17 = vld [vmem:[#allocation17 + $0x240] ss:$8 sps:$4 sm:$0xff]  }
 0xb2b   :  { %8829 = vmatprep.subr.bf16.mxu1 %v16610_v60  ;;  %v16667_v60 = vld [vmem:[#allocation17 + $0x254] ss:$8 sps:$4 sm:$0xff]  }
 0xb2e   :  { %8830 = vmatpush1.bf16.msra.mxu1 %v16608_v37  ;;  %v16665_v37 = vld [vmem:[#allocation17 + $0x250] ss:$8 sps:$4 sm:$0xff]  }
 0xb2f   :  { %8831 = vmatprep.subr.bf16.mxu1 %v16613_v61  ;;  %v16670_v61 = vld [vmem:[#allocation17 + $0x264] ss:$8 sps:$4 sm:$0xff]  }
 0xb32   :  { %8832 = vmatpush1.bf16.msra.mxu1 %v16611_v62 }
 0xb33   :  { %8833 = vmatprep.subr.bf16.mxu1 %v16616_v1 }
 0xb36   :  { %8834 = vmatpush1.bf16.msra.mxu1 %v16614_v35 }
 0xb37   :  { %8835 = vmatprep.subr.bf16.mxu1 %v16619_v2  ;;  %v16668_v2 = vld [vmem:[#allocation17 + $0x260] ss:$8 sps:$4 sm:$0xff]  }
 0xb38   :  { %v18269_v0 = vpop.f32.mrb[24].mxu1 }
 0xb39   :  { %v18271_v20 = vpop.f32.mrb[25].mxu1 }
 0xb3a   :  { %v7119_v5 = vpop.f32.mrb[26].mxu1  ;;  %8836 = vmatpush1.bf16.msra.mxu1 %v16617_v63 }
 0xb3b   :  { %v7120_v8 = vpop.f32.mrb[27].mxu1  ;;  %8837 = vmatprep.subr.bf16.mxu1 %v16622_v3  ;;  %v16673_v3 = vld [vmem:[#allocation17 + $0x274] ss:$8 sps:$4 sm:$0xff]   ;;  %v16671_v5 = vld [vmem:[#allocation17 + $0x270] ss:$8 sps:$4 sm:$0xff]  }
 0xb3c   :  { %v16674_v8 = vld [vmem:[#allocation17 + $0x280] ss:$8 sps:$4 sm:$0xff]  }
 0xb3e   :  { %8838 = vmatpush1.bf16.msra.mxu1 %v16620_v6  ;;  %v16676_v6 = vld [vmem:[#allocation17 + $0x284] ss:$8 sps:$4 sm:$0xff]  }
 0xb3f   :  { %8839 = vmatprep.subr.bf16.mxu1 %v16625_v9  ;;  %v16679_v9 = vld [vmem:[#allocation17 + $0x294] ss:$8 sps:$4 sm:$0xff]  }
 0xb42   :  { %8840 = vmatpush1.bf16.msra.mxu1 %v16623_v10  ;;  %v16677_v10 = vld [vmem:[#allocation17 + $0x290] ss:$8 sps:$4 sm:$0xff]  }
 0xb43   :  { %8841 = vmatprep.subr.bf16.mxu1 %v16628_v34  ;;  %v16682_v34 = vld [vmem:[#allocation17 + $0x2a4] ss:$8 sps:$4 sm:$0xff]  }
 0xb46   :  { %8842 = vmatpush1.bf16.msra.mxu1 %v16626_v13  ;;  %v16680_v13 = vld [vmem:[#allocation17 + $0x2a0] ss:$8 sps:$4 sm:$0xff]  }
 0xb47   :  { %8843 = vmatprep.subr.bf16.mxu1 %v16631_v14  ;;  %v16685_v14 = vld [vmem:[#allocation17 + $0x2b4] ss:$8 sps:$4 sm:$0xff]  }
 0xb4a   :  { %8844 = vmatpush1.bf16.msra.mxu1 %v16629_v15  ;;  %v16683_v15 = vld [vmem:[#allocation17 + $0x2b0] ss:$8 sps:$4 sm:$0xff]  }
 0xb4b   :  { %8845 = vmatprep.subr.bf16.mxu1 %v16634_v16  ;;  %v16688_v16 = vld [vmem:[#allocation17 + $0x2c4] ss:$8 sps:$4 sm:$0xff]  }
 0xb4e   :  { %8846 = vmatpush1.bf16.msra.mxu1 %v16632_v18  ;;  %v16686_v18 = vld [vmem:[#allocation17 + $0x2c0] ss:$8 sps:$4 sm:$0xff]  }
 0xb4f   :  { %8847 = vmatprep.subr.bf16.mxu1 %v16637_v19  ;;  %v18290_v19 = vsub.s32 4, %v18183_v38 }
 0xb52   :  { %8848 = vmatpush1.bf16.msra.mxu1 %v16635_v21  ;;  %v16691_v21 = vld [vmem:[#allocation17 + $0x2d4] ss:$8 sps:$4 sm:$0xff]  }
 0xb53   :  { %8849 = vmatprep.subr.bf16.mxu1 %v16640_v22  ;;  %v18293_v22 = vsub.s32 7, %v18183_v38 }
 0xb55   :  { %v5547_v28 = vrot.slane %v18250_v49, %v18293_v22 }
 0xb56   :  { %8850 = vmatpush1.bf16.msra.mxu1 %v16638_v23  ;;  %v16689_v23 = vld [vmem:[#allocation17 + $0x2d0] ss:$8 sps:$4 sm:$0xff]  }
 0xb57   :  { %8851 = vmatprep.subr.bf16.mxu1 %v16643_v25  ;;  %v5535_v25 = vrot.slane %v18250_v49, %v18290_v19  ;;  %v7036_v42 = vadd.f32 %v18248_v7, %v5547_v28  ;;  %v16704_v7 = vld [vmem:[#allocation17 + $0x320] ss:$8 sps:$4 sm:$0xff]  }
 0xb59   :  { %v6993_v33 = vadd.f32 %v18240_v52, %v5535_v25  ;;  %v7211_v46 = vmax.f32 %v7036_v42, 0.0  ;;  %v16701_v52 = vld [vmem:[#allocation17 + $0x310] ss:$8 sps:$4 sm:$0xff]  }
 0xb5a   :  { %8852 = vmatpush1.bf16.msra.mxu1 %v16641_v27  ;;  %v16694_v27 = vld [vmem:[#allocation17 + $0x2e4] ss:$8 sps:$4 sm:$0xff]   ;;  %v16743_v42 = vld [vmem:[#allocation17 + $0x3f0] ss:$8 sps:$4 sm:$0xff]  }
 0xb5b   :  { %8853 = vmatprep.subr.bf16.mxu1 %v16646_v29  ;;  %v16692_v29 = vld [vmem:[#allocation17 + $0x2e0] ss:$8 sps:$4 sm:$0xff]   ;;  %v7208_v44 = vmax.f32 %v6993_v33, 0.0 }
 0xb5d   :  { %v7224_v48 = vpack.c.bf16 %v7208_v44, %v7208_v44  ;;  %v16748_v44 = vld [vmem:[#allocation17 + $0x404] ss:$8 sps:$4 sm:$0xff]  }
 0xb5e   :  { %8854 = vmatpush1.bf16.msra.mxu1 %v16644_v40  ;;  %v16697_v40 = vld [vmem:[#allocation17 + $0x2f4] ss:$8 sps:$4 sm:$0xff]  }
 0xb5f   :  { %8855 = vmatprep.subr.bf16.mxu1 %v16649_v43  ;;  %v16695_v43 = vld [vmem:[#allocation17 + $0x2f0] ss:$8 sps:$4 sm:$0xff]  }
 0xb62   :  { %8856 = vmatpush1.bf16.msra.mxu1 %v16647_v45  ;;  %v16700_v45 = vld [vmem:[#allocation17 + $0x304] ss:$8 sps:$4 sm:$0xff]  }
 0xb63   :  { %8866 = vmatprep.subr.bf16.mxu1 %v16652_v47  ;;  %v16698_v47 = vld [vmem:[#allocation17 + $0x300] ss:$8 sps:$4 sm:$0xff]  }
 0xb65   :  { %8858 = vmatmul.mubr.bf16.vlgmr.msra.gmra.mrb[40].mxu1 %v7222_v51  ;;  %v7227_v51 = vpack.c.bf16 %v7211_v46, %v7211_v46 }
 0xb66   :  { %8867 = vmatpush1.bf16.msra.mxu1 %v16650_v50  ;;  %8898 = vmatprep.mubr.bf16.mxu1 %v7225_v54  ;;  %v16703_v50 = vld [vmem:[#allocation17 + $0x314] ss:$8 sps:$4 sm:$0xff]  }
 0xb67   :  { %8868 = vmatprep.subr.bf16.mxu1 %v16655_v53  ;;  %v16706_v53 = vld [vmem:[#allocation17 + $0x324] ss:$8 sps:$4 sm:$0xff]   ;;  %v16709_v54 = vld [vmem:[#allocation17 + $0x334] ss:$8 sps:$4 sm:$0xff]  }
 0xb6a   :  { %8869 = vmatpush1.bf16.msra.mxu1 %v16653_v32  ;;  %v16707_v32 = vld [vmem:[#allocation17 + $0x330] ss:$8 sps:$4 sm:$0xff]  }
 0xb6b   :  { %8870 = vmatprep.subr.bf16.mxu1 %v16658_v56  ;;  %v16712_v56 = vld [vmem:[#allocation17 + $0x344] ss:$8 sps:$4 sm:$0xff]  }
 0xb6e   :  { %8871 = vmatpush1.bf16.msra.mxu1 %v16656_v55  ;;  %v16710_v55 = vld [vmem:[#allocation17 + $0x340] ss:$8 sps:$4 sm:$0xff]  }
 0xb6f   :  { %8872 = vmatprep.subr.bf16.mxu1 %v16661_v57  ;;  %v16715_v57 = vld [vmem:[#allocation17 + $0x354] ss:$8 sps:$4 sm:$0xff]  }
 0xb72   :  { %8873 = vmatpush1.bf16.msra.mxu1 %v16659_v58  ;;  %v16713_v58 = vld [vmem:[#allocation17 + $0x350] ss:$8 sps:$4 sm:$0xff]  }
 0xb73   :  { %8874 = vmatprep.subr.bf16.mxu1 %v16664_v59  ;;  %v16718_v59 = vld [vmem:[#allocation17 + $0x364] ss:$8 sps:$4 sm:$0xff]  }
 0xb76   :  { %8875 = vmatpush1.bf16.msra.mxu1 %v16662_v17 }
 0xb77   :  { %8876 = vmatprep.subr.bf16.mxu1 %v16667_v60 }
 0xb78   :  { %v18285_v62 = vpop.f32.mrb[28].mxu1 }
 0xb79   :  { %v18287_v1 = vpop.f32.mrb[29].mxu1 }
 0xb7a   :  { %v7160_v35 = vpop.f32.mrb[30].mxu1  ;;  %8877 = vmatpush1.bf16.msra.mxu1 %v16665_v37 }
 0xb7b   :  { %v7161_v63 = vpop.f32.mrb[31].mxu1  ;;  %8878 = vmatprep.subr.bf16.mxu1 %v16670_v61  ;;  %v16716_v61 = vld [vmem:[#allocation17 + $0x360] ss:$8 sps:$4 sm:$0xff]  }
 0xb7c   :  { %v16719_v63 = vld [vmem:[#allocation17 + $0x370] ss:$8 sps:$4 sm:$0xff]  }
 0xb7e   :  { %8879 = vmatpush1.bf16.msra.mxu1 %v16668_v2  ;;  %v16721_v2 = vld [vmem:[#allocation17 + $0x374] ss:$8 sps:$4 sm:$0xff]  }
 0xb7f   :  { %8880 = vmatprep.subr.bf16.mxu1 %v16673_v3  ;;  %v16724_v3 = vld [vmem:[#allocation17 + $0x384] ss:$8 sps:$4 sm:$0xff]  }
 0xb82   :  { %8881 = vmatpush1.bf16.msra.mxu1 %v16671_v5  ;;  %v16722_v5 = vld [vmem:[#allocation17 + $0x380] ss:$8 sps:$4 sm:$0xff]  }
 0xb83   :  { %8882 = vmatprep.subr.bf16.mxu1 %v16676_v6  ;;  %v16727_v6 = vld [vmem:[#allocation17 + $0x394] ss:$8 sps:$4 sm:$0xff]  }
 0xb86   :  { %8883 = vmatpush1.bf16.msra.mxu1 %v16674_v8  ;;  %v16725_v8 = vld [vmem:[#allocation17 + $0x390] ss:$8 sps:$4 sm:$0xff]  }
 0xb87   :  { %8884 = vmatprep.subr.bf16.mxu1 %v16679_v9  ;;  %v16730_v9 = vld [vmem:[#allocation17 + $0x3a4] ss:$8 sps:$4 sm:$0xff]  }
 0xb8a   :  { %8885 = vmatpush1.bf16.msra.mxu1 %v16677_v10  ;;  %v16728_v10 = vld [vmem:[#allocation17 + $0x3a0] ss:$8 sps:$4 sm:$0xff]  }
 0xb8b   :  { %8886 = vmatprep.subr.bf16.mxu1 %v16682_v34  ;;  %v16733_v34 = vld [vmem:[#allocation17 + $0x3b4] ss:$8 sps:$4 sm:$0xff]  }
 0xb8e   :  { %8887 = vmatpush1.bf16.msra.mxu1 %v16680_v13  ;;  %v16731_v13 = vld [vmem:[#allocation17 + $0x3b0] ss:$8 sps:$4 sm:$0xff]  }
 0xb8f   :  { %8888 = vmatprep.subr.bf16.mxu1 %v16685_v14  ;;  %v16736_v14 = vld [vmem:[#allocation17 + $0x3c4] ss:$8 sps:$4 sm:$0xff]  }
 0xb92   :  { %8889 = vmatpush1.bf16.msra.mxu1 %v16683_v15  ;;  %v16734_v15 = vld [vmem:[#allocation17 + $0x3c0] ss:$8 sps:$4 sm:$0xff]  }
 0xb93   :  { %8890 = vmatprep.subr.bf16.mxu1 %v16688_v16  ;;  %v18306_v16 = vsub.s32 6, %v18183_v38  ;;  %v16745_v38 = vld [vmem:[#allocation17 + $0x3f4] ss:$8 sps:$4 sm:$0xff]  }
 0xb95   :  { %v5543_v25 = vrot.slane %v18250_v49, %v18306_v16  ;;  %v16746_v49 = vld [vmem:[#allocation17 + $0x400] ss:$8 sps:$4 sm:$0xff]  }
 0xb96   :  { %8891 = vmatpush1.bf16.msra.mxu1 %v16686_v18  ;;  %v16739_v18 = vld [vmem:[#allocation17 + $0x3d4] ss:$8 sps:$4 sm:$0xff]  }
 0xb97   :  { %8892 = vmatprep.subr.bf16.mxu1 %v16691_v21  ;;  %v18308_v21 = vld [vmem:[#allocation16 + $0x8] sm:$0xff]  ;;  %v7034_v33 = vadd.f32 %v18246_v4, %v5543_v25  ;;  %v16749_v4 = vld [vmem:[#allocation17 + $0x410] ss:$8 sps:$4 sm:$0xff]  }
 0xb98   :  { %v5555_v28 = vrot.slane %v18308_v21, %v18189_v41  ;;  %v5563_v25 = vrot.slane %v18308_v21, %v18261_v36 }
 0xb9a   :  { %8893 = vmatpush1.bf16.msra.mxu1 %v16689_v23  ;;  %v16737_v23 = vld [vmem:[#allocation17 + $0x3d0] ss:$8 sps:$4 sm:$0xff]  }
 0xb9b   :  { %8894 = vmatprep.subr.bf16.mxu1 %v16694_v27  ;;  %v16742_v27 = vld [vmem:[#allocation17 + $0x3e4] ss:$8 sps:$4 sm:$0xff]  }
 0xb9e   :  { %8895 = vmatpush1.bf16.msra.mxu1 %v16692_v29  ;;  %v16740_v29 = vld [vmem:[#allocation17 + $0x3e0] ss:$8 sps:$4 sm:$0xff]  }
 0xb9f   :  { %8896 = vmatprep.subr.bf16.mxu1 %v16697_v40  ;;  %v7077_v40 = vadd.f32 %v18258_v12, %v5555_v28  ;;  %v16752_v12 = vld [vmem:[#allocation17 + $0x420] ss:$8 sps:$4 sm:$0xff]  }
 0xba2   :  { %8897 = vmatpush1.bf16.msra.mxu1 %v16695_v43  ;;  %v7210_v43 = vmax.f32 %v7034_v33, 0.0  ;;  %v7118_v33 = vadd.f32 %v18271_v20, %v5563_v25  ;;  %v16800_v20 = vld [vmem:[#allocation17 + $0x520] ss:$8 sps:$4 sm:$0xff]   ;;  %v16833_v25 = vld [vmem:[#allocation17 + $0x5d0] ss:$8 sps:$4 sm:$0xff]  }
 0xba3   :  { %8907 = vmatprep.subr.bf16.mxu1 %v16700_v45  ;;  %v7213_v45 = vmax.f32 %v7077_v40, 0.0 }
 0xba4   :  { %v7226_v46 = vpack.c.bf16 %v7210_v43, %v7210_v43  ;;  %v7215_v43 = vmax.f32 %v7118_v33, 0.0  ;;  %v16836_v33 = vld [vmem:[#allocation17 + $0x5e0] ss:$8 sps:$4 sm:$0xff]  }
 0xba5   :  { %8899 = vmatmul.mubr.bf16.vlgmr.msra.gmra.mrb[44].mxu1 %v7224_v48  ;;  %v7229_v48 = vpack.c.bf16 %v7213_v45, %v7213_v45 }
 0xba6   :  { %8908 = vmatpush1.bf16.msra.mxu1 %v16698_v47  ;;  %8939 = vmatprep.mubr.bf16.mxu1 %v7227_v51  ;;  %v16751_v47 = vld [vmem:[#allocation17 + $0x414] ss:$8 sps:$4 sm:$0xff]  }
 0xba7   :  { %8909 = vmatprep.subr.bf16.mxu1 %v16703_v50  ;;  %v16754_v50 = vld [vmem:[#allocation17 + $0x424] ss:$8 sps:$4 sm:$0xff]   ;;  %v16757_v51 = vld [vmem:[#allocation17 + $0x434] ss:$8 sps:$4 sm:$0xff]  }
 0xbaa   :  { %8910 = vmatpush1.bf16.msra.mxu1 %v16701_v52  ;;  %v16755_v52 = vld [vmem:[#allocation17 + $0x430] ss:$8 sps:$4 sm:$0xff]  }
 0xbab   :  { %8911 = vmatprep.subr.bf16.mxu1 %v16706_v53  ;;  %v16760_v53 = vld [vmem:[#allocation17 + $0x444] ss:$8 sps:$4 sm:$0xff]  }
 0xbae   :  { %8912 = vmatpush1.bf16.msra.mxu1 %v16704_v7  ;;  %v16758_v7 = vld [vmem:[#allocation17 + $0x440] ss:$8 sps:$4 sm:$0xff]  }
 0xbaf   :  { %8913 = vmatprep.subr.bf16.mxu1 %v16709_v54  ;;  %v16763_v54 = vld [vmem:[#allocation17 + $0x454] ss:$8 sps:$4 sm:$0xff]  }
 0xbb2   :  { %8914 = vmatpush1.bf16.msra.mxu1 %v16707_v32  ;;  %v16761_v32 = vld [vmem:[#allocation17 + $0x450] ss:$8 sps:$4 sm:$0xff]  }
 0xbb3   :  { %8915 = vmatprep.subr.bf16.mxu1 %v16712_v56  ;;  %v16766_v56 = vld [vmem:[#allocation17 + $0x464] ss:$8 sps:$4 sm:$0xff]  }
 0xbb6   :  { %8916 = vmatpush1.bf16.msra.mxu1 %v16710_v55 }
 0xbb7   :  { %8917 = vmatprep.subr.bf16.mxu1 %v16715_v57 }
 0xbb8   :  { %v18301_v17 = vpop.f32.mrb[32].mxu1 }
 0xbb9   :  { %v18303_v60 = vpop.f32.mrb[33].mxu1 }
 0xbba   :  { %v7201_v37 = vpop.f32.mrb[34].mxu1  ;;  %8918 = vmatpush1.bf16.msra.mxu1 %v16713_v58 }
 0xbbb   :  { %v7202_v35 = vpop.f32.mrb[35].mxu1  ;;  %8919 = vmatprep.subr.bf16.mxu1 %v16718_v59  ;;  %v16764_v59 = vld [vmem:[#allocation17 + $0x460] ss:$8 sps:$4 sm:$0xff]  }
 0xbbc   :  { %v16767_v35 = vld [vmem:[#allocation17 + $0x470] ss:$8 sps:$4 sm:$0xff]  }
 0xbbe   :  { %8920 = vmatpush1.bf16.msra.mxu1 %v16716_v61  ;;  %v16769_v61 = vld [vmem:[#allocation17 + $0x474] ss:$8 sps:$4 sm:$0xff]  }
 0xbbf   :  { %8921 = vmatprep.subr.bf16.mxu1 %v16721_v2  ;;  %v16772_v2 = vld [vmem:[#allocation17 + $0x484] ss:$8 sps:$4 sm:$0xff]  }
 0xbc2   :  { %8922 = vmatpush1.bf16.msra.mxu1 %v16719_v63  ;;  %v16770_v63 = vld [vmem:[#allocation17 + $0x480] ss:$8 sps:$4 sm:$0xff]  }
 0xbc3   :  { %8923 = vmatprep.subr.bf16.mxu1 %v16724_v3  ;;  %v16775_v3 = vld [vmem:[#allocation17 + $0x494] ss:$8 sps:$4 sm:$0xff]  }
 0xbc6   :  { %8924 = vmatpush1.bf16.msra.mxu1 %v16722_v5  ;;  %v16773_v5 = vld [vmem:[#allocation17 + $0x490] ss:$8 sps:$4 sm:$0xff]  }
 0xbc7   :  { %8925 = vmatprep.subr.bf16.mxu1 %v16727_v6  ;;  %v16778_v6 = vld [vmem:[#allocation17 + $0x4a4] ss:$8 sps:$4 sm:$0xff]  }
 0xbca   :  { %8926 = vmatpush1.bf16.msra.mxu1 %v16725_v8  ;;  %v16776_v8 = vld [vmem:[#allocation17 + $0x4a0] ss:$8 sps:$4 sm:$0xff]  }
 0xbcb   :  { %8927 = vmatprep.subr.bf16.mxu1 %v16730_v9  ;;  %v16781_v9 = vld [vmem:[#allocation17 + $0x4b4] ss:$8 sps:$4 sm:$0xff]  }
 0xbce   :  { %8928 = vmatpush1.bf16.msra.mxu1 %v16728_v10  ;;  %v16779_v10 = vld [vmem:[#allocation17 + $0x4b0] ss:$8 sps:$4 sm:$0xff]  }
 0xbcf   :  { %8929 = vmatprep.subr.bf16.mxu1 %v16733_v34  ;;  %v16784_v34 = vld [vmem:[#allocation17 + $0x4c4] ss:$8 sps:$4 sm:$0xff]  }
 0xbd2   :  { %8930 = vmatpush1.bf16.msra.mxu1 %v16731_v13  ;;  %v16782_v13 = vld [vmem:[#allocation17 + $0x4c0] ss:$8 sps:$4 sm:$0xff]  }
 0xbd3   :  { %8931 = vmatprep.subr.bf16.mxu1 %v16736_v14  ;;  %v16787_v14 = vld [vmem:[#allocation17 + $0x4d4] ss:$8 sps:$4 sm:$0xff]  }
 0xbd6   :  { %8932 = vmatpush1.bf16.msra.mxu1 %v16734_v15  ;;  %v16785_v15 = vld [vmem:[#allocation17 + $0x4d0] ss:$8 sps:$4 sm:$0xff]  }
 0xbd7   :  { %8933 = vmatprep.subr.bf16.mxu1 %v16739_v18  ;;  %v5551_v18 = vrot.slane %v18308_v21, %v18186_v39 }
 0xbd9   :  { %v7075_v28 = vadd.f32 %v18256_v11, %v5551_v18  ;;  %v16797_v11 = vld [vmem:[#allocation17 + $0x510] ss:$8 sps:$4 sm:$0xff]   ;;  %v16830_v18 = vld [vmem:[#allocation17 + $0x5c0] ss:$8 sps:$4 sm:$0xff]  }
 0xbda   :  { %8934 = vmatpush1.bf16.msra.mxu1 %v16737_v23  ;;  %v16790_v23 = vld [vmem:[#allocation17 + $0x4e4] ss:$8 sps:$4 sm:$0xff]  }
 0xbdb   :  { %8935 = vmatprep.subr.bf16.mxu1 %v16742_v27  ;;  %v16788_v27 = vld [vmem:[#allocation17 + $0x4e0] ss:$8 sps:$4 sm:$0xff]   ;;  %v7212_v40 = vmax.f32 %v7075_v28, 0.0  ;;  %v16838_v28 = vld [vmem:[#allocation17 + $0x5e4] ss:$8 sps:$4 sm:$0xff]  }
 0xbdd   :  { %v7228_v45 = vpack.c.bf16 %v7212_v40, %v7212_v40  ;;  %v16841_v40 = vld [vmem:[#allocation17 + $0x5f4] ss:$8 sps:$4 sm:$0xff]  }
 0xbde   :  { %8936 = vmatpush1.bf16.msra.mxu1 %v16740_v29  ;;  %v16793_v29 = vld [vmem:[#allocation17 + $0x4f4] ss:$8 sps:$4 sm:$0xff]  }
 0xbdf   :  { %8937 = vmatprep.subr.bf16.mxu1 %v16745_v38  ;;  %v16791_v38 = vld [vmem:[#allocation17 + $0x4f0] ss:$8 sps:$4 sm:$0xff]  }
 0xbe2   :  { %8938 = vmatpush1.bf16.msra.mxu1 %v16743_v42  ;;  %v16796_v42 = vld [vmem:[#allocation17 + $0x504] ss:$8 sps:$4 sm:$0xff]  }
 0xbe3   :  { %8948 = vmatprep.subr.bf16.mxu1 %v16748_v44  ;;  %v16794_v44 = vld [vmem:[#allocation17 + $0x500] ss:$8 sps:$4 sm:$0xff]  }
 0xbe5   :  { %8940 = vmatmul.mubr.bf16.vlgmr.msra.gmra.mrb[48].mxu1 %v7226_v46  ;;  %v7231_v46 = vpack.c.bf16 %v7215_v43, %v7215_v43  ;;  %v16839_v43 = vld [vmem:[#allocation17 + $0x5f0] ss:$8 sps:$4 sm:$0xff]  }
 0xbe6   :  { %8949 = vmatpush1.bf16.msra.mxu1 %v16746_v49  ;;  %8980 = vmatprep.mubr.bf16.mxu1 %v7229_v48  ;;  %v16799_v49 = vld [vmem:[#allocation17 + $0x514] ss:$8 sps:$4 sm:$0xff]  }
 0xbe7   :  { %8950 = vmatprep.subr.bf16.mxu1 %v16751_v47  ;;  %v16802_v47 = vld [vmem:[#allocation17 + $0x524] ss:$8 sps:$4 sm:$0xff]   ;;  %v16805_v48 = vld [vmem:[#allocation17 + $0x534] ss:$8 sps:$4 sm:$0xff]  }
 0xbea   :  { %8951 = vmatpush1.bf16.msra.mxu1 %v16749_v4  ;;  %v16803_v4 = vld [vmem:[#allocation17 + $0x530] ss:$8 sps:$4 sm:$0xff]  }
 0xbeb   :  { %8952 = vmatprep.subr.bf16.mxu1 %v16754_v50  ;;  %v16808_v50 = vld [vmem:[#allocation17 + $0x544] ss:$8 sps:$4 sm:$0xff]  }
 0xbee   :  { %8953 = vmatpush1.bf16.msra.mxu1 %v16752_v12  ;;  %v7492_v12 = vld [vmem:[#allocation19] sm:$0x3] }
 0xbef   :  { %8954 = vmatprep.subr.bf16.mxu1 %v16757_v51  ;;  %v16806_v51 = vld [vmem:[#allocation17 + $0x540] ss:$8 sps:$4 sm:$0xff]  }
 0xbf2   :  { %8955 = vmatpush1.bf16.msra.mxu1 %v16755_v52  ;;  %v7497_v52 = vrot.slane %v7492_v12, %v18186_v39 }
 0xbf3   :  { %8956 = vmatprep.subr.bf16.mxu1 %v16760_v53  ;;  %v16811_v53 = vld [vmem:[#allocation17 + $0x554] ss:$8 sps:$4 sm:$0xff]  }
 0xbf6   :  { %8957 = vmatpush1.bf16.msra.mxu1 %v16758_v7  ;;  %v7501_v7 = vrot.slane %v7492_v12, %v18189_v41  ;;  %v16856_v12 = vld [vmem:[#allocation17 + $0x644] ss:$8 sps:$4 sm:$0xff]  }
 0xbf7   :  { %8958 = vmatprep.subr.bf16.mxu1 %v16763_v54  ;;  %v16809_v54 = vld [vmem:[#allocation17 + $0x550] ss:$8 sps:$4 sm:$0xff]  }
 0xbf8   :  { %v18316_v55 = vpop.f32.mrb[36].mxu1 }
 0xbf9   :  { %v18318_v57 = vpop.f32.mrb[37].mxu1 }
 0xbfa   :  { %v8822_v58 = vpop.f32.mrb[38].mxu1  ;;  %8959 = vmatpush1.bf16.msra.mxu1 %v16761_v32  ;;  %v8819_v32 = vadd.f32 %v18316_v55, %v7497_v52  ;;  %v16820_v55 = vld [vmem:[#allocation17 + $0x584] ss:$8 sps:$4 sm:$0xff]   ;;  %v16859_v52 = vld [vmem:[#allocation17 + $0x654] ss:$8 sps:$4 sm:$0xff]  }
 0xbfb   :  { %v8823_v37 = vpop.f32.mrb[39].mxu1  ;;  %8960 = vmatprep.subr.bf16.mxu1 %v16766_v56  ;;  %v16814_v56 = vld [vmem:[#allocation17 + $0x564] ss:$8 sps:$4 sm:$0xff]   ;;  %v8821_v58 = vadd.f32 %v18318_v57, %v7501_v7  ;;  %v16823_v57 = vld [vmem:[#allocation17 + $0x594] ss:$8 sps:$4 sm:$0xff]  }
 0xbfc   :  { %v16862_v7 = vld [vmem:[#allocation17 + $0x664] ss:$8 sps:$4 sm:$0xff]  }
 0xbfe   :  { %8961 = vmatpush1.bf16.msra.mxu1 %v16764_v59 }
 0xbff   :  { %8962 = vmatprep.subr.bf16.mxu1 %v16769_v61 }
 0xc02   :  { %8963 = vmatpush1.bf16.msra.mxu1 %v16767_v35 }
 0xc03   :  { %8964 = vmatprep.subr.bf16.mxu1 %v16772_v2 }
 0xc06   :  { %8965 = vmatpush1.bf16.msra.mxu1 %v16770_v63  ;;  %v16812_v63 = vld [vmem:[#allocation17 + $0x560] ss:$8 sps:$4 sm:$0xff]  }
 0xc07   :  { %8966 = vmatprep.subr.bf16.mxu1 %v16775_v3 }
 0xc0a   :  { %8967 = vmatpush1.bf16.msra.mxu1 %v16773_v5  ;;  %v16817_v5 = vld [vmem:[#allocation17 + $0x574] ss:$8 sps:$4 sm:$0xff]  }
 0xc0b   :  { %8968 = vmatprep.subr.bf16.mxu1 %v16778_v6  ;;  %v16815_v6 = vld [vmem:[#allocation17 + $0x570] ss:$8 sps:$4 sm:$0xff]  }
 0xc0e   :  { %8969 = vmatpush1.bf16.msra.mxu1 %v16776_v8  ;;  %v16818_v8 = vld [vmem:[#allocation17 + $0x580] ss:$8 sps:$4 sm:$0xff]  }
 0xc0f   :  { %8970 = vmatprep.subr.bf16.mxu1 %v16781_v9  ;;  %v16821_v9 = vld [vmem:[#allocation17 + $0x590] ss:$8 sps:$4 sm:$0xff]  }
 0xc12   :  { %8971 = vmatpush1.bf16.msra.mxu1 %v16779_v10  ;;  %v16826_v10 = vld [vmem:[#allocation17 + $0x5a4] ss:$8 sps:$4 sm:$0xff]  }
 0xc13   :  { %8972 = vmatprep.subr.bf16.mxu1 %v16784_v34  ;;  %v16824_v34 = vld [vmem:[#allocation17 + $0x5a0] ss:$8 sps:$4 sm:$0xff]  }
 0xc16   :  { %8973 = vmatpush1.bf16.msra.mxu1 %v16782_v13  ;;  %v16829_v13 = vld [vmem:[#allocation17 + $0x5b4] ss:$8 sps:$4 sm:$0xff]  }
 0xc17   :  { %8974 = vmatprep.subr.bf16.mxu1 %v16787_v14  ;;  %v16827_v14 = vld [vmem:[#allocation17 + $0x5b0] ss:$8 sps:$4 sm:$0xff]  }
 0xc1a   :  { %8975 = vmatpush1.bf16.msra.mxu1 %v16785_v15  ;;  %v16832_v15 = vld [vmem:[#allocation17 + $0x5c4] ss:$8 sps:$4 sm:$0xff]  }
 0xc1b   :  { %8976 = vmatprep.subr.bf16.mxu1 %v16790_v23  ;;  %v16835_v23 = vld [vmem:[#allocation17 + $0x5d4] ss:$8 sps:$4 sm:$0xff]  }
 0xc1e   :  { %8977 = vmatpush1.bf16.msra.mxu1 %v16788_v27  ;;  %v5559_v27 = vrot.slane %v18308_v21, %v18274_v24 }
 0xc1f   :  { %8978 = vmatprep.subr.bf16.mxu1 %v16793_v29  ;;  %v5571_v29 = vrot.slane %v18308_v21, %v18277_v26 }
 0xc22   :  { %8979 = vmatpush1.bf16.msra.mxu1 %v16791_v38  ;;  %v7116_v38 = vadd.f32 %v18269_v0, %v5559_v27  ;;  %v16845_v0 = vld [vmem:[#allocation17 + $0x610] ss:$8 sps:$4 sm:$0xff]  }
 0xc23   :  { %8989 = vmatprep.subr.bf16.mxu1 %v16796_v42  ;;  %v7159_v42 = vadd.f32 %v18287_v1, %v5571_v29  ;;  %v16848_v1 = vld [vmem:[#allocation17 + $0x620] ss:$8 sps:$4 sm:$0xff]  }
 0xc25   :  { %8981 = vmatmul.mubr.bf16.vlgmr.msra.gmra.mrb[52].mxu1 %v7228_v45  ;;  %v16844_v45 = vld [vmem:[#allocation17 + $0x604] ss:$8 sps:$4 sm:$0xff]  }
 0xc26   :  { %8990 = vmatpush1.bf16.msra.mxu1 %v16794_v44  ;;  %9021 = vmatprep.mubr.bf16.mxu1 %v7231_v46  ;;  %v7214_v44 = vmax.f32 %v7116_v38, 0.0  ;;  %v16842_v46 = vld [vmem:[#allocation17 + $0x600] ss:$8 sps:$4 sm:$0xff]  }
 0xc27   :  { %8991 = vmatprep.subr.bf16.mxu1 %v16799_v49  ;;  %v7217_v49 = vmax.f32 %v7159_v42, 0.0 }
 0xc2a   :  { %8992 = vmatpush1.bf16.msra.mxu1 %v16797_v11  ;;  %v7230_v11 = vpack.c.bf16 %v7214_v44, %v7214_v44 }
 0xc2b   :  { %8993 = vmatprep.subr.bf16.mxu1 %v16802_v47  ;;  %v16847_v47 = vld [vmem:[#allocation17 + $0x614] ss:$8 sps:$4 sm:$0xff]  }
 0xc2e   :  { %8994 = vmatpush1.bf16.msra.mxu1 %v16800_v20  ;;  %v7233_v20 = vpack.c.bf16 %v7217_v49, %v7217_v49 }
 0xc2f   :  { %8995 = vmatprep.subr.bf16.mxu1 %v16805_v48  ;;  %v16850_v48 = vld [vmem:[#allocation17 + $0x624] ss:$8 sps:$4 sm:$0xff]  }
 0xc32   :  { %8996 = vmatpush1.bf16.msra.mxu1 %v16803_v4  ;;  %v16853_v4 = vld [vmem:[#allocation17 + $0x634] ss:$8 sps:$4 sm:$0xff]  }
 0xc33   :  { %8997 = vmatprep.subr.bf16.mxu1 %v16808_v50  ;;  %v16851_v50 = vld [vmem:[#allocation17 + $0x630] ss:$8 sps:$4 sm:$0xff]  }
 0xc36   :  { %8998 = vmatpush1.bf16.msra.mxu1 %v16806_v51  ;;  %v16854_v51 = vld [vmem:[#allocation17 + $0x640] ss:$8 sps:$4 sm:$0xff]  }
 0xc37   :  { %8999 = vmatprep.subr.bf16.mxu1 %v16811_v53  ;;  %v16857_v53 = vld [vmem:[#allocation17 + $0x650] ss:$8 sps:$4 sm:$0xff]  }
 0xc38   :  { %v8859_v59 = vpop.f32.mrb[40].mxu1 }
 0xc39   :  { %v18330_v37 = vadd.f32 %v8859_v59, %v8819_v32  ;;  %v8861_v61 = vpop.f32.mrb[41].mxu1 }
 0xc3a   :  { %v18332_v35 = vadd.f32 %v8861_v61, %v8821_v58  ;;  %v8863_v2 = vpop.f32.mrb[42].mxu1  ;;  %9000 = vmatpush1.bf16.msra.mxu1 %v16809_v54  ;;  %v16860_v61 = vld [vmem:[#allocation17 + $0x660] ss:$8 sps:$4 sm:$0xff]  }
 0xc3b   :  { %v8864_v3 = vpop.f32.mrb[43].mxu1  ;;  %9001 = vmatprep.subr.bf16.mxu1 %v16814_v56 }
 0xc3c   :  { %v16863_v3 = vld [vmem:[#allocation17 + $0x670] ss:$8 sps:$4 sm:$0xff]  }
 0xc3e   :  { %9002 = vmatpush1.bf16.msra.mxu1 %v16812_v63  ;;  %v16865_v63 = vld [vmem:[#allocation17 + $0x674] ss:$8 sps:$4 sm:$0xff]  }
 0xc3f   :  { %9003 = vmatprep.subr.bf16.mxu1 %v16817_v5  ;;  %v16868_v5 = vld [vmem:[#allocation17 + $0x684] ss:$8 sps:$4 sm:$0xff]  }
 0xc42   :  { %9004 = vmatpush1.bf16.msra.mxu1 %v16815_v6  ;;  %v16866_v6 = vld [vmem:[#allocation17 + $0x680] ss:$8 sps:$4 sm:$0xff]  }
 0xc43   :  { %9005 = vmatprep.subr.bf16.mxu1 %v16820_v55  ;;  %v16871_v55 = vld [vmem:[#allocation17 + $0x694] ss:$8 sps:$4 sm:$0xff]  }
 0xc46   :  { %9006 = vmatpush1.bf16.msra.mxu1 %v16818_v8  ;;  %v16874_v8 = vld [vmem:[#allocation17 + $0x6a4] ss:$8 sps:$4 sm:$0xff]  }
 0xc47   :  { %9007 = vmatprep.subr.bf16.mxu1 %v16823_v57  ;;  %v16877_v57 = vld [vmem:[#allocation17 + $0x6b4] ss:$8 sps:$4 sm:$0xff]  }
 0xc4a   :  { %9008 = vmatpush1.bf16.msra.mxu1 %v16821_v9  ;;  %v16875_v9 = vld [vmem:[#allocation17 + $0x6b0] ss:$8 sps:$4 sm:$0xff]  }
 0xc4b   :  { %9009 = vmatprep.subr.bf16.mxu1 %v16826_v10  ;;  %v16880_v10 = vld [vmem:[#allocation17 + $0x6c4] ss:$8 sps:$4 sm:$0xff]  }
 0xc4e   :  { %9010 = vmatpush1.bf16.msra.mxu1 %v16824_v34  ;;  %v16878_v34 = vld [vmem:[#allocation17 + $0x6c0] ss:$8 sps:$4 sm:$0xff]  }
 0xc4f   :  { %9011 = vmatprep.subr.bf16.mxu1 %v16829_v13  ;;  %v16883_v13 = vld [vmem:[#allocation17 + $0x6d4] ss:$8 sps:$4 sm:$0xff]  }
 0xc52   :  { %9012 = vmatpush1.bf16.msra.mxu1 %v16827_v14  ;;  %v16881_v14 = vld [vmem:[#allocation17 + $0x6d0] ss:$8 sps:$4 sm:$0xff]  }
 0xc53   :  { %9013 = vmatprep.subr.bf16.mxu1 %v16832_v15  ;;  %v5567_v15 = vrot.slane %v18308_v21, %v18290_v19 }
 0xc55   :  { %v7157_v27 = vadd.f32 %v18285_v62, %v5567_v15  ;;  %v16893_v62 = vld [vmem:[#allocation17 + $0x710] ss:$8 sps:$4 sm:$0xff]  }
 0xc56   :  { %9014 = vmatpush1.bf16.msra.mxu1 %v16830_v18  ;;  %v16886_v18 = vld [vmem:[#allocation17 + $0x6e4] ss:$8 sps:$4 sm:$0xff]  }
 0xc57   :  { %9015 = vmatprep.subr.bf16.mxu1 %v16835_v23  ;;  %v5579_v23 = vrot.slane %v18308_v21, %v18293_v22  ;;  %v7216_v38 = vmax.f32 %v7157_v27, 0.0 }
 0xc59   :  { %v7200_v29 = vadd.f32 %v18303_v60, %v5579_v23  ;;  %v7232_v44 = vpack.c.bf16 %v7216_v38, %v7216_v38  ;;  %v16896_v60 = vld [vmem:[#allocation17 + $0x720] ss:$8 sps:$4 sm:$0xff]  }
 0xc5a   :  { %9016 = vmatpush1.bf16.msra.mxu1 %v16833_v25  ;;  %v16884_v25 = vld [vmem:[#allocation17 + $0x6e0] ss:$8 sps:$4 sm:$0xff]  }
 0xc5b   :  { %9017 = vmatprep.subr.bf16.mxu1 %v16838_v28  ;;  %v16889_v28 = vld [vmem:[#allocation17 + $0x6f4] ss:$8 sps:$4 sm:$0xff]   ;;  %v7219_v42 = vmax.f32 %v7200_v29, 0.0 }
 0xc5d   :  { %v7235_v49 = vpack.c.bf16 %v7219_v42, %v7219_v42 }
 0xc5e   :  { %9018 = vmatpush1.bf16.msra.mxu1 %v16836_v33  ;;  %v16887_v33 = vld [vmem:[#allocation17 + $0x6f0] ss:$8 sps:$4 sm:$0xff]  }
 0xc5f   :  { %9019 = vmatprep.subr.bf16.mxu1 %v16841_v40  ;;  %v16892_v40 = vld [vmem:[#allocation17 + $0x704] ss:$8 sps:$4 sm:$0xff]  }
 0xc62   :  { %9020 = vmatpush1.bf16.msra.mxu1 %v16839_v43  ;;  %v16890_v43 = vld [vmem:[#allocation17 + $0x700] ss:$8 sps:$4 sm:$0xff]  }
 0xc63   :  { %9030 = vmatprep.subr.bf16.mxu1 %v16844_v45  ;;  %v16895_v45 = vld [vmem:[#allocation17 + $0x714] ss:$8 sps:$4 sm:$0xff]  }
 0xc65   :  { %9022 = vmatmul.mubr.bf16.vlgmr.msra.gmra.mrb[56].mxu1 %v7230_v11  ;;  %v16901_v11 = vld [vmem:[#allocation17 + $0x734] ss:$8 sps:$4 sm:$0xff]  }
 0xc66   :  { %9031 = vmatpush1.bf16.msra.mxu1 %v16842_v46  ;;  %9062 = vmatprep.mubr.bf16.mxu1 %v7233_v20  ;;  %v16898_v46 = vld [vmem:[#allocation17 + $0x724] ss:$8 sps:$4 sm:$0xff]  }
 0xc67   :  { %9032 = vmatprep.subr.bf16.mxu1 %v16847_v47  ;;  %v16899_v47 = vld [vmem:[#allocation17 + $0x730] ss:$8 sps:$4 sm:$0xff]   ;;  %v16904_v20 = vld [vmem:[#allocation17 + $0x744] ss:$8 sps:$4 sm:$0xff]  }
 0xc6a   :  { %9033 = vmatpush1.bf16.msra.mxu1 %v16845_v0  ;;  %v16902_v0 = vld [vmem:[#allocation17 + $0x740] ss:$8 sps:$4 sm:$0xff]  }
 0xc6b   :  { %9034 = vmatprep.subr.bf16.mxu1 %v16850_v48  ;;  %v16907_v48 = vld [vmem:[#allocation17 + $0x754] ss:$8 sps:$4 sm:$0xff]  }
 0xc6e   :  { %9035 = vmatpush1.bf16.msra.mxu1 %v16848_v1  ;;  %v16905_v1 = vld [vmem:[#allocation17 + $0x750] ss:$8 sps:$4 sm:$0xff]  }
 0xc6f   :  { %9036 = vmatprep.subr.bf16.mxu1 %v16853_v4  ;;  %v16910_v4 = vld [vmem:[#allocation17 + $0x764] ss:$8 sps:$4 sm:$0xff]  }
 0xc72   :  { %9037 = vmatpush1.bf16.msra.mxu1 %v16851_v50 }
 0xc73   :  { %9038 = vmatprep.subr.bf16.mxu1 %v16856_v12 }
 0xc76   :  { %9039 = vmatpush1.bf16.msra.mxu1 %v16854_v51 }
 0xc77   :  { %9040 = vmatprep.subr.bf16.mxu1 %v16859_v52 }
 0xc78   :  { %v8900_v54 = vpop.f32.mrb[44].mxu1 }
 0xc79   :  { %v18341_v32 = vadd.f32 %v8900_v54, %v18330_v37  ;;  %v8902_v56 = vpop.f32.mrb[45].mxu1  ;;  %v16869_v37 = vld [vmem:[#allocation17 + $0x690] ss:$8 sps:$4 sm:$0xff]  }
 0xc7a   :  { %v18344_v58 = vadd.f32 %v8902_v56, %v18332_v35  ;;  %v8904_v59 = vpop.f32.mrb[46].mxu1  ;;  %9041 = vmatpush1.bf16.msra.mxu1 %v16857_v53  ;;  %v16872_v35 = vld [vmem:[#allocation17 + $0x6a0] ss:$8 sps:$4 sm:$0xff]   ;;  %v16913_v56 = vld [vmem:[#allocation17 + $0x774] ss:$8 sps:$4 sm:$0xff]  }
 0xc7b   :  { %v8905_v2 = vpop.f32.mrb[47].mxu1  ;;  %9042 = vmatprep.subr.bf16.mxu1 %v16862_v7  ;;  %v16908_v7 = vld [vmem:[#allocation17 + $0x760] ss:$8 sps:$4 sm:$0xff]   ;;  %v16911_v59 = vld [vmem:[#allocation17 + $0x770] ss:$8 sps:$4 sm:$0xff]  }
 0xc7c   :  { %v16914_v2 = vld [vmem:[#allocation17 + $0x780] ss:$8 sps:$4 sm:$0xff]  }
 0xc7e   :  { %9043 = vmatpush1.bf16.msra.mxu1 %v16860_v61  ;;  %v16916_v61 = vld [vmem:[#allocation17 + $0x784] ss:$8 sps:$4 sm:$0xff]  }
 0xc7f   :  { %9044 = vmatprep.subr.bf16.mxu1 %v16865_v63  ;;  %v16919_v63 = vld [vmem:[#allocation17 + $0x794] ss:$8 sps:$4 sm:$0xff]  }
 0xc82   :  { %9045 = vmatpush1.bf16.msra.mxu1 %v16863_v3  ;;  %v16917_v3 = vld [vmem:[#allocation17 + $0x790] ss:$8 sps:$4 sm:$0xff]  }
 0xc83   :  { %9046 = vmatprep.subr.bf16.mxu1 %v16868_v5  ;;  %v16925_v5 = vld [vmem:[#allocation17 + $0x7b4] ss:$8 sps:$4 sm:$0xff]  }
 0xc86   :  { %9047 = vmatpush1.bf16.msra.mxu1 %v16866_v6  ;;  %v16923_v6 = vld [vmem:[#allocation17 + $0x7b0] ss:$8 sps:$4 sm:$0xff]  }
 0xc87   :  { %9048 = vmatprep.subr.bf16.mxu1 %v16871_v55  ;;  %v16928_v55 = vld [vmem:[#allocation17 + $0x7c4] ss:$8 sps:$4 sm:$0xff]  }
 0xc8a   :  { %9049 = vmatpush1.bf16.msra.mxu1 %v16869_v37  ;;  %v16926_v37 = vld [vmem:[#allocation17 + $0x7c0] ss:$8 sps:$4 sm:$0xff]  }
 0xc8b   :  { %9050 = vmatprep.subr.bf16.mxu1 %v16874_v8  ;;  %v16931_v8 = vld [vmem:[#allocation17 + $0x7d4] ss:$8 sps:$4 sm:$0xff]  }
 0xc8e   :  { %9051 = vmatpush1.bf16.msra.mxu1 %v16872_v35  ;;  %v16929_v35 = vld [vmem:[#allocation17 + $0x7d0] ss:$8 sps:$4 sm:$0xff]  }
 0xc8f   :  { %9052 = vmatprep.subr.bf16.mxu1 %v16877_v57  ;;  %v5575_v57 = vrot.slane %v18308_v21, %v18306_v16 }
 0xc92   :  { %9053 = vmatpush1.bf16.msra.mxu1 %v16875_v9  ;;  %v16934_v9 = vld [vmem:[#allocation17 + $0x7e4] ss:$8 sps:$4 sm:$0xff]  }
 0xc93   :  { %9054 = vmatprep.subr.bf16.mxu1 %v16880_v10  ;;  %v16932_v10 = vld [vmem:[#allocation17 + $0x7e0] ss:$8 sps:$4 sm:$0xff]  }
 0xc96   :  { %9055 = vmatpush1.bf16.msra.mxu1 %v16878_v34  ;;  %v7198_v34 = vadd.f32 %v18301_v17, %v5575_v57 }
 0xc97   :  { %9056 = vmatprep.subr.bf16.mxu1 %v16883_v13  ;;  %v16937_v13 = vld [vmem:[#allocation17 + $0x7f4] ss:$8 sps:$4 sm:$0xff]  }
 0xc98   :  { %v7218_v15 = vmax.f32 %v7198_v34, 0.0 }
 0xc9a   :  { %9057 = vmatpush1.bf16.msra.mxu1 %v16881_v14  ;;  %v16935_v14 = vld [vmem:[#allocation17 + $0x7f0] ss:$8 sps:$4 sm:$0xff]  }
 0xc9b   :  { %9058 = vmatprep.subr.bf16.mxu1 %v16886_v18  ;;  %v7234_v18 = vpack.c.bf16 %v7218_v15, %v7218_v15  ;;  %v16970_v15 = vld [vmem:[#allocation8 + $0x1a4] ss:$8 sps:$4 sm:$0xff]  }
 0xc9e   :  { %9059 = vmatpush1.bf16.msra.mxu1 %v16884_v25 }
 0xc9f   :  { %9060 = vmatprep.subr.bf16.mxu1 %v16889_v28 }
 0xca2   :  { %9061 = vmatpush1.bf16.msra.mxu1 %v16887_v33 }
 0xca3   :  { %9071 = vmatprep.subr.bf16.mxu1 %v16892_v40 }
 0xca5   :  { %9063 = vmatmul.mubr.bf16.vlgmr.msra.gmra.mrb[60].mxu1 %v7232_v44 }
 0xca6   :  { %9072 = vmatpush1.bf16.msra.mxu1 %v16890_v43  ;;  %9103 = vmatprep.mubr.bf16.mxu1 %v7235_v49 }
 0xca7   :  { %9073 = vmatprep.subr.bf16.mxu1 %v16895_v45 }
 0xcaa   :  { %9074 = vmatpush1.bf16.msra.mxu1 %v16893_v62 }
 0xcab   :  { %9075 = vmatprep.subr.bf16.mxu1 %v16898_v46 }
 0xcae   :  { %9076 = vmatpush1.bf16.msra.mxu1 %v16896_v60 }
 0xcaf   :  { %9077 = vmatprep.subr.bf16.mxu1 %v16901_v11 }
 0xcb2   :  { %9078 = vmatpush1.bf16.msra.mxu1 %v16899_v47 }
 0xcb3   :  { %9079 = vmatprep.subr.bf16.mxu1 %v16904_v20 }
 0xcb6   :  { %9080 = vmatpush1.bf16.msra.mxu1 %v16902_v0 }
 0xcb7   :  { %9081 = vmatprep.subr.bf16.mxu1 %v16907_v48 }
 0xcb8   :  { %v8941_v50 = vpop.f32.mrb[48].mxu1 }
 0xcb9   :  { %v8942_v12 = vadd.f32 %v8941_v50, %v18341_v32  ;;  %v8943_v51 = vpop.f32.mrb[49].mxu1  ;;  %v16922_v32 = vld [vmem:[#allocation17 + $0x7a4] ss:$8 sps:$4 sm:$0xff]  }
 0xcba   :  { %v8944_v52 = vadd.f32 %v8943_v51, %v18344_v58  ;;  %v8945_v53 = vpop.f32.mrb[50].mxu1  ;;  %9082 = vmatpush1.bf16.msra.mxu1 %v16905_v1  ;;  %v16920_v58 = vld [vmem:[#allocation17 + $0x7a0] ss:$8 sps:$4 sm:$0xff]   ;;  %v16938_v51 = vld [vmem:[#allocation8 + $0x100] ss:$8 sps:$4 sm:$0xff]  }
 0xcbb   :  { %v8946_v54 = vpop.f32.mrb[51].mxu1  ;;  %9083 = vmatprep.subr.bf16.mxu1 %v16910_v4  ;;  %v16943_v53 = vld [vmem:[#allocation8 + $0x114] ss:$8 sps:$4 sm:$0xff]  }
 0xcbc   :  { %v16946_v54 = vld [vmem:[#allocation8 + $0x124] ss:$8 sps:$4 sm:$0xff]  }
 0xcbe   :  { %9084 = vmatpush1.bf16.msra.mxu1 %v16908_v7  ;;  %v16941_v7 = vld [vmem:[#allocation8 + $0x110] ss:$8 sps:$4 sm:$0xff]  }
 0xcbf   :  { %9085 = vmatprep.subr.bf16.mxu1 %v16913_v56  ;;  %v16944_v56 = vld [vmem:[#allocation8 + $0x120] ss:$8 sps:$4 sm:$0xff]  }
 0xcc2   :  { %9086 = vmatpush1.bf16.msra.mxu1 %v16911_v59  ;;  %v16949_v59 = vld [vmem:[#allocation8 + $0x134] ss:$8 sps:$4 sm:$0xff]  }
 0xcc3   :  { %9087 = vmatprep.subr.bf16.mxu1 %v16916_v61  ;;  %v16947_v61 = vld [vmem:[#allocation8 + $0x130] ss:$8 sps:$4 sm:$0xff]  }
 0xcc6   :  { %9088 = vmatpush1.bf16.msra.mxu1 %v16914_v2  ;;  %v16955_v2 = vld [vmem:[#allocation8 + $0x154] ss:$8 sps:$4 sm:$0xff]  }
 0xcc7   :  { %9089 = vmatprep.subr.bf16.mxu1 %v16919_v63  ;;  %v16953_v63 = vld [vmem:[#allocation8 + $0x150] ss:$8 sps:$4 sm:$0xff]  }
 0xcca   :  { %9090 = vmatpush1.bf16.msra.mxu1 %v16917_v3  ;;  %v16958_v3 = vld [vmem:[#allocation8 + $0x164] ss:$8 sps:$4 sm:$0xff]  }
 0xccb   :  { %9091 = vmatprep.subr.bf16.mxu1 %v16922_v32  ;;  %v16956_v32 = vld [vmem:[#allocation8 + $0x160] ss:$8 sps:$4 sm:$0xff]  }
 0xcce   :  { %9092 = vmatpush1.bf16.msra.mxu1 %v16920_v58  ;;  %v16961_v58 = vld [vmem:[#allocation8 + $0x174] ss:$8 sps:$4 sm:$0xff]  }
 0xccf   :  { %9093 = vmatprep.subr.bf16.mxu1 %v16925_v5  ;;  %v16959_v5 = vld [vmem:[#allocation8 + $0x170] ss:$8 sps:$4 sm:$0xff]  }
 0xcd2   :  { %9094 = vmatpush1.bf16.msra.mxu1 %v16923_v6  ;;  %v16964_v6 = vld [vmem:[#allocation8 + $0x184] ss:$8 sps:$4 sm:$0xff]  }
 0xcd3   :  { %9095 = vmatprep.subr.bf16.mxu1 %v16928_v55  ;;  %v16962_v55 = vld [vmem:[#allocation8 + $0x180] ss:$8 sps:$4 sm:$0xff]  }
 0xcd6   :  { %9096 = vmatpush1.bf16.msra.mxu1 %v16926_v37  ;;  %v16967_v37 = vld [vmem:[#allocation8 + $0x194] ss:$8 sps:$4 sm:$0xff]  }
 0xcd7   :  { %9097 = vmatprep.subr.bf16.mxu1 %v16931_v8  ;;  %v16965_v8 = vld [vmem:[#allocation8 + $0x190] ss:$8 sps:$4 sm:$0xff]  }
 0xcda   :  { %9098 = vmatpush1.bf16.msra.mxu1 %v16929_v35 }
 0xcdb   :  { %9099 = vmatprep.subr.bf16.mxu1 %v16934_v9 }
 0xcde   :  { %9100 = vmatpush1.bf16.msra.mxu1 %v16932_v10 }
 0xcdf   :  { %9101 = vmatprep.subr.bf16.mxu1 %v16937_v13 }
 0xce2   :  { %9102 = vmatpush1.bf16.msra.mxu1 %v16935_v14 }
 0xce5   :  { %9104 = vmatmul.mubr.bf16.vlgmr.msra.gmra.mrb[64].mxu1 %v7234_v18  ;;  %v16968_v18 = vld [vmem:[#allocation8 + $0x1a0] ss:$8 sps:$4 sm:$0xff]  }
 0xcf8   :  { %v8982_v23 = vpop.f32.mrb[52].mxu1 }
 0xcf9   :  { %v8983_v25 = vadd.f32 %v8982_v23, %v8942_v12  ;;  %v8984_v27 = vpop.f32.mrb[53].mxu1  ;;  %v16973_v23 = vld [vmem:[#allocation8 + $0x1b4] ss:$8 sps:$4 sm:$0xff]  }
 0xcfa   :  { %v8985_v28 = vadd.f32 %v8984_v27, %v8944_v52  ;;  %v8986_v21 = vpop.f32.mrb[54].mxu1  ;;  %v16940_v52 = vld [vmem:[#allocation8 + $0x104] ss:$8 sps:$4 sm:$0xff]  }
 0xcfb   :  { %v8987_v29 = vpop.f32.mrb[55].mxu1  ;;  %9366 = vmatprep.subr.bf16.mxu1 %v16940_v52  ;;  %v16976_v27 = vld [vmem:[#allocation8 + $0x1c4] ss:$8 sps:$4 sm:$0xff]   ;;  %v16979_v21 = vld [vmem:[#allocation8 + $0x1d4] ss:$8 sps:$4 sm:$0xff]  }
 0xcfc   :  { %9367 = vmatpush1.bf16.msra.mxu1 %v16938_v51  ;;  %v16977_v29 = vld [vmem:[#allocation8 + $0x1d0] ss:$8 sps:$4 sm:$0xff]   ;;  %v9194_v52 = vld [vmem:[#allocation10 + $0x2] sm:$0x3] }
 0xcfd   :  { %9368 = vmatprep.subr.bf16.mxu1 %v16943_v53  ;;  %v9199_v53 = vrot.slane %v9194_v52, %v18186_v39 }
 0xd00   :  { %9369 = vmatpush1.bf16.msra.mxu1 %v16941_v7  ;;  %v9203_v7 = vrot.slane %v9194_v52, %v18189_v41 }
 0xd01   :  { %9370 = vmatprep.subr.bf16.mxu1 %v16946_v54 }
 0xd04   :  { %9371 = vmatpush1.bf16.msra.mxu1 %v16944_v56 }
 0xd05   :  { %9372 = vmatprep.subr.bf16.mxu1 %v16949_v59 }
 0xd08   :  { %9373 = vmatpush1.bf16.msra.mxu1 %v16947_v61 }
 0xd38   :  { %v9023_v33 = vpop.f32.mrb[56].mxu1 }
 0xd39   :  { %v9024_v38 = vadd.f32 %v9023_v33, %v8983_v25  ;;  %v9025_v40 = vpop.f32.mrb[57].mxu1  ;;  %v16971_v25 = vld [vmem:[#allocation8 + $0x1b0] ss:$8 sps:$4 sm:$0xff]   ;;  %v16982_v33 = vld [vmem:[#allocation8 + $0x1e4] ss:$8 sps:$4 sm:$0xff]  }
 0xd3a   :  { %v9026_v42 = vadd.f32 %v9025_v40, %v8985_v28  ;;  %v9027_v17 = vpop.f32.mrb[58].mxu1  ;;  %v16974_v28 = vld [vmem:[#allocation8 + $0x1c0] ss:$8 sps:$4 sm:$0xff]   ;;  %v16985_v40 = vld [vmem:[#allocation8 + $0x1f4] ss:$8 sps:$4 sm:$0xff]  }
 0xd3b   :  { %v9028_v43 = vpop.f32.mrb[59].mxu1 }
 0xd78   :  { %v9064_v44 = vpop.f32.mrb[60].mxu1 }
 0xd79   :  { %v9065_v45 = vadd.f32 %v9064_v44, %v9024_v38  ;;  %v9066_v49 = vpop.f32.mrb[61].mxu1  ;;  %v16980_v38 = vld [vmem:[#allocation8 + $0x1e0] ss:$8 sps:$4 sm:$0xff]  }
 0xd7a   :  { %v9067_v62 = vadd.f32 %v9066_v49, %v9026_v42  ;;  %v9068_v46 = vpop.f32.mrb[62].mxu1  ;;  %v16983_v42 = vld [vmem:[#allocation8 + $0x1f0] ss:$8 sps:$4 sm:$0xff]   ;;  %v9115_v49 = vld [vmem:[#allocation22] sm:$0x3] }
 0xd7b   :  { %v9069_v60 = vpop.f32.mrb[63].mxu1 }
 0xdb8   :  { %v9105_v11 = vpop.f32.mrb[64].mxu1 }
 0xdb9   :  { %v9106_v47 = vadd.f32 %v9105_v11, %v9065_v45  ;;  %v9107_v20 = vpop.f32.mrb[65].mxu1  ;;  %v9114_v45 = vld [vmem:[#allocation20] sm:$0x3] }
 0xdba   :  { %v9108_v0 = vadd.f32 %v9107_v20, %v9067_v62  ;;  %v9109_v48 = vpop.f32.mrb[66].mxu1  ;;  %v9136_v62 = vrot.slane %v9114_v45, %v18186_v39  ;;  %v9140_v46 = vrot.slane %v9114_v45, %v18189_v41  ;;  %v9149_v20 = vrot.slane %v9115_v49, %v18186_v39 }
 0xdbb   :  { %v9110_v1 = vpop.f32.mrb[67].mxu1  ;;  %v9112_v4 = vadd.f32 %v9106_v47, %v18207_v30  ;;  %v16952_v30 = vld [vmem:[#allocation8 + $0x144] ss:$8 sps:$4 sm:$0xff]  }
 0xdbc   :  { %v9113_v50 = vadd.f32 %v9108_v0, %v18209_v31  ;;  %v16950_v31 = vld [vmem:[#allocation8 + $0x140] ss:$8 sps:$4 sm:$0xff]   ;;  %9374 = vmatprep.subr.bf16.mxu1 %v16952_v30  ;;  %v9153_v0 = vrot.slane %v9115_v49, %v18189_v41  ;;  %v9522_v49 = vld [vmem:[#allocation14 + $0xa00] sm:$0xff] }
 0xdbd   :  { %9375 = vmatpush1.bf16.msra.mxu1 %v16950_v31 }
 0xdbe   :  { %v9116_v12 = vadd.f32 %v9113_v50, %v9112_v4  ;;  %9376 = vmatprep.subr.bf16.mxu1 %v16955_v2 }
 0xdc0   :  { %9117 = vadd.xlane.f32.xlu1 %v9116_v12 }
 0xdc1   :  { %9377 = vmatpush1.bf16.msra.mxu1 %v16953_v63 }
 0xdc2   :  { %9378 = vmatprep.subr.bf16.mxu1 %v16958_v3 }
 0xdc5   :  { %9379 = vmatpush1.bf16.msra.mxu1 %v16956_v32  ;;  %v9458_v32 = vld [vmem:[#allocation14 + $0x800] sm:$0xff] }
 0xdc6   :  { %9380 = vmatprep.subr.bf16.mxu1 %v16961_v58  ;;  %v9466_v58 = vld [vmem:[#allocation14 + $0x840] sm:$0xff] }
 0xdc9   :  { %9381 = vmatpush1.bf16.msra.mxu1 %v16959_v5  ;;  %v9460_v5 = vld [vmem:[#allocation14 + $0x810] sm:$0xff] }
 0xdca   :  { %9382 = vmatprep.subr.bf16.mxu1 %v16964_v6  ;;  %v14882_v6 = vcombine.low %v9458_v32, %v9466_v58 }
 0xdcd   :  { %9383 = vmatpush1.bf16.msra.mxu1 %v16962_v55  ;;  %v14883_v55 = vcombine.high %v9458_v32, %v9466_v58  ;;  %v9570_v32 = vld [vmem:[#allocation14 + $0xb80] sm:$0xff] }
 0xdce   :  { %9384 = vmatprep.subr.bf16.mxu1 %v16967_v37  ;;  %v9468_v37 = vld [vmem:[#allocation14 + $0x850] sm:$0xff]  ;;  %v9578_v58 = vld [vmem:[#allocation14 + $0xbc0] sm:$0xff] }
 0xdd1   :  { %9385 = vmatpush1.bf16.msra.mxu1 %v16965_v8  ;;  %v9474_v8 = vld [vmem:[#allocation14 + $0x880] sm:$0xff] }
 0xdd2   :  { %9386 = vmatprep.subr.bf16.mxu1 %v16970_v15 }
 0xdd5   :  { %9387 = vmatpush1.bf16.msra.mxu1 %v16968_v18  ;;  %v9498_v18 = vld [vmem:[#allocation14 + $0x940] sm:$0xff] }
 0xdd6   :  { %9388 = vmatprep.subr.bf16.mxu1 %v16973_v23  ;;  %v9492_v23 = vld [vmem:[#allocation14 + $0x910] sm:$0xff] }
 0xdd9   :  { %9389 = vmatpush1.bf16.msra.mxu1 %v16971_v25  ;;  %v9500_v25 = vld [vmem:[#allocation14 + $0x950] sm:$0xff] }
 0xdda   :  { %9390 = vmatprep.subr.bf16.mxu1 %v16976_v27 }
 0xddd   :  { %9391 = vmatpush1.bf16.msra.mxu1 %v16974_v28 }
 0xdde   :  { %9392 = vmatprep.subr.bf16.mxu1 %v16979_v21 }
 0xde1   :  { %9393 = vmatpush1.bf16.msra.mxu1 %v16977_v29  ;;  %v14919_v29 = vcombine.high %v9492_v23, %v9500_v25 }
 0xde2   :  { %9394 = vmatprep.subr.bf16.mxu1 %v16982_v33  ;;  %v9506_v33 = vld [vmem:[#allocation14 + $0x980] sm:$0xff] }
 0xde5   :  { %9395 = vmatpush1.bf16.msra.mxu1 %v16980_v38  ;;  %v9514_v38 = vld [vmem:[#allocation14 + $0x9c0] sm:$0xff] }
 0xde6   :  { %9396 = vmatprep.subr.bf16.mxu1 %v16985_v40  ;;  %v9508_v40 = vld [vmem:[#allocation14 + $0x990] sm:$0xff] }
 0xde9   :  { %9397 = vmatpush1.bf16.msra.mxu1 %v16983_v42  ;;  %v9516_v42 = vld [vmem:[#allocation14 + $0x9d0] sm:$0xff] }
 0xdea   :  { %11079 = vmatprep.subr.bf16.mxu1 %v14883_v55  ;;  %v14935_v45 = vcombine.high %v9508_v40, %v9516_v42 }
 0xe4d   :  { %v9118_v35 = vpop.xlane.xlu1 %9117 }
 0xe4e   :  { %v9119_v57 = vmul.f32 0.00390625, %v9118_v35  ;;  %v9482_v35 = vld [vmem:[#allocation14 + $0x8c0] sm:$0xff] }
 0xe4f   :  { %v14898_v27 = vcombine.low %v9474_v8, %v9482_v35 }
 0xe50   :  { %v9120_v9 = vsub.f32 %v9112_v4, %v9119_v57  ;;  %v9121_v10 = vsub.f32 %v9113_v50, %v9119_v57  ;;  %v14886_v57 = vcombine.low %v9460_v5, %v9468_v37 }
 0xe52   :  { %v9122_v34 = vmul.f32 %v9120_v9, %v9120_v9  ;;  %v9123_v13 = vmul.f32 %v9121_v10, %v9121_v10 }
 0xe54   :  { %v9124_v14 = vadd.f32 %v9123_v13, %v9122_v34  ;;  %v9476_v34 = vld [vmem:[#allocation14 + $0x890] sm:$0xff] }
 0xe55   :  { %v9484_v13 = vld [vmem:[#allocation14 + $0x8d0] sm:$0xff] }
 0xe56   :  { %9125 = vadd.xlane.f32.xlu1 %v9124_v14  ;;  %v9490_v14 = vld [vmem:[#allocation14 + $0x900] sm:$0xff]  ;;  %v14903_v15 = vcombine.high %v9476_v34, %v9484_v13  ;;  %v14902_v28 = vcombine.low %v9476_v34, %v9484_v13  ;;  %v9596_v34 = vld [vmem:[#allocation14 + $0xc50] sm:$0xff]  ;;  %v14994_v13 = vcombine.low %v9570_v32, %v9578_v58 }
 0xe57   :  { %v14915_v21 = vcombine.high %v9490_v14, %v9498_v18 }
 0xee3   :  { %v9126_v17 = vpop.xlane.xlu1 %9125 }
 0xee4   :  { %v9127_v43 = vmul.f32 0.00390625, %v9126_v17  ;;  %v14914_v17 = vcombine.low %v9490_v14, %v9498_v18 }
 0xee6   :  { %v9128_v44 = vadd.f32 1e-05, %v9127_v43  ;;  %v14918_v43 = vcombine.low %v9492_v23, %v9500_v25  ;;  %v9602_v23 = vld [vmem:[#allocation14 + $0xc80] sm:$0xff] }
 0xee7   :  { %v9610_v25 = vld [vmem:[#allocation14 + $0xcc0] sm:$0xff] }
 0xee8   :  { %17392 = vrsqrt.f32 %v9128_v44  ;;  %v14931_v44 = vcombine.high %v9506_v33, %v9514_v38 }
 0xef2   :  { %v17393_v60 = vpop.eup %17392 }
 0xef3   :  { %v9130_v11 = vmul.f32 %v17393_v60, %v9120_v9  ;;  %v9131_v47 = vmul.f32 %v17393_v60, %v9121_v10  ;;  %v14887_v9 = vcombine.high %v9460_v5, %v9468_v37  ;;  %v14899_v10 = vcombine.high %v9474_v8, %v9482_v35  ;;  %v9532_v60 = vld [vmem:[#allocation14 + $0xa50] sm:$0xff] }
 0xef4   :  { %v9572_v5 = vld [vmem:[#allocation14 + $0xb90] sm:$0xff]  ;;  %v14995_v8 = vcombine.high %v9570_v32, %v9578_v58  ;;  %v9666_v58 = vld [vmem:[#allocation14 + $0xe80] sm:$0xff] }
 0xef5   :  { %v9144_v48 = vmul.f32 %v9140_v46, %v9131_v47  ;;  %v9143_v1 = vmul.f32 %v9136_v62, %v9130_v11  ;;  %11161 = vmatprep.subr.bf16.mxu0 %v14887_v9  ;;  %v9530_v62 = vld [vmem:[#allocation14 + $0xa40] sm:$0xff]  ;;  %v9524_v46 = vld [vmem:[#allocation14 + $0xa10] sm:$0xff]  ;;  %v14930_v11 = vcombine.low %v9506_v33, %v9514_v38  ;;  %v14934_v47 = vcombine.low %v9508_v40, %v9516_v42 }
 0xef6   :  { %11162 = vmatpush1.bf16.msra.mxu0 %v14886_v57  ;;  %v9586_v57 = vld [vmem:[#allocation14 + $0xc00] sm:$0xff]  ;;  %v15027_v33 = vcombine.high %v9602_v23, %v9610_v25 }
 0xef7   :  { %v9157_v4 = vadd.f32 %v9153_v0, %v9144_v48  ;;  %v9156_v50 = vadd.f32 %v9149_v20, %v9143_v1  ;;  %11163 = vmatprep.subr.bf16.mxu0 %v14903_v15  ;;  %v14947_v20 = vcombine.high %v9522_v49, %v9530_v62  ;;  %v14951_v0 = vcombine.high %v9524_v46, %v9532_v60  ;;  %v9538_v48 = vld [vmem:[#allocation14 + $0xa80] sm:$0xff] }
 0xef8   :  { %v9546_v1 = vld [vmem:[#allocation14 + $0xac0] sm:$0xff] }
 0xef9   :  { %v9159_v12 = vpack.c.bf16 %v9157_v4, %v9157_v4  ;;  %v9158_v51 = vpack.c.bf16 %v9156_v50, %v9156_v50  ;;  %v14963_v52 = vcombine.high %v9538_v48, %v9546_v1  ;;  %v9594_v9 = vld [vmem:[#allocation14 + $0xc40] sm:$0xff] }
 0xefa   :  { %11164 = vmatpush1.bf16.msra.mxu0 %v14902_v28  ;;  %v15011_v15 = vcombine.high %v9586_v57, %v9594_v9  ;;  %v9612_v28 = vld [vmem:[#allocation14 + $0xcd0] sm:$0xff]  ;;  %v9618_v40 = vld [vmem:[#allocation14 + $0xd00] sm:$0xff] }
 0xefb   :  { %9398 = vmatprep.mubr.bf16.mxu1 %v9159_v12  ;;  %11165 = vmatprep.subr.bf16.mxu0 %v14919_v29  ;;  %v14946_v12 = vcombine.low %v9522_v49, %v9530_v62  ;;  %v9626_v42 = vld [vmem:[#allocation14 + $0xd40] sm:$0xff] }
 0xefc   :  { %9399 = vmatmul.mubr.bf16.vlgmr.msra.gmra.mrb[68].mxu1 %v9158_v51  ;;  %v14950_v51 = vcombine.low %v9524_v46, %v9532_v60  ;;  %v15043_v49 = vcombine.high %v9618_v40, %v9626_v42  ;;  %v15042_v46 = vcombine.low %v9618_v40, %v9626_v42  ;;  %v9459_v42 = vld [vmem:[#allocation14 + $0x808] sm:$0xff] }
 0xefd   :  { %11080 = vmatpush1.bf16.msra.mxu1 %v14882_v6  ;;  %v9580_v6 = vld [vmem:[#allocation14 + $0xbd0] sm:$0xff] }
 0xefe   :  { %11081 = vmatprep.subr.bf16.mxu1 %v14899_v10  ;;  %11166 = vmatpush1.bf16.msra.mxu0 %v14918_v43  ;;  %v14999_v35 = vcombine.high %v9572_v5, %v9580_v6  ;;  %v9588_v10 = vld [vmem:[#allocation14 + $0xc10] sm:$0xff]  ;;  %v14998_v14 = vcombine.low %v9572_v5, %v9580_v6  ;;  %v9674_v5 = vld [vmem:[#allocation14 + $0xec0] sm:$0xff] }
 0xeff   :  { %11167 = vmatprep.subr.bf16.mxu0 %v14935_v45  ;;  %v15015_v18 = vcombine.high %v9588_v10, %v9596_v34  ;;  %v15014_v29 = vcombine.low %v9588_v10, %v9596_v34  ;;  %v9628_v43 = vld [vmem:[#allocation14 + $0xd50] sm:$0xff]  ;;  %v9690_v10 = vld [vmem:[#allocation14 + $0xf40] sm:$0xff] }
 0xf00   :  { %v9668_v6 = vld [vmem:[#allocation14 + $0xe90] sm:$0xff] }
 0xf01   :  { %11082 = vmatpush1.bf16.msra.mxu1 %v14898_v27  ;;  %v9604_v27 = vld [vmem:[#allocation14 + $0xc90] sm:$0xff] }
 0xf02   :  { %11083 = vmatprep.subr.bf16.mxu1 %v14915_v21  ;;  %11168 = vmatpush1.bf16.msra.mxu0 %v14934_v47  ;;  %v15010_v21 = vcombine.low %v9586_v57, %v9594_v9  ;;  %v15031_v38 = vcombine.high %v9604_v27, %v9612_v28  ;;  %v15030_v45 = vcombine.low %v9604_v27, %v9612_v28  ;;  %v9682_v9 = vld [vmem:[#allocation14 + $0xf00] sm:$0xff]  ;;  %v9684_v34 = vld [vmem:[#allocation14 + $0xf10] sm:$0xff] }
 0xf03   :  { %11169 = vmatprep.subr.bf16.mxu0 %v14951_v0  ;;  %v9706_v27 = vld [vmem:[#allocation14 + $0xfc0] sm:$0xff]  ;;  %v9700_v28 = vld [vmem:[#allocation14 + $0xf90] sm:$0xff] }
 0xf05   :  { %11084 = vmatpush1.bf16.msra.mxu1 %v14914_v17  ;;  %v9620_v17 = vld [vmem:[#allocation14 + $0xd10] sm:$0xff] }
 0xf06   :  { %11085 = vmatprep.subr.bf16.mxu1 %v14931_v44  ;;  %11170 = vmatpush1.bf16.msra.mxu0 %v14950_v51  ;;  %v15026_v44 = vcombine.low %v9602_v23, %v9610_v25  ;;  %v15047_v62 = vcombine.high %v9620_v17, %v9628_v43  ;;  %v15046_v60 = vcombine.low %v9620_v17, %v9628_v43  ;;  %v9636_v51 = vld [vmem:[#allocation14 + $0xd90] sm:$0xff]  ;;  %v9698_v25 = vld [vmem:[#allocation14 + $0xf80] sm:$0xff]  ;;  %v9467_v17 = vld [vmem:[#allocation14 + $0x848] sm:$0xff] }
 0xf07   :  { %v9462_v43 = vld [vmem:[#allocation14 + $0x820] sm:$0xff] }
 0xf09   :  { %11086 = vmatpush1.bf16.msra.mxu1 %v14930_v11 }
 0xf0a   :  { %11087 = vmatprep.subr.bf16.mxu1 %v14947_v20 }
 0xf0d   :  { %11088 = vmatpush1.bf16.msra.mxu1 %v14946_v12  ;;  %v9642_v12 = vld [vmem:[#allocation14 + $0xdc0] sm:$0xff] }
 0xf0e   :  { %11089 = vmatprep.subr.bf16.mxu1 %v14963_v52 }
 0xfcf   :  { %v9400_v54 = vpop.f32.mrb[68].mxu1 }
 0xfd0   :  { %v9401_v56 = vadd.f32 %v9400_v54, %v9199_v53  ;;  %v9402_v59 = vpop.f32.mrb[69].mxu1  ;;  %v9562_v54 = vld [vmem:[#allocation14 + $0xb40] sm:$0xff] }
 0xfd1   :  { %v9403_v61 = vadd.f32 %v9402_v59, %v9203_v7  ;;  %v9404_v30 = vpop.f32.mrb[70].mxu1  ;;  %v9554_v7 = vld [vmem:[#allocation14 + $0xb00] sm:$0xff]  ;;  %v9564_v59 = vld [vmem:[#allocation14 + $0xb50] sm:$0xff] }
 0xfd2   :  { %v18365_v31 = vadd.f32 %v9401_v56, %v9156_v50  ;;  %v9405_v2 = vpop.f32.mrb[71].mxu1  ;;  %v9548_v50 = vld [vmem:[#allocation14 + $0xad0] sm:$0xff]  ;;  %v14978_v55 = vcombine.low %v9554_v7, %v9562_v54 }
 0xfd3   :  { %v18367_v63 = vadd.f32 %v9403_v61, %v9157_v4  ;;  %v9540_v4 = vld [vmem:[#allocation14 + $0xa90] sm:$0xff]  ;;  %v14962_v61 = vcombine.low %v9538_v48, %v9546_v1  ;;  %v14979_v2 = vcombine.high %v9554_v7, %v9562_v54 }
 0xfd4   :  { %v14967_v53 = vcombine.high %v9540_v4, %v9548_v50  ;;  %v9556_v56 = vld [vmem:[#allocation14 + $0xb10] sm:$0xff]  ;;  %v14966_v30 = vcombine.low %v9540_v4, %v9548_v50  ;;  %v9634_v50 = vld [vmem:[#allocation14 + $0xd80] sm:$0xff] }
 0xfd5   :  { %v9413_v3 = vadd.f32 %v18367_v63, %v18365_v31  ;;  %11090 = vmatpush1.bf16.msra.mxu1 %v14962_v61  ;;  %v14982_v37 = vcombine.low %v9556_v56, %v9564_v59  ;;  %v15059_v52 = vcombine.high %v9634_v50, %v9642_v12  ;;  %v15058_v7 = vcombine.low %v9634_v50, %v9642_v12 }
 0xfd6   :  { %11171 = vmatprep.subr.bf16.mxu0 %v14967_v53  ;;  %11091 = vmatprep.subr.bf16.mxu1 %v14979_v2  ;;  %v9644_v53 = vld [vmem:[#allocation14 + $0xdd0] sm:$0xff] }
 0xfd7   :  { %9414 = vadd.xlane.f32.xlu0 %v9413_v3  ;;  %v14983_v3 = vcombine.high %v9556_v56, %v9564_v59  ;;  %11172 = vmatpush1.bf16.msra.mxu0 %v14966_v30  ;;  %v15062_v54 = vcombine.low %v9636_v51, %v9644_v53  ;;  %v9658_v56 = vld [vmem:[#allocation14 + $0xe40] sm:$0xff]  ;;  %v9652_v59 = vld [vmem:[#allocation14 + $0xe10] sm:$0xff] }
 0xfd8   :  { %v9660_v30 = vld [vmem:[#allocation14 + $0xe50] sm:$0xff] }
 0xfd9   :  { %11173 = vmatprep.subr.bf16.mxu0 %v14983_v3  ;;  %11092 = vmatpush1.bf16.msra.mxu1 %v14978_v55  ;;  %v15078_v3 = vcombine.low %v9652_v59, %v9660_v30  ;;  %v15079_v32 = vcombine.high %v9652_v59, %v9660_v30  ;;  %v15091_v55 = vcombine.high %v9666_v58, %v9674_v5  ;;  %v9475_v59 = vld [vmem:[#allocation14 + $0x888] sm:$0xff]  ;;  %v9478_v30 = vld [vmem:[#allocation14 + $0x8a0] sm:$0xff] }
 0xfda   :  { %11093 = vmatprep.subr.bf16.mxu1 %v14995_v8  ;;  %v15090_v8 = vcombine.low %v9666_v58, %v9674_v5  ;;  %v9499_v5 = vld [vmem:[#allocation14 + $0x948] sm:$0xff] }
 0xfdb   :  { %11174 = vmatpush1.bf16.msra.mxu0 %v14982_v37  ;;  %v9676_v37 = vld [vmem:[#allocation14 + $0xed0] sm:$0xff] }
 0xfdc   :  { %11175 = vmatprep.subr.bf16.mxu0 %v14999_v35  ;;  %v15094_v35 = vcombine.low %v9668_v6, %v9676_v37  ;;  %v15095_v57 = vcombine.high %v9668_v6, %v9676_v37  ;;  %v9494_v6 = vld [vmem:[#allocation14 + $0x920] sm:$0xff] }
 0xfdd   :  { %11094 = vmatpush1.bf16.msra.mxu1 %v14994_v13  ;;  %v15107_v13 = vcombine.high %v9682_v9, %v9690_v10 }
 0xfde   :  { %11095 = vmatprep.subr.bf16.mxu1 %v15011_v15  ;;  %v15106_v15 = vcombine.low %v9682_v9, %v9690_v10  ;;  %v9507_v9 = vld [vmem:[#allocation14 + $0x988] sm:$0xff] }
 0xfdf   :  { %11176 = vmatpush1.bf16.msra.mxu0 %v14998_v14  ;;  %v9692_v14 = vld [vmem:[#allocation14 + $0xf50] sm:$0xff]  ;;  %v9515_v10 = vld [vmem:[#allocation14 + $0x9c8] sm:$0xff] }
 0xfe0   :  { %11177 = vmatprep.subr.bf16.mxu0 %v15015_v18  ;;  %v15110_v18 = vcombine.low %v9684_v34, %v9692_v14  ;;  %v15111_v23 = vcombine.high %v9684_v34, %v9692_v14  ;;  %v9510_v34 = vld [vmem:[#allocation14 + $0x9a0] sm:$0xff] }
 0xfe1   :  { %11096 = vmatpush1.bf16.msra.mxu1 %v15010_v21  ;;  %v15123_v21 = vcombine.high %v9698_v25, %v9706_v27 }
 0xfe2   :  { %11097 = vmatprep.subr.bf16.mxu1 %v15027_v33  ;;  %v15122_v33 = vcombine.low %v9698_v25, %v9706_v27  ;;  %v9523_v25 = vld [vmem:[#allocation14 + $0xa08] sm:$0xff] }
 0xfe3   :  { %11178 = vmatpush1.bf16.msra.mxu0 %v15014_v29  ;;  %v9708_v29 = vld [vmem:[#allocation14 + $0xfd0] sm:$0xff]  ;;  %v9531_v27 = vld [vmem:[#allocation14 + $0xa48] sm:$0xff] }
 0xfe4   :  { %11179 = vmatprep.subr.bf16.mxu0 %v15031_v38  ;;  %v15126_v38 = vcombine.low %v9700_v28, %v9708_v29  ;;  %v15127_v40 = vcombine.high %v9700_v28, %v9708_v29  ;;  %v9526_v28 = vld [vmem:[#allocation14 + $0xa20] sm:$0xff]  ;;  %v14932_v29 = vcombine.low %v9507_v9, %v9515_v10 }
 0xfe5   :  { %11098 = vmatpush1.bf16.msra.mxu1 %v15026_v44  ;;  %v14885_v44 = vcombine.high %v9459_v42, %v9467_v17 }
 0xfe6   :  { %11099 = vmatprep.subr.bf16.mxu1 %v15043_v49  ;;  %v14884_v49 = vcombine.low %v9459_v42, %v9467_v17  ;;  %v9539_v42 = vld [vmem:[#allocation14 + $0xa88] sm:$0xff] }
 0xfe7   :  { %11180 = vmatpush1.bf16.msra.mxu0 %v15030_v45  ;;  %v9470_v45 = vld [vmem:[#allocation14 + $0x860] sm:$0xff]  ;;  %v9547_v17 = vld [vmem:[#allocation14 + $0xac8] sm:$0xff] }
 0xfe8   :  { %11181 = vmatprep.subr.bf16.mxu0 %v15047_v62  ;;  %v14890_v62 = vcombine.low %v9462_v43, %v9470_v45 }
 0xfe9   :  { %11100 = vmatpush1.bf16.msra.mxu1 %v15042_v46  ;;  %v14891_v46 = vcombine.high %v9462_v43, %v9470_v45  ;;  %v9542_v43 = vld [vmem:[#allocation14 + $0xaa0] sm:$0xff]  ;;  %v14948_v45 = vcombine.low %v9523_v25, %v9531_v27 }
 0xfea   :  { %11101 = vmatprep.subr.bf16.mxu1 %v15059_v52 }
 0xfeb   :  { %11182 = vmatpush1.bf16.msra.mxu0 %v15046_v60 }
 0xfed   :  { %11102 = vmatpush1.bf16.msra.mxu1 %v15058_v7 }
0x1064   :  { %v9415_v11 = vpop.xlane.xlu0 %9414 }
0x1065   :  { %v9416_v47 = vmul.f32 0.00390625, %v9415_v11 }
0x1067   :  { %v18372_v20 = vsub.f32 %v18365_v31, %v9416_v47  ;;  %v18375_v0 = vsub.f32 %v18367_v63, %v9416_v47  ;;  %v15063_v31 = vcombine.high %v9636_v51, %v9644_v53  ;;  %v9650_v63 = vld [vmem:[#allocation14 + $0xe00] sm:$0xff] }
0x1068   :  { %v15075_v61 = vcombine.high %v9650_v63, %v9658_v56  ;;  %v15074_v2 = vcombine.low %v9650_v63, %v9658_v56 }
0x1069   :  { %v9419_v48 = vmul.f32 %v18372_v20, %v18372_v20  ;;  %v9420_v1 = vmul.f32 %v18375_v0, %v18375_v0  ;;  %11183 = vmatprep.subr.bf16.mxu0 %v15063_v31 }
0x106a   :  { %11184 = vmatpush1.bf16.msra.mxu0 %v15062_v54  ;;  %11103 = vmatprep.subr.bf16.mxu1 %v15075_v61  ;;  %v9483_v61 = vld [vmem:[#allocation14 + $0x8c8] sm:$0xff] }
0x106b   :  { %v9421_v4 = vadd.f32 %v9420_v1, %v9419_v48  ;;  %11185 = vmatprep.subr.bf16.mxu0 %v15079_v32  ;;  %11104 = vmatpush1.bf16.msra.mxu1 %v15074_v2  ;;  %v9410_v48 = vld [vmem:[#allocation11 + $0x2] sm:$0x3]  ;;  %v9412_v1 = vld [vmem:[#allocation13 + $0x2] sm:$0x3]  ;;  %v9486_v2 = vld [vmem:[#allocation14 + $0x8e0] sm:$0xff]  ;;  %v14900_v37 = vcombine.low %v9475_v59, %v9483_v61 }
0x106c   :  { %11105 = vmatprep.subr.bf16.mxu1 %v15091_v55  ;;  %v9437_v50 = vrot.slane %v9410_v48, %v18189_v41  ;;  %v9446_v51 = vrot.slane %v9412_v1, %v18186_v39  ;;  %v9450_v52 = vrot.slane %v9412_v1, %v18189_v41  ;;  %v14907_v58 = vcombine.high %v9478_v30, %v9486_v2  ;;  %v9502_v55 = vld [vmem:[#allocation14 + $0x960] sm:$0xff] }
0x106d   :  { %9422 = vadd.xlane.f32.xlu1 %v9421_v4  ;;  %v9433_v4 = vrot.slane %v9410_v48, %v18186_v39  ;;  %v9566_v48 = vld [vmem:[#allocation14 + $0xb60] sm:$0xff]  ;;  %v14964_v1 = vcombine.low %v9539_v42, %v9547_v17 }
0x106e   :  { %11186 = vmatpush1.bf16.msra.mxu0 %v15078_v3 }
0x106f   :  { %11187 = vmatprep.subr.bf16.mxu0 %v15095_v57  ;;  %11106 = vmatpush1.bf16.msra.mxu1 %v15090_v8  ;;  %v14906_v8 = vcombine.low %v9478_v30, %v9486_v2  ;;  %v14923_v57 = vcombine.high %v9494_v6, %v9502_v55  ;;  %v9587_v30 = vld [vmem:[#allocation14 + $0xc08] sm:$0xff] }
0x1070   :  { %11107 = vmatprep.subr.bf16.mxu1 %v15107_v13  ;;  %v9518_v13 = vld [vmem:[#allocation14 + $0x9e0] sm:$0xff]  ;;  %v9595_v2 = vld [vmem:[#allocation14 + $0xc48] sm:$0xff] }
0x1072   :  { %11188 = vmatpush1.bf16.msra.mxu0 %v15094_v35 }
0x1073   :  { %11189 = vmatprep.subr.bf16.mxu0 %v15111_v23  ;;  %11108 = vmatpush1.bf16.msra.mxu1 %v15106_v15  ;;  %v14922_v15 = vcombine.low %v9494_v6, %v9502_v55  ;;  %v14939_v23 = vcombine.high %v9510_v34, %v9518_v13  ;;  %v15013_v6 = vcombine.high %v9587_v30, %v9595_v2 }
0x1074   :  { %11109 = vmatprep.subr.bf16.mxu1 %v15123_v21  ;;  %v9534_v21 = vld [vmem:[#allocation14 + $0xa60] sm:$0xff] }
0x1076   :  { %11190 = vmatpush1.bf16.msra.mxu0 %v15110_v18  ;;  %v14933_v18 = vcombine.high %v9507_v9, %v9515_v10  ;;  %v15012_v9 = vcombine.low %v9587_v30, %v9595_v2 }
0x1077   :  { %11191 = vmatprep.subr.bf16.mxu0 %v15127_v40  ;;  %11110 = vmatpush1.bf16.msra.mxu1 %v15122_v33  ;;  %v14938_v33 = vcombine.low %v9510_v34, %v9518_v13  ;;  %v14955_v40 = vcombine.high %v9526_v28, %v9534_v21 }
0x1078   :  { %11120 = vmatprep.subr.bf16.mxu1 %v14885_v44  ;;  %v9550_v44 = vld [vmem:[#allocation14 + $0xae0] sm:$0xff] }
0x107a   :  { %11192 = vmatpush1.bf16.msra.mxu0 %v15126_v38  ;;  %v14949_v38 = vcombine.high %v9523_v25, %v9531_v27 }
0x107b   :  { %11243 = vmatprep.subr.bf16.mxu0 %v14891_v46  ;;  %v14971_v46 = vcombine.high %v9542_v43, %v9550_v44 }
0x10fa   :  { %v9423_v60 = vpop.xlane.xlu1 %9422 }
0x10fb   :  { %v9424_v11 = vmul.f32 0.00390625, %v9423_v60  ;;  %v9555_v60 = vld [vmem:[#allocation14 + $0xb08] sm:$0xff] }
0x10fd   :  { %v9425_v47 = vadd.f32 1e-05, %v9424_v11  ;;  %v9563_v11 = vld [vmem:[#allocation14 + $0xb48] sm:$0xff] }
0x10ff   :  { %17394 = vrsqrt.f32 %v9425_v47  ;;  %v9558_v47 = vld [vmem:[#allocation14 + $0xb20] sm:$0xff] }
0x1109   :  { %v17395_v12 = vpop.eup %17394 }
0x110a   :  { %v9427_v53 = vmul.f32 %v17395_v12, %v18372_v20  ;;  %v9428_v7 = vmul.f32 %v17395_v12, %v18375_v0  ;;  %v9491_v20 = vld [vmem:[#allocation14 + $0x908] sm:$0xff]  ;;  %v14901_v0 = vcombine.high %v9475_v59, %v9483_v61  ;;  %v14987_v12 = vcombine.high %v9558_v47, %v9566_v48 }
0x110b   :  { %v14917_v35 = vcombine.high %v9491_v20, %v9499_v5  ;;  %v14916_v14 = vcombine.low %v9491_v20, %v9499_v5  ;;  %v9590_v20 = vld [vmem:[#allocation14 + $0xc20] sm:$0xff] }
0x110c   :  { %v9440_v54 = vmul.f32 %v9433_v4, %v9427_v53  ;;  %v9441_v31 = vmul.f32 %v9437_v50, %v9428_v7  ;;  %v14970_v4 = vcombine.low %v9542_v43, %v9550_v44  ;;  %v14981_v50 = vcombine.high %v9555_v60, %v9563_v11  ;;  %v9574_v53 = vld [vmem:[#allocation14 + $0xba0] sm:$0xff] }
0x110d   :  { %v9582_v7 = vld [vmem:[#allocation14 + $0xbe0] sm:$0xff] }
0x110e   :  { %v18387_v63 = vadd.f32 %v9446_v51, %v9440_v54  ;;  %v18389_v56 = vadd.f32 %v9450_v52, %v9441_v31  ;;  %v9571_v51 = vld [vmem:[#allocation14 + $0xb88] sm:$0xff]  ;;  %v14980_v54 = vcombine.low %v9555_v60, %v9563_v11  ;;  %v14986_v31 = vcombine.low %v9558_v47, %v9566_v48 }
0x110f   :  { %v9579_v52 = vld [vmem:[#allocation14 + $0xbc8] sm:$0xff]  ;;  %v15003_v61 = vcombine.high %v9574_v53, %v9582_v7  ;;  %v15002_v5 = vcombine.low %v9574_v53, %v9582_v7 }
0x1110   :  { %v18393_v3 = vpack.c.bf16 %v18387_v63, %v18387_v63  ;;  %v18397_v32 = vpack.c.bf16 %v18389_v56, %v18389_v56  ;;  %v14997_v59 = vcombine.high %v9571_v51, %v9579_v52 }
0x1112   :  { %11111 = vmatprep.mubr.bf16.mxu1 %v18397_v32  ;;  %11193 = vmatprep.mubr.bf16.mxu0 %v18397_v32 }
0x1113   :  { %11112 = vmatmul.mubr.bf16.vlgmr.msra.gmra.mrb[72].mxu1 %v18393_v3  ;;  %11194 = vmatmul.mubr.bf16.vlgmr.msra.gmra.mrb[4].mxu0 %v18393_v3 }
0x1114   :  { %11121 = vmatpush1.bf16.msra.mxu1 %v14884_v49  ;;  %11244 = vmatpush1.bf16.msra.mxu0 %v14890_v62  ;;  %v14954_v49 = vcombine.low %v9526_v28, %v9534_v21  ;;  %v14965_v62 = vcombine.high %v9539_v42, %v9547_v17 }
0x1115   :  { %11152 = vmatprep.mubr.bf16.mxu1 %v18397_v32  ;;  %11275 = vmatprep.mubr.bf16.mxu0 %v18397_v32 }
0x1116   :  { %11122 = vmatprep.subr.bf16.mxu1 %v14901_v0  ;;  %11245 = vmatprep.subr.bf16.mxu0 %v14907_v58  ;;  %v9598_v0 = vld [vmem:[#allocation14 + $0xc60] sm:$0xff]  ;;  %v14996_v58 = vcombine.low %v9571_v51, %v9579_v52 }
0x1117   :  { %v15019_v55 = vcombine.high %v9590_v20, %v9598_v0  ;;  %v15018_v10 = vcombine.low %v9590_v20, %v9598_v0 }
0x1118   :  { %11123 = vmatpush1.bf16.msra.mxu1 %v14900_v37  ;;  %11246 = vmatpush1.bf16.msra.mxu0 %v14906_v8  ;;  %v9603_v37 = vld [vmem:[#allocation14 + $0xc88] sm:$0xff] }
0x1119   :  { %11124 = vmatprep.subr.bf16.mxu1 %v14917_v35  ;;  %11247 = vmatprep.subr.bf16.mxu0 %v14923_v57  ;;  %v9611_v8 = vld [vmem:[#allocation14 + $0xcc8] sm:$0xff]  ;;  %v9606_v35 = vld [vmem:[#allocation14 + $0xca0] sm:$0xff] }
0x111a   :  { %v9614_v57 = vld [vmem:[#allocation14 + $0xce0] sm:$0xff]  ;;  %v15029_v34 = vcombine.high %v9603_v37, %v9611_v8  ;;  %v15028_v25 = vcombine.low %v9603_v37, %v9611_v8 }
0x111b   :  { %v15035_v13 = vcombine.high %v9606_v35, %v9614_v57  ;;  %v15034_v27 = vcombine.low %v9606_v35, %v9614_v57 }
0x111c   :  { %11125 = vmatpush1.bf16.msra.mxu1 %v14916_v14  ;;  %11248 = vmatpush1.bf16.msra.mxu0 %v14922_v15  ;;  %v9619_v14 = vld [vmem:[#allocation14 + $0xd08] sm:$0xff] }
0x111d   :  { %11126 = vmatprep.subr.bf16.mxu1 %v14933_v18  ;;  %11249 = vmatprep.subr.bf16.mxu0 %v14939_v23  ;;  %v9627_v15 = vld [vmem:[#allocation14 + $0xd48] sm:$0xff]  ;;  %v9622_v18 = vld [vmem:[#allocation14 + $0xd20] sm:$0xff] }
0x111e   :  { %v9630_v23 = vld [vmem:[#allocation14 + $0xd60] sm:$0xff]  ;;  %v15045_v28 = vcombine.high %v9619_v14, %v9627_v15  ;;  %v15044_v42 = vcombine.low %v9619_v14, %v9627_v15 }
0x111f   :  { %v15051_v21 = vcombine.high %v9622_v18, %v9630_v23  ;;  %v15050_v17 = vcombine.low %v9622_v18, %v9630_v23 }
0x1120   :  { %11127 = vmatpush1.bf16.msra.mxu1 %v14932_v29  ;;  %11250 = vmatpush1.bf16.msra.mxu0 %v14938_v33  ;;  %v9635_v29 = vld [vmem:[#allocation14 + $0xd88] sm:$0xff] }
0x1121   :  { %11128 = vmatprep.subr.bf16.mxu1 %v14949_v38  ;;  %11251 = vmatprep.subr.bf16.mxu0 %v14955_v40  ;;  %v9643_v33 = vld [vmem:[#allocation14 + $0xdc8] sm:$0xff]  ;;  %v9638_v38 = vld [vmem:[#allocation14 + $0xda0] sm:$0xff] }
0x1122   :  { %v9646_v40 = vld [vmem:[#allocation14 + $0xde0] sm:$0xff]  ;;  %v15061_v43 = vcombine.high %v9635_v29, %v9643_v33  ;;  %v15060_v60 = vcombine.low %v9635_v29, %v9643_v33 }
0x1123   :  { %v15067_v44 = vcombine.high %v9638_v38, %v9646_v40  ;;  %v15066_v11 = vcombine.low %v9638_v38, %v9646_v40 }
0x1124   :  { %11129 = vmatpush1.bf16.msra.mxu1 %v14948_v45  ;;  %11252 = vmatpush1.bf16.msra.mxu0 %v14954_v49  ;;  %v9651_v45 = vld [vmem:[#allocation14 + $0xe08] sm:$0xff] }
0x1125   :  { %11130 = vmatprep.subr.bf16.mxu1 %v14965_v62  ;;  %11253 = vmatprep.subr.bf16.mxu0 %v14971_v46  ;;  %v9659_v49 = vld [vmem:[#allocation14 + $0xe48] sm:$0xff]  ;;  %v9654_v62 = vld [vmem:[#allocation14 + $0xe20] sm:$0xff] }
0x1126   :  { %v9662_v46 = vld [vmem:[#allocation14 + $0xe60] sm:$0xff]  ;;  %v15077_v47 = vcombine.high %v9651_v45, %v9659_v49  ;;  %v15076_v51 = vcombine.low %v9651_v45, %v9659_v49 }
0x1127   :  { %v15083_v48 = vcombine.high %v9654_v62, %v9662_v46  ;;  %v15082_v52 = vcombine.low %v9654_v62, %v9662_v46 }
0x1128   :  { %11131 = vmatpush1.bf16.msra.mxu1 %v14964_v1  ;;  %11254 = vmatpush1.bf16.msra.mxu0 %v14970_v4  ;;  %v9667_v1 = vld [vmem:[#allocation14 + $0xe88] sm:$0xff] }
0x1129   :  { %11132 = vmatprep.subr.bf16.mxu1 %v14981_v50  ;;  %11255 = vmatprep.subr.bf16.mxu0 %v14987_v12  ;;  %v9675_v4 = vld [vmem:[#allocation14 + $0xec8] sm:$0xff]  ;;  %v9670_v50 = vld [vmem:[#allocation14 + $0xea0] sm:$0xff] }
0x112a   :  { %v9678_v12 = vld [vmem:[#allocation14 + $0xee0] sm:$0xff]  ;;  %v15093_v53 = vcombine.high %v9667_v1, %v9675_v4  ;;  %v15092_v30 = vcombine.low %v9667_v1, %v9675_v4 }
0x112b   :  { %v15099_v7 = vcombine.high %v9670_v50, %v9678_v12  ;;  %v15098_v2 = vcombine.low %v9670_v50, %v9678_v12 }
0x112c   :  { %11133 = vmatpush1.bf16.msra.mxu1 %v14980_v54  ;;  %11256 = vmatpush1.bf16.msra.mxu0 %v14986_v31  ;;  %v9683_v54 = vld [vmem:[#allocation14 + $0xf08] sm:$0xff] }
0x112d   :  { %11134 = vmatprep.subr.bf16.mxu1 %v14997_v59  ;;  %11257 = vmatprep.subr.bf16.mxu0 %v15003_v61  ;;  %v9691_v31 = vld [vmem:[#allocation14 + $0xf48] sm:$0xff]  ;;  %v9686_v59 = vld [vmem:[#allocation14 + $0xf20] sm:$0xff] }
0x112e   :  { %v9694_v61 = vld [vmem:[#allocation14 + $0xf60] sm:$0xff]  ;;  %v15109_v20 = vcombine.high %v9683_v54, %v9691_v31  ;;  %v15108_v37 = vcombine.low %v9683_v54, %v9691_v31 }
0x112f   :  { %v15115_v0 = vcombine.high %v9686_v59, %v9694_v61  ;;  %v15114_v8 = vcombine.low %v9686_v59, %v9694_v61 }
0x1130   :  { %11135 = vmatpush1.bf16.msra.mxu1 %v14996_v58  ;;  %11258 = vmatpush1.bf16.msra.mxu0 %v15002_v5  ;;  %v9699_v58 = vld [vmem:[#allocation14 + $0xf88] sm:$0xff] }
0x1131   :  { %11136 = vmatprep.subr.bf16.mxu1 %v15013_v6  ;;  %11259 = vmatprep.subr.bf16.mxu0 %v15019_v55  ;;  %v9707_v5 = vld [vmem:[#allocation14 + $0xfc8] sm:$0xff]  ;;  %v9702_v6 = vld [vmem:[#allocation14 + $0xfa0] sm:$0xff] }
0x1132   :  { %v9710_v55 = vld [vmem:[#allocation14 + $0xfe0] sm:$0xff]  ;;  %v15125_v35 = vcombine.high %v9699_v58, %v9707_v5  ;;  %v15124_v14 = vcombine.low %v9699_v58, %v9707_v5 }
0x1133   :  { %v15131_v57 = vcombine.high %v9702_v6, %v9710_v55  ;;  %v15130_v15 = vcombine.low %v9702_v6, %v9710_v55 }
0x1134   :  { %11137 = vmatpush1.bf16.msra.mxu1 %v15012_v9  ;;  %11260 = vmatpush1.bf16.msra.mxu0 %v15018_v10  ;;  %v9461_v9 = vld [vmem:[#allocation14 + $0x818] sm:$0xff] }
0x1135   :  { %11138 = vmatprep.subr.bf16.mxu1 %v15029_v34  ;;  %11261 = vmatprep.subr.bf16.mxu0 %v15035_v13  ;;  %v9469_v10 = vld [vmem:[#allocation14 + $0x858] sm:$0xff]  ;;  %v9464_v34 = vld [vmem:[#allocation14 + $0x830] sm:$0xff] }
0x1136   :  { %v9472_v13 = vld [vmem:[#allocation14 + $0x870] sm:$0xff]  ;;  %v14889_v18 = vcombine.high %v9461_v9, %v9469_v10  ;;  %v14888_v29 = vcombine.low %v9461_v9, %v9469_v10 }
0x1137   :  { %v14895_v23 = vcombine.high %v9464_v34, %v9472_v13  ;;  %v14894_v33 = vcombine.low %v9464_v34, %v9472_v13 }
0x1138   :  { %11139 = vmatpush1.bf16.msra.mxu1 %v15028_v25  ;;  %11262 = vmatpush1.bf16.msra.mxu0 %v15034_v27  ;;  %v9477_v25 = vld [vmem:[#allocation14 + $0x898] sm:$0xff] }
0x1139   :  { %11140 = vmatprep.subr.bf16.mxu1 %v15045_v28  ;;  %11263 = vmatprep.subr.bf16.mxu0 %v15051_v21  ;;  %v9485_v27 = vld [vmem:[#allocation14 + $0x8d8] sm:$0xff]  ;;  %v9480_v28 = vld [vmem:[#allocation14 + $0x8b0] sm:$0xff] }
0x113a   :  { %v9488_v21 = vld [vmem:[#allocation14 + $0x8f0] sm:$0xff]  ;;  %v14905_v38 = vcombine.high %v9477_v25, %v9485_v27  ;;  %v14904_v45 = vcombine.low %v9477_v25, %v9485_v27 }
0x113b   :  { %v14911_v40 = vcombine.high %v9480_v28, %v9488_v21  ;;  %v14910_v49 = vcombine.low %v9480_v28, %v9488_v21 }
0x113c   :  { %11141 = vmatpush1.bf16.msra.mxu1 %v15044_v42  ;;  %11264 = vmatpush1.bf16.msra.mxu0 %v15050_v17  ;;  %v9493_v42 = vld [vmem:[#allocation14 + $0x918] sm:$0xff] }
0x113d   :  { %11142 = vmatprep.subr.bf16.mxu1 %v15061_v43  ;;  %11265 = vmatprep.subr.bf16.mxu0 %v15067_v44  ;;  %v9501_v17 = vld [vmem:[#allocation14 + $0x958] sm:$0xff]  ;;  %v9496_v43 = vld [vmem:[#allocation14 + $0x930] sm:$0xff] }
0x113e   :  { %v9504_v44 = vld [vmem:[#allocation14 + $0x970] sm:$0xff]  ;;  %v14921_v62 = vcombine.high %v9493_v42, %v9501_v17  ;;  %v14920_v1 = vcombine.low %v9493_v42, %v9501_v17 }
0x113f   :  { %v14927_v46 = vcombine.high %v9496_v43, %v9504_v44  ;;  %v14926_v4 = vcombine.low %v9496_v43, %v9504_v44 }
0x1140   :  { %11143 = vmatpush1.bf16.msra.mxu1 %v15060_v60  ;;  %11266 = vmatpush1.bf16.msra.mxu0 %v15066_v11  ;;  %v9509_v60 = vld [vmem:[#allocation14 + $0x998] sm:$0xff] }
0x1141   :  { %11144 = vmatprep.subr.bf16.mxu1 %v15077_v47  ;;  %11267 = vmatprep.subr.bf16.mxu0 %v15083_v48  ;;  %v9517_v11 = vld [vmem:[#allocation14 + $0x9d8] sm:$0xff]  ;;  %v9512_v47 = vld [vmem:[#allocation14 + $0x9b0] sm:$0xff] }
0x1142   :  { %v9520_v48 = vld [vmem:[#allocation14 + $0x9f0] sm:$0xff]  ;;  %v14937_v50 = vcombine.high %v9509_v60, %v9517_v11  ;;  %v14936_v54 = vcombine.low %v9509_v60, %v9517_v11 }
0x1143   :  { %v14943_v12 = vcombine.high %v9512_v47, %v9520_v48  ;;  %v14942_v31 = vcombine.low %v9512_v47, %v9520_v48 }
0x1144   :  { %11145 = vmatpush1.bf16.msra.mxu1 %v15076_v51  ;;  %11268 = vmatpush1.bf16.msra.mxu0 %v15082_v52  ;;  %v9525_v51 = vld [vmem:[#allocation14 + $0xa18] sm:$0xff] }
0x1145   :  { %11146 = vmatprep.subr.bf16.mxu1 %v15093_v53  ;;  %11269 = vmatprep.subr.bf16.mxu0 %v15099_v7  ;;  %v9533_v52 = vld [vmem:[#allocation14 + $0xa58] sm:$0xff]  ;;  %v9528_v53 = vld [vmem:[#allocation14 + $0xa30] sm:$0xff] }
0x1146   :  { %v9536_v7 = vld [vmem:[#allocation14 + $0xa70] sm:$0xff]  ;;  %v14953_v59 = vcombine.high %v9525_v51, %v9533_v52  ;;  %v14952_v58 = vcombine.low %v9525_v51, %v9533_v52 }
0x1147   :  { %v14959_v61 = vcombine.high %v9528_v53, %v9536_v7  ;;  %v14958_v5 = vcombine.low %v9528_v53, %v9536_v7 }
0x1148   :  { %11147 = vmatpush1.bf16.msra.mxu1 %v15092_v30  ;;  %11270 = vmatpush1.bf16.msra.mxu0 %v15098_v2  ;;  %v9541_v30 = vld [vmem:[#allocation14 + $0xa98] sm:$0xff] }
0x1149   :  { %11148 = vmatprep.subr.bf16.mxu1 %v15109_v20  ;;  %11271 = vmatprep.subr.bf16.mxu0 %v15115_v0  ;;  %v9549_v2 = vld [vmem:[#allocation14 + $0xad8] sm:$0xff]  ;;  %v9544_v20 = vld [vmem:[#allocation14 + $0xab0] sm:$0xff] }
0x114a   :  { %v9552_v0 = vld [vmem:[#allocation14 + $0xaf0] sm:$0xff]  ;;  %v14969_v6 = vcombine.high %v9541_v30, %v9549_v2  ;;  %v14968_v9 = vcombine.low %v9541_v30, %v9549_v2 }
0x114b   :  { %v14975_v55 = vcombine.high %v9544_v20, %v9552_v0  ;;  %v14974_v10 = vcombine.low %v9544_v20, %v9552_v0 }
0x114c   :  { %11149 = vmatpush1.bf16.msra.mxu1 %v15108_v37  ;;  %11272 = vmatpush1.bf16.msra.mxu0 %v15114_v8  ;;  %v9557_v37 = vld [vmem:[#allocation14 + $0xb18] sm:$0xff] }
0x114d   :  { %11150 = vmatprep.subr.bf16.mxu1 %v15125_v35  ;;  %11273 = vmatprep.subr.bf16.mxu0 %v15131_v57  ;;  %v9565_v8 = vld [vmem:[#allocation14 + $0xb58] sm:$0xff]  ;;  %v9560_v35 = vld [vmem:[#allocation14 + $0xb30] sm:$0xff] }
0x114e   :  { %v9568_v57 = vld [vmem:[#allocation14 + $0xb70] sm:$0xff]  ;;  %v14985_v34 = vcombine.high %v9557_v37, %v9565_v8  ;;  %v14984_v25 = vcombine.low %v9557_v37, %v9565_v8 }
0x114f   :  { %v14991_v13 = vcombine.high %v9560_v35, %v9568_v57  ;;  %v14990_v27 = vcombine.low %v9560_v35, %v9568_v57 }
0x1150   :  { %11151 = vmatpush1.bf16.msra.mxu1 %v15124_v14  ;;  %11274 = vmatpush1.bf16.msra.mxu0 %v15130_v15  ;;  %v9573_v14 = vld [vmem:[#allocation14 + $0xb98] sm:$0xff] }
0x1151   :  { %11202 = vmatprep.subr.bf16.mxu1 %v14889_v18  ;;  %11325 = vmatprep.subr.bf16.mxu0 %v14895_v23  ;;  %v9581_v15 = vld [vmem:[#allocation14 + $0xbd8] sm:$0xff]  ;;  %v9576_v18 = vld [vmem:[#allocation14 + $0xbb0] sm:$0xff] }
0x1152   :  { %v9584_v23 = vld [vmem:[#allocation14 + $0xbf0] sm:$0xff]  ;;  %v15001_v28 = vcombine.high %v9573_v14, %v9581_v15  ;;  %v15000_v42 = vcombine.low %v9573_v14, %v9581_v15 }
0x1153   :  { %11153 = vmatmul.mubr.bf16.vlgmr.msra.gmra.mrb[76].mxu1 %v18393_v3  ;;  %11276 = vmatmul.mubr.bf16.vlgmr.msra.gmra.mrb[8].mxu0 %v18393_v3  ;;  %v15007_v21 = vcombine.high %v9576_v18, %v9584_v23  ;;  %v15006_v17 = vcombine.low %v9576_v18, %v9584_v23 }
0x1154   :  { %11203 = vmatpush1.bf16.msra.mxu1 %v14888_v29  ;;  %11234 = vmatprep.mubr.bf16.mxu1 %v18397_v32  ;;  %v9589_v29 = vld [vmem:[#allocation14 + $0xc18] sm:$0xff] }
0x1155   :  { %11326 = vmatpush1.bf16.msra.mxu0 %v14894_v33  ;;  %11357 = vmatprep.mubr.bf16.mxu0 %v18397_v32  ;;  %v9597_v33 = vld [vmem:[#allocation14 + $0xc58] sm:$0xff] }
0x1156   :  { %11204 = vmatprep.subr.bf16.mxu1 %v14905_v38  ;;  %11327 = vmatprep.subr.bf16.mxu0 %v14911_v40  ;;  %v9592_v38 = vld [vmem:[#allocation14 + $0xc30] sm:$0xff]  ;;  %v15017_v43 = vcombine.high %v9589_v29, %v9597_v33  ;;  %v15016_v60 = vcombine.low %v9589_v29, %v9597_v33 }
0x1157   :  { %v9600_v40 = vld [vmem:[#allocation14 + $0xc70] sm:$0xff] }
0x1158   :  { %11205 = vmatpush1.bf16.msra.mxu1 %v14904_v45  ;;  %v15023_v44 = vcombine.high %v9592_v38, %v9600_v40  ;;  %v9605_v45 = vld [vmem:[#allocation14 + $0xc98] sm:$0xff]  ;;  %v15022_v11 = vcombine.low %v9592_v38, %v9600_v40 }
0x1159   :  { %11328 = vmatpush1.bf16.msra.mxu0 %v14910_v49  ;;  %11206 = vmatprep.subr.bf16.mxu1 %v14921_v62  ;;  %v9613_v49 = vld [vmem:[#allocation14 + $0xcd8] sm:$0xff]  ;;  %v9608_v62 = vld [vmem:[#allocation14 + $0xcb0] sm:$0xff] }
0x115a   :  { %11329 = vmatprep.subr.bf16.mxu0 %v14927_v46  ;;  %v9616_v46 = vld [vmem:[#allocation14 + $0xcf0] sm:$0xff]  ;;  %v15033_v47 = vcombine.high %v9605_v45, %v9613_v49  ;;  %v15032_v51 = vcombine.low %v9605_v45, %v9613_v49 }
0x115b   :  { %v15039_v48 = vcombine.high %v9608_v62, %v9616_v46  ;;  %v15038_v52 = vcombine.low %v9608_v62, %v9616_v46 }
0x115c   :  { %11207 = vmatpush1.bf16.msra.mxu1 %v14920_v1  ;;  %v9621_v1 = vld [vmem:[#allocation14 + $0xd18] sm:$0xff] }
0x115d   :  { %11330 = vmatpush1.bf16.msra.mxu0 %v14926_v4  ;;  %11208 = vmatprep.subr.bf16.mxu1 %v14937_v50  ;;  %v9629_v4 = vld [vmem:[#allocation14 + $0xd58] sm:$0xff]  ;;  %v9624_v50 = vld [vmem:[#allocation14 + $0xd30] sm:$0xff] }
0x115e   :  { %11331 = vmatprep.subr.bf16.mxu0 %v14943_v12  ;;  %v9632_v12 = vld [vmem:[#allocation14 + $0xd70] sm:$0xff]  ;;  %v15049_v53 = vcombine.high %v9621_v1, %v9629_v4  ;;  %v15048_v30 = vcombine.low %v9621_v1, %v9629_v4  ;;  %v9479_v4 = vld [vmem:[#allocation14 + $0x8a8] sm:$0xff] }
0x115f   :  { %v15055_v7 = vcombine.high %v9624_v50, %v9632_v12  ;;  %v15054_v2 = vcombine.low %v9624_v50, %v9632_v12  ;;  %v9487_v50 = vld [vmem:[#allocation14 + $0x8e8] sm:$0xff] }
0x1160   :  { %11209 = vmatpush1.bf16.msra.mxu1 %v14936_v54  ;;  %v9637_v54 = vld [vmem:[#allocation14 + $0xd98] sm:$0xff]  ;;  %v16988_v12 = vld [vmem:[#allocation17 + $0x804] ss:$8 sps:$4 sm:$0xff]  }
0x1161   :  { %11332 = vmatpush1.bf16.msra.mxu0 %v14942_v31  ;;  %11210 = vmatprep.subr.bf16.mxu1 %v14953_v59  ;;  %v9645_v31 = vld [vmem:[#allocation14 + $0xdd8] sm:$0xff]  ;;  %v9640_v59 = vld [vmem:[#allocation14 + $0xdb0] sm:$0xff] }
0x1162   :  { %11333 = vmatprep.subr.bf16.mxu0 %v14959_v61  ;;  %v9648_v61 = vld [vmem:[#allocation14 + $0xdf0] sm:$0xff]  ;;  %v15065_v20 = vcombine.high %v9637_v54, %v9645_v31  ;;  %v15064_v37 = vcombine.low %v9637_v54, %v9645_v31  ;;  %v16986_v54 = vld [vmem:[#allocation17 + $0x800] ss:$8 sps:$4 sm:$0xff]  }
0x1163   :  { %v15071_v0 = vcombine.high %v9640_v59, %v9648_v61  ;;  %v15070_v8 = vcombine.low %v9640_v59, %v9648_v61  ;;  %v16991_v31 = vld [vmem:[#allocation17 + $0x814] ss:$8 sps:$4 sm:$0xff]   ;;  %v14908_v59 = vcombine.low %v9479_v4, %v9487_v50 }
0x1164   :  { %11211 = vmatpush1.bf16.msra.mxu1 %v14952_v58  ;;  %v9653_v58 = vld [vmem:[#allocation14 + $0xe18] sm:$0xff] }
0x1165   :  { %11334 = vmatpush1.bf16.msra.mxu0 %v14958_v5  ;;  %11212 = vmatprep.subr.bf16.mxu1 %v14969_v6  ;;  %v9661_v5 = vld [vmem:[#allocation14 + $0xe58] sm:$0xff]  ;;  %v9656_v6 = vld [vmem:[#allocation14 + $0xe30] sm:$0xff] }
0x1166   :  { %11335 = vmatprep.subr.bf16.mxu0 %v14975_v55  ;;  %v9664_v55 = vld [vmem:[#allocation14 + $0xe70] sm:$0xff]  ;;  %v15081_v35 = vcombine.high %v9653_v58, %v9661_v5  ;;  %v15080_v14 = vcombine.low %v9653_v58, %v9661_v5 }
0x1167   :  { %v15087_v57 = vcombine.high %v9656_v6, %v9664_v55  ;;  %v15086_v15 = vcombine.low %v9656_v6, %v9664_v55  ;;  %v9527_v6 = vld [vmem:[#allocation14 + $0xa28] sm:$0xff] }
0x1168   :  { %11213 = vmatpush1.bf16.msra.mxu1 %v14968_v9  ;;  %v9669_v9 = vld [vmem:[#allocation14 + $0xe98] sm:$0xff]  ;;  %v9535_v55 = vld [vmem:[#allocation14 + $0xa68] sm:$0xff] }
0x1169   :  { %11336 = vmatpush1.bf16.msra.mxu0 %v14974_v10  ;;  %11214 = vmatprep.subr.bf16.mxu1 %v14985_v34  ;;  %v9677_v10 = vld [vmem:[#allocation14 + $0xed8] sm:$0xff]  ;;  %v9672_v34 = vld [vmem:[#allocation14 + $0xeb0] sm:$0xff] }
0x116a   :  { %11337 = vmatprep.subr.bf16.mxu0 %v14991_v13  ;;  %v9680_v13 = vld [vmem:[#allocation14 + $0xef0] sm:$0xff]  ;;  %v15097_v18 = vcombine.high %v9669_v9, %v9677_v10  ;;  %v15096_v29 = vcombine.low %v9669_v9, %v9677_v10  ;;  %v9543_v9 = vld [vmem:[#allocation14 + $0xaa8] sm:$0xff] }
0x116b   :  { %v15103_v23 = vcombine.high %v9672_v34, %v9680_v13  ;;  %v15102_v33 = vcombine.low %v9672_v34, %v9680_v13  ;;  %v9551_v10 = vld [vmem:[#allocation14 + $0xae8] sm:$0xff]  ;;  %v16995_v34 = vld [vmem:[#allocation17 + $0x830] ss:$8 sps:$4 sm:$0xff]  }
0x116c   :  { %11215 = vmatpush1.bf16.msra.mxu1 %v14984_v25  ;;  %v9685_v25 = vld [vmem:[#allocation14 + $0xf18] sm:$0xff]  ;;  %v17000_v13 = vld [vmem:[#allocation17 + $0x844] ss:$8 sps:$4 sm:$0xff]  }
0x116d   :  { %11338 = vmatpush1.bf16.msra.mxu0 %v14990_v27  ;;  %11216 = vmatprep.subr.bf16.mxu1 %v15001_v28  ;;  %v9693_v27 = vld [vmem:[#allocation14 + $0xf58] sm:$0xff]  ;;  %v9688_v28 = vld [vmem:[#allocation14 + $0xf30] sm:$0xff] }
0x116e   :  { %11339 = vmatprep.subr.bf16.mxu0 %v15007_v21  ;;  %v9696_v21 = vld [vmem:[#allocation14 + $0xf70] sm:$0xff]  ;;  %v15113_v38 = vcombine.high %v9685_v25, %v9693_v27  ;;  %v15112_v45 = vcombine.low %v9685_v25, %v9693_v27  ;;  %v16998_v25 = vld [vmem:[#allocation17 + $0x840] ss:$8 sps:$4 sm:$0xff]  }
0x116f   :  { %v15119_v40 = vcombine.high %v9688_v28, %v9696_v21  ;;  %v15118_v49 = vcombine.low %v9688_v28, %v9696_v21  ;;  %v17003_v27 = vld [vmem:[#allocation17 + $0x854] ss:$8 sps:$4 sm:$0xff]   ;;  %v14972_v28 = vcombine.low %v9543_v9, %v9551_v10 }
0x1170   :  { %11217 = vmatpush1.bf16.msra.mxu1 %v15000_v42  ;;  %v9701_v42 = vld [vmem:[#allocation14 + $0xf98] sm:$0xff] }
0x1171   :  { %11340 = vmatpush1.bf16.msra.mxu0 %v15006_v17  ;;  %11218 = vmatprep.subr.bf16.mxu1 %v15017_v43  ;;  %v9709_v17 = vld [vmem:[#allocation14 + $0xfd8] sm:$0xff]  ;;  %v9704_v43 = vld [vmem:[#allocation14 + $0xfb0] sm:$0xff] }
0x1172   :  { %11341 = vmatprep.subr.bf16.mxu0 %v15023_v44  ;;  %v9712_v44 = vld [vmem:[#allocation14 + $0xff0] sm:$0xff]  ;;  %v15129_v62 = vcombine.high %v9701_v42, %v9709_v17 }
0x1173   :  { %v15135_v46 = vcombine.high %v9704_v43, %v9712_v44 }
0x1174   :  { %11219 = vmatpush1.bf16.msra.mxu1 %v15016_v60  ;;  %v9463_v60 = vld [vmem:[#allocation14 + $0x828] sm:$0xff] }
0x1175   :  { %11342 = vmatpush1.bf16.msra.mxu0 %v15022_v11  ;;  %11220 = vmatprep.subr.bf16.mxu1 %v15033_v47  ;;  %v9471_v11 = vld [vmem:[#allocation14 + $0x868] sm:$0xff]  ;;  %v15128_v47 = vcombine.low %v9701_v42, %v9709_v17 }
0x1176   :  { %11343 = vmatprep.subr.bf16.mxu0 %v15039_v48  ;;  %v15134_v48 = vcombine.low %v9704_v43, %v9712_v44  ;;  %v14893_v1 = vcombine.high %v9463_v60, %v9471_v11  ;;  %v9591_v43 = vld [vmem:[#allocation14 + $0xc28] sm:$0xff] }
0x1177   :  { %v9599_v44 = vld [vmem:[#allocation14 + $0xc68] sm:$0xff] }
0x1178   :  { %11221 = vmatpush1.bf16.msra.mxu1 %v15032_v51  ;;  %v14892_v51 = vcombine.low %v9463_v60, %v9471_v11  ;;  %v9607_v60 = vld [vmem:[#allocation14 + $0xca8] sm:$0xff] }
0x1179   :  { %11344 = vmatpush1.bf16.msra.mxu0 %v15038_v52  ;;  %11222 = vmatprep.subr.bf16.mxu1 %v15049_v53  ;;  %v14909_v52 = vcombine.high %v9479_v4, %v9487_v50  ;;  %v9495_v53 = vld [vmem:[#allocation14 + $0x928] sm:$0xff] }
0x117a   :  { %11345 = vmatprep.subr.bf16.mxu0 %v15055_v7  ;;  %v9503_v7 = vld [vmem:[#allocation14 + $0x968] sm:$0xff] }
0x117b   :  { %v14925_v61 = vcombine.high %v9495_v53, %v9503_v7  ;;  %v14924_v58 = vcombine.low %v9495_v53, %v9503_v7  ;;  %v9615_v11 = vld [vmem:[#allocation14 + $0xce8] sm:$0xff] }
0x117c   :  { %11223 = vmatpush1.bf16.msra.mxu1 %v15048_v30  ;;  %v9511_v30 = vld [vmem:[#allocation14 + $0x9a8] sm:$0xff]  ;;  %v15037_v4 = vcombine.high %v9607_v60, %v9615_v11  ;;  %v15036_v53 = vcombine.low %v9607_v60, %v9615_v11 }
0x117d   :  { %11346 = vmatpush1.bf16.msra.mxu0 %v15054_v2  ;;  %11224 = vmatprep.subr.bf16.mxu1 %v15065_v20  ;;  %v9519_v2 = vld [vmem:[#allocation14 + $0x9e8] sm:$0xff]  ;;  %v16989_v20 = vld [vmem:[#allocation17 + $0x810] ss:$8 sps:$4 sm:$0xff]  }
0x117e   :  { %11347 = vmatprep.subr.bf16.mxu0 %v15071_v0  ;;  %v16994_v0 = vld [vmem:[#allocation17 + $0x824] ss:$8 sps:$4 sm:$0xff]   ;;  %v14941_v5 = vcombine.high %v9511_v30, %v9519_v2 }
0x117f   :  { %v9623_v50 = vld [vmem:[#allocation14 + $0xd28] sm:$0xff] }
0x1180   :  { %11225 = vmatpush1.bf16.msra.mxu1 %v15064_v37  ;;  %v16992_v37 = vld [vmem:[#allocation17 + $0x820] ss:$8 sps:$4 sm:$0xff]  }
0x1181   :  { %11348 = vmatpush1.bf16.msra.mxu0 %v15070_v8  ;;  %11226 = vmatprep.subr.bf16.mxu1 %v15081_v35  ;;  %v16997_v8 = vld [vmem:[#allocation17 + $0x834] ss:$8 sps:$4 sm:$0xff]   ;;  %v14940_v35 = vcombine.low %v9511_v30, %v9519_v2 }
0x1182   :  { %11349 = vmatprep.subr.bf16.mxu0 %v15087_v57  ;;  %v14957_v57 = vcombine.high %v9527_v6, %v9535_v55 }
0x1184   :  { %11227 = vmatpush1.bf16.msra.mxu1 %v15080_v14  ;;  %v14956_v14 = vcombine.low %v9527_v6, %v9535_v55 }
0x1185   :  { %11350 = vmatpush1.bf16.msra.mxu0 %v15086_v15  ;;  %11228 = vmatprep.subr.bf16.mxu1 %v15097_v18  ;;  %v14973_v15 = vcombine.high %v9543_v9, %v9551_v10  ;;  %v9559_v18 = vld [vmem:[#allocation14 + $0xb28] sm:$0xff] }
0x1186   :  { %11351 = vmatprep.subr.bf16.mxu0 %v15103_v23  ;;  %v9567_v23 = vld [vmem:[#allocation14 + $0xb68] sm:$0xff] }
0x1187   :  { %v14989_v21 = vcombine.high %v9559_v18, %v9567_v23  ;;  %v14988_v42 = vcombine.low %v9559_v18, %v9567_v23 }
0x1188   :  { %11229 = vmatpush1.bf16.msra.mxu1 %v15096_v29  ;;  %v9575_v29 = vld [vmem:[#allocation14 + $0xba8] sm:$0xff] }
0x1189   :  { %11352 = vmatpush1.bf16.msra.mxu0 %v15102_v33  ;;  %11230 = vmatprep.subr.bf16.mxu1 %v15113_v38  ;;  %v9583_v33 = vld [vmem:[#allocation14 + $0xbe8] sm:$0xff]  ;;  %v17001_v38 = vld [vmem:[#allocation17 + $0x850] ss:$8 sps:$4 sm:$0xff]  }
0x118a   :  { %11353 = vmatprep.subr.bf16.mxu0 %v15119_v40  ;;  %v17006_v40 = vld [vmem:[#allocation17 + $0x864] ss:$8 sps:$4 sm:$0xff]   ;;  %v15005_v17 = vcombine.high %v9575_v29, %v9583_v33 }
0x118c   :  { %11231 = vmatpush1.bf16.msra.mxu1 %v15112_v45  ;;  %v17004_v45 = vld [vmem:[#allocation17 + $0x860] ss:$8 sps:$4 sm:$0xff]  }
0x118d   :  { %11354 = vmatpush1.bf16.msra.mxu0 %v15118_v49  ;;  %11232 = vmatprep.subr.bf16.mxu1 %v15129_v62  ;;  %v17009_v49 = vld [vmem:[#allocation17 + $0x874] ss:$8 sps:$4 sm:$0xff]   ;;  %v15004_v62 = vcombine.low %v9575_v29, %v9583_v33 }
0x118e   :  { %11355 = vmatprep.subr.bf16.mxu0 %v15135_v46  ;;  %v15021_v46 = vcombine.high %v9591_v43, %v9599_v44 }
0x1190   :  { %11233 = vmatpush1.bf16.msra.mxu1 %v15128_v47  ;;  %v17007_v47 = vld [vmem:[#allocation17 + $0x870] ss:$8 sps:$4 sm:$0xff]  }
0x1191   :  { %11356 = vmatpush1.bf16.msra.mxu0 %v15134_v48  ;;  %11284 = vmatprep.subr.bf16.mxu1 %v14893_v1  ;;  %v17012_v48 = vld [vmem:[#allocation17 + $0x884] ss:$8 sps:$4 sm:$0xff]   ;;  %v15020_v1 = vcombine.low %v9591_v43, %v9599_v44 }
0x1192   :  { %12989 = vmatprep.subr.bf16.mxu0 %v16988_v12  ;;  %v9631_v12 = vld [vmem:[#allocation14 + $0xd68] sm:$0xff] }
0x1193   :  { %11235 = vmatmul.mubr.bf16.vlgmr.msra.gmra.mrb[80].mxu1 %v18393_v3  ;;  %v15053_v7 = vcombine.high %v9623_v50, %v9631_v12  ;;  %v15052_v30 = vcombine.low %v9623_v50, %v9631_v12  ;;  %v9513_v50 = vld [vmem:[#allocation14 + $0x9b8] sm:$0xff] }
0x1194   :  { %11358 = vmatmul.mubr.bf16.vlgmr.msra.gmra.mrb[12].mxu0 %v18393_v3  ;;  %11285 = vmatpush1.bf16.msra.mxu1 %v14892_v51  ;;  %v17010_v51 = vld [vmem:[#allocation17 + $0x880] ss:$8 sps:$4 sm:$0xff]   ;;  %v9521_v12 = vld [vmem:[#allocation14 + $0x9f8] sm:$0xff] }
0x1195   :  { %11316 = vmatprep.mubr.bf16.mxu1 %v18397_v32  ;;  %11286 = vmatprep.subr.bf16.mxu1 %v14909_v52  ;;  %v17015_v52 = vld [vmem:[#allocation17 + $0x894] ss:$8 sps:$4 sm:$0xff]  }
0x1196   :  { %12990 = vmatpush1.bf16.msra.mxu0 %v16986_v54  ;;  %v9639_v54 = vld [vmem:[#allocation14 + $0xda8] sm:$0xff] }
0x1197   :  { %12991 = vmatprep.subr.bf16.mxu0 %v16991_v31  ;;  %v9647_v31 = vld [vmem:[#allocation14 + $0xde8] sm:$0xff] }
0x1198   :  { %11287 = vmatpush1.bf16.msra.mxu1 %v14908_v59  ;;  %v17013_v59 = vld [vmem:[#allocation17 + $0x890] ss:$8 sps:$4 sm:$0xff]   ;;  %v15069_v2 = vcombine.high %v9639_v54, %v9647_v31  ;;  %v15068_v6 = vcombine.low %v9639_v54, %v9647_v31  ;;  %v14944_v54 = vcombine.low %v9513_v50, %v9521_v12 }
0x1199   :  { %11288 = vmatprep.subr.bf16.mxu1 %v14925_v61  ;;  %v17018_v61 = vld [vmem:[#allocation17 + $0x8a4] ss:$8 sps:$4 sm:$0xff]  }
0x119a   :  { %12992 = vmatpush1.bf16.msra.mxu0 %v16989_v20  ;;  %v9655_v20 = vld [vmem:[#allocation14 + $0xe28] sm:$0xff] }
0x119b   :  { %12993 = vmatprep.subr.bf16.mxu0 %v16994_v0  ;;  %v9663_v0 = vld [vmem:[#allocation14 + $0xe68] sm:$0xff] }
0x119c   :  { %11289 = vmatpush1.bf16.msra.mxu1 %v14924_v58  ;;  %v17016_v58 = vld [vmem:[#allocation17 + $0x8a0] ss:$8 sps:$4 sm:$0xff]   ;;  %v15085_v55 = vcombine.high %v9655_v20, %v9663_v0  ;;  %v15084_v9 = vcombine.low %v9655_v20, %v9663_v0  ;;  %v9561_v20 = vld [vmem:[#allocation14 + $0xb38] sm:$0xff] }
0x119d   :  { %11290 = vmatprep.subr.bf16.mxu1 %v14941_v5  ;;  %v17021_v5 = vld [vmem:[#allocation17 + $0x8b4] ss:$8 sps:$4 sm:$0xff]  }
0x119e   :  { %12994 = vmatpush1.bf16.msra.mxu0 %v16992_v37  ;;  %v9671_v37 = vld [vmem:[#allocation14 + $0xea8] sm:$0xff]  ;;  %v9569_v0 = vld [vmem:[#allocation14 + $0xb78] sm:$0xff] }
0x119f   :  { %12995 = vmatprep.subr.bf16.mxu0 %v16997_v8  ;;  %v9679_v8 = vld [vmem:[#allocation14 + $0xee8] sm:$0xff] }
0x11a0   :  { %11291 = vmatpush1.bf16.msra.mxu1 %v14940_v35  ;;  %v17019_v35 = vld [vmem:[#allocation17 + $0x8b0] ss:$8 sps:$4 sm:$0xff]   ;;  %v15101_v10 = vcombine.high %v9671_v37, %v9679_v8  ;;  %v15100_v18 = vcombine.low %v9671_v37, %v9679_v8  ;;  %v14993_v37 = vcombine.high %v9561_v20, %v9569_v0 }
0x11a1   :  { %11292 = vmatprep.subr.bf16.mxu1 %v14957_v57  ;;  %v17024_v57 = vld [vmem:[#allocation17 + $0x8c4] ss:$8 sps:$4 sm:$0xff]  }
0x11a2   :  { %12996 = vmatpush1.bf16.msra.mxu0 %v16995_v34  ;;  %v9687_v34 = vld [vmem:[#allocation14 + $0xf28] sm:$0xff] }
0x11a3   :  { %12997 = vmatprep.subr.bf16.mxu0 %v17000_v13  ;;  %v9695_v13 = vld [vmem:[#allocation14 + $0xf68] sm:$0xff] }
0x11a4   :  { %11293 = vmatpush1.bf16.msra.mxu1 %v14956_v14  ;;  %v17022_v14 = vld [vmem:[#allocation17 + $0x8c0] ss:$8 sps:$4 sm:$0xff]   ;;  %v15117_v23 = vcombine.high %v9687_v34, %v9695_v13  ;;  %v15116_v29 = vcombine.low %v9687_v34, %v9695_v13 }
0x11a5   :  { %11294 = vmatprep.subr.bf16.mxu1 %v14973_v15  ;;  %v17027_v15 = vld [vmem:[#allocation17 + $0x8d4] ss:$8 sps:$4 sm:$0xff]  }
0x11a6   :  { %12998 = vmatpush1.bf16.msra.mxu0 %v16998_v25  ;;  %v9703_v25 = vld [vmem:[#allocation14 + $0xfa8] sm:$0xff] }
0x11a7   :  { %12999 = vmatprep.subr.bf16.mxu0 %v17003_v27  ;;  %v9711_v27 = vld [vmem:[#allocation14 + $0xfe8] sm:$0xff] }
0x11a8   :  { %11295 = vmatpush1.bf16.msra.mxu1 %v14972_v28  ;;  %v17025_v28 = vld [vmem:[#allocation17 + $0x8d0] ss:$8 sps:$4 sm:$0xff]   ;;  %v15133_v33 = vcombine.high %v9703_v25, %v9711_v27  ;;  %v15132_v43 = vcombine.low %v9703_v25, %v9711_v27  ;;  %v14992_v25 = vcombine.low %v9561_v20, %v9569_v0 }
0x11a9   :  { %11296 = vmatprep.subr.bf16.mxu1 %v14989_v21  ;;  %v17030_v21 = vld [vmem:[#allocation17 + $0x8e4] ss:$8 sps:$4 sm:$0xff]   ;;  %v9657_v20 = vld [vmem:[#allocation14 + $0xe38] sm:$0xff] }
0x11aa   :  { %13000 = vmatpush1.bf16.msra.mxu0 %v17001_v38  ;;  %v9465_v38 = vld [vmem:[#allocation14 + $0x838] sm:$0xff] }
0x11ab   :  { %13001 = vmatprep.subr.bf16.mxu0 %v17006_v40  ;;  %v9473_v40 = vld [vmem:[#allocation14 + $0x878] sm:$0xff] }
0x11ac   :  { %11297 = vmatpush1.bf16.msra.mxu1 %v14988_v42  ;;  %v17028_v42 = vld [vmem:[#allocation17 + $0x8e0] ss:$8 sps:$4 sm:$0xff]   ;;  %v14897_v44 = vcombine.high %v9465_v38, %v9473_v40  ;;  %v14896_v60 = vcombine.low %v9465_v38, %v9473_v40  ;;  %v9593_v38 = vld [vmem:[#allocation14 + $0xc38] sm:$0xff] }
0x11ad   :  { %11298 = vmatprep.subr.bf16.mxu1 %v15005_v17  ;;  %v17033_v17 = vld [vmem:[#allocation17 + $0x8f4] ss:$8 sps:$4 sm:$0xff]  }
0x11ae   :  { %13002 = vmatpush1.bf16.msra.mxu0 %v17004_v45  ;;  %v9481_v45 = vld [vmem:[#allocation14 + $0x8b8] sm:$0xff] }
0x11af   :  { %13003 = vmatprep.subr.bf16.mxu0 %v17009_v49  ;;  %v9489_v49 = vld [vmem:[#allocation14 + $0x8f8] sm:$0xff] }
0x11b0   :  { %11299 = vmatpush1.bf16.msra.mxu1 %v15004_v62  ;;  %v17031_v62 = vld [vmem:[#allocation17 + $0x8f0] ss:$8 sps:$4 sm:$0xff]   ;;  %v14913_v11 = vcombine.high %v9481_v45, %v9489_v49 }
0x11b1   :  { %11300 = vmatprep.subr.bf16.mxu1 %v15021_v46  ;;  %v17036_v46 = vld [vmem:[#allocation17 + $0xa04] ss:$8 sps:$4 sm:$0xff]   ;;  %v9601_v40 = vld [vmem:[#allocation14 + $0xc78] sm:$0xff] }
0x11b2   :  { %13004 = vmatpush1.bf16.msra.mxu0 %v17007_v47  ;;  %v9497_v47 = vld [vmem:[#allocation14 + $0x938] sm:$0xff] }
0x11b3   :  { %13005 = vmatprep.subr.bf16.mxu0 %v17012_v48  ;;  %v9505_v48 = vld [vmem:[#allocation14 + $0x978] sm:$0xff] }
0x11b4   :  { %11301 = vmatpush1.bf16.msra.mxu1 %v15020_v1  ;;  %v14912_v1 = vcombine.low %v9481_v45, %v9489_v49  ;;  %v15025_v49 = vcombine.high %v9593_v38, %v9601_v40  ;;  %v9665_v0 = vld [vmem:[#allocation14 + $0xe78] sm:$0xff] }
0x11b5   :  { %11302 = vmatprep.subr.bf16.mxu1 %v15037_v4  ;;  %v14929_v4 = vcombine.high %v9497_v47, %v9505_v48 }
0x11b6   :  { %13006 = vmatpush1.bf16.msra.mxu0 %v17010_v51  ;;  %v14928_v51 = vcombine.low %v9497_v47, %v9505_v48  ;;  %v15024_v47 = vcombine.low %v9593_v38, %v9601_v40  ;;  %v17037_v48 = vld [vmem:[#allocation17 + $0xa10] ss:$8 sps:$4 sm:$0xff]   ;;  %v17060_v38 = vld [vmem:[#allocation17 + $0xa84] ss:$8 sps:$4 sm:$0xff]  }
0x11b7   :  { %13007 = vmatprep.subr.bf16.mxu0 %v17015_v52  ;;  %v14945_v52 = vcombine.high %v9513_v50, %v9521_v12  ;;  %v9625_v50 = vld [vmem:[#allocation14 + $0xd38] sm:$0xff] }
0x11b8   :  { %11303 = vmatpush1.bf16.msra.mxu1 %v15036_v53  ;;  %v9529_v53 = vld [vmem:[#allocation14 + $0xa38] sm:$0xff] }
0x11b9   :  { %11304 = vmatprep.subr.bf16.mxu1 %v15053_v7  ;;  %v9537_v7 = vld [vmem:[#allocation14 + $0xa78] sm:$0xff] }
0x11ba   :  { %13008 = vmatpush1.bf16.msra.mxu0 %v17013_v59  ;;  %v14961_v31 = vcombine.high %v9529_v53, %v9537_v7  ;;  %v9545_v59 = vld [vmem:[#allocation14 + $0xab8] sm:$0xff] }
0x11bb   :  { %13009 = vmatprep.subr.bf16.mxu0 %v17018_v61  ;;  %v9553_v61 = vld [vmem:[#allocation14 + $0xaf8] sm:$0xff] }
0x11bc   :  { %11305 = vmatpush1.bf16.msra.mxu1 %v15052_v30  ;;  %v14960_v30 = vcombine.low %v9529_v53, %v9537_v7  ;;  %v9633_v12 = vld [vmem:[#allocation14 + $0xd78] sm:$0xff] }
0x11bd   :  { %11306 = vmatprep.subr.bf16.mxu1 %v15069_v2  ;;  %v14977_v2 = vcombine.high %v9545_v59, %v9553_v61  ;;  %v15057_v53 = vcombine.high %v9625_v50, %v9633_v12  ;;  %v17045_v7 = vld [vmem:[#allocation17 + $0xa34] ss:$8 sps:$4 sm:$0xff]  }
0x11be   :  { %13010 = vmatpush1.bf16.msra.mxu0 %v17016_v58 }
0x11bf   :  { %13011 = vmatprep.subr.bf16.mxu0 %v17021_v5  ;;  %v14976_v5 = vcombine.low %v9545_v59, %v9553_v61  ;;  %v15056_v59 = vcombine.low %v9625_v50, %v9633_v12  ;;  %v17043_v61 = vld [vmem:[#allocation17 + $0xa30] ss:$8 sps:$4 sm:$0xff]   ;;  %v17084_v50 = vld [vmem:[#allocation17 + $0xac4] ss:$8 sps:$4 sm:$0xff]  }
0x11c0   :  { %11307 = vmatpush1.bf16.msra.mxu1 %v15068_v6  ;;  %v17079_v12 = vld [vmem:[#allocation17 + $0x930] ss:$8 sps:$4 sm:$0xff]  }
0x11c1   :  { %11308 = vmatprep.subr.bf16.mxu1 %v15085_v55 }
0x11c2   :  { %13012 = vmatpush1.bf16.msra.mxu0 %v17019_v35 }
0x11c3   :  { %13013 = vmatprep.subr.bf16.mxu0 %v17024_v57  ;;  %v9577_v57 = vld [vmem:[#allocation14 + $0xbb8] sm:$0xff] }
0x11c4   :  { %11309 = vmatpush1.bf16.msra.mxu1 %v15084_v9  ;;  %v9585_v9 = vld [vmem:[#allocation14 + $0xbf8] sm:$0xff] }
0x11c5   :  { %11310 = vmatprep.subr.bf16.mxu1 %v15101_v10 }
0x11c6   :  { %13014 = vmatpush1.bf16.msra.mxu0 %v17022_v14 }
0x11c7   :  { %13015 = vmatprep.subr.bf16.mxu0 %v17027_v15 }
0x11c8   :  { %11311 = vmatpush1.bf16.msra.mxu1 %v15100_v18 }
0x11c9   :  { %11312 = vmatprep.subr.bf16.mxu1 %v15117_v23 }
0x11ca   :  { %13016 = vmatpush1.bf16.msra.mxu0 %v17025_v28 }
0x11cb   :  { %13017 = vmatprep.subr.bf16.mxu0 %v17030_v21 }
0x11cc   :  { %11313 = vmatpush1.bf16.msra.mxu1 %v15116_v29  ;;  %v15009_v29 = vcombine.high %v9577_v57, %v9585_v9 }
0x11cd   :  { %11314 = vmatprep.subr.bf16.mxu1 %v15133_v33 }
0x11ce   :  { %13018 = vmatpush1.bf16.msra.mxu0 %v17028_v42 }
0x11cf   :  { %13019 = vmatprep.subr.bf16.mxu0 %v17033_v17 }
0x11d0   :  { %11315 = vmatpush1.bf16.msra.mxu1 %v15132_v43  ;;  %v15008_v43 = vcombine.low %v9577_v57, %v9585_v9  ;;  %v15088_v57 = vcombine.low %v9657_v20, %v9665_v0  ;;  %v17049_v9 = vld [vmem:[#allocation17 + $0xa50] ss:$8 sps:$4 sm:$0xff]  }
0x11d1   :  { %11366 = vmatprep.subr.bf16.mxu1 %v14897_v44  ;;  %v17034_v44 = vld [vmem:[#allocation17 + $0xa00] ss:$8 sps:$4 sm:$0xff]  }
0x11d2   :  { %13020 = vmatpush1.bf16.msra.mxu0 %v17031_v62  ;;  %v17039_v62 = vld [vmem:[#allocation17 + $0xa14] ss:$8 sps:$4 sm:$0xff]  }
0x11d3   :  { %11317 = vmatmul.mubr.bf16.vlgmr.msra.gmra.mrb[84].mxu1 %v18393_v3  ;;  %13071 = vmatprep.subr.bf16.mxu0 %v17036_v46  ;;  %v9609_v46 = vld [vmem:[#allocation14 + $0xcb8] sm:$0xff] }
0x11d4   :  { %11367 = vmatpush1.bf16.msra.mxu1 %v14896_v60  ;;  %11398 = vmatprep.mubr.bf16.mxu1 %v18397_v32  ;;  %v18414_v32 = vld [vmem:[#allocation16 + $0x10] sm:$0xff]  ;;  %v9617_v60 = vld [vmem:[#allocation14 + $0xcf8] sm:$0xff] }
0x11d5   :  { %11368 = vmatprep.subr.bf16.mxu1 %v14913_v11  ;;  %v9722_v58 = vrot.slane %v18414_v32, %v18186_v39  ;;  %v9726_v6 = vrot.slane %v18414_v32, %v18189_v41  ;;  %v9742_v55 = vrot.slane %v18414_v32, %v18277_v26 }
0x11d8   :  { %11369 = vmatpush1.bf16.msra.mxu1 %v14912_v1  ;;  %v15041_v1 = vcombine.high %v9609_v46, %v9617_v60 }
0x11d9   :  { %11370 = vmatprep.subr.bf16.mxu1 %v14929_v4  ;;  %v17042_v4 = vld [vmem:[#allocation17 + $0xa24] ss:$8 sps:$4 sm:$0xff]  }
0x11dc   :  { %11371 = vmatpush1.bf16.msra.mxu1 %v14928_v51  ;;  %v15040_v51 = vcombine.low %v9609_v46, %v9617_v60  ;;  %v17067_v46 = vld [vmem:[#allocation17 + $0x910] ss:$8 sps:$4 sm:$0xff]   ;;  %v17070_v60 = vld [vmem:[#allocation17 + $0xaa0] ss:$8 sps:$4 sm:$0xff]  }
0x11dd   :  { %11372 = vmatprep.subr.bf16.mxu1 %v14945_v52  ;;  %v17040_v52 = vld [vmem:[#allocation17 + $0xa20] ss:$8 sps:$4 sm:$0xff]  }
0x11e0   :  { %11373 = vmatpush1.bf16.msra.mxu1 %v14944_v54  ;;  %v9641_v54 = vld [vmem:[#allocation14 + $0xdb8] sm:$0xff] }
0x11e1   :  { %11374 = vmatprep.subr.bf16.mxu1 %v14961_v31  ;;  %v9649_v31 = vld [vmem:[#allocation14 + $0xdf8] sm:$0xff] }
0x11e4   :  { %11375 = vmatpush1.bf16.msra.mxu1 %v14960_v30  ;;  %v15073_v30 = vcombine.high %v9641_v54, %v9649_v31 }
0x11e5   :  { %11376 = vmatprep.subr.bf16.mxu1 %v14977_v2  ;;  %v17048_v2 = vld [vmem:[#allocation17 + $0xa44] ss:$8 sps:$4 sm:$0xff]  }
0x11e6   :  { %v11113_v8 = vpop.f32.mrb[72].mxu1  ;;  %v18422_v35 = vpop.f32.mrb[4].mxu0 }
0x11e7   :  { %v11114_v10 = vadd.f32 %v11113_v8, %v9722_v58  ;;  %v11115_v34 = vpop.f32.mrb[73].mxu1  ;;  %v11197_v13 = vpop.f32.mrb[5].mxu0  ;;  %v15072_v58 = vcombine.low %v9641_v54, %v9649_v31  ;;  %v9681_v8 = vld [vmem:[#allocation14 + $0xef8] sm:$0xff]  ;;  %v9738_v54 = vrot.slane %v18414_v32, %v18290_v19 }
0x11e8   :  { %v11116_v14 = vadd.f32 %v11115_v34, %v9726_v6  ;;  %v11198_v15 = vadd.f32 %v11197_v13, %v9742_v55  ;;  %11377 = vmatpush1.bf16.msra.mxu1 %v14976_v5  ;;  %v11117_v18 = vpop.f32.mrb[74].mxu1  ;;  %v11199_v23 = vpop.f32.mrb[6].mxu0  ;;  %v17046_v5 = vld [vmem:[#allocation17 + $0xa40] ss:$8 sps:$4 sm:$0xff]   ;;  %v15089_v6 = vcombine.high %v9657_v20, %v9665_v0  ;;  %v17051_v55 = vld [vmem:[#allocation17 + $0xa54] ss:$8 sps:$4 sm:$0xff]  }
0x11e9   :  { %v11407_v27 = vmax.f32 %v11114_v10, 0.0  ;;  %v11118_v28 = vpop.f32.mrb[75].mxu1  ;;  %v11200_v21 = vpop.f32.mrb[7].mxu0  ;;  %11378 = vmatprep.subr.bf16.mxu1 %v14993_v37  ;;  %v9673_v37 = vld [vmem:[#allocation14 + $0xeb8] sm:$0xff]  ;;  %v17054_v34 = vld [vmem:[#allocation17 + $0xa64] ss:$8 sps:$4 sm:$0xff]  }
0x11ea   :  { %v11408_v33 = vmax.f32 %v11116_v14, 0.0  ;;  %v11412_v42 = vmax.f32 %v11198_v15, 0.0  ;;  %v15105_v10 = vcombine.high %v9673_v37, %v9681_v8  ;;  %v9689_v13 = vld [vmem:[#allocation14 + $0xf38] sm:$0xff]  ;;  %v15104_v15 = vcombine.low %v9673_v37, %v9681_v8  ;;  %v17052_v18 = vld [vmem:[#allocation17 + $0xa60] ss:$8 sps:$4 sm:$0xff]  }
0x11eb   :  { %v11423_v45 = vpack.c.bf16 %v11407_v27, %v11407_v27  ;;  %v9697_v14 = vld [vmem:[#allocation14 + $0xf78] sm:$0xff]  ;;  %v17094_v0 = vld [vmem:[#allocation17 + $0xae0] ss:$8 sps:$4 sm:$0xff]  }
0x11ec   :  { %v11424_v17 = vpack.c.bf16 %v11408_v33, %v11408_v33  ;;  %11379 = vmatpush1.bf16.msra.mxu1 %v14992_v25  ;;  %v11428_v11 = vpack.c.bf16 %v11412_v42, %v11412_v42  ;;  %v15121_v23 = vcombine.high %v9689_v13, %v9697_v14  ;;  %v17057_v25 = vld [vmem:[#allocation17 + $0xa74] ss:$8 sps:$4 sm:$0xff]   ;;  %v15120_v21 = vcombine.low %v9689_v13, %v9697_v14  ;;  %v17058_v42 = vld [vmem:[#allocation17 + $0xa80] ss:$8 sps:$4 sm:$0xff]   ;;  %v17091_v20 = vld [vmem:[#allocation17 + $0x950] ss:$8 sps:$4 sm:$0xff]  }
0x11ed   :  { %11380 = vmatprep.subr.bf16.mxu1 %v15009_v29  ;;  %v9705_v27 = vld [vmem:[#allocation14 + $0xfb8] sm:$0xff] }
0x11ee   :  { %13021 = vmatprep.mubr.bf16.mxu0 %v11424_v17  ;;  %v9713_v28 = vld [vmem:[#allocation14 + $0xff8] sm:$0xff]  ;;  %v17063_v17 = vld [vmem:[#allocation17 + $0x904] ss:$8 sps:$4 sm:$0xff]  }
0x11ef   :  { %13022 = vmatmul.mubr.bf16.vlgmr.msra.gmra.mrb[16].mxu0 %v11423_v45  ;;  %v17055_v29 = vld [vmem:[#allocation17 + $0xa70] ss:$8 sps:$4 sm:$0xff]   ;;  %v15137_v33 = vcombine.high %v9705_v27, %v9713_v28  ;;  %v15136_v40 = vcombine.low %v9705_v27, %v9713_v28  ;;  %v17108_v27 = vld [vmem:[#allocation17 + $0xc04] ss:$8 sps:$4 sm:$0xff]  }
0x11f0   :  { %11381 = vmatpush1.bf16.msra.mxu1 %v15008_v43  ;;  %13072 = vmatpush1.bf16.msra.mxu0 %v17034_v44  ;;  %v17066_v43 = vld [vmem:[#allocation17 + $0xa94] ss:$8 sps:$4 sm:$0xff]   ;;  %v17061_v44 = vld [vmem:[#allocation17 + $0x900] ss:$8 sps:$4 sm:$0xff]   ;;  %v17064_v45 = vld [vmem:[#allocation17 + $0xa90] ss:$8 sps:$4 sm:$0xff]  }
0x11f1   :  { %13103 = vmatprep.mubr.bf16.mxu0 %v11428_v11  ;;  %11382 = vmatprep.subr.bf16.mxu1 %v15025_v49  ;;  %v17069_v49 = vld [vmem:[#allocation17 + $0x914] ss:$8 sps:$4 sm:$0xff]   ;;  %v17075_v11 = vld [vmem:[#allocation17 + $0x924] ss:$8 sps:$4 sm:$0xff]  }
0x11f2   :  { %13073 = vmatprep.subr.bf16.mxu0 %v17039_v62  ;;  %v17072_v62 = vld [vmem:[#allocation17 + $0xaa4] ss:$8 sps:$4 sm:$0xff]   ;;  %v18427_v31 = vld [vmem:[#allocation16 + $0x18] sm:$0xff] }
0x11f4   :  { %11383 = vmatpush1.bf16.msra.mxu1 %v15024_v47  ;;  %13074 = vmatpush1.bf16.msra.mxu0 %v17037_v48  ;;  %v17078_v47 = vld [vmem:[#allocation17 + $0xab4] ss:$8 sps:$4 sm:$0xff]   ;;  %v17073_v48 = vld [vmem:[#allocation17 + $0x920] ss:$8 sps:$4 sm:$0xff]  }
0x11f5   :  { %11384 = vmatprep.subr.bf16.mxu1 %v15041_v1  ;;  %13075 = vmatprep.subr.bf16.mxu0 %v17042_v4  ;;  %v17076_v1 = vld [vmem:[#allocation17 + $0xab0] ss:$8 sps:$4 sm:$0xff]   ;;  %v17081_v4 = vld [vmem:[#allocation17 + $0x934] ss:$8 sps:$4 sm:$0xff]  }
0x11f8   :  { %11385 = vmatpush1.bf16.msra.mxu1 %v15040_v51  ;;  %13076 = vmatpush1.bf16.msra.mxu0 %v17040_v52  ;;  %v17087_v51 = vld [vmem:[#allocation17 + $0x944] ss:$8 sps:$4 sm:$0xff]   ;;  %v17090_v52 = vld [vmem:[#allocation17 + $0xad4] ss:$8 sps:$4 sm:$0xff]  }
0x11f9   :  { %11386 = vmatprep.subr.bf16.mxu1 %v15057_v53  ;;  %13077 = vmatprep.subr.bf16.mxu0 %v17045_v7  ;;  %v17085_v53 = vld [vmem:[#allocation17 + $0x940] ss:$8 sps:$4 sm:$0xff]   ;;  %v17088_v7 = vld [vmem:[#allocation17 + $0xad0] ss:$8 sps:$4 sm:$0xff]  }
0x11fc   :  { %11387 = vmatpush1.bf16.msra.mxu1 %v15056_v59  ;;  %13078 = vmatpush1.bf16.msra.mxu0 %v17043_v61  ;;  %v17093_v59 = vld [vmem:[#allocation17 + $0x954] ss:$8 sps:$4 sm:$0xff]   ;;  %v17096_v61 = vld [vmem:[#allocation17 + $0xae4] ss:$8 sps:$4 sm:$0xff]  }
0x11fd   :  { %11388 = vmatprep.subr.bf16.mxu1 %v15073_v30  ;;  %13079 = vmatprep.subr.bf16.mxu0 %v17048_v2  ;;  %v9734_v30 = vrot.slane %v18414_v32, %v18261_v36  ;;  %v9758_v2 = vrot.slane %v18427_v31, %v18189_v41 }
0x1200   :  { %11389 = vmatpush1.bf16.msra.mxu1 %v15072_v58  ;;  %13080 = vmatpush1.bf16.msra.mxu0 %v17046_v5  ;;  %v11196_v58 = vadd.f32 %v18422_v35, %v9738_v54  ;;  %v17099_v5 = vld [vmem:[#allocation17 + $0x964] ss:$8 sps:$4 sm:$0xff]   ;;  %v17141_v54 = vld [vmem:[#allocation17 + $0x9d4] ss:$8 sps:$4 sm:$0xff]  }
0x1201   :  { %11390 = vmatprep.subr.bf16.mxu1 %v15089_v6  ;;  %13081 = vmatprep.subr.bf16.mxu0 %v17051_v55  ;;  %v17102_v6 = vld [vmem:[#allocation17 + $0xaf4] ss:$8 sps:$4 sm:$0xff]  }
0x1202   :  { %v11411_v35 = vmax.f32 %v11196_v58, 0.0  ;;  %v17145_v58 = vld [vmem:[#allocation17 + $0x9e0] ss:$8 sps:$4 sm:$0xff]  }
0x1204   :  { %11391 = vmatpush1.bf16.msra.mxu1 %v15088_v57  ;;  %13082 = vmatpush1.bf16.msra.mxu0 %v17049_v9  ;;  %v17097_v9 = vld [vmem:[#allocation17 + $0x960] ss:$8 sps:$4 sm:$0xff]  }
0x1205   :  { %11392 = vmatprep.subr.bf16.mxu1 %v15105_v10  ;;  %13083 = vmatprep.subr.bf16.mxu0 %v17054_v34 }
0x1208   :  { %11393 = vmatpush1.bf16.msra.mxu1 %v15104_v15  ;;  %13084 = vmatpush1.bf16.msra.mxu0 %v17052_v18  ;;  %v17100_v15 = vld [vmem:[#allocation17 + $0xaf0] ss:$8 sps:$4 sm:$0xff]   ;;  %v17105_v18 = vld [vmem:[#allocation17 + $0x974] ss:$8 sps:$4 sm:$0xff]  }
0x1209   :  { %11394 = vmatprep.subr.bf16.mxu1 %v15121_v23  ;;  %13085 = vmatprep.subr.bf16.mxu0 %v17057_v25 }
0x120c   :  { %11395 = vmatpush1.bf16.msra.mxu1 %v15120_v21  ;;  %13086 = vmatpush1.bf16.msra.mxu0 %v17055_v29 }
0x120d   :  { %11396 = vmatprep.subr.bf16.mxu1 %v15137_v33  ;;  %13087 = vmatprep.subr.bf16.mxu0 %v17060_v38  ;;  %v17103_v33 = vld [vmem:[#allocation17 + $0x970] ss:$8 sps:$4 sm:$0xff]   ;;  %v17106_v38 = vld [vmem:[#allocation17 + $0xc00] ss:$8 sps:$4 sm:$0xff]  }
0x1210   :  { %11397 = vmatpush1.bf16.msra.mxu1 %v15136_v40  ;;  %13088 = vmatpush1.bf16.msra.mxu0 %v17058_v42  ;;  %v11427_v40 = vpack.c.bf16 %v11411_v35, %v11411_v35  ;;  %v17111_v42 = vld [vmem:[#allocation17 + $0x984] ss:$8 sps:$4 sm:$0xff]  }
0x1211   :  { %13030 = vmatprep.subr.bf16.mxu1 %v17063_v17  ;;  %13089 = vmatprep.subr.bf16.mxu0 %v17066_v43  ;;  %v17114_v17 = vld [vmem:[#allocation17 + $0xc14] ss:$8 sps:$4 sm:$0xff]  }
0x1213   :  { %11399 = vmatmul.mubr.bf16.vlgmr.msra.gmra.mrb[88].mxu1 %v18393_v3  ;;  %v17082_v3 = vld [vmem:[#allocation17 + $0xac0] ss:$8 sps:$4 sm:$0xff]  }
0x1214   :  { %13031 = vmatpush1.bf16.msra.mxu1 %v17061_v44  ;;  %13090 = vmatpush1.bf16.msra.mxu0 %v17064_v45  ;;  %v17109_v44 = vld [vmem:[#allocation17 + $0x980] ss:$8 sps:$4 sm:$0xff]   ;;  %v17112_v45 = vld [vmem:[#allocation17 + $0xc10] ss:$8 sps:$4 sm:$0xff]  }
0x1215   :  { %13032 = vmatprep.subr.bf16.mxu1 %v17069_v49  ;;  %13091 = vmatprep.subr.bf16.mxu0 %v17072_v62  ;;  %v17117_v49 = vld [vmem:[#allocation17 + $0x994] ss:$8 sps:$4 sm:$0xff]   ;;  %v17120_v62 = vld [vmem:[#allocation17 + $0xc24] ss:$8 sps:$4 sm:$0xff]  }
0x1218   :  { %13033 = vmatpush1.bf16.msra.mxu1 %v17067_v46  ;;  %13092 = vmatpush1.bf16.msra.mxu0 %v17070_v60  ;;  %v17115_v46 = vld [vmem:[#allocation17 + $0x990] ss:$8 sps:$4 sm:$0xff]   ;;  %v17118_v60 = vld [vmem:[#allocation17 + $0xc20] ss:$8 sps:$4 sm:$0xff]  }
0x1219   :  { %13034 = vmatprep.subr.bf16.mxu1 %v17075_v11  ;;  %13093 = vmatprep.subr.bf16.mxu0 %v17078_v47  ;;  %v17123_v11 = vld [vmem:[#allocation17 + $0x9a4] ss:$8 sps:$4 sm:$0xff]   ;;  %v17126_v47 = vld [vmem:[#allocation17 + $0xc34] ss:$8 sps:$4 sm:$0xff]  }
0x121c   :  { %13035 = vmatpush1.bf16.msra.mxu1 %v17073_v48  ;;  %13094 = vmatpush1.bf16.msra.mxu0 %v17076_v1  ;;  %v17121_v48 = vld [vmem:[#allocation17 + $0x9a0] ss:$8 sps:$4 sm:$0xff]   ;;  %v17124_v1 = vld [vmem:[#allocation17 + $0xc30] ss:$8 sps:$4 sm:$0xff]  }
0x121d   :  { %13036 = vmatprep.subr.bf16.mxu1 %v17081_v4  ;;  %13095 = vmatprep.subr.bf16.mxu0 %v17084_v50  ;;  %v17129_v4 = vld [vmem:[#allocation17 + $0x9b4] ss:$8 sps:$4 sm:$0xff]   ;;  %v17132_v50 = vld [vmem:[#allocation17 + $0xc44] ss:$8 sps:$4 sm:$0xff]  }
0x1220   :  { %13037 = vmatpush1.bf16.msra.mxu1 %v17079_v12  ;;  %13096 = vmatpush1.bf16.msra.mxu0 %v17082_v3  ;;  %v17127_v12 = vld [vmem:[#allocation17 + $0x9b0] ss:$8 sps:$4 sm:$0xff]   ;;  %v17130_v3 = vld [vmem:[#allocation17 + $0xc40] ss:$8 sps:$4 sm:$0xff]  }
0x1221   :  { %13038 = vmatprep.subr.bf16.mxu1 %v17087_v51  ;;  %13097 = vmatprep.subr.bf16.mxu0 %v17090_v52  ;;  %v17135_v51 = vld [vmem:[#allocation17 + $0x9c4] ss:$8 sps:$4 sm:$0xff]   ;;  %v17138_v52 = vld [vmem:[#allocation17 + $0xc54] ss:$8 sps:$4 sm:$0xff]  }
0x1224   :  { %13039 = vmatpush1.bf16.msra.mxu1 %v17085_v53  ;;  %13098 = vmatpush1.bf16.msra.mxu0 %v17088_v7  ;;  %v17133_v53 = vld [vmem:[#allocation17 + $0x9c0] ss:$8 sps:$4 sm:$0xff]   ;;  %v17136_v7 = vld [vmem:[#allocation17 + $0xc50] ss:$8 sps:$4 sm:$0xff]  }
0x1225   :  { %13040 = vmatprep.subr.bf16.mxu1 %v17093_v59  ;;  %13099 = vmatprep.subr.bf16.mxu0 %v17096_v61  ;;  %v17144_v59 = vld [vmem:[#allocation17 + $0xc64] ss:$8 sps:$4 sm:$0xff]   ;;  %v17139_v61 = vld [vmem:[#allocation17 + $0x9d0] ss:$8 sps:$4 sm:$0xff]  }
0x1226   :  { %v18434_v55 = vpop.f32.mrb[76].mxu1  ;;  %v18436_v37 = vpop.f32.mrb[8].mxu0 }
0x1227   :  { %v11156_v8 = vpop.f32.mrb[77].mxu1  ;;  %v11279_v57 = vpop.f32.mrb[9].mxu0 }
0x1228   :  { %v11157_v10 = vadd.f32 %v11156_v8, %v9734_v30  ;;  %v11280_v34 = vadd.f32 %v11279_v57, %v9758_v2  ;;  %v11158_v13 = vpop.f32.mrb[78].mxu1  ;;  %v11281_v14 = vpop.f32.mrb[10].mxu0  ;;  %13041 = vmatpush1.bf16.msra.mxu1 %v17091_v20  ;;  %13100 = vmatpush1.bf16.msra.mxu0 %v17094_v0  ;;  %v17142_v30 = vld [vmem:[#allocation17 + $0xc60] ss:$8 sps:$4 sm:$0xff]   ;;  %v9730_v2 = vrot.slane %v18414_v32, %v18274_v24  ;;  %v17147_v20 = vld [vmem:[#allocation17 + $0x9e4] ss:$8 sps:$4 sm:$0xff]  }
0x1229   :  { %v11159_v23 = vpop.f32.mrb[79].mxu1  ;;  %v11282_v25 = vpop.f32.mrb[11].mxu0  ;;  %13042 = vmatprep.subr.bf16.mxu1 %v17099_v5  ;;  %13101 = vmatprep.subr.bf16.mxu0 %v17102_v6  ;;  %v17150_v0 = vld [vmem:[#allocation17 + $0xc74] ss:$8 sps:$4 sm:$0xff]   ;;  %v17148_v5 = vld [vmem:[#allocation17 + $0xc70] ss:$8 sps:$4 sm:$0xff]  }
0x122a   :  { %v11410_v28 = vmax.f32 %v11157_v10, 0.0  ;;  %v11416_v21 = vmax.f32 %v11280_v34, 0.0  ;;  %v11155_v6 = vadd.f32 %v18434_v55, %v9730_v2  ;;  %v17153_v8 = vld [vmem:[#allocation17 + $0x9f4] ss:$8 sps:$4 sm:$0xff]   ;;  %v17156_v57 = vld [vmem:[#allocation17 + $0xc84] ss:$8 sps:$4 sm:$0xff]  }
0x122b   :  { %v17154_v10 = vld [vmem:[#allocation17 + $0xc80] ss:$8 sps:$4 sm:$0xff]   ;;  %v17159_v13 = vld [vmem:[#allocation17 + $0xb04] ss:$8 sps:$4 sm:$0xff]   ;;  %v17162_v14 = vld [vmem:[#allocation17 + $0xc94] ss:$8 sps:$4 sm:$0xff]  }
0x122c   :  { %v11426_v29 = vpack.c.bf16 %v11410_v28, %v11410_v28  ;;  %13043 = vmatpush1.bf16.msra.mxu1 %v17097_v9  ;;  %13102 = vmatpush1.bf16.msra.mxu0 %v17100_v15  ;;  %v11432_v43 = vpack.c.bf16 %v11416_v21, %v11416_v21  ;;  %v17151_v9 = vld [vmem:[#allocation17 + $0x9f0] ss:$8 sps:$4 sm:$0xff]   ;;  %v11409_v34 = vmax.f32 %v11155_v6, 0.0  ;;  %v17157_v15 = vld [vmem:[#allocation17 + $0xb00] ss:$8 sps:$4 sm:$0xff]  }
0x122d   :  { %13044 = vmatprep.subr.bf16.mxu1 %v17105_v18  ;;  %13153 = vmatprep.subr.bf16.mxu0 %v17108_v27  ;;  %v17160_v18 = vld [vmem:[#allocation17 + $0xc90] ss:$8 sps:$4 sm:$0xff]   ;;  %v17165_v55 = vld [vmem:[#allocation17 + $0xb14] ss:$8 sps:$4 sm:$0xff]   ;;  %v17168_v23 = vld [vmem:[#allocation17 + $0xca4] ss:$8 sps:$4 sm:$0xff]  }
0x122e   :  { %13062 = vmatprep.mubr.bf16.mxu1 %v11426_v29  ;;  %v11425_v35 = vpack.c.bf16 %v11409_v34, %v11409_v34  ;;  %v17163_v25 = vld [vmem:[#allocation17 + $0xb10] ss:$8 sps:$4 sm:$0xff]   ;;  %v17166_v27 = vld [vmem:[#allocation17 + $0xca0] ss:$8 sps:$4 sm:$0xff]   ;;  %v17171_v28 = vld [vmem:[#allocation17 + $0xb24] ss:$8 sps:$4 sm:$0xff]  }
0x122f   :  { %13104 = vmatmul.mubr.bf16.vlgmr.msra.gmra.mrb[20].mxu0 %v11427_v40  ;;  %v17174_v21 = vld [vmem:[#allocation17 + $0xcb4] ss:$8 sps:$4 sm:$0xff]   ;;  %v17169_v29 = vld [vmem:[#allocation17 + $0xb20] ss:$8 sps:$4 sm:$0xff]   ;;  %v17180_v40 = vld [vmem:[#allocation17 + $0xcc4] ss:$8 sps:$4 sm:$0xff]  }
0x1230   :  { %13045 = vmatpush1.bf16.msra.mxu1 %v17103_v33  ;;  %13154 = vmatpush1.bf16.msra.mxu0 %v17106_v38  ;;  %v17172_v33 = vld [vmem:[#allocation17 + $0xcb0] ss:$8 sps:$4 sm:$0xff]   ;;  %v17177_v38 = vld [vmem:[#allocation17 + $0xb34] ss:$8 sps:$4 sm:$0xff]   ;;  %v17207_v34 = vld [vmem:[#allocation17 + $0xb84] ss:$8 sps:$4 sm:$0xff]  }
0x1231   :  { %13185 = vmatprep.mubr.bf16.mxu0 %v11432_v43  ;;  %13046 = vmatprep.subr.bf16.mxu1 %v17111_v42  ;;  %v17175_v42 = vld [vmem:[#allocation17 + $0xb30] ss:$8 sps:$4 sm:$0xff]   ;;  %v17183_v43 = vld [vmem:[#allocation17 + $0xb44] ss:$8 sps:$4 sm:$0xff]  }
0x1232   :  { %13155 = vmatprep.subr.bf16.mxu0 %v17114_v17  ;;  %v17178_v17 = vld [vmem:[#allocation17 + $0xcc0] ss:$8 sps:$4 sm:$0xff]  }
0x1234   :  { %13047 = vmatpush1.bf16.msra.mxu1 %v17109_v44  ;;  %13156 = vmatpush1.bf16.msra.mxu0 %v17112_v45  ;;  %v17186_v44 = vld [vmem:[#allocation17 + $0xcd4] ss:$8 sps:$4 sm:$0xff]   ;;  %v17181_v45 = vld [vmem:[#allocation17 + $0xb40] ss:$8 sps:$4 sm:$0xff]  }
0x1235   :  { %13048 = vmatprep.subr.bf16.mxu1 %v17117_v49  ;;  %13157 = vmatprep.subr.bf16.mxu0 %v17120_v62  ;;  %v17184_v49 = vld [vmem:[#allocation17 + $0xcd0] ss:$8 sps:$4 sm:$0xff]   ;;  %v9754_v62 = vrot.slane %v18427_v31, %v18186_v39 }
0x1238   :  { %13049 = vmatpush1.bf16.msra.mxu1 %v17115_v46  ;;  %13158 = vmatpush1.bf16.msra.mxu0 %v17118_v60  ;;  %v17189_v46 = vld [vmem:[#allocation17 + $0xb54] ss:$8 sps:$4 sm:$0xff]   ;;  %v17192_v60 = vld [vmem:[#allocation17 + $0xce4] ss:$8 sps:$4 sm:$0xff]  }
0x1239   :  { %13050 = vmatprep.subr.bf16.mxu1 %v17123_v11  ;;  %13159 = vmatprep.subr.bf16.mxu0 %v17126_v47  ;;  %v9750_v11 = vrot.slane %v18414_v32, %v18293_v22  ;;  %v17187_v47 = vld [vmem:[#allocation17 + $0xb50] ss:$8 sps:$4 sm:$0xff]  }
0x123c   :  { %13051 = vmatpush1.bf16.msra.mxu1 %v17121_v48  ;;  %13160 = vmatpush1.bf16.msra.mxu0 %v17124_v1  ;;  %v17190_v48 = vld [vmem:[#allocation17 + $0xce0] ss:$8 sps:$4 sm:$0xff]   ;;  %v11278_v1 = vadd.f32 %v18436_v37, %v9754_v62  ;;  %v17201_v37 = vld [vmem:[#allocation17 + $0xb74] ss:$8 sps:$4 sm:$0xff]   ;;  %v17240_v62 = vld [vmem:[#allocation17 + $0xe64] ss:$8 sps:$4 sm:$0xff]  }
0x123d   :  { %13052 = vmatprep.subr.bf16.mxu1 %v17129_v4  ;;  %13161 = vmatprep.subr.bf16.mxu0 %v17132_v50  ;;  %v9774_v4 = vrot.slane %v18427_v31, %v18277_v26  ;;  %v17195_v50 = vld [vmem:[#allocation17 + $0xb64] ss:$8 sps:$4 sm:$0xff]  }
0x1240   :  { %13053 = vmatpush1.bf16.msra.mxu1 %v17127_v12  ;;  %13162 = vmatpush1.bf16.msra.mxu0 %v17130_v3  ;;  %v17198_v12 = vld [vmem:[#allocation17 + $0xcf4] ss:$8 sps:$4 sm:$0xff]  }
0x1241   :  { %13054 = vmatprep.subr.bf16.mxu1 %v17135_v51  ;;  %13163 = vmatprep.subr.bf16.mxu0 %v17138_v52 }
0x1244   :  { %13055 = vmatpush1.bf16.msra.mxu1 %v17133_v53  ;;  %13164 = vmatpush1.bf16.msra.mxu0 %v17136_v7  ;;  %v17193_v53 = vld [vmem:[#allocation17 + $0xb60] ss:$8 sps:$4 sm:$0xff]  }
0x1245   :  { %13056 = vmatprep.subr.bf16.mxu1 %v17141_v54  ;;  %13165 = vmatprep.subr.bf16.mxu0 %v17144_v59 }
0x1248   :  { %13057 = vmatpush1.bf16.msra.mxu1 %v17139_v61  ;;  %13166 = vmatpush1.bf16.msra.mxu0 %v17142_v30  ;;  %v17196_v61 = vld [vmem:[#allocation17 + $0xcf0] ss:$8 sps:$4 sm:$0xff]   ;;  %v11415_v30 = vmax.f32 %v11278_v1, 0.0  ;;  %v17241_v1 = vld [vmem:[#allocation17 + $0xbe0] ss:$8 sps:$4 sm:$0xff]  }
0x1249   :  { %13058 = vmatprep.subr.bf16.mxu1 %v17147_v20  ;;  %13167 = vmatprep.subr.bf16.mxu0 %v17150_v0  ;;  %v17204_v0 = vld [vmem:[#allocation17 + $0xe04] ss:$8 sps:$4 sm:$0xff]  }
0x124c   :  { %13059 = vmatpush1.bf16.msra.mxu1 %v17145_v58  ;;  %13168 = vmatpush1.bf16.msra.mxu0 %v17148_v5 }
0x124d   :  { %13060 = vmatprep.subr.bf16.mxu1 %v17153_v8  ;;  %13169 = vmatprep.subr.bf16.mxu0 %v17156_v57  ;;  %v17199_v57 = vld [vmem:[#allocation17 + $0xb70] ss:$8 sps:$4 sm:$0xff]  }
0x1250   :  { %13061 = vmatpush1.bf16.msra.mxu1 %v17151_v9  ;;  %13170 = vmatpush1.bf16.msra.mxu0 %v17154_v10  ;;  %v17202_v9 = vld [vmem:[#allocation17 + $0xe00] ss:$8 sps:$4 sm:$0xff]   ;;  %v11431_v10 = vpack.c.bf16 %v11415_v30, %v11415_v30 }
0x1251   :  { %13112 = vmatprep.subr.bf16.mxu1 %v17159_v13  ;;  %13171 = vmatprep.subr.bf16.mxu0 %v17162_v14  ;;  %v17210_v13 = vld [vmem:[#allocation17 + $0xe14] ss:$8 sps:$4 sm:$0xff]  }
0x1253   :  { %13063 = vmatmul.mubr.bf16.vlgmr.msra.gmra.mrb[92].mxu1 %v11425_v35  ;;  %v17213_v35 = vld [vmem:[#allocation17 + $0xb94] ss:$8 sps:$4 sm:$0xff]  }
0x1254   :  { %13113 = vmatpush1.bf16.msra.mxu1 %v17157_v15  ;;  %13172 = vmatpush1.bf16.msra.mxu0 %v17160_v18  ;;  %v17205_v15 = vld [vmem:[#allocation17 + $0xb80] ss:$8 sps:$4 sm:$0xff]   ;;  %v17208_v18 = vld [vmem:[#allocation17 + $0xe10] ss:$8 sps:$4 sm:$0xff]  }
0x1255   :  { %13114 = vmatprep.subr.bf16.mxu1 %v17165_v55  ;;  %13173 = vmatprep.subr.bf16.mxu0 %v17168_v23  ;;  %v17216_v55 = vld [vmem:[#allocation17 + $0xe24] ss:$8 sps:$4 sm:$0xff]   ;;  %v17211_v23 = vld [vmem:[#allocation17 + $0xb90] ss:$8 sps:$4 sm:$0xff]  }
0x1258   :  { %13115 = vmatpush1.bf16.msra.mxu1 %v17163_v25  ;;  %13174 = vmatpush1.bf16.msra.mxu0 %v17166_v27  ;;  %v17214_v25 = vld [vmem:[#allocation17 + $0xe20] ss:$8 sps:$4 sm:$0xff]   ;;  %v17219_v27 = vld [vmem:[#allocation17 + $0xba4] ss:$8 sps:$4 sm:$0xff]  }
0x1259   :  { %13116 = vmatprep.subr.bf16.mxu1 %v17171_v28  ;;  %13175 = vmatprep.subr.bf16.mxu0 %v17174_v21  ;;  %v17222_v28 = vld [vmem:[#allocation17 + $0xe34] ss:$8 sps:$4 sm:$0xff]   ;;  %v17217_v21 = vld [vmem:[#allocation17 + $0xba0] ss:$8 sps:$4 sm:$0xff]  }
0x125c   :  { %13117 = vmatpush1.bf16.msra.mxu1 %v17169_v29  ;;  %13176 = vmatpush1.bf16.msra.mxu0 %v17172_v33  ;;  %v17220_v29 = vld [vmem:[#allocation17 + $0xe30] ss:$8 sps:$4 sm:$0xff]   ;;  %v17225_v33 = vld [vmem:[#allocation17 + $0xbb4] ss:$8 sps:$4 sm:$0xff]  }
0x125d   :  { %13118 = vmatprep.subr.bf16.mxu1 %v17177_v38  ;;  %13177 = vmatprep.subr.bf16.mxu0 %v17180_v40  ;;  %v17228_v38 = vld [vmem:[#allocation17 + $0xe44] ss:$8 sps:$4 sm:$0xff]   ;;  %v17223_v40 = vld [vmem:[#allocation17 + $0xbb0] ss:$8 sps:$4 sm:$0xff]  }
0x1260   :  { %13119 = vmatpush1.bf16.msra.mxu1 %v17175_v42  ;;  %13178 = vmatpush1.bf16.msra.mxu0 %v17178_v17  ;;  %v17226_v42 = vld [vmem:[#allocation17 + $0xe40] ss:$8 sps:$4 sm:$0xff]   ;;  %v17231_v17 = vld [vmem:[#allocation17 + $0xbc4] ss:$8 sps:$4 sm:$0xff]  }
0x1261   :  { %13120 = vmatprep.subr.bf16.mxu1 %v17183_v43  ;;  %13179 = vmatprep.subr.bf16.mxu0 %v17186_v44  ;;  %v17234_v43 = vld [vmem:[#allocation17 + $0xe54] ss:$8 sps:$4 sm:$0xff]   ;;  %v17229_v44 = vld [vmem:[#allocation17 + $0xbc0] ss:$8 sps:$4 sm:$0xff]  }
0x1264   :  { %13121 = vmatpush1.bf16.msra.mxu1 %v17181_v45  ;;  %13180 = vmatpush1.bf16.msra.mxu0 %v17184_v49  ;;  %v17232_v45 = vld [vmem:[#allocation17 + $0xe50] ss:$8 sps:$4 sm:$0xff]   ;;  %v17237_v49 = vld [vmem:[#allocation17 + $0xbd4] ss:$8 sps:$4 sm:$0xff]  }
0x1265   :  { %13122 = vmatprep.subr.bf16.mxu1 %v17189_v46  ;;  %13181 = vmatprep.subr.bf16.mxu0 %v17192_v60  ;;  %v17235_v46 = vld [vmem:[#allocation17 + $0xbd0] ss:$8 sps:$4 sm:$0xff]   ;;  %v17238_v60 = vld [vmem:[#allocation17 + $0xe60] ss:$8 sps:$4 sm:$0xff]  }
0x1266   :  { %v18448_v3 = vpop.f32.mrb[80].mxu1 }
0x1267   :  { %v18450_v51 = vpop.f32.mrb[12].mxu0  ;;  %v11238_v52 = vpop.f32.mrb[81].mxu1 }
0x1268   :  { %v11239_v7 = vadd.f32 %v11238_v52, %v9750_v11  ;;  %v11361_v54 = vpop.f32.mrb[13].mxu0  ;;  %v11240_v59 = vpop.f32.mrb[82].mxu1  ;;  %13123 = vmatpush1.bf16.msra.mxu1 %v17187_v47  ;;  %13182 = vmatpush1.bf16.msra.mxu0 %v17190_v48  ;;  %v9746_v11 = vrot.slane %v18414_v32, %v18306_v16  ;;  %v17243_v47 = vld [vmem:[#allocation17 + $0xbe4] ss:$8 sps:$4 sm:$0xff]   ;;  %v17246_v48 = vld [vmem:[#allocation17 + $0xe74] ss:$8 sps:$4 sm:$0xff]  }
0x1269   :  { %v11362_v2 = vadd.f32 %v11361_v54, %v9774_v4  ;;  %v11363_v26 = vpop.f32.mrb[14].mxu0  ;;  %v11241_v20 = vpop.f32.mrb[83].mxu1  ;;  %13124 = vmatprep.subr.bf16.mxu1 %v17195_v50  ;;  %13183 = vmatprep.subr.bf16.mxu0 %v17198_v12  ;;  %v17244_v4 = vld [vmem:[#allocation17 + $0xe70] ss:$8 sps:$4 sm:$0xff]   ;;  %v17249_v12 = vld [vmem:[#allocation17 + $0xbf4] ss:$8 sps:$4 sm:$0xff]  }
0x126a   :  { %v11414_v58 = vmax.f32 %v11239_v7, 0.0  ;;  %v11364_v5 = vpop.f32.mrb[15].mxu0  ;;  %v11237_v50 = vadd.f32 %v18448_v3, %v9746_v11  ;;  %v17252_v52 = vld [vmem:[#allocation17 + $0xe84] ss:$8 sps:$4 sm:$0xff]   ;;  %v17250_v7 = vld [vmem:[#allocation17 + $0xe80] ss:$8 sps:$4 sm:$0xff]  }
0x126b   :  { %v11420_v6 = vmax.f32 %v11362_v2, 0.0  ;;  %v17255_v32 = vld [vmem:[#allocation17 + $0xd04] ss:$8 sps:$4 sm:$0xff]   ;;  %v17258_v59 = vld [vmem:[#allocation17 + $0xe94] ss:$8 sps:$4 sm:$0xff]  }
0x126c   :  { %v11430_v8 = vpack.c.bf16 %v11414_v58, %v11414_v58  ;;  %13125 = vmatpush1.bf16.msra.mxu1 %v17193_v53  ;;  %13184 = vmatpush1.bf16.msra.mxu0 %v17196_v61  ;;  %v17247_v53 = vld [vmem:[#allocation17 + $0xbf0] ss:$8 sps:$4 sm:$0xff]   ;;  %v11413_v54 = vmax.f32 %v11237_v50, 0.0  ;;  %v17253_v61 = vld [vmem:[#allocation17 + $0xd00] ss:$8 sps:$4 sm:$0xff]  }
0x126d   :  { %13126 = vmatprep.subr.bf16.mxu1 %v17201_v37  ;;  %13235 = vmatprep.subr.bf16.mxu0 %v17204_v0  ;;  %v11436_v14 = vpack.c.bf16 %v11420_v6, %v11420_v6  ;;  %v17256_v37 = vld [vmem:[#allocation17 + $0xe90] ss:$8 sps:$4 sm:$0xff]   ;;  %v17261_v3 = vld [vmem:[#allocation17 + $0xd14] ss:$8 sps:$4 sm:$0xff]   ;;  %v17264_v2 = vld [vmem:[#allocation17 + $0xea4] ss:$8 sps:$4 sm:$0xff]  }
0x126e   :  { %13144 = vmatprep.mubr.bf16.mxu1 %v11430_v8  ;;  %v11429_v30 = vpack.c.bf16 %v11413_v54, %v11413_v54  ;;  %v17259_v26 = vld [vmem:[#allocation17 + $0xd10] ss:$8 sps:$4 sm:$0xff]   ;;  %v17262_v20 = vld [vmem:[#allocation17 + $0xea0] ss:$8 sps:$4 sm:$0xff]   ;;  %v17267_v0 = vld [vmem:[#allocation17 + $0xd24] ss:$8 sps:$4 sm:$0xff]  }
0x126f   :  { %13186 = vmatmul.mubr.bf16.vlgmr.msra.gmra.mrb[24].mxu0 %v11431_v10  ;;  %v17270_v58 = vld [vmem:[#allocation17 + $0xeb4] ss:$8 sps:$4 sm:$0xff]   ;;  %v17265_v5 = vld [vmem:[#allocation17 + $0xd20] ss:$8 sps:$4 sm:$0xff]   ;;  %v17268_v6 = vld [vmem:[#allocation17 + $0xeb0] ss:$8 sps:$4 sm:$0xff]  }
0x1270   :  { %13127 = vmatpush1.bf16.msra.mxu1 %v17199_v57  ;;  %13236 = vmatpush1.bf16.msra.mxu0 %v17202_v9  ;;  %v17273_v8 = vld [vmem:[#allocation17 + $0xd34] ss:$8 sps:$4 sm:$0xff]   ;;  %v17276_v57 = vld [vmem:[#allocation17 + $0xec4] ss:$8 sps:$4 sm:$0xff]   ;;  %v17271_v9 = vld [vmem:[#allocation17 + $0xd30] ss:$8 sps:$4 sm:$0xff]  }
0x1271   :  { %13267 = vmatprep.mubr.bf16.mxu0 %v11436_v14  ;;  %13128 = vmatprep.subr.bf16.mxu1 %v17207_v34  ;;  %v17274_v10 = vld [vmem:[#allocation17 + $0xec0] ss:$8 sps:$4 sm:$0xff]   ;;  %v17279_v34 = vld [vmem:[#allocation17 + $0xd44] ss:$8 sps:$4 sm:$0xff]   ;;  %v17303_v11 = vld [vmem:[#allocation17 + $0xd94] ss:$8 sps:$4 sm:$0xff]  }
0x1272   :  { %13237 = vmatprep.subr.bf16.mxu0 %v17210_v13  ;;  %v17282_v13 = vld [vmem:[#allocation17 + $0xed4] ss:$8 sps:$4 sm:$0xff]   ;;  %v17277_v14 = vld [vmem:[#allocation17 + $0xd40] ss:$8 sps:$4 sm:$0xff]   ;;  %v17307_v50 = vld [vmem:[#allocation17 + $0xdb0] ss:$8 sps:$4 sm:$0xff]  }
0x1274   :  { %13129 = vmatpush1.bf16.msra.mxu1 %v17205_v15  ;;  %13238 = vmatpush1.bf16.msra.mxu0 %v17208_v18  ;;  %v17280_v15 = vld [vmem:[#allocation17 + $0xed0] ss:$8 sps:$4 sm:$0xff]   ;;  %v9770_v18 = vrot.slane %v18427_v31, %v18290_v19 }
0x1275   :  { %13130 = vmatprep.subr.bf16.mxu1 %v17213_v35  ;;  %13239 = vmatprep.subr.bf16.mxu0 %v17216_v55  ;;  %v17285_v35 = vld [vmem:[#allocation17 + $0xd54] ss:$8 sps:$4 sm:$0xff]   ;;  %v17288_v55 = vld [vmem:[#allocation17 + $0xee4] ss:$8 sps:$4 sm:$0xff]  }
0x1278   :  { %13131 = vmatpush1.bf16.msra.mxu1 %v17211_v23  ;;  %13240 = vmatpush1.bf16.msra.mxu0 %v17214_v25  ;;  %v9766_v23 = vrot.slane %v18427_v31, %v18261_v36  ;;  %v17283_v25 = vld [vmem:[#allocation17 + $0xd50] ss:$8 sps:$4 sm:$0xff]   ;;  %v17297_v36 = vld [vmem:[#allocation17 + $0xd74] ss:$8 sps:$4 sm:$0xff]  }
0x1279   :  { %13132 = vmatprep.subr.bf16.mxu1 %v17219_v27  ;;  %13241 = vmatprep.subr.bf16.mxu0 %v17222_v28  ;;  %v17286_v27 = vld [vmem:[#allocation17 + $0xee0] ss:$8 sps:$4 sm:$0xff]   ;;  %v11360_v28 = vadd.f32 %v18450_v51, %v9770_v18  ;;  %v17295_v51 = vld [vmem:[#allocation17 + $0xd70] ss:$8 sps:$4 sm:$0xff]   ;;  %v9782_v18 = vrot.slane %v18427_v31, %v18293_v22 }
0x127a   :  { %v17346_v22 = vld [vmem:[#allocation17 + $0xf80] ss:$8 sps:$4 sm:$0xff]  }
0x127c   :  { %13133 = vmatpush1.bf16.msra.mxu1 %v17217_v21  ;;  %13242 = vmatpush1.bf16.msra.mxu0 %v17220_v29  ;;  %v17291_v21 = vld [vmem:[#allocation17 + $0xd64] ss:$8 sps:$4 sm:$0xff]   ;;  %v17294_v29 = vld [vmem:[#allocation17 + $0xef4] ss:$8 sps:$4 sm:$0xff]  }
0x127d   :  { %13134 = vmatprep.subr.bf16.mxu1 %v17225_v33  ;;  %13243 = vmatprep.subr.bf16.mxu0 %v17228_v38 }
0x1280   :  { %13135 = vmatpush1.bf16.msra.mxu1 %v17223_v40  ;;  %13244 = vmatpush1.bf16.msra.mxu0 %v17226_v42  ;;  %v17289_v42 = vld [vmem:[#allocation17 + $0xd60] ss:$8 sps:$4 sm:$0xff]  }
0x1281   :  { %13136 = vmatprep.subr.bf16.mxu1 %v17231_v17  ;;  %13245 = vmatprep.subr.bf16.mxu0 %v17234_v43  ;;  %v17292_v17 = vld [vmem:[#allocation17 + $0xef0] ss:$8 sps:$4 sm:$0xff]   ;;  %v11419_v43 = vmax.f32 %v11360_v28, 0.0 }
0x1284   :  { %13137 = vmatpush1.bf16.msra.mxu1 %v17229_v44  ;;  %13246 = vmatpush1.bf16.msra.mxu0 %v17232_v45 }
0x1285   :  { %13138 = vmatprep.subr.bf16.mxu1 %v17237_v49  ;;  %13247 = vmatprep.subr.bf16.mxu0 %v17240_v62  ;;  %v11435_v62 = vpack.c.bf16 %v11419_v43, %v11419_v43  ;;  %v17349_v43 = vld [vmem:[#allocation17 + $0xf90] ss:$8 sps:$4 sm:$0xff]  }
0x1288   :  { %13139 = vmatpush1.bf16.msra.mxu1 %v17235_v46  ;;  %13248 = vmatpush1.bf16.msra.mxu0 %v17238_v60  ;;  %v17300_v46 = vld [vmem:[#allocation17 + $0xd84] ss:$8 sps:$4 sm:$0xff]   ;;  %v17298_v60 = vld [vmem:[#allocation17 + $0xd80] ss:$8 sps:$4 sm:$0xff]  }
0x1289   :  { %13140 = vmatprep.subr.bf16.mxu1 %v17243_v47  ;;  %13249 = vmatprep.subr.bf16.mxu0 %v17246_v48  ;;  %v17301_v47 = vld [vmem:[#allocation17 + $0xd90] ss:$8 sps:$4 sm:$0xff]   ;;  %v17306_v48 = vld [vmem:[#allocation17 + $0xda4] ss:$8 sps:$4 sm:$0xff]  }
0x128c   :  { %13141 = vmatpush1.bf16.msra.mxu1 %v17241_v1  ;;  %13250 = vmatpush1.bf16.msra.mxu0 %v17244_v4  ;;  %v17304_v1 = vld [vmem:[#allocation17 + $0xda0] ss:$8 sps:$4 sm:$0xff]   ;;  %v17309_v4 = vld [vmem:[#allocation17 + $0xdb4] ss:$8 sps:$4 sm:$0xff]  }
0x128d   :  { %13142 = vmatprep.subr.bf16.mxu1 %v17249_v12  ;;  %13251 = vmatprep.subr.bf16.mxu0 %v17252_v52  ;;  %v17312_v12 = vld [vmem:[#allocation17 + $0xdc4] ss:$8 sps:$4 sm:$0xff]   ;;  %v17310_v52 = vld [vmem:[#allocation17 + $0xdc0] ss:$8 sps:$4 sm:$0xff]  }
0x1290   :  { %13143 = vmatpush1.bf16.msra.mxu1 %v17247_v53  ;;  %13252 = vmatpush1.bf16.msra.mxu0 %v17250_v7  ;;  %v17315_v53 = vld [vmem:[#allocation17 + $0xdd4] ss:$8 sps:$4 sm:$0xff]  }
0x1291   :  { %13194 = vmatprep.subr.bf16.mxu1 %v17255_v32  ;;  %13253 = vmatprep.subr.bf16.mxu0 %v17258_v59  ;;  %v17313_v59 = vld [vmem:[#allocation17 + $0xdd0] ss:$8 sps:$4 sm:$0xff]  }
0x1293   :  { %13145 = vmatmul.mubr.bf16.vlgmr.msra.gmra.mrb[96].mxu1 %v11429_v30  ;;  %v17318_v30 = vld [vmem:[#allocation17 + $0xde4] ss:$8 sps:$4 sm:$0xff]  }
0x1294   :  { %13195 = vmatpush1.bf16.msra.mxu1 %v17253_v61  ;;  %13254 = vmatpush1.bf16.msra.mxu0 %v17256_v37  ;;  %v9762_v61 = vrot.slane %v18427_v31, %v18274_v24  ;;  %v17325_v24 = vld [vmem:[#allocation17 + $0xf10] ss:$8 sps:$4 sm:$0xff]  }
0x1295   :  { %13196 = vmatprep.subr.bf16.mxu1 %v17261_v3  ;;  %13255 = vmatprep.subr.bf16.mxu0 %v17264_v2  ;;  %v17316_v3 = vld [vmem:[#allocation17 + $0xde0] ss:$8 sps:$4 sm:$0xff]  }
0x1298   :  { %13197 = vmatpush1.bf16.msra.mxu1 %v17259_v26  ;;  %13256 = vmatpush1.bf16.msra.mxu0 %v17262_v20  ;;  %v17321_v26 = vld [vmem:[#allocation17 + $0xdf4] ss:$8 sps:$4 sm:$0xff]   ;;  %v17319_v20 = vld [vmem:[#allocation17 + $0xdf0] ss:$8 sps:$4 sm:$0xff]  }
0x1299   :  { %13198 = vmatprep.subr.bf16.mxu1 %v17267_v0  ;;  %13257 = vmatprep.subr.bf16.mxu0 %v17270_v58  ;;  %v17324_v58 = vld [vmem:[#allocation17 + $0xf04] ss:$8 sps:$4 sm:$0xff]  }
0x129c   :  { %13199 = vmatpush1.bf16.msra.mxu1 %v17265_v5  ;;  %13258 = vmatpush1.bf16.msra.mxu0 %v17268_v6  ;;  %v17322_v5 = vld [vmem:[#allocation17 + $0xf00] ss:$8 sps:$4 sm:$0xff]  }
0x129d   :  { %13200 = vmatprep.subr.bf16.mxu1 %v17273_v8  ;;  %13259 = vmatprep.subr.bf16.mxu0 %v17276_v57  ;;  %v17327_v8 = vld [vmem:[#allocation17 + $0xf14] ss:$8 sps:$4 sm:$0xff]   ;;  %v17330_v57 = vld [vmem:[#allocation17 + $0xf24] ss:$8 sps:$4 sm:$0xff]  }
0x12a0   :  { %13201 = vmatpush1.bf16.msra.mxu1 %v17271_v9  ;;  %13260 = vmatpush1.bf16.msra.mxu0 %v17274_v10  ;;  %v17328_v9 = vld [vmem:[#allocation17 + $0xf20] ss:$8 sps:$4 sm:$0xff]   ;;  %v17333_v10 = vld [vmem:[#allocation17 + $0xf34] ss:$8 sps:$4 sm:$0xff]  }
0x12a1   :  { %13202 = vmatprep.subr.bf16.mxu1 %v17279_v34  ;;  %13261 = vmatprep.subr.bf16.mxu0 %v17282_v13  ;;  %v17331_v34 = vld [vmem:[#allocation17 + $0xf30] ss:$8 sps:$4 sm:$0xff]   ;;  %v17336_v13 = vld [vmem:[#allocation17 + $0xf44] ss:$8 sps:$4 sm:$0xff]  }
0x12a4   :  { %13203 = vmatpush1.bf16.msra.mxu1 %v17277_v14  ;;  %13262 = vmatpush1.bf16.msra.mxu0 %v17280_v15  ;;  %v17334_v14 = vld [vmem:[#allocation17 + $0xf40] ss:$8 sps:$4 sm:$0xff]   ;;  %v17339_v15 = vld [vmem:[#allocation17 + $0xf54] ss:$8 sps:$4 sm:$0xff]  }
0x12a5   :  { %13204 = vmatprep.subr.bf16.mxu1 %v17285_v35  ;;  %13263 = vmatprep.subr.bf16.mxu0 %v17288_v55  ;;  %v17337_v35 = vld [vmem:[#allocation17 + $0xf50] ss:$8 sps:$4 sm:$0xff]   ;;  %v17342_v55 = vld [vmem:[#allocation17 + $0xf64] ss:$8 sps:$4 sm:$0xff]  }
0x12a6   :  { %v11318_v33 = vpop.f32.mrb[84].mxu1 }
0x12a7   :  { %v11320_v38 = vpop.f32.mrb[85].mxu1  ;;  %v11319_v2 = vadd.f32 %v11318_v33, %v9762_v61  ;;  %v17345_v33 = vld [vmem:[#allocation17 + $0xf74] ss:$8 sps:$4 sm:$0xff]  }
0x12a8   :  { %v11321_v19 = vadd.f32 %v11320_v38, %v9766_v23  ;;  %v11322_v40 = vpop.f32.mrb[86].mxu1  ;;  %13205 = vmatpush1.bf16.msra.mxu1 %v17283_v25  ;;  %13264 = vmatpush1.bf16.msra.mxu0 %v17286_v27 }
0x12a9   :  { %v11323_v44 = vpop.f32.mrb[87].mxu1  ;;  %13206 = vmatprep.subr.bf16.mxu1 %v17291_v21  ;;  %13265 = vmatprep.subr.bf16.mxu0 %v17294_v29  ;;  %v11417_v0 = vmax.f32 %v11319_v2, 0.0  ;;  %v17340_v21 = vld [vmem:[#allocation17 + $0xf60] ss:$8 sps:$4 sm:$0xff]   ;;  %v17343_v40 = vld [vmem:[#allocation17 + $0xf70] ss:$8 sps:$4 sm:$0xff]  }
0x12aa   :  { %v11418_v45 = vmax.f32 %v11321_v19, 0.0  ;;  %v17354_v44 = vld [vmem:[#allocation17 + $0xfa4] ss:$8 sps:$4 sm:$0xff]  }
0x12ab   :  { %v11433_v6 = vpack.c.bf16 %v11417_v0, %v11417_v0 }
0x12ac   :  { %v11434_v49 = vpack.c.bf16 %v11418_v45, %v11418_v45  ;;  %13207 = vmatpush1.bf16.msra.mxu1 %v17289_v42  ;;  %13266 = vmatpush1.bf16.msra.mxu0 %v17292_v17  ;;  %v17348_v42 = vld [vmem:[#allocation17 + $0xf84] ss:$8 sps:$4 sm:$0xff]   ;;  %v17351_v17 = vld [vmem:[#allocation17 + $0xf94] ss:$8 sps:$4 sm:$0xff]  }
0x12ad   :  { %13208 = vmatprep.subr.bf16.mxu1 %v17297_v36  ;;  %v17352_v36 = vld [vmem:[#allocation17 + $0xfa0] ss:$8 sps:$4 sm:$0xff]   ;;  %v17357_v45 = vld [vmem:[#allocation17 + $0xfb4] ss:$8 sps:$4 sm:$0xff]  }
0x12ae   :  { %13226 = vmatprep.mubr.bf16.mxu1 %v11434_v49  ;;  %v17355_v49 = vld [vmem:[#allocation17 + $0xfb0] ss:$8 sps:$4 sm:$0xff]  }
0x12af   :  { %13268 = vmatmul.mubr.bf16.vlgmr.msra.gmra.mrb[28].mxu0 %v11435_v62  ;;  %v17358_v62 = vld [vmem:[#allocation17 + $0xfc0] ss:$8 sps:$4 sm:$0xff]  }
0x12b0   :  { %13209 = vmatpush1.bf16.msra.mxu1 %v17295_v51  ;;  %v17360_v51 = vld [vmem:[#allocation17 + $0xfc4] ss:$8 sps:$4 sm:$0xff]  }
0x12b1   :  { %13210 = vmatprep.subr.bf16.mxu1 %v17300_v46  ;;  %v17363_v46 = vld [vmem:[#allocation17 + $0xfd4] ss:$8 sps:$4 sm:$0xff]  }
0x12b4   :  { %13211 = vmatpush1.bf16.msra.mxu1 %v17298_v60 }
0x12b5   :  { %13212 = vmatprep.subr.bf16.mxu1 %v17303_v11 }
0x12b8   :  { %13213 = vmatpush1.bf16.msra.mxu1 %v17301_v47 }
0x12b9   :  { %13214 = vmatprep.subr.bf16.mxu1 %v17306_v48  ;;  %v17361_v48 = vld [vmem:[#allocation17 + $0xfd0] ss:$8 sps:$4 sm:$0xff]  }
0x12bc   :  { %13215 = vmatpush1.bf16.msra.mxu1 %v17304_v1  ;;  %v9778_v1 = vrot.slane %v18427_v31, %v18306_v16 }
0x12bd   :  { %13216 = vmatprep.subr.bf16.mxu1 %v17309_v4 }
0x12c0   :  { %13217 = vmatpush1.bf16.msra.mxu1 %v17307_v50  ;;  %v17366_v50 = vld [vmem:[#allocation17 + $0xfe4] ss:$8 sps:$4 sm:$0xff]  }
0x12c1   :  { %13218 = vmatprep.subr.bf16.mxu1 %v17312_v12  ;;  %v17364_v12 = vld [vmem:[#allocation17 + $0xfe0] ss:$8 sps:$4 sm:$0xff]  }
0x12c2   :  { %v18460_v7 = vpop.f32.mrb[16].mxu0 }
0x12c3   :  { %v18462_v54 = vpop.f32.mrb[17].mxu0 }
0x12c4   :  { %13219 = vmatpush1.bf16.msra.mxu1 %v17310_v52  ;;  %v13027_v32 = vpop.f32.mrb[18].mxu0 }
0x12c5   :  { %v13028_v37 = vpop.f32.mrb[19].mxu0  ;;  %13220 = vmatprep.subr.bf16.mxu1 %v17315_v53  ;;  %v17369_v53 = vld [vmem:[#allocation17 + $0xff4] ss:$8 sps:$4 sm:$0xff]   ;;  %v17367_v32 = vld [vmem:[#allocation17 + $0xff0] ss:$8 sps:$4 sm:$0xff]  }
0x12c6   :  { %v11697_v37 = vld [vmem:[#allocation19 + $0x2] sm:$0x3] }
0x12c7   :  { %v11706_v16 = vrot.slane %v11697_v37, %v18189_v41 }
0x12c8   :  { %13221 = vmatpush1.bf16.msra.mxu1 %v17313_v59 }
0x12c9   :  { %13222 = vmatprep.subr.bf16.mxu1 %v17318_v30  ;;  %v11702_v30 = vrot.slane %v11697_v37, %v18186_v39  ;;  %v17379_v37 = vld [vmem:[%s18548_s13 + $0x20] sm:$0xff]  }
0x12cb   :  { %v13024_v31 = vadd.f32 %v18460_v7, %v11702_v30  ;;  %v17380_v30 = vld [vmem:[%s18548_s13 + $0x68] sm:$0xff]  }
0x12cc   :  { %13223 = vmatpush1.bf16.msra.mxu1 %v17316_v3  ;;  %v13026_v3 = vadd.f32 %v18462_v54, %v11706_v16  ;;  %v17381_v16 = vld [vmem:[%s18548_s13 + $0x28] sm:$0xff]  }
0x12cd   :  { %13224 = vmatprep.subr.bf16.mxu1 %v17321_v26 }
0x12d0   :  { %13225 = vmatpush1.bf16.msra.mxu1 %v17319_v20 }
0x12d1   :  { %13276 = vmatprep.subr.bf16.mxu1 %v17324_v58 }
0x12d3   :  { %13227 = vmatmul.mubr.bf16.vlgmr.msra.gmra.mrb[100].mxu1 %v11433_v6 }
0x12d4   :  { %13277 = vmatpush1.bf16.msra.mxu1 %v17322_v5 }
0x12d5   :  { %13278 = vmatprep.subr.bf16.mxu1 %v17327_v8 }
0x12d8   :  { %13279 = vmatpush1.bf16.msra.mxu1 %v17325_v24 }
0x12d9   :  { %13280 = vmatprep.subr.bf16.mxu1 %v17330_v57 }
0x12dc   :  { %13281 = vmatpush1.bf16.msra.mxu1 %v17328_v9 }
0x12dd   :  { %13282 = vmatprep.subr.bf16.mxu1 %v17333_v10 }
0x12e0   :  { %13283 = vmatpush1.bf16.msra.mxu1 %v17331_v34 }
0x12e1   :  { %13284 = vmatprep.subr.bf16.mxu1 %v17336_v13 }
0x12e4   :  { %13285 = vmatpush1.bf16.msra.mxu1 %v17334_v14 }
0x12e5   :  { %13286 = vmatprep.subr.bf16.mxu1 %v17339_v15 }
0x12e6   :  { %v11400_v23 = vpop.f32.mrb[88].mxu1 }
0x12e7   :  { %v11402_v25 = vpop.f32.mrb[89].mxu1  ;;  %v11401_v52 = vadd.f32 %v11400_v23, %v9778_v1 }
0x12e8   :  { %v11403_v27 = vadd.f32 %v11402_v25, %v9782_v18  ;;  %v11404_v28 = vpop.f32.mrb[90].mxu1  ;;  %13287 = vmatpush1.bf16.msra.mxu1 %v17337_v35 }
0x12e9   :  { %v11405_v29 = vpop.f32.mrb[91].mxu1  ;;  %13288 = vmatprep.subr.bf16.mxu1 %v17342_v55  ;;  %v11421_v59 = vmax.f32 %v11401_v52, 0.0  ;;  %v17374_v52 = vld [vmem:[%s18548_s13 + $0x50] sm:$0xff]  }
0x12ea   :  { %v11422_v38 = vmax.f32 %v11403_v27, 0.0 }
0x12eb   :  { %v11437_v61 = vpack.c.bf16 %v11421_v59, %v11421_v59  ;;  %v17377_v59 = vld [vmem:[%s18548_s13 + $0x18] sm:$0xff]  }
0x12ec   :  { %v11438_v19 = vpack.c.bf16 %v11422_v38, %v11422_v38  ;;  %13289 = vmatpush1.bf16.msra.mxu1 %v17340_v21 }
0x12ed   :  { %13290 = vmatprep.subr.bf16.mxu1 %v17345_v33 }
0x12ee   :  { %13308 = vmatprep.mubr.bf16.mxu1 %v11438_v19 }
0x12f0   :  { %13291 = vmatpush1.bf16.msra.mxu1 %v17343_v40 }
0x12f1   :  { %13292 = vmatprep.subr.bf16.mxu1 %v17348_v42 }
0x12f4   :  { %13293 = vmatpush1.bf16.msra.mxu1 %v17346_v22 }
0x12f5   :  { %13294 = vmatprep.subr.bf16.mxu1 %v17351_v17 }
0x12f8   :  { %13295 = vmatpush1.bf16.msra.mxu1 %v17349_v43 }
0x12f9   :  { %13296 = vmatprep.subr.bf16.mxu1 %v17354_v44 }
0x12fc   :  { %13297 = vmatpush1.bf16.msra.mxu1 %v17352_v36 }
0x12fd   :  { %13298 = vmatprep.subr.bf16.mxu1 %v17357_v45 }
0x1300   :  { %13299 = vmatpush1.bf16.msra.mxu1 %v17355_v49 }
0x1301   :  { %13300 = vmatprep.subr.bf16.mxu1 %v17360_v51 }
0x1302   :  { %v13105_v60 = vpop.f32.mrb[20].mxu0 }
0x1303   :  { %v13107_v11 = vpop.f32.mrb[21].mxu0 }
0x1304   :  { %v13109_v47 = vpop.f32.mrb[22].mxu0  ;;  %13301 = vmatpush1.bf16.msra.mxu1 %v17358_v62 }
0x1305   :  { %v13110_v4 = vpop.f32.mrb[23].mxu0  ;;  %13302 = vmatprep.subr.bf16.mxu1 %v17363_v46  ;;  %v17370_v46 = vld [vmem:[%s18548_s13 + $0x40] sm:$0xff]  }
0x1306   :  { %15420 = vmatprep.subr.bf16.mxu0 %v17370_v46 }
0x1308   :  { %13303 = vmatpush1.bf16.msra.mxu1 %v17361_v48 }
0x1309   :  { %13304 = vmatprep.subr.bf16.mxu1 %v17366_v50 }
0x130c   :  { %13305 = vmatpush1.bf16.msra.mxu1 %v17364_v12 }
0x130d   :  { %13306 = vmatprep.subr.bf16.mxu1 %v17369_v53  ;;  %v17375_v53 = vld [vmem:[%s18548_s13 + $0x10] sm:$0xff]  }
0x1310   :  { %13307 = vmatpush1.bf16.msra.mxu1 %v17367_v32  ;;  %v17376_v32 = vld [vmem:[%s18548_s13 + $0x58] sm:$0xff]  }
0x1313   :  { %13309 = vmatmul.mubr.bf16.vlgmr.msra.gmra.mrb[104].mxu1 %v11437_v61  ;;  %v17378_v61 = vld [vmem:[%s18548_s13 + $0x60] sm:$0xff]  }
0x1326   :  { %v13064_v2 = vpop.f32.mrb[92].mxu1 }
0x1327   :  { %v13065_v26 = vadd.f32 %v13064_v2, %v13024_v31  ;;  %v13066_v20 = vpop.f32.mrb[93].mxu1  ;;  %v17382_v31 = vld [vmem:[%s18548_s13 + $0x70] sm:$0xff]   ;;  %v17384_v2 = vld [vmem:[%s18548_s13 + $0x78] sm:$0xff]  }
0x1328   :  { %v13067_v0 = vadd.f32 %v13066_v20, %v13026_v3  ;;  %v13068_v58 = vpop.f32.mrb[94].mxu1  ;;  %v17383_v3 = vld [vmem:[%s18548_s13 + $0x30] sm:$0xff]   ;;  %v17386_v20 = vld [vmem:[#allocation25] sm:$0xff]  }
0x1329   :  { %v13069_v5 = vpop.f32.mrb[95].mxu1  ;;  %v13106_v6 = vadd.f32 %v13105_v60, %v13065_v26  ;;  %v17371_v60 = vld [vmem:[%s18548_s13] sm:$0xff]   ;;  %v17385_v26 = vld [vmem:[%s18548_s13 + $0x38] sm:$0xff]   ;;  %v17387_v58 = vld [vmem:[#allocation25 + $0x8] sm:$0xff]  }
0x132a   :  { %v13108_v8 = vadd.f32 %v13107_v11, %v13067_v0  ;;  %v17372_v11 = vld [vmem:[%s18548_s13 + $0x48] sm:$0xff]   ;;  %15421 = vmatpush3.bf16.msra.mxu0 %v17371_v60  ;;  %v17822_v0 = vmov 0.0  }
0x132b   :  { %15422 = vmatprep.subr.bf16.mxu0 %v17372_v11  ;;  %15447 = vmatprep.subr.bf16.mxu1 %v17822_v0 }
0x132c   :  { %15448 = vmatpush3.bf16.msra.mxu1 %v17386_v20  ;;  %15455 = vmatprep.mubr.msk.bf16.mxu1 %vm17823_vm2, %v17822_v0 }
0x132d   :  { %15449 = vmatprep.subr.bf16.mxu1 %v17822_v0 }
0x1330   :  { %15450 = vmatpush3.bf16.msra.mxu1 %v17387_v58 }
0x1331   :  { %15451 = vmatprep.subr.bf16.mxu1 %v17822_v0 }
0x1342   :  { %v13187_v24 = vpop.f32.mrb[24].mxu0 }
0x1343   :  { %v13189_v57 = vpop.f32.mrb[25].mxu0 }
0x1344   :  { %v13191_v9 = vpop.f32.mrb[26].mxu0 }
0x1345   :  { %v13192_v10 = vpop.f32.mrb[27].mxu0 }
0x1366   :  { %v13146_v34 = vpop.f32.mrb[96].mxu1 }
0x1367   :  { %v13147_v13 = vadd.f32 %v13146_v34, %v13106_v6  ;;  %v13148_v14 = vpop.f32.mrb[97].mxu1 }
0x1368   :  { %v13149_v15 = vadd.f32 %v13148_v14, %v13108_v8  ;;  %v13150_v18 = vpop.f32.mrb[98].mxu1 }
0x1369   :  { %v13151_v7 = vpop.f32.mrb[99].mxu1  ;;  %v13188_v35 = vadd.f32 %v13187_v24, %v13147_v13  ;;  %v13320_v24 = vld [vmem:[#allocation20 + $0x2] sm:$0x3] }
0x136a   :  { %v13190_v54 = vadd.f32 %v13189_v57, %v13149_v15  ;;  %v13322_v57 = vld [vmem:[#allocation22 + $0x2] sm:$0x3]  ;;  %v13343_v9 = vrot.slane %v13320_v24, %v18186_v39  ;;  %v13347_v10 = vrot.slane %v13320_v24, %v18189_v41 }
0x136b   :  { %v13356_v14 = vrot.slane %v13322_v57, %v18186_v39  ;;  %v13360_v15 = vrot.slane %v13322_v57, %v18189_v41  ;;  %v15394_v39 = vld [vmem:[#allocation23] ss:$0 sm:$0xff] }
0x1382   :  { %v13269_v55 = vpop.f32.mrb[28].mxu0 }
0x1383   :  { %v13271_v23 = vpop.f32.mrb[29].mxu0 }
0x1384   :  { %v13273_v25 = vpop.f32.mrb[30].mxu0 }
0x1385   :  { %v13274_v27 = vpop.f32.mrb[31].mxu0 }
0x1386   :  { %v17388_v27 = vld [vmem:[#allocation25 + $0x10] sm:$0xff]  }
0x1387   :  { %15452 = vmatpush3.bf16.msra.mxu1 %v17388_v27 }
0x1388   :  { %15453 = vmatprep.subr.bf16.mxu1 %v17822_v0 }
0x13a6   :  { %v13228_v28 = vpop.f32.mrb[100].mxu1 }
0x13a7   :  { %v13229_v21 = vadd.f32 %v13228_v28, %v13188_v35  ;;  %v13230_v29 = vpop.f32.mrb[101].mxu1  ;;  %v17389_v28 = vld [vmem:[#allocation25 + $0x18] sm:$0xff]  }
0x13a8   :  { %v13231_v33 = vadd.f32 %v13230_v29, %v13190_v54  ;;  %v13232_v38 = vpop.f32.mrb[102].mxu1  ;;  %15454 = vmatpush3.bf16.msra.mxu1 %v17389_v28 }
0x13a9   :  { %v13233_v19 = vpop.f32.mrb[103].mxu1  ;;  %v13270_v40 = vadd.f32 %v13269_v55, %v13229_v21 }
0x13aa   :  { %v13272_v42 = vadd.f32 %v13271_v23, %v13231_v33 }
0x13e6   :  { %v13310_v22 = vpop.f32.mrb[104].mxu1 }
0x13e7   :  { %v13311_v17 = vadd.f32 %v13310_v22, %v13270_v40  ;;  %v13312_v43 = vpop.f32.mrb[105].mxu1  ;;  %v15411_v22 = vld [vmem:[#allocation26] ss:$0 sm:$0xff] }
0x13e8   :  { %v13313_v44 = vadd.f32 %v13312_v43, %v13272_v42  ;;  %v13314_v36 = vpop.f32.mrb[106].mxu1 }
0x13e9   :  { %v13317_v45 = vadd.f32 %v13311_v17, %v18387_v63  ;;  %v13315_v49 = vpop.f32.mrb[107].mxu1  ;;  %v17373_v63 = vld [vmem:[%s18548_s13 + $0x8] sm:$0xff]  }
0x13ea   :  { %v13318_v51 = vadd.f32 %v13313_v44, %v18389_v56  ;;  %15423 = vmatpush3.bf16.msra.mxu0 %v17373_v63  ;;  %v15418_v63 = vld [vmem:[#allocation28] ss:$0 sm:$0xff] }
0x13eb   :  { %15424 = vmatprep.subr.bf16.mxu0 %v17374_v52 }
0x13ec   :  { %v13323_v62 = vadd.f32 %v13318_v51, %v13317_v45 }
0x13ee   :  { %13324 = vadd.xlane.f32.xlu0 %v13323_v62  ;;  %15425 = vmatpush3.bf16.msra.mxu0 %v17375_v53 }
0x13ef   :  { %15426 = vmatprep.subr.bf16.mxu0 %v17376_v32 }
0x13f2   :  { %15427 = vmatpush3.bf16.msra.mxu0 %v17377_v59 }
0x13f3   :  { %15428 = vmatprep.subr.bf16.mxu0 %v17378_v61 }
0x13f6   :  { %15429 = vmatpush3.bf16.msra.mxu0 %v17379_v37 }
0x13f7   :  { %15430 = vmatprep.subr.bf16.mxu0 %v17380_v30 }
0x13fa   :  { %15431 = vmatpush3.bf16.msra.mxu0 %v17381_v16 }
0x13fb   :  { %15432 = vmatprep.subr.bf16.mxu0 %v17382_v31 }
0x13fe   :  { %15433 = vmatpush3.bf16.msra.mxu0 %v17383_v3 }
0x13ff   :  { %15434 = vmatprep.subr.bf16.mxu0 %v17384_v2 }
0x1402   :  { %15435 = vmatpush3.bf16.msra.mxu0 %v17385_v26 }
0x147b   :  { %v13325_v56 = vpop.xlane.xlu0 %13324 }
0x147c   :  { %v13326_v47 = vmul.f32 0.00390625, %v13325_v56 }
0x147e   :  { %v13327_v48 = vsub.f32 %v13317_v45, %v13326_v47  ;;  %v13328_v1 = vsub.f32 %v13318_v51, %v13326_v47 }
0x1480   :  { %v13329_v4 = vmul.f32 %v13327_v48, %v13327_v48  ;;  %v13330_v50 = vmul.f32 %v13328_v1, %v13328_v1 }
0x1482   :  { %v13331_v12 = vadd.f32 %v13330_v50, %v13329_v4  ;;  %v15419_v4 = vld [vmem:[#allocation2] ss:$0 sm:$0xff] }
0x1484   :  { %13332 = vadd.xlane.f32.xlu1 %v13331_v12 }
0x1511   :  { %v13333_v5 = vpop.xlane.xlu1 %13332 }
0x1512   :  { %v13334_v6 = vmul.f32 0.00390625, %v13333_v5 }
0x1514   :  { %v13335_v8 = vadd.f32 1e-05, %v13334_v6 }
0x1516   :  { %17396 = vrsqrt.f32 %v13335_v8 }
0x1520   :  { %v17397_v34 = vpop.eup %17396 }
0x1521   :  { %v13338_v13 = vmul.f32 %v17397_v34, %v13328_v1  ;;  %v13337_v18 = vmul.f32 %v17397_v34, %v13327_v48  ;;  %v17824_v1 = vmov 0  }
0x1522   :  { %15566 = vset.pattern.permute.xlu1 %v17824_v1  ;;  %15567 = vset.pattern.permute.xlu0 %v17824_v1 }
0x1523   :  { %v13351_v7 = vmul.f32 %v13347_v10, %v13338_v13  ;;  %v13350_v35 = vmul.f32 %v13343_v9, %v13337_v18 }
0x1525   :  { %v13364_v54 = vadd.f32 %v13360_v15, %v13351_v7  ;;  %v13363_v55 = vadd.f32 %v13356_v14, %v13350_v35 }
0x1527   :  { %v13366_v23 = vpack.c.bf16 %v13364_v54, %v13364_v54  ;;  %v13365_v25 = vpack.c.bf16 %v13363_v55, %v13363_v55 }
0x1529   :  { %13534 = vmatprep.mubr.bf16.mxu0 %v13366_v23 }
0x152a   :  { %13535 = vmatmul.mubr.bf16.vlgmr.msra.gmra.mrb[32].mxu0 %v13365_v25 }
0x15fd   :  { %v15436_v21 = vpop.f32.mrb[32].mxu0 }
0x15fe   :  { %v15437_v29 = vpop.f32.mrb[33].mxu0 }
0x15ff   :  { %v15438_v41 = vadd.f32 %v15437_v29, %v15436_v21  ;;  %v15439_v33 = vpop.f32.mrb[34].mxu0 }
0x1600   :  { %v15440_v38 = vpop.f32.mrb[35].mxu0 }
0x1601   :  { %v13537_v19 = vadd.f32 %v15438_v41, %v15394_v39 }
0x1603   :  { %v13542_v40 = vmax.f32 %v13537_v19, 0.0 }
0x1605   :  { %v13543_v42 = vpack.c.bf16 %v13542_v40, %v13542_v40 }
0x1607   :  { %15456 = vmatmul.mubr.msk.bf16.vlgmr.msra.gmra.mrb[108].mxu1 %vm13583_vm3, %v13543_v42 }
0x16da   :  { %v13621_v17 = vpop.f32.mrb[108].mxu1 }
0x16db   :  { %v13622_v43 = vadd.f32 %v15411_v22, %v13621_v17  ;;  %v15457_v44 = vpop.f32.mrb[109].mxu1 }
0x16dc   :  { %v13624_v36 = vpop.f32.mrb[110].mxu1 }
0x16dd   :  { %v15417_v45 = vmul.f32 -1.442695, %v13622_v43  ;;  %v15458_v49 = vpop.f32.mrb[111].mxu1 }
0x16df   :  { %17398 = vpow2.f32 %v15417_v45 }
0x16e9   :  { %v17399_v51 = vpop.eup %17398 }
0x16ea   :  { %v13631_v62 = vadd.f32 1.0, %v17399_v51 }
0x16ec   :  { %17400 = vrcp.f32 %v13631_v62 }
0x16ed   :  { %17402 = vtanh.f32 %v13622_v43 }
0x16f6   :  { %v17401_v46 = vpop.eup %17400 }
0x16f7   :  { %13635 = vrot.lane.b32.xlu0 %v17401_v46, %s17805_s0  ;;  %v17403_v60 = vpop.eup %17402 }
0x1769   :  { %v13636_v11 = vpop.permute.xlu0 %13635 }
0x176a   :  { %v13638_v56 = vmul.f32 %v17403_v60, %v13636_v11 }
0x176c   :  { %v13646_v47 = vmul.f32 %v15418_v63, %v13638_v56 }
0x176e   :  { %v13647_v48 = vsel %vm13583_vm3, %v13646_v47, 0.0 }
0x176f   :  { %13648 = vadd.xlane.f32.xlu1 %v13647_v48 }
0x17fc   :  { %v13649_v50 = vpop.xlane.xlu1 %13648 }
0x17fd   :  { %v13657_v12 = vadd.f32 %v15419_v4, %v13649_v50 }
0x17ff   :  { %13660 = vperm.xlu1 %15566, %v13657_v12  }
0x187e   :  { %v13661_v52 = vpop.permute.xlu1 %13660 }
0x187f   :  { %v13663_v53 = vsel %vm13583_vm3, %v13542_v40, %v13661_v52 }
0x1880   :  { %13664 = vst [vmem:[%s18574_s24] sm:$0xff] %v13663_v53 }
0x1881   :  { %13669 = vsyncpa [#allocation4], 1 }
0x1882   :  { %13670 = vsyncpa [#allocation6], 1 }
0x1883   :  { %13671 = vsyncpa [#allocation9], 1 }
0x1884   :  { %13672 = vsyncpa [#allocation12], 1 }
0x1885   :  { %13673 = vsyncpa [#allocation15], 1 }
0x1886   :  { %13674 = vsyncpa [#allocation18], 1 }
0x1887   :  { %13675 = vsyncpa [#allocation21], 1 }
0x1888   :  { %13676 = vsyncpa [#allocation24], 1 }
0x1889   :  { %13677 = vsyncpa [#allocation27], 1 }

</bundles_post_ra>
